<compile_context>
chip_gen: v7x
topology: tpu7x:2x2x1
jax: 0.10.0
libtpu: 0.0.40
codegen_flags: <defaults>
</compile_context>

<pallas_src>
import jax
import jax.numpy as jnp
from jax import lax
from jax.experimental import pallas as pl
from jax.experimental.pallas import tpu as pltpu


def _make_lstm_kernel(has_init_state: bool):
    """Kernel factory; has_init_state selects the argument signature."""

    def kernel(*refs):
        if has_init_state:
            (x_ref, u_ref, b_ref, w_ref, h0_ref, c0_ref,
             out_ref, hf_ref, cf_ref, xu_sc, h_sc, c_sc) = refs
        else:
            (x_ref, u_ref, b_ref, w_ref,
             out_ref, hf_ref, cf_ref, xu_sc, h_sc, c_sc) = refs
            h0_ref = c0_ref = None

        tt_idx = pl.program_id(1)
        TT = x_ref.shape[1]          # static time-chunk length
        N = h_sc.shape[-1]           # static n_units

        # (Re-)initialize the recurrent state at the first time chunk of each
        # feature tile.  When no initial state is given, zero-init the scratch
        # directly (no HBM zeros are ever created).
        @pl.when(tt_idx == 0)
        def _():
            if has_init_state:
                h_sc[...] = h0_ref[...].astype(jnp.float32)
                c_sc[...] = c0_ref[...].astype(jnp.float32)
            else:
                h_sc[...] = jnp.zeros_like(h_sc)
                c_sc[...] = jnp.zeros_like(c_sc)

        # Fused input projection for the whole time chunk: x_t[...,None]*U + b.
        # Fully parallel over (B, TT, TD) on the VPU, staged in VMEM so the serial
        # per-step critical path is only the recurrent matmul + gate nonlinearities.
        xu_sc[...] = (x_ref[...].astype(jnp.float32)[..., None]
                      * u_ref[...][None, None, :, :]
                      + b_ref[...][None, None, :, :])          # [B, TT, TD, 4N]

        w = w_ref[...]                                         # [TD, N, 4N]
        w_dt = w.dtype

        def step(i, carry):
            h, c = carry                                       # [B, TD, N] f32 each
            # Per-feature recurrent matmul; gates come out 4N-wide in one shot.
            z = jnp.einsum('bdn,dnm->bdm', h.astype(w_dt), w,
                           preferred_element_type=jnp.float32)  # [B, TD, 4N]
            z = z + xu_sc[:, pl.ds(i, 1)][:, 0]

            # Gate order in the concatenation is (j, i, f, o): one tanh on the j
            # slice, one merged 3N-wide sigmoid for (i, f, o).
            j = jnp.tanh(z[..., :N])
            s = jax.nn.sigmoid(z[..., N:])
            i_g = s[..., 0 * N:1 * N]
            f_g = s[..., 1 * N:2 * N]
            o_g = s[..., 2 * N:3 * N]

            c_new = c * f_g + i_g * j
            h_new = o_g * jnp.tanh(c_new)

            out_ref[:, pl.ds(i, 1)] = h_new[:, None].astype(out_ref.dtype)
            return h_new, c_new

        h, c = lax.fori_loop(0, TT, step, (h_sc[...], c_sc[...]), unroll=True)
        h_sc[...] = h
        c_sc[...] = c

        # Final state only materialized once, on the last time chunk.
        @pl.when(tt_idx == pl.num_programs(1) - 1)
        def _():
            hf_ref[...] = h.astype(hf_ref.dtype)
            cf_ref[...] = c.astype(cf_ref.dtype)

    return kernel


def _pick_time_chunk(T, cap=32):
    """Time-chunk length: T itself (always legal), or a multiple of 8 dividing T."""
    if T <= cap:
        return T
    best = 0
    for tt in range(8, cap + 1, 8):
        if T % tt == 0:
            best = tt
    return best if best else T


def _vmem_bytes(B, TT, TD, N, x_item, w_item, out_item, has_init):
    """VMEM estimate for one grid step: all double-buffered operands + scratch."""
    f32 = 4
    b = 0
    b += 2 * B * TT * TD * x_item                 # x block
    b += 2 * 2 * TD * 4 * N * f32                 # U + bias blocks
    b += 2 * TD * N * 4 * N * w_item              # W block
    if has_init:
        b += 2 * 2 * B * TD * N * f32             # h0 + c0 blocks
    b += 2 * B * TT * TD * N * out_item           # per-step output block
    b += 2 * 2 * B * TD * N * out_item            # final h / c blocks
    b += B * TT * TD * 4 * N * f32                # xu scratch
    b += 2 * B * TD * N * f32                     # h / c state scratch
    return b


def _pick_feature_tile(D, fits):
    """Largest legal feature tile that fits the budget.

    Legal tiles: D itself, or a multiple of 128 dividing D (the feature axis is the
    lane dimension of x's block).  Falls back to the smallest legal tile if nothing
    fits (never silently to full D).
    NOTE (v7x): if D allows it and both halves fit, capping TD at D//2 lets the
    'parallel' feature axis shard across the two TensorCores.
    """
    cands = sorted({D} | {td for td in range(128, D, 128) if D % td == 0},
                   reverse=True)
    for td in cands:
        if fits(td):
            return td
    return cands[-1]


def lstm_cell_forward(x, params, hx=None, *, feature_tile=None, time_chunk=None,
                      weight_dtype=None, vmem_budget_bytes=40 * 1024 * 1024,
                      interpret=False):
    """x: [B, T, D]. Returns (outputs [B, T, D, N], (h [B, D, N], c [B, D, N]))."""
    B, T, D = x.shape
    N = params['W_j'].shape[-1]
    out_dt = x.dtype

    # Glue: concatenate the 4 gates (order j, i, f, o) along the unit axis -> 4N lanes.
    W = jnp.concatenate([params['W_j'], params['W_i'],
                         params['W_f'], params['W_o']], axis=-1)          # [D, N, 4N]
    if weight_dtype is not None:
        # e.g. jnp.bfloat16: halves W's VMEM footprint, full-rate MXU; accumulation
        # and all state/gate math stay f32.
        W = W.astype(weight_dtype)
    U = jnp.concatenate([params['U_j'][:, 0, :], params['U_i'][:, 0, :],
                         params['U_f'][:, 0, :], params['U_o'][:, 0, :]],
                        axis=-1)                                          # [D, 4N]
    bias = jnp.concatenate([params['b_j'], params['b_i'],
                            params['b_f'], params['b_o']], axis=-1)       # [D, 4N]

    has_init = hx is not None
    if has_init:
        h0 = hx[0].astype(jnp.float32)
        c0 = hx[1].astype(jnp.float32)

    TT = int(time_chunk) if time_chunk is not None else _pick_time_chunk(T)
    assert TT == T or (TT % 8 == 0 and T % TT == 0), \
        "time chunk must divide T and be a multiple of 8 (or equal T)"

    if feature_tile is not None:
        TD = int(min(feature_tile, D))
    else:
        def fits(td):
            return _vmem_bytes(B, TT, td, N, x.dtype.itemsize, W.dtype.itemsize,
                               jnp.dtype(out_dt).itemsize, has_init) <= vmem_budget_bytes
        TD = _pick_feature_tile(D, fits)
    assert TD == D or (TD % 128 == 0 and D % TD == 0), \
        "feature tile must equal D or be a 128-aligned divisor of D"

    grid = (D // TD, T // TT)   # (parallel feature tiles, sequential time chunks)

    in_specs = [
        pl.BlockSpec((B, TT, TD), lambda d, t: (0, t, d)),          # x (native layout)
        pl.BlockSpec((TD, 4 * N), lambda d, t: (d, 0)),             # U  (const over t)
        pl.BlockSpec((TD, 4 * N), lambda d, t: (d, 0)),             # bias
        pl.BlockSpec((TD, N, 4 * N), lambda d, t: (d, 0, 0)),       # W
    ]
    args = [x, U, bias, W]
    if has_init:
        in_specs += [pl.BlockSpec((B, TD, N), lambda d, t: (0, d, 0)),   # h0
                     pl.BlockSpec((B, TD, N), lambda d, t: (0, d, 0))]   # c0
        args += [h0, c0]

    out_shapes = (
        jax.ShapeDtypeStruct((B, T, D, N), out_dt),   # per-step h, native layout
        jax.ShapeDtypeStruct((B, D, N), out_dt),      # final h
        jax.ShapeDtypeStruct((B, D, N), out_dt),      # final c
    )
    out_specs = [
        pl.BlockSpec((B, TT, TD, N), lambda d, t: (0, t, d, 0)),
        pl.BlockSpec((B, TD, N), lambda d, t: (0, d, 0)),
        pl.BlockSpec((B, TD, N), lambda d, t: (0, d, 0)),
    ]

    grid_spec = pltpu.PrefetchScalarGridSpec(
        num_scalar_prefetch=0,
        grid=grid,
        in_specs=in_specs,
        out_specs=out_specs,
        scratch_shapes=[
            pltpu.VMEM((B, TT, TD, 4 * N), jnp.float32),   # fused input projection
            pltpu.VMEM((B, TD, N), jnp.float32),           # h state
            pltpu.VMEM((B, TD, N), jnp.float32),           # c state
        ],
    )

    outputs, h_f, c_f = pl.pallas_call(
        _make_lstm_kernel(has_init),
        out_shape=out_shapes,
        grid_spec=grid_spec,
        compiler_params=pltpu.CompilerParams(
            # feature tiles are independent recurrences (megacore-shardable);
            # the time axis carries the recurrence and must stay sequential.
            dimension_semantics=("parallel", "arbitrary"),
            # 48 MiB is safe on v7x (64 MiB physical) and leaves headroom on v5e/v6e.
            vmem_limit_bytes=48 * 1024 * 1024,
        ),
        interpret=interpret,
    )(*args)

    return outputs, (h_f, c_f)


def lstm_cell_reference(x, params, hx=None):
    """Pure-JAX reference mirroring the PyTorch forward."""
    B, T, D = x.shape
    N = params['W_j'].shape[-1]
    if hx is None:
        h = jnp.zeros((B, D, N), x.dtype)
        c = jnp.zeros((B, D, N), x.dtype)
    else:
        h, c = hx

    def gate(h, x_t, Wk, Uk, bk):
        rec = jnp.einsum('bij,ijk->bik', h, Wk)
        inp = x_t[:, :, None] * Uk[None, :, 0, :]
        return rec + inp + bk[None, :, :]

    def step(carry, x_t):
        h, c = carry
        j = jnp.tanh(gate(h, x_t, params['W_j'], params['U_j'], params['b_j']))
        i = jax.nn.sigmoid(gate(h, x_t, params['W_i'], params['U_i'], params['b_i']))
        f = jax.nn.sigmoid(gate(h, x_t, params['W_f'], params['U_f'], params['b_f']))
        o = jax.nn.sigmoid(gate(h, x_t, params['W_o'], params['U_o'], params['b_o']))
        c_new = c * f + i * j
        h_new = o * jnp.tanh(c_new)
        return (h_new, c_new), h_new

    (h_f, c_f), hs = lax.scan(step, (h, c), jnp.transpose(x, (1, 0, 2)))
    return jnp.transpose(hs, (1, 0, 2, 3)), (h_f, c_f)


def init_params(key, input_dim, n_units, init_std=0.02):
    ks = jax.random.split(key, 12)
    D, N = input_dim, n_units
    names_shapes = [
        ('U_j', (D, 1, N)), ('U_i', (D, 1, N)), ('U_f', (D, 1, N)), ('U_o', (D, 1, N)),
        ('W_j', (D, N, N)), ('W_i', (D, N, N)), ('W_f', (D, N, N)), ('W_o', (D, N, N)),
        ('b_j', (D, N)), ('b_i', (D, N)), ('b_f', (D, N)), ('b_o', (D, N)),
    ]
    return {name: jax.random.normal(k, shape, jnp.float32) * init_std
            for k, (name, shape) in zip(ks, names_shapes)}


if __name__ == "__main__":
    B, T, D, N = 2, 8, 4, 32   # batch, seq, input_dim, n_units
    key = jax.random.PRNGKey(0)
    k_param, k_x, k_h, k_c = jax.random.split(key, 4)
    params = init_params(k_param, D, N)
    x = jax.random.normal(k_x, (B, T, D), jnp.float32)

    # Default path (hx=None, zero state initialized in-kernel).
    fwd = jax.jit(lstm_cell_forward)
    outputs, (h_f, c_f) = jax.block_until_ready(fwd(x, params))

    ref_out, (ref_h, ref_c) = lstm_cell_reference(x, params)
    assert outputs.shape == (B, T, D, N)
    assert jnp.allclose(outputs, ref_out, atol=1e-5, rtol=1e-5)
    assert jnp.allclose(h_f, ref_h, atol=1e-5, rtol=1e-5)
    assert jnp.allclose(c_f, ref_c, atol=1e-5, rtol=1e-5)

    # Explicit initial-state path.
    h0 = jax.random.normal(k_h, (B, D, N), jnp.float32) * 0.1
    c0 = jax.random.normal(k_c, (B, D, N), jnp.float32) * 0.1
    out2, (h2, c2) = jax.block_until_ready(jax.jit(lstm_cell_forward)(x, params, (h0, c0)))
    ref2, (rh2, rc2) = lstm_cell_reference(x, params, (h0, c0))
    assert jnp.allclose(out2, ref2, atol=1e-5, rtol=1e-5)
    assert jnp.allclose(h2, rh2, atol=1e-5, rtol=1e-5)
    assert jnp.allclose(c2, rc2, atol=1e-5, rtol=1e-5)

    print("KERNEL_OK")
</pallas_src>

<mosaic_0001>
module attributes {stable_mosaic.version = 11 : i64} {
  func.func @kernel(%arg0: i32, %arg1: i32, %arg2: memref<2x8x4xf32, #tpu.memory_space<vmem>>, %arg3: memref<4x128xf32, #tpu.memory_space<vmem>>, %arg4: memref<4x128xf32, #tpu.memory_space<vmem>>, %arg5: memref<4x32x128xf32, #tpu.memory_space<vmem>>, %arg6: memref<2x8x4x32xf32, #tpu.memory_space<vmem>>, %arg7: memref<2x4x32xf32, #tpu.memory_space<vmem>>, %arg8: memref<2x4x32xf32, #tpu.memory_space<vmem>>, %arg9: memref<2x8x4x128xf32, #tpu.memory_space<vmem>>, %arg10: memref<2x4x32xf32, #tpu.memory_space<vmem>>, %arg11: memref<2x4x32xf32, #tpu.memory_space<vmem>>) attributes {dimension_semantics = [#tpu.dimension_semantics<parallel>, #tpu.dimension_semantics<arbitrary>], iteration_bounds = array<i64: 1, 1>, scalar_prefetch = 0 : i64, scratch_operands = 3 : i64, tpu.core_type = #tpu.core_type<tc>, window_params = [{transform_indices = @transform_0, window_bounds = array<i64: 2, 8, 4>}, {transform_indices = @transform_1, window_bounds = array<i64: 4, 128>}, {transform_indices = @transform_2, window_bounds = array<i64: 4, 128>}, {transform_indices = @transform_3, window_bounds = array<i64: 4, 32, 128>}, {transform_indices = @transform_4, window_bounds = array<i64: 2, 8, 4, 32>}, {transform_indices = @transform_5, window_bounds = array<i64: 2, 4, 32>}, {transform_indices = @transform_6, window_bounds = array<i64: 2, 4, 32>}]} {
    %c0_i32 = arith.constant 0 : i32
    %0 = arith.cmpi eq, %arg1, %c0_i32 : i32
    %1 = arith.extui %0 : i1 to i32
    %c0_i32_0 = arith.constant 0 : i32
    %2 = arith.cmpi ne, %1, %c0_i32_0 : i32
    scf.if %2 {
      %cst_92 = arith.constant 0.000000e+00 : f32
      %223 = vector.broadcast %cst_92 : f32 to vector<2x4x32xf32>
      %c0_93 = arith.constant 0 : index
      %c0_94 = arith.constant 0 : index
      %c0_95 = arith.constant 0 : index
      %224 = vector.load %arg10[%c0_93, %c0_94, %c0_95] : memref<2x4x32xf32, #tpu.memory_space<vmem>>, vector<2x4x32xf32>
      tpu.vector_store %arg10[%c0_93, %c0_94, %c0_95], %223 {strides = array<i32>} : memref<2x4x32xf32, #tpu.memory_space<vmem>>, vector<2x4x32xf32>,
      %cst_96 = arith.constant 0.000000e+00 : f32
      %225 = vector.broadcast %cst_96 : f32 to vector<2x4x32xf32>
      %c0_97 = arith.constant 0 : index
      %c0_98 = arith.constant 0 : index
      %c0_99 = arith.constant 0 : index
      %226 = vector.load %arg11[%c0_97, %c0_98, %c0_99] : memref<2x4x32xf32, #tpu.memory_space<vmem>>, vector<2x4x32xf32>
      tpu.vector_store %arg11[%c0_97, %c0_98, %c0_99], %225 {strides = array<i32>} : memref<2x4x32xf32, #tpu.memory_space<vmem>>, vector<2x4x32xf32>,
    } else {
    }
    %c0 = arith.constant 0 : index
    %c0_1 = arith.constant 0 : index
    %c0_2 = arith.constant 0 : index
    %3 = vector.load %arg2[%c0, %c0_1, %c0_2] : memref<2x8x4xf32, #tpu.memory_space<vmem>>, vector<2x8x4xf32>
    %4 = vector.shape_cast %3 : vector<2x8x4xf32> to vector<2x8x4x1xf32>
    %c0_3 = arith.constant 0 : index
    %c0_4 = arith.constant 0 : index
    %5 = vector.load %arg3[%c0_3, %c0_4] : memref<4x128xf32, #tpu.memory_space<vmem>>, vector<4x128xf32>
    %6 = vector.shape_cast %5 : vector<4x128xf32> to vector<1x1x4x128xf32>
    %7 = vector.broadcast %4 : vector<2x8x4x1xf32> to vector<2x8x4x128xf32>
    %8 = vector.broadcast %6 : vector<1x1x4x128xf32> to vector<2x8x4x128xf32>
    %9 = arith.mulf %7, %8 : vector<2x8x4x128xf32>
    %c0_5 = arith.constant 0 : index
    %c0_6 = arith.constant 0 : index
    %10 = vector.load %arg4[%c0_5, %c0_6] : memref<4x128xf32, #tpu.memory_space<vmem>>, vector<4x128xf32>
    %11 = vector.shape_cast %10 : vector<4x128xf32> to vector<1x1x4x128xf32>
    %12 = vector.broadcast %11 : vector<1x1x4x128xf32> to vector<2x8x4x128xf32>
    %13 = arith.addf %9, %12 : vector<2x8x4x128xf32>
    %c0_7 = arith.constant 0 : index
    %c0_8 = arith.constant 0 : index
    %c0_9 = arith.constant 0 : index
    %c0_10 = arith.constant 0 : index
    %14 = vector.load %arg9[%c0_7, %c0_8, %c0_9, %c0_10] : memref<2x8x4x128xf32, #tpu.memory_space<vmem>>, vector<2x8x4x128xf32>
    tpu.vector_store %arg9[%c0_7, %c0_8, %c0_9, %c0_10], %13 {strides = array<i32>} : memref<2x8x4x128xf32, #tpu.memory_space<vmem>>, vector<2x8x4x128xf32>,
    %c0_11 = arith.constant 0 : index
    %c0_12 = arith.constant 0 : index
    %c0_13 = arith.constant 0 : index
    %15 = vector.load %arg5[%c0_11, %c0_12, %c0_13] : memref<4x32x128xf32, #tpu.memory_space<vmem>>, vector<4x32x128xf32>
    %c0_14 = arith.constant 0 : index
    %c0_15 = arith.constant 0 : index
    %c0_16 = arith.constant 0 : index
    %16 = vector.load %arg10[%c0_14, %c0_15, %c0_16] : memref<2x4x32xf32, #tpu.memory_space<vmem>>, vector<2x4x32xf32>
    %c0_17 = arith.constant 0 : index
    %c0_18 = arith.constant 0 : index
    %c0_19 = arith.constant 0 : index
    %17 = vector.load %arg11[%c0_17, %c0_18, %c0_19] : memref<2x4x32xf32, #tpu.memory_space<vmem>>, vector<2x4x32xf32>
    %c0_i32_20 = arith.constant 0 : i32
    "tpu.trace_start"() <{level = 10 : i32, message = "bdn,dnm->bdm"}> : () -> ()
    %cst = arith.constant dense<0.000000e+00> : vector<4x128x2xf32>
    %18 = tpu.matmul %15, %16, %cst {dimension_numbers = #tpu.dot_dimension_numbers<[1], [2], [2], [0], [0, 0, 0, 2, 1, 0], [0], [1]>} : vector<4x32x128xf32>, vector<2x4x32xf32>, vector<4x128x2xf32> -> vector<4x128x2xf32>
    %19 = tpu.transpose %18, [2, 0, 1] : vector<4x128x2xf32> -> vector<2x4x128xf32>
    "tpu.trace_stop"() : () -> ()
    %c0_21 = arith.constant 0 : index
    %20 = arith.index_cast %c0_i32_20 : i32 to index
    %c0_22 = arith.constant 0 : index
    %c0_23 = arith.constant 0 : index
    %21 = vector.load %arg9[%c0_21, %20, %c0_22, %c0_23] : memref<2x8x4x128xf32, #tpu.memory_space<vmem>>, vector<2x1x4x128xf32>
    %22 = vector.shape_cast %21 : vector<2x1x4x128xf32> to vector<2x4x128xf32>
    %23 = arith.addf %19, %22 : vector<2x4x128xf32>
    %24 = vector.extract_strided_slice %23 {offsets = [0, 0, 0], sizes = [2, 4, 32], strides = [1, 1, 1]} : vector<2x4x128xf32> to vector<2x4x32xf32>
    %25 = math.tanh %24 : vector<2x4x32xf32>
    %26 = vector.extract_strided_slice %23 {offsets = [0, 0, 32], sizes = [2, 4, 96], strides = [1, 1, 1]} : vector<2x4x128xf32> to vector<2x4x96xf32>
    %27 = arith.negf %26 : vector<2x4x96xf32>
    %28 = math.exp %27 : vector<2x4x96xf32>
    %cst_24 = arith.constant 1.000000e+00 : f32
    %29 = vector.broadcast %cst_24 : f32 to vector<2x4x96xf32>
    %30 = arith.addf %29, %28 : vector<2x4x96xf32>
    %31 = arith.divf %29, %30 : vector<2x4x96xf32>
    %32 = vector.extract_strided_slice %31 {offsets = [0, 0, 0], sizes = [2, 4, 32], strides = [1, 1, 1]} : vector<2x4x96xf32> to vector<2x4x32xf32>
    %33 = vector.extract_strided_slice %31 {offsets = [0, 0, 32], sizes = [2, 4, 32], strides = [1, 1, 1]} : vector<2x4x96xf32> to vector<2x4x32xf32>
    %34 = vector.extract_strided_slice %31 {offsets = [0, 0, 64], sizes = [2, 4, 32], strides = [1, 1, 1]} : vector<2x4x96xf32> to vector<2x4x32xf32>
    %35 = arith.mulf %17, %33 : vector<2x4x32xf32>
    %36 = arith.mulf %32, %25 : vector<2x4x32xf32>
    %37 = arith.addf %35, %36 : vector<2x4x32xf32>
    %38 = math.tanh %37 : vector<2x4x32xf32>
    %39 = arith.mulf %34, %38 : vector<2x4x32xf32>
    %40 = vector.shape_cast %39 : vector<2x4x32xf32> to vector<2x1x4x32xf32>
    %c0_25 = arith.constant 0 : index
    %41 = arith.index_cast %c0_i32_20 : i32 to index
    %c0_26 = arith.constant 0 : index
    %c0_27 = arith.constant 0 : index
    %42 = vector.load %arg6[%c0_25, %41, %c0_26, %c0_27] : memref<2x8x4x32xf32, #tpu.memory_space<vmem>>, vector<2x1x4x32xf32>
    tpu.vector_store %arg6[%c0_25, %41, %c0_26, %c0_27], %40 {strides = array<i32>} : memref<2x8x4x32xf32, #tpu.memory_space<vmem>>, vector<2x1x4x32xf32>,
    %c1_i32 = arith.constant 1 : i32
    "tpu.trace_start"() <{level = 10 : i32, message = "bdn,dnm->bdm"}> : () -> ()
    %cst_28 = arith.constant dense<0.000000e+00> : vector<4x128x2xf32>
    %43 = tpu.matmul %15, %39, %cst_28 {dimension_numbers = #tpu.dot_dimension_numbers<[1], [2], [2], [0], [0, 0, 0, 2, 1, 0], [0], [1]>} : vector<4x32x128xf32>, vector<2x4x32xf32>, vector<4x128x2xf32> -> vector<4x128x2xf32>
    %44 = tpu.transpose %43, [2, 0, 1] : vector<4x128x2xf32> -> vector<2x4x128xf32>
    "tpu.trace_stop"() : () -> ()
    %c0_29 = arith.constant 0 : index
    %45 = arith.index_cast %c1_i32 : i32 to index
    %c0_30 = arith.constant 0 : index
    %c0_31 = arith.constant 0 : index
    %46 = vector.load %arg9[%c0_29, %45, %c0_30, %c0_31] : memref<2x8x4x128xf32, #tpu.memory_space<vmem>>, vector<2x1x4x128xf32>
    %47 = vector.shape_cast %46 : vector<2x1x4x128xf32> to vector<2x4x128xf32>
    %48 = arith.addf %44, %47 : vector<2x4x128xf32>
    %49 = vector.extract_strided_slice %48 {offsets = [0, 0, 0], sizes = [2, 4, 32], strides = [1, 1, 1]} : vector<2x4x128xf32> to vector<2x4x32xf32>
    %50 = math.tanh %49 : vector<2x4x32xf32>
    %51 = vector.extract_strided_slice %48 {offsets = [0, 0, 32], sizes = [2, 4, 96], strides = [1, 1, 1]} : vector<2x4x128xf32> to vector<2x4x96xf32>
    %52 = arith.negf %51 : vector<2x4x96xf32>
    %53 = math.exp %52 : vector<2x4x96xf32>
    %cst_32 = arith.constant 1.000000e+00 : f32
    %54 = vector.broadcast %cst_32 : f32 to vector<2x4x96xf32>
    %55 = arith.addf %54, %53 : vector<2x4x96xf32>
    %56 = arith.divf %54, %55 : vector<2x4x96xf32>
    %57 = vector.extract_strided_slice %56 {offsets = [0, 0, 0], sizes = [2, 4, 32], strides = [1, 1, 1]} : vector<2x4x96xf32> to vector<2x4x32xf32>
    %58 = vector.extract_strided_slice %56 {offsets = [0, 0, 32], sizes = [2, 4, 32], strides = [1, 1, 1]} : vector<2x4x96xf32> to vector<2x4x32xf32>
    %59 = vector.extract_strided_slice %56 {offsets = [0, 0, 64], sizes = [2, 4, 32], strides = [1, 1, 1]} : vector<2x4x96xf32> to vector<2x4x32xf32>
    %60 = arith.mulf %37, %58 : vector<2x4x32xf32>
    %61 = arith.mulf %57, %50 : vector<2x4x32xf32>
    %62 = arith.addf %60, %61 : vector<2x4x32xf32>
    %63 = math.tanh %62 : vector<2x4x32xf32>
    %64 = arith.mulf %59, %63 : vector<2x4x32xf32>
    %65 = vector.shape_cast %64 : vector<2x4x32xf32> to vector<2x1x4x32xf32>
    %c0_33 = arith.constant 0 : index
    %66 = arith.index_cast %c1_i32 : i32 to index
    %c0_34 = arith.constant 0 : index
    %c0_35 = arith.constant 0 : index
    %67 = vector.load %arg6[%c0_33, %66, %c0_34, %c0_35] : memref<2x8x4x32xf32, #tpu.memory_space<vmem>>, vector<2x1x4x32xf32>
    tpu.vector_store %arg6[%c0_33, %66, %c0_34, %c0_35], %65 {strides = array<i32>} : memref<2x8x4x32xf32, #tpu.memory_space<vmem>>, vector<2x1x4x32xf32>,
    %c2_i32 = arith.constant 2 : i32
    "tpu.trace_start"() <{level = 10 : i32, message = "bdn,dnm->bdm"}> : () -> ()
    %cst_36 = arith.constant dense<0.000000e+00> : vector<4x128x2xf32>
    %68 = tpu.matmul %15, %64, %cst_36 {dimension_numbers = #tpu.dot_dimension_numbers<[1], [2], [2], [0], [0, 0, 0, 2, 1, 0], [0], [1]>} : vector<4x32x128xf32>, vector<2x4x32xf32>, vector<4x128x2xf32> -> vector<4x128x2xf32>
    %69 = tpu.transpose %68, [2, 0, 1] : vector<4x128x2xf32> -> vector<2x4x128xf32>
    "tpu.trace_stop"() : () -> ()
    %c0_37 = arith.constant 0 : index
    %70 = arith.index_cast %c2_i32 : i32 to index
    %c0_38 = arith.constant 0 : index
    %c0_39 = arith.constant 0 : index
    %71 = vector.load %arg9[%c0_37, %70, %c0_38, %c0_39] : memref<2x8x4x128xf32, #tpu.memory_space<vmem>>, vector<2x1x4x128xf32>
    %72 = vector.shape_cast %71 : vector<2x1x4x128xf32> to vector<2x4x128xf32>
    %73 = arith.addf %69, %72 : vector<2x4x128xf32>
    %74 = vector.extract_strided_slice %73 {offsets = [0, 0, 0], sizes = [2, 4, 32], strides = [1, 1, 1]} : vector<2x4x128xf32> to vector<2x4x32xf32>
    %75 = math.tanh %74 : vector<2x4x32xf32>
    %76 = vector.extract_strided_slice %73 {offsets = [0, 0, 32], sizes = [2, 4, 96], strides = [1, 1, 1]} : vector<2x4x128xf32> to vector<2x4x96xf32>
    %77 = arith.negf %76 : vector<2x4x96xf32>
    %78 = math.exp %77 : vector<2x4x96xf32>
    %cst_40 = arith.constant 1.000000e+00 : f32
    %79 = vector.broadcast %cst_40 : f32 to vector<2x4x96xf32>
    %80 = arith.addf %79, %78 : vector<2x4x96xf32>
    %81 = arith.divf %79, %80 : vector<2x4x96xf32>
    %82 = vector.extract_strided_slice %81 {offsets = [0, 0, 0], sizes = [2, 4, 32], strides = [1, 1, 1]} : vector<2x4x96xf32> to vector<2x4x32xf32>
    %83 = vector.extract_strided_slice %81 {offsets = [0, 0, 32], sizes = [2, 4, 32], strides = [1, 1, 1]} : vector<2x4x96xf32> to vector<2x4x32xf32>
    %84 = vector.extract_strided_slice %81 {offsets = [0, 0, 64], sizes = [2, 4, 32], strides = [1, 1, 1]} : vector<2x4x96xf32> to vector<2x4x32xf32>
    %85 = arith.mulf %62, %83 : vector<2x4x32xf32>
    %86 = arith.mulf %82, %75 : vector<2x4x32xf32>
    %87 = arith.addf %85, %86 : vector<2x4x32xf32>
    %88 = math.tanh %87 : vector<2x4x32xf32>
    %89 = arith.mulf %84, %88 : vector<2x4x32xf32>
    %90 = vector.shape_cast %89 : vector<2x4x32xf32> to vector<2x1x4x32xf32>
    %c0_41 = arith.constant 0 : index
    %91 = arith.index_cast %c2_i32 : i32 to index
    %c0_42 = arith.constant 0 : index
    %c0_43 = arith.constant 0 : index
    %92 = vector.load %arg6[%c0_41, %91, %c0_42, %c0_43] : memref<2x8x4x32xf32, #tpu.memory_space<vmem>>, vector<2x1x4x32xf32>
    tpu.vector_store %arg6[%c0_41, %91, %c0_42, %c0_43], %90 {strides = array<i32>} : memref<2x8x4x32xf32, #tpu.memory_space<vmem>>, vector<2x1x4x32xf32>,
    %c3_i32 = arith.constant 3 : i32
    "tpu.trace_start"() <{level = 10 : i32, message = "bdn,dnm->bdm"}> : () -> ()
    %cst_44 = arith.constant dense<0.000000e+00> : vector<4x128x2xf32>
    %93 = tpu.matmul %15, %89, %cst_44 {dimension_numbers = #tpu.dot_dimension_numbers<[1], [2], [2], [0], [0, 0, 0, 2, 1, 0], [0], [1]>} : vector<4x32x128xf32>, vector<2x4x32xf32>, vector<4x128x2xf32> -> vector<4x128x2xf32>
    %94 = tpu.transpose %93, [2, 0, 1] : vector<4x128x2xf32> -> vector<2x4x128xf32>
    "tpu.trace_stop"() : () -> ()
    %c0_45 = arith.constant 0 : index
    %95 = arith.index_cast %c3_i32 : i32 to index
    %c0_46 = arith.constant 0 : index
    %c0_47 = arith.constant 0 : index
    %96 = vector.load %arg9[%c0_45, %95, %c0_46, %c0_47] : memref<2x8x4x128xf32, #tpu.memory_space<vmem>>, vector<2x1x4x128xf32>
    %97 = vector.shape_cast %96 : vector<2x1x4x128xf32> to vector<2x4x128xf32>
    %98 = arith.addf %94, %97 : vector<2x4x128xf32>
    %99 = vector.extract_strided_slice %98 {offsets = [0, 0, 0], sizes = [2, 4, 32], strides = [1, 1, 1]} : vector<2x4x128xf32> to vector<2x4x32xf32>
    %100 = math.tanh %99 : vector<2x4x32xf32>
    %101 = vector.extract_strided_slice %98 {offsets = [0, 0, 32], sizes = [2, 4, 96], strides = [1, 1, 1]} : vector<2x4x128xf32> to vector<2x4x96xf32>
    %102 = arith.negf %101 : vector<2x4x96xf32>
    %103 = math.exp %102 : vector<2x4x96xf32>
    %cst_48 = arith.constant 1.000000e+00 : f32
    %104 = vector.broadcast %cst_48 : f32 to vector<2x4x96xf32>
    %105 = arith.addf %104, %103 : vector<2x4x96xf32>
    %106 = arith.divf %104, %105 : vector<2x4x96xf32>
    %107 = vector.extract_strided_slice %106 {offsets = [0, 0, 0], sizes = [2, 4, 32], strides = [1, 1, 1]} : vector<2x4x96xf32> to vector<2x4x32xf32>
    %108 = vector.extract_strided_slice %106 {offsets = [0, 0, 32], sizes = [2, 4, 32], strides = [1, 1, 1]} : vector<2x4x96xf32> to vector<2x4x32xf32>
    %109 = vector.extract_strided_slice %106 {offsets = [0, 0, 64], sizes = [2, 4, 32], strides = [1, 1, 1]} : vector<2x4x96xf32> to vector<2x4x32xf32>
    %110 = arith.mulf %87, %108 : vector<2x4x32xf32>
    %111 = arith.mulf %107, %100 : vector<2x4x32xf32>
    %112 = arith.addf %110, %111 : vector<2x4x32xf32>
    %113 = math.tanh %112 : vector<2x4x32xf32>
    %114 = arith.mulf %109, %113 : vector<2x4x32xf32>
    %115 = vector.shape_cast %114 : vector<2x4x32xf32> to vector<2x1x4x32xf32>
    %c0_49 = arith.constant 0 : index
    %116 = arith.index_cast %c3_i32 : i32 to index
    %c0_50 = arith.constant 0 : index
    %c0_51 = arith.constant 0 : index
    %117 = vector.load %arg6[%c0_49, %116, %c0_50, %c0_51] : memref<2x8x4x32xf32, #tpu.memory_space<vmem>>, vector<2x1x4x32xf32>
    tpu.vector_store %arg6[%c0_49, %116, %c0_50, %c0_51], %115 {strides = array<i32>} : memref<2x8x4x32xf32, #tpu.memory_space<vmem>>, vector<2x1x4x32xf32>,
    %c4_i32 = arith.constant 4 : i32
    "tpu.trace_start"() <{level = 10 : i32, message = "bdn,dnm->bdm"}> : () -> ()
    %cst_52 = arith.constant dense<0.000000e+00> : vector<4x128x2xf32>
    %118 = tpu.matmul %15, %114, %cst_52 {dimension_numbers = #tpu.dot_dimension_numbers<[1], [2], [2], [0], [0, 0, 0, 2, 1, 0], [0], [1]>} : vector<4x32x128xf32>, vector<2x4x32xf32>, vector<4x128x2xf32> -> vector<4x128x2xf32>
    %119 = tpu.transpose %118, [2, 0, 1] : vector<4x128x2xf32> -> vector<2x4x128xf32>
    "tpu.trace_stop"() : () -> ()
    %c0_53 = arith.constant 0 : index
    %120 = arith.index_cast %c4_i32 : i32 to index
    %c0_54 = arith.constant 0 : index
    %c0_55 = arith.constant 0 : index
    %121 = vector.load %arg9[%c0_53, %120, %c0_54, %c0_55] : memref<2x8x4x128xf32, #tpu.memory_space<vmem>>, vector<2x1x4x128xf32>
    %122 = vector.shape_cast %121 : vector<2x1x4x128xf32> to vector<2x4x128xf32>
    %123 = arith.addf %119, %122 : vector<2x4x128xf32>
    %124 = vector.extract_strided_slice %123 {offsets = [0, 0, 0], sizes = [2, 4, 32], strides = [1, 1, 1]} : vector<2x4x128xf32> to vector<2x4x32xf32>
    %125 = math.tanh %124 : vector<2x4x32xf32>
    %126 = vector.extract_strided_slice %123 {offsets = [0, 0, 32], sizes = [2, 4, 96], strides = [1, 1, 1]} : vector<2x4x128xf32> to vector<2x4x96xf32>
    %127 = arith.negf %126 : vector<2x4x96xf32>
    %128 = math.exp %127 : vector<2x4x96xf32>
    %cst_56 = arith.constant 1.000000e+00 : f32
    %129 = vector.broadcast %cst_56 : f32 to vector<2x4x96xf32>
    %130 = arith.addf %129, %128 : vector<2x4x96xf32>
    %131 = arith.divf %129, %130 : vector<2x4x96xf32>
    %132 = vector.extract_strided_slice %131 {offsets = [0, 0, 0], sizes = [2, 4, 32], strides = [1, 1, 1]} : vector<2x4x96xf32> to vector<2x4x32xf32>
    %133 = vector.extract_strided_slice %131 {offsets = [0, 0, 32], sizes = [2, 4, 32], strides = [1, 1, 1]} : vector<2x4x96xf32> to vector<2x4x32xf32>
    %134 = vector.extract_strided_slice %131 {offsets = [0, 0, 64], sizes = [2, 4, 32], strides = [1, 1, 1]} : vector<2x4x96xf32> to vector<2x4x32xf32>
    %135 = arith.mulf %112, %133 : vector<2x4x32xf32>
    %136 = arith.mulf %132, %125 : vector<2x4x32xf32>
    %137 = arith.addf %135, %136 : vector<2x4x32xf32>
    %138 = math.tanh %137 : vector<2x4x32xf32>
    %139 = arith.mulf %134, %138 : vector<2x4x32xf32>
    %140 = vector.shape_cast %139 : vector<2x4x32xf32> to vector<2x1x4x32xf32>
    %c0_57 = arith.constant 0 : index
    %141 = arith.index_cast %c4_i32 : i32 to index
    %c0_58 = arith.constant 0 : index
    %c0_59 = arith.constant 0 : index
    %142 = vector.load %arg6[%c0_57, %141, %c0_58, %c0_59] : memref<2x8x4x32xf32, #tpu.memory_space<vmem>>, vector<2x1x4x32xf32>
    tpu.vector_store %arg6[%c0_57, %141, %c0_58, %c0_59], %140 {strides = array<i32>} : memref<2x8x4x32xf32, #tpu.memory_space<vmem>>, vector<2x1x4x32xf32>,
    %c5_i32 = arith.constant 5 : i32
    "tpu.trace_start"() <{level = 10 : i32, message = "bdn,dnm->bdm"}> : () -> ()
    %cst_60 = arith.constant dense<0.000000e+00> : vector<4x128x2xf32>
    %143 = tpu.matmul %15, %139, %cst_60 {dimension_numbers = #tpu.dot_dimension_numbers<[1], [2], [2], [0], [0, 0, 0, 2, 1, 0], [0], [1]>} : vector<4x32x128xf32>, vector<2x4x32xf32>, vector<4x128x2xf32> -> vector<4x128x2xf32>
    %144 = tpu.transpose %143, [2, 0, 1] : vector<4x128x2xf32> -> vector<2x4x128xf32>
    "tpu.trace_stop"() : () -> ()
    %c0_61 = arith.constant 0 : index
    %145 = arith.index_cast %c5_i32 : i32 to index
    %c0_62 = arith.constant 0 : index
    %c0_63 = arith.constant 0 : index
    %146 = vector.load %arg9[%c0_61, %145, %c0_62, %c0_63] : memref<2x8x4x128xf32, #tpu.memory_space<vmem>>, vector<2x1x4x128xf32>
    %147 = vector.shape_cast %146 : vector<2x1x4x128xf32> to vector<2x4x128xf32>
    %148 = arith.addf %144, %147 : vector<2x4x128xf32>
    %149 = vector.extract_strided_slice %148 {offsets = [0, 0, 0], sizes = [2, 4, 32], strides = [1, 1, 1]} : vector<2x4x128xf32> to vector<2x4x32xf32>
    %150 = math.tanh %149 : vector<2x4x32xf32>
    %151 = vector.extract_strided_slice %148 {offsets = [0, 0, 32], sizes = [2, 4, 96], strides = [1, 1, 1]} : vector<2x4x128xf32> to vector<2x4x96xf32>
    %152 = arith.negf %151 : vector<2x4x96xf32>
    %153 = math.exp %152 : vector<2x4x96xf32>
    %cst_64 = arith.constant 1.000000e+00 : f32
    %154 = vector.broadcast %cst_64 : f32 to vector<2x4x96xf32>
    %155 = arith.addf %154, %153 : vector<2x4x96xf32>
    %156 = arith.divf %154, %155 : vector<2x4x96xf32>
    %157 = vector.extract_strided_slice %156 {offsets = [0, 0, 0], sizes = [2, 4, 32], strides = [1, 1, 1]} : vector<2x4x96xf32> to vector<2x4x32xf32>
    %158 = vector.extract_strided_slice %156 {offsets = [0, 0, 32], sizes = [2, 4, 32], strides = [1, 1, 1]} : vector<2x4x96xf32> to vector<2x4x32xf32>
    %159 = vector.extract_strided_slice %156 {offsets = [0, 0, 64], sizes = [2, 4, 32], strides = [1, 1, 1]} : vector<2x4x96xf32> to vector<2x4x32xf32>
    %160 = arith.mulf %137, %158 : vector<2x4x32xf32>
    %161 = arith.mulf %157, %150 : vector<2x4x32xf32>
    %162 = arith.addf %160, %161 : vector<2x4x32xf32>
    %163 = math.tanh %162 : vector<2x4x32xf32>
    %164 = arith.mulf %159, %163 : vector<2x4x32xf32>
    %165 = vector.shape_cast %164 : vector<2x4x32xf32> to vector<2x1x4x32xf32>
    %c0_65 = arith.constant 0 : index
    %166 = arith.index_cast %c5_i32 : i32 to index
    %c0_66 = arith.constant 0 : index
    %c0_67 = arith.constant 0 : index
    %167 = vector.load %arg6[%c0_65, %166, %c0_66, %c0_67] : memref<2x8x4x32xf32, #tpu.memory_space<vmem>>, vector<2x1x4x32xf32>
    tpu.vector_store %arg6[%c0_65, %166, %c0_66, %c0_67], %165 {strides = array<i32>} : memref<2x8x4x32xf32, #tpu.memory_space<vmem>>, vector<2x1x4x32xf32>,
    %c6_i32 = arith.constant 6 : i32
    "tpu.trace_start"() <{level = 10 : i32, message = "bdn,dnm->bdm"}> : () -> ()
    %cst_68 = arith.constant dense<0.000000e+00> : vector<4x128x2xf32>
    %168 = tpu.matmul %15, %164, %cst_68 {dimension_numbers = #tpu.dot_dimension_numbers<[1], [2], [2], [0], [0, 0, 0, 2, 1, 0], [0], [1]>} : vector<4x32x128xf32>, vector<2x4x32xf32>, vector<4x128x2xf32> -> vector<4x128x2xf32>
    %169 = tpu.transpose %168, [2, 0, 1] : vector<4x128x2xf32> -> vector<2x4x128xf32>
    "tpu.trace_stop"() : () -> ()
    %c0_69 = arith.constant 0 : index
    %170 = arith.index_cast %c6_i32 : i32 to index
    %c0_70 = arith.constant 0 : index
    %c0_71 = arith.constant 0 : index
    %171 = vector.load %arg9[%c0_69, %170, %c0_70, %c0_71] : memref<2x8x4x128xf32, #tpu.memory_space<vmem>>, vector<2x1x4x128xf32>
    %172 = vector.shape_cast %171 : vector<2x1x4x128xf32> to vector<2x4x128xf32>
    %173 = arith.addf %169, %172 : vector<2x4x128xf32>
    %174 = vector.extract_strided_slice %173 {offsets = [0, 0, 0], sizes = [2, 4, 32], strides = [1, 1, 1]} : vector<2x4x128xf32> to vector<2x4x32xf32>
    %175 = math.tanh %174 : vector<2x4x32xf32>
    %176 = vector.extract_strided_slice %173 {offsets = [0, 0, 32], sizes = [2, 4, 96], strides = [1, 1, 1]} : vector<2x4x128xf32> to vector<2x4x96xf32>
    %177 = arith.negf %176 : vector<2x4x96xf32>
    %178 = math.exp %177 : vector<2x4x96xf32>
    %cst_72 = arith.constant 1.000000e+00 : f32
    %179 = vector.broadcast %cst_72 : f32 to vector<2x4x96xf32>
    %180 = arith.addf %179, %178 : vector<2x4x96xf32>
    %181 = arith.divf %179, %180 : vector<2x4x96xf32>
    %182 = vector.extract_strided_slice %181 {offsets = [0, 0, 0], sizes = [2, 4, 32], strides = [1, 1, 1]} : vector<2x4x96xf32> to vector<2x4x32xf32>
    %183 = vector.extract_strided_slice %181 {offsets = [0, 0, 32], sizes = [2, 4, 32], strides = [1, 1, 1]} : vector<2x4x96xf32> to vector<2x4x32xf32>
    %184 = vector.extract_strided_slice %181 {offsets = [0, 0, 64], sizes = [2, 4, 32], strides = [1, 1, 1]} : vector<2x4x96xf32> to vector<2x4x32xf32>
    %185 = arith.mulf %162, %183 : vector<2x4x32xf32>
    %186 = arith.mulf %182, %175 : vector<2x4x32xf32>
    %187 = arith.addf %185, %186 : vector<2x4x32xf32>
    %188 = math.tanh %187 : vector<2x4x32xf32>
    %189 = arith.mulf %184, %188 : vector<2x4x32xf32>
    %190 = vector.shape_cast %189 : vector<2x4x32xf32> to vector<2x1x4x32xf32>
    %c0_73 = arith.constant 0 : index
    %191 = arith.index_cast %c6_i32 : i32 to index
    %c0_74 = arith.constant 0 : index
    %c0_75 = arith.constant 0 : index
    %192 = vector.load %arg6[%c0_73, %191, %c0_74, %c0_75] : memref<2x8x4x32xf32, #tpu.memory_space<vmem>>, vector<2x1x4x32xf32>
    tpu.vector_store %arg6[%c0_73, %191, %c0_74, %c0_75], %190 {strides = array<i32>} : memref<2x8x4x32xf32, #tpu.memory_space<vmem>>, vector<2x1x4x32xf32>,
    %c7_i32 = arith.constant 7 : i32
    "tpu.trace_start"() <{level = 10 : i32, message = "bdn,dnm->bdm"}> : () -> ()
    %cst_76 = arith.constant dense<0.000000e+00> : vector<4x128x2xf32>
    %193 = tpu.matmul %15, %189, %cst_76 {dimension_numbers = #tpu.dot_dimension_numbers<[1], [2], [2], [0], [0, 0, 0, 2, 1, 0], [0], [1]>} : vector<4x32x128xf32>, vector<2x4x32xf32>, vector<4x128x2xf32> -> vector<4x128x2xf32>
    %194 = tpu.transpose %193, [2, 0, 1] : vector<4x128x2xf32> -> vector<2x4x128xf32>
    "tpu.trace_stop"() : () -> ()
    %c0_77 = arith.constant 0 : index
    %195 = arith.index_cast %c7_i32 : i32 to index
    %c0_78 = arith.constant 0 : index
    %c0_79 = arith.constant 0 : index
    %196 = vector.load %arg9[%c0_77, %195, %c0_78, %c0_79] : memref<2x8x4x128xf32, #tpu.memory_space<vmem>>, vector<2x1x4x128xf32>
    %197 = vector.shape_cast %196 : vector<2x1x4x128xf32> to vector<2x4x128xf32>
    %198 = arith.addf %194, %197 : vector<2x4x128xf32>
    %199 = vector.extract_strided_slice %198 {offsets = [0, 0, 0], sizes = [2, 4, 32], strides = [1, 1, 1]} : vector<2x4x128xf32> to vector<2x4x32xf32>
    %200 = math.tanh %199 : vector<2x4x32xf32>
    %201 = vector.extract_strided_slice %198 {offsets = [0, 0, 32], sizes = [2, 4, 96], strides = [1, 1, 1]} : vector<2x4x128xf32> to vector<2x4x96xf32>
    %202 = arith.negf %201 : vector<2x4x96xf32>
    %203 = math.exp %202 : vector<2x4x96xf32>
    %cst_80 = arith.constant 1.000000e+00 : f32
    %204 = vector.broadcast %cst_80 : f32 to vector<2x4x96xf32>
    %205 = arith.addf %204, %203 : vector<2x4x96xf32>
    %206 = arith.divf %204, %205 : vector<2x4x96xf32>
    %207 = vector.extract_strided_slice %206 {offsets = [0, 0, 0], sizes = [2, 4, 32], strides = [1, 1, 1]} : vector<2x4x96xf32> to vector<2x4x32xf32>
    %208 = vector.extract_strided_slice %206 {offsets = [0, 0, 32], sizes = [2, 4, 32], strides = [1, 1, 1]} : vector<2x4x96xf32> to vector<2x4x32xf32>
    %209 = vector.extract_strided_slice %206 {offsets = [0, 0, 64], sizes = [2, 4, 32], strides = [1, 1, 1]} : vector<2x4x96xf32> to vector<2x4x32xf32>
    %210 = arith.mulf %187, %208 : vector<2x4x32xf32>
    %211 = arith.mulf %207, %200 : vector<2x4x32xf32>
    %212 = arith.addf %210, %211 : vector<2x4x32xf32>
    %213 = math.tanh %212 : vector<2x4x32xf32>
    %214 = arith.mulf %209, %213 : vector<2x4x32xf32>
    %215 = vector.shape_cast %214 : vector<2x4x32xf32> to vector<2x1x4x32xf32>
    %c0_81 = arith.constant 0 : index
    %216 = arith.index_cast %c7_i32 : i32 to index
    %c0_82 = arith.constant 0 : index
    %c0_83 = arith.constant 0 : index
    %217 = vector.load %arg6[%c0_81, %216, %c0_82, %c0_83] : memref<2x8x4x32xf32, #tpu.memory_space<vmem>>, vector<2x1x4x32xf32>
    tpu.vector_store %arg6[%c0_81, %216, %c0_82, %c0_83], %215 {strides = array<i32>} : memref<2x8x4x32xf32, #tpu.memory_space<vmem>>, vector<2x1x4x32xf32>,
    %c8_i32 = arith.constant 8 : i32
    %c0_84 = arith.constant 0 : index
    %c0_85 = arith.constant 0 : index
    %c0_86 = arith.constant 0 : index
    %218 = vector.load %arg10[%c0_84, %c0_85, %c0_86] : memref<2x4x32xf32, #tpu.memory_space<vmem>>, vector<2x4x32xf32>
    tpu.vector_store %arg10[%c0_84, %c0_85, %c0_86], %214 {strides = array<i32>} : memref<2x4x32xf32, #tpu.memory_space<vmem>>, vector<2x4x32xf32>,
    %c0_87 = arith.constant 0 : index
    %c0_88 = arith.constant 0 : index
    %c0_89 = arith.constant 0 : index
    %219 = vector.load %arg11[%c0_87, %c0_88, %c0_89] : memref<2x4x32xf32, #tpu.memory_space<vmem>>, vector<2x4x32xf32>
    tpu.vector_store %arg11[%c0_87, %c0_88, %c0_89], %212 {strides = array<i32>} : memref<2x4x32xf32, #tpu.memory_space<vmem>>, vector<2x4x32xf32>,
    %c0_i32_90 = arith.constant 0 : i32
    %220 = arith.cmpi eq, %arg1, %c0_i32_90 : i32
    %221 = arith.extui %220 : i1 to i32
    %c0_i32_91 = arith.constant 0 : i32
    %222 = arith.cmpi ne, %221, %c0_i32_91 : i32
    scf.if %222 {
      %c0_92 = arith.constant 0 : index
      %c0_93 = arith.constant 0 : index
      %c0_94 = arith.constant 0 : index
      %223 = vector.load %arg7[%c0_92, %c0_93, %c0_94] : memref<2x4x32xf32, #tpu.memory_space<vmem>>, vector<2x4x32xf32>
      tpu.vector_store %arg7[%c0_92, %c0_93, %c0_94], %214 {strides = array<i32>} : memref<2x4x32xf32, #tpu.memory_space<vmem>>, vector<2x4x32xf32>,
      %c0_95 = arith.constant 0 : index
      %c0_96 = arith.constant 0 : index
      %c0_97 = arith.constant 0 : index
      %224 = vector.load %arg8[%c0_95, %c0_96, %c0_97] : memref<2x4x32xf32, #tpu.memory_space<vmem>>, vector<2x4x32xf32>
      tpu.vector_store %arg8[%c0_95, %c0_96, %c0_97], %212 {strides = array<i32>} : memref<2x4x32xf32, #tpu.memory_space<vmem>>, vector<2x4x32xf32>,
    } else {
    }
    return
  }
  func.func @transform_0(%arg0: i32, %arg1: i32) -> (i32, i32, i32) {
    %c0_i32 = arith.constant 0 : i32
    %c0_i32_0 = arith.constant 0 : i32
    return %c0_i32, %arg1, %arg0 : i32, i32, i32
  }
  func.func @transform_1(%arg0: i32, %arg1: i32) -> (i32, i32) {
    %c0_i32 = arith.constant 0 : i32
    %c0_i32_0 = arith.constant 0 : i32
    return %arg0, %c0_i32 : i32, i32
  }
  func.func @transform_2(%arg0: i32, %arg1: i32) -> (i32, i32) {
    %c0_i32 = arith.constant 0 : i32
    %c0_i32_0 = arith.constant 0 : i32
    return %arg0, %c0_i32 : i32, i32
  }
  func.func @transform_3(%arg0: i32, %arg1: i32) -> (i32, i32, i32) {
    %c0_i32 = arith.constant 0 : i32
    %c0_i32_0 = arith.constant 0 : i32
    %c0_i32_1 = arith.constant 0 : i32
    return %arg0, %c0_i32, %c0_i32_0 : i32, i32, i32
  }
  func.func @transform_4(%arg0: i32, %arg1: i32) -> (i32, i32, i32, i32) {
    %c0_i32 = arith.constant 0 : i32
    %c0_i32_0 = arith.constant 0 : i32
    %c0_i32_1 = arith.constant 0 : i32
    return %c0_i32, %arg1, %arg0, %c0_i32_0 : i32, i32, i32, i32
  }
  func.func @transform_5(%arg0: i32, %arg1: i32) -> (i32, i32, i32) {
    %c0_i32 = arith.constant 0 : i32
    %c0_i32_0 = arith.constant 0 : i32
    %c0_i32_1 = arith.constant 0 : i32
    return %c0_i32, %arg0, %c0_i32_0 : i32, i32, i32
  }
  func.func @transform_6(%arg0: i32, %arg1: i32) -> (i32, i32, i32) {
    %c0_i32 = arith.constant 0 : i32
    %c0_i32_0 = arith.constant 0 : i32
    %c0_i32_1 = arith.constant 0 : i32
    return %c0_i32, %arg0, %c0_i32_0 : i32, i32, i32
  }
}

</mosaic_0001>

<bundles_post_ra>
// kernel: lstm_cell_forward.1
= control target key start
LH: loop header
LB: loop body
LE: loop exit
PB: predicated region body
PF: predicated region fallthrough
CT: control target
= control target key end

     0   :  { %12 = vsyncpa [#allocation6], 0  ;;  %vm26_vm0 = vcmask 257024   ;;  %s25245_s0 = inlined_call_operand.vmem [shape: f32[2,8,4], index: 0, kind: input, shape index: {}]   ;;  %s25246_s1 = inlined_call_operand.vmem [shape: f32[4,128], index: 1, kind: input, shape index: {}]   ;;  %s25247_s2 = inlined_call_operand.vmem [shape: f32[4,128], index: 2, kind: input, shape index: {}]   ;;  %s25248_s3 = inlined_call_operand.vmem [shape: f32[4,32,128], index: 3, kind: input, shape index: {}]   ;;  %s25249_s4 = inlined_call_operand.hbm [shape: f32[2,8,4,32], index: 4, kind: output, shape index: {0}]   ;;  %s25250_s5 = inlined_call_operand.hbm [shape: f32[2,4,32], index: 5, kind: output, shape index: {1}]   ;;  %s25251_s6 = inlined_call_operand.hbm [shape: f32[2,4,32], index: 6, kind: output, shape index: {2}]  }
   0x1   :  { %13 = vsyncpa [#allocation8], 0  ;;  %v25252_v0 = vmov 0.0   ;;  %v33_v5 = vlaneseq  ;;  %v22708_v6 = vmov 1983009808   ;;  %vm1871_vm1 = vcmask 261120  }
   0x2   :  { %27 = vst.msk [vmem:[#allocation3] sm:$0xf] %vm26_vm0, %v25252_v0  ;;  %28 = vst.msk [vmem:[#allocation3 + $0x4] sm:$0xf] %vm26_vm0, %v25252_v0  ;;  %v281_v7 = vunpack.c.l.s4 %v22708_v6  ;;  %v22709_v11 = vmov 1934713408  }
   0x3   :  { %29 = vst.msk [vmem:[#allocation4] sm:$0xf] %vm26_vm0, %v25252_v0  ;;  %30 = vst.msk [vmem:[#allocation4 + $0x4] sm:$0xf] %vm26_vm0, %v25252_v0  ;;  %v22760_v9 = vshrl.u32 %v33_v5, 7  ;;  %v312_v12 = vunpack.c.l.s4 %v22709_v11  ;;  %s22710_s12 = smov 32  }
   0x4   :  { %v282_v10 = vunpack.c.0.s8 %v281_v7  ;;  %s22711_s13 = smov 64   ;;  %s22712_s14 = smov 96  }
   0x5   :  { %25351 = vst [vmem:[#allocation12_spill] sm:$0xff] %v22760_v9  ;;  %v313_v15 = vunpack.c.0.s8 %v312_v12  ;;  %s22714_s22 = smov [#allocation5]  }
   0x6   :  { %v22765_v14 = vsub.s32 %v282_v10, %v22760_v9  ;;  %s19983_s23 = sshll.u32 %s22714_s22, 4  ;;  %s25183_s23 = int_to_ptr.vmem [resolvable:$true] %s19983_s23 }
   0x7   :  { %v22772_v21 = vsub.s32 %v313_v15, %v22760_v9 }
   0x9   :  { %v211_v1 = vld [vmem:[#allocation3] sm:$0xf]  ;;  %v212_v2 = vld [vmem:[#allocation3 + $0x4] sm:$0xf] }
   0xa   :  { %215 = vxpose.xlu0.b32.start.end [1/1] (short) (narrow) %v211_v1, 32 }
  0x17   :  { %247 = vxpose.xlu0.b32.start.end [1/1] (short) (narrow) %v212_v2, 32 }
  0x8a   :  { %v231_v3 = vpop.trf.xlu0 }
  0x8b   :  { %v279_v16 = vcombine.high %v231_v3, %v25252_v0  ;;  %v286_v18 = vrot.slane %v231_v3, %v22765_v14 }
  0x8d   :  { %v293_v24 = vrot.slane %v279_v16, %v22765_v14 }
  0x8e   :  { %v232_v4 = vpop.trf.xlu0 }
  0x8f   :  { %v352_v26 = vrot.slane %v232_v4, %v22765_v14  ;;  %v345_v33 = vcombine.high %v232_v4, %v25252_v0 }
  0x91   :  { %v359_v40 = vrot.slane %v345_v33, %v22765_v14  ;;  %v199_v33 = vld [vmem:[%s25248_s3 + $0x20] sm:$0xff] }
  0x92   :  { %v233_v8 = vpop.trf.xlu0 }
  0x93   :  { %v418_v51 = vrot.slane %v233_v8, %v22765_v14  ;;  %v411_v57 = vcombine.high %v233_v8, %v25252_v0 }
  0x95   :  { %v425_v63 = vrot.slane %v411_v57, %v22765_v14  ;;  %v206_v57 = vld [vmem:[%s25248_s3 + $0x58] sm:$0xff] }
  0x96   :  { %v22762_v13 = vpop.trf.xlu0 }
  0x97   :  { %v484_v11 = vrot.slane %v22762_v13, %v22765_v14 }
  0x9a   :  { %v263_v17 = vpop.trf.xlu0 }
  0x9b   :  { %v294_v19 = vcombine.high %v263_v17, %v25252_v0  ;;  %v301_v20 = vrot.slane %v263_v17, %v22765_v14 }
  0x9d   :  { %v308_v22 = vrot.slane %v294_v19, %v22765_v14  ;;  %v309_v23 = vcombine.low %v286_v18, %v301_v20  ;;  %v310_v29 = vcombine.high %v286_v18, %v301_v20  ;;  %v477_v18 = vcombine.high %v22762_v13, %v25252_v0 }
  0x9e   :  { %v264_v25 = vpop.trf.xlu0 }
  0x9f   :  { %v367_v27 = vrot.slane %v264_v25, %v22765_v14  ;;  %v317_v28 = vrot.slane %v309_v23, %v22772_v21  ;;  %v360_v30 = vcombine.high %v264_v25, %v25252_v0  ;;  %v325_v31 = vcombine.low %v293_v24, %v308_v22 }
  0xa0   :  { %v324_v35 = vrot.slane %v310_v29, %v22772_v21  ;;  %v326_v52 = vcombine.high %v293_v24, %v308_v22  ;;  %v491_v24 = vrot.slane %v477_v18, %v22765_v14 }
  0xa1   :  { %543 = vxpose.xlu1.b32.start.end [1/1] (short) (narrow) %v317_v28, 8  ;;  %v375_v32 = vcombine.low %v352_v26, %v367_v27  ;;  %v333_v34 = vrot.slane %v325_v31, %v22772_v21  ;;  %v374_v36 = vrot.slane %v360_v30, %v22765_v14  ;;  %v376_v39 = vcombine.high %v352_v26, %v367_v27 }
  0xa2   :  { %v341_v41 = vcombine.high %v317_v28, %v25252_v0  ;;  %v265_v45 = vpop.trf.xlu0  ;;  %v342_v46 = vcombine.high %v324_v35, %v25252_v0  ;;  %v340_v58 = vrot.slane %v326_v52, %v22772_v21 }
  0xa3   :  { %v343_v37 = vcombine.high %v333_v34, %v25252_v0  ;;  %v383_v38 = vrot.slane %v375_v32, %v22772_v21  ;;  %v390_v43 = vrot.slane %v376_v39, %v22772_v21  ;;  %v391_v44 = vcombine.low %v359_v40, %v374_v36  ;;  %v197_v39 = vld [vmem:[%s25248_s3 + $0x10] sm:$0xff] }
  0xa4   :  { %v433_v47 = vrot.slane %v265_v45, %v22765_v14  ;;  %v392_v50 = vcombine.high %v359_v40, %v374_v36  ;;  %v426_v53 = vcombine.high %v265_v45, %v25252_v0  ;;  %v344_v1 = vcombine.high %v340_v58, %v25252_v0  ;;  %v202_v36 = vld [vmem:[%s25248_s3 + $0x38] sm:$0xff] }
  0xa5   :  { %607 = vxpose.xlu1.b32.start.end [1/1] (short) (narrow) %v324_v35, 8  ;;  %703 = vxpose.xlu0.b32.start.end [1/1] (short) (narrow) %v343_v37, 8  ;;  %v407_v42 = vcombine.high %v383_v38, %v25252_v0  ;;  %v408_v48 = vcombine.high %v390_v43, %v25252_v0  ;;  %v399_v49 = vrot.slane %v391_v44, %v22772_v21  ;;  %v201_v35 = vld [vmem:[%s25248_s3 + $0x30] sm:$0xff]  ;;  %v195_v37 = vld [vmem:[%s25248_s3] sm:$0xff]  ;;  %v198_v40 = vld [vmem:[%s25248_s3 + $0x18] sm:$0xff] }
  0xa6   :  { %v406_v55 = vrot.slane %v392_v50, %v22772_v21  ;;  %v441_v56 = vcombine.low %v418_v51, %v433_v47  ;;  %v440_v59 = vrot.slane %v426_v53, %v22765_v14  ;;  %v442_v62 = vcombine.high %v418_v51, %v433_v47  ;;  %v266_v5 = vpop.trf.xlu0  ;;  %v210_v44 = vld [vmem:[%s25248_s3 + $0x78] sm:$0xff]  ;;  %v204_v51 = vld [vmem:[%s25248_s3 + $0x48] sm:$0xff] }
  0xa7   :  { %v409_v54 = vcombine.high %v399_v49, %v25252_v0  ;;  %v499_v6 = vrot.slane %v266_v5, %v22765_v14  ;;  %v492_v12 = vcombine.high %v266_v5, %v25252_v0 }
  0xa8   :  { %v410_v60 = vcombine.high %v406_v55, %v25252_v0  ;;  %v449_v61 = vrot.slane %v441_v56, %v22772_v21  ;;  %v456_v3 = vrot.slane %v442_v62, %v22772_v21  ;;  %v457_v4 = vcombine.low %v425_v63, %v440_v59 }
  0xa9   :  { %575 = vxpose.xlu1.b32.start.end [1/1] (short) (narrow) %v341_v41, 8  ;;  %831 = vxpose.xlu0.b32.start.end [1/1] (short) (narrow) %v407_v42, 8  ;;  %v458_v10 = vcombine.high %v425_v63, %v440_v59  ;;  %v507_v17 = vcombine.low %v484_v11, %v499_v6  ;;  %v506_v19 = vrot.slane %v492_v12, %v22765_v14  ;;  %v207_v41 = vld [vmem:[%s25248_s3 + $0x60] sm:$0xff]  ;;  %v208_v42 = vld [vmem:[%s25248_s3 + $0x68] sm:$0xff] }
  0xaa   :  { %v473_v2 = vcombine.high %v449_v61, %v25252_v0  ;;  %v474_v7 = vcombine.high %v456_v3, %v25252_v0  ;;  %v465_v8 = vrot.slane %v457_v4, %v22772_v21  ;;  %v508_v23 = vcombine.high %v484_v11, %v499_v6 }
  0xab   :  { %v472_v16 = vrot.slane %v458_v10, %v22772_v21  ;;  %v515_v22 = vrot.slane %v507_v17, %v22772_v21  ;;  %v523_v27 = vcombine.low %v491_v24, %v506_v19  ;;  %v524_v29 = vcombine.high %v491_v24, %v506_v19 }
  0xac   :  { %v475_v15 = vcombine.high %v465_v8, %v25252_v0  ;;  %v522_v26 = vrot.slane %v508_v23, %v22772_v21 }
  0xad   :  { %639 = vxpose.xlu1.b32.start.end [1/1] (short) (narrow) %v342_v46, 8  ;;  %895 = vxpose.xlu0.b32.start.end [1/1] (short) (narrow) %v408_v48, 8  ;;  %v476_v20 = vcombine.high %v472_v16, %v25252_v0  ;;  %v539_v25 = vcombine.high %v515_v22, %v25252_v0  ;;  %v531_v28 = vrot.slane %v523_v27, %v22772_v21  ;;  %v203_v48 = vld [vmem:[%s25248_s3 + $0x40] sm:$0xff] }
  0xae   :  { %v540_v13 = vcombine.high %v522_v26, %v25252_v0  ;;  %v538_v31 = vrot.slane %v524_v29, %v22772_v21 }
  0xaf   :  { %v541_v30 = vcombine.high %v531_v28, %v25252_v0 }
  0xb0   :  { %v542_v32 = vcombine.high %v538_v31, %v25252_v0 }
  0xb1   :  { %671 = vxpose.xlu1.b32.start.end [1/1] (short) (narrow) %v333_v34, 8  ;;  %959 = vxpose.xlu0.b32.start.end [1/1] (short) (narrow) %v409_v54, 8  ;;  %v200_v34 = vld [vmem:[%s25248_s3 + $0x28] sm:$0xff]  ;;  %v205_v54 = vld [vmem:[%s25248_s3 + $0x50] sm:$0xff] }
  0xb5   :  { %735 = vxpose.xlu1.b32.start.end [1/1] (short) (narrow) %v340_v58, 8  ;;  %1023 = vxpose.xlu0.b32.start.end [1/1] (short) (narrow) %v410_v60, 8 }
  0xb9   :  { %767 = vxpose.xlu1.b32.start.end [1/1] (short) (narrow) %v344_v1, 8  ;;  %1087 = vxpose.xlu0.b32.start.end [1/1] (short) (narrow) %v473_v2, 8 }
  0xbd   :  { %799 = vxpose.xlu1.b32.start.end [1/1] (short) (narrow) %v383_v38, 8  ;;  %1151 = vxpose.xlu0.b32.start.end [1/1] (short) (narrow) %v474_v7, 8  ;;  %v196_v38 = vld [vmem:[%s25248_s3 + $0x8] sm:$0xff] }
  0xc1   :  { %863 = vxpose.xlu1.b32.start.end [1/1] (short) (narrow) %v390_v43, 8  ;;  %1215 = vxpose.xlu0.b32.start.end [1/1] (short) (narrow) %v475_v15, 8  ;;  %v209_v43 = vld [vmem:[%s25248_s3 + $0x70] sm:$0xff] }
  0xc5   :  { %927 = vxpose.xlu1.b32.start.end [1/1] (short) (narrow) %v399_v49, 8  ;;  %1279 = vxpose.xlu0.b32.start.end [1/1] (short) (narrow) %v476_v20, 8 }
  0xc9   :  { %991 = vxpose.xlu1.b32.start.end [1/1] (short) (narrow) %v406_v55, 8  ;;  %1343 = vxpose.xlu0.b32.start.end [1/1] (short) (narrow) %v539_v25, 8 }
  0xcd   :  { %1055 = vxpose.xlu1.b32.start.end [1/1] (short) (narrow) %v449_v61, 8  ;;  %1407 = vxpose.xlu0.b32.start.end [1/1] (short) (narrow) %v540_v13, 8 }
  0xd1   :  { %1119 = vxpose.xlu1.b32.start.end [1/1] (short) (narrow) %v456_v3, 8  ;;  %1471 = vxpose.xlu0.b32.start.end [1/1] (short) (narrow) %v541_v30, 8 }
  0xd5   :  { %1183 = vxpose.xlu1.b32.start.end [1/1] (short) (narrow) %v465_v8, 8  ;;  %1535 = vxpose.xlu0.b32.start.end [1/1] (short) (narrow) %v542_v32, 8 }
  0xd9   :  { %1247 = vxpose.xlu1.b32.start.end [1/1] (short) (narrow) %v472_v16, 8  ;;  %2065 = vxpose.xlu0.b32.start [1/4] (short) %v199_v33, 128 }
  0xdd   :  { %1311 = vxpose.xlu1.b32.start.end [1/1] (short) (narrow) %v515_v22, 8  ;;  %2066 = vxpose.xlu0.b32.cont [2/4] (short) %v200_v34, 128 }
  0xe1   :  { %1375 = vxpose.xlu1.b32.start.end [1/1] (short) (narrow) %v522_v26, 8  ;;  %2067 = vxpose.xlu0.b32.cont [3/4] (short) %v201_v35, 128 }
  0xe5   :  { %1439 = vxpose.xlu1.b32.start.end [1/1] (short) (narrow) %v531_v28, 8  ;;  %2068 = vxpose.xlu0.b32.end [4/4] (short) %v202_v36, 128 }
  0xe9   :  { %1503 = vxpose.xlu1.b32.start.end [1/1] (short) (narrow) %v538_v31, 8 }
  0xed   :  { %1839 = vxpose.xlu1.b32.start [1/4] (short) %v195_v37, 128 }
  0xf1   :  { %1840 = vxpose.xlu1.b32.cont [2/4] (short) %v196_v38, 128 }
  0xf5   :  { %1841 = vxpose.xlu1.b32.cont [3/4] (short) %v197_v39, 128 }
  0xf9   :  { %1842 = vxpose.xlu1.b32.end [4/4] (short) %v198_v40, 128 }
 0x116   :  { %2515 = vxpose.xlu0.b32.start [1/4] (short) %v207_v41, 128 }
 0x11a   :  { %2516 = vxpose.xlu0.b32.cont [2/4] (short) %v208_v42, 128 }
 0x11e   :  { %2517 = vxpose.xlu0.b32.cont [3/4] (short) %v209_v43, 128 }
 0x121   :  { %v559_v45 = vpop.trf.xlu1 }
 0x122   :  { %2518 = vxpose.xlu0.b32.end [4/4] (short) %v210_v44, 128 }
 0x125   :  { %v623_v46 = vpop.trf.xlu1  ;;  %v719_v47 = vpop.trf.xlu0 }
 0x126   :  { %v1567_v8 = vcombine.low %v559_v45, %v623_v46 }
 0x128   :  { %v22893_v20 = vrot.slane %v1567_v8, %v22765_v14 }
 0x129   :  { %v591_v49 = vpop.trf.xlu1  ;;  %v847_v50 = vpop.trf.xlu0 }
 0x12a   :  { %2290 = vxpose.xlu1.b32.start [1/4] (short) %v203_v48, 128 }
 0x12d   :  { %v655_v52 = vpop.trf.xlu1  ;;  %v911_v53 = vpop.trf.xlu0 }
 0x12e   :  { %2291 = vxpose.xlu1.b32.cont [2/4] (short) %v204_v51, 128  ;;  %v1575_v4 = vcombine.low %v591_v49, %v655_v52  ;;  %v1643_v10 = vcombine.low %v847_v50, %v911_v53 }
 0x130   :  { %v22884_v15 = vrot.slane %v1575_v4, %v22765_v14  ;;  %v22896_v22 = vrot.slane %v1643_v10, %v22765_v14 }
 0x131   :  { %v687_v55 = vpop.trf.xlu1  ;;  %v975_v56 = vpop.trf.xlu0 }
 0x132   :  { %2292 = vxpose.xlu1.b32.cont [3/4] (short) %v205_v54, 128  ;;  %v1599_v26 = vcombine.low %v22893_v20, %v22884_v15  ;;  %v1600_v10 = vcombine.high %v22893_v20, %v22884_v15 }
 0x134   :  { %v1607_v33 = vrot.slane %v1599_v26, %v22772_v21 }
 0x135   :  { %v751_v58 = vpop.trf.xlu1  ;;  %v1039_v59 = vpop.trf.xlu0 }
 0x136   :  { %2293 = vxpose.xlu1.b32.end [4/4] (short) %v206_v57, 128  ;;  %v1583_v5 = vcombine.low %v687_v55, %v751_v58  ;;  %v1659_v17 = vcombine.low %v975_v56, %v1039_v59 }
 0x138   :  { %v22887_v16 = vrot.slane %v1583_v5, %v22765_v14  ;;  %v1666_v27 = vrot.slane %v1659_v17, %v22765_v14 }
 0x139   :  { %v783_v60 = vpop.trf.xlu1  ;;  %v22876_v61 = vpop.trf.xlu0 }
 0x13a   :  { %v1591_v2 = vcombine.low %v719_v47, %v783_v60 }
 0x13c   :  { %v22881_v11 = vrot.slane %v1591_v2, %v22765_v14 }
 0x13d   :  { %v815_v62 = vpop.trf.xlu1  ;;  %v22878_v63 = vpop.trf.xlu0 }
 0x13e   :  { %v1615_v23 = vcombine.low %v22887_v16, %v22881_v11  ;;  %v1711_v56 = vcombine.low %v22876_v61, %v22878_v63 }
 0x140   :  { %v1623_v32 = vrot.slane %v1615_v23, %v22772_v21 }
 0x141   :  { %v879_v1 = vpop.trf.xlu1  ;;  %v1231_v3 = vpop.trf.xlu0 }
 0x142   :  { %v1635_v6 = vcombine.low %v815_v62, %v879_v1  ;;  %v1631_v38 = vcombine.low %v1607_v33, %v1623_v32  ;;  %v1632_v40 = vcombine.high %v1607_v33, %v1623_v32 }
 0x144   :  { %v22890_v18 = vrot.slane %v1635_v6, %v22765_v14 }
 0x145   :  { %v943_v7 = vpop.trf.xlu1  ;;  %v1295_v12 = vpop.trf.xlu0 }
 0x146   :  { %v1667_v13 = vcombine.low %v22890_v18, %v22896_v22  ;;  %v1727_v53 = vcombine.low %v1231_v3, %v1295_v12  ;;  %v1718_v3 = vrot.slane %v1711_v56, %v22765_v14  ;;  %v1616_v12 = vcombine.high %v22887_v16, %v22881_v11 }
 0x147   :  { %v1668_v17 = vcombine.high %v22890_v18, %v22896_v22  ;;  %v1614_v11 = vrot.slane %v1600_v10, %v22772_v21 }
 0x148   :  { %v1675_v34 = vrot.slane %v1667_v13, %v22772_v21  ;;  %v1734_v62 = vrot.slane %v1727_v53, %v22765_v14  ;;  %v1630_v16 = vrot.slane %v1616_v12, %v22772_v21 }
 0x149   :  { %v1007_v19 = vpop.trf.xlu1  ;;  %v1359_v25 = vpop.trf.xlu0  ;;  %v1682_v18 = vrot.slane %v1668_v17, %v22772_v21 }
 0x14a   :  { %v1651_v24 = vcombine.low %v943_v7, %v1007_v19 }
 0x14c   :  { %v1658_v28 = vrot.slane %v1651_v24, %v22765_v14 }
 0x14d   :  { %v1071_v29 = vpop.trf.xlu1  ;;  %v1423_v31 = vpop.trf.xlu0 }
 0x14e   :  { %v1683_v30 = vcombine.low %v1658_v28, %v1666_v27  ;;  %v1779_v59 = vcombine.low %v1359_v25, %v1423_v31  ;;  %v1684_v5 = vcombine.high %v1658_v28, %v1666_v27 }
 0x150   :  { %v1691_v35 = vrot.slane %v1683_v30, %v22772_v21  ;;  %v1786_v61 = vrot.slane %v1779_v59, %v22765_v14  ;;  %v1698_v26 = vrot.slane %v1684_v5, %v22772_v21  ;;  %v22975_v5 = vld [vmem:[%s25245_s0 + $0x8] sm:$0xff] }
 0x151   :  { %v1135_v36 = vpop.trf.xlu1  ;;  %v1487_v37 = vpop.trf.xlu0 }
 0x152   :  { %v1699_v39 = vcombine.low %v1675_v34, %v1691_v35  ;;  %v1700_v41 = vcombine.high %v1675_v34, %v1691_v35  ;;  %v1703_v54 = vcombine.low %v1071_v29, %v1135_v36  ;;  %v1701_v36 = vcombine.low %v1682_v18, %v1698_v26 }
 0x154   :  { %v22217_v42 = vpack.c.bf16 %v1699_v39, %v1631_v38  ;;  %v22225_v43 = vpack.c.bf16 %v1700_v41, %v1632_v40  ;;  %v1710_v1 = vrot.slane %v1703_v54, %v22765_v14 }
 0x155   :  { %v1199_v44 = vpop.trf.xlu1  ;;  %v1551_v45 = vpop.trf.xlu0 }
 0x156   :  { %22218 = vmatprep.subr.bf16.mxu0 %v22217_v42  ;;  %22226 = vmatprep.subr.bf16.mxu1 %v22225_v43  ;;  %v1795_v2 = vcombine.low %v1487_v37, %v1551_v45  ;;  %v1735_v19 = vcombine.low %v1710_v1, %v1718_v3  ;;  %v1736_v33 = vcombine.high %v1710_v1, %v1718_v3 }
 0x157   :  { %22220 = vmatpush3.bf16.msra.mxu0 %v22217_v42  ;;  %22228 = vmatpush3.bf16.msra.mxu1 %v22225_v43  ;;  %v1702_v37 = vcombine.high %v1682_v18, %v1698_v26  ;;  %v1633_v43 = vcombine.low %v1614_v11, %v1630_v16 }
 0x158   :  { %v1802_v23 = vrot.slane %v1795_v2, %v22765_v14  ;;  %v1743_v22 = vrot.slane %v1735_v19, %v22772_v21 }
 0x159   :  { %v1263_v46 = vpop.trf.xlu1  ;;  %v22910_v47 = vpop.trf.xlu0  ;;  %v22233_v53 = vpack.c.bf16 %v1701_v36, %v1633_v43 }
 0x15a   :  { %25352 = vst [vmem:[#allocation13_spill] sm:$0xff] %v22910_v47  ;;  %21233 = vmatprep.mubr.msk.f32.mxu1 %vm1871_vm1, %v22910_v47  ;;  %v1719_v50 = vcombine.low %v1199_v44, %v1263_v46  ;;  %v1634_v44 = vcombine.high %v1614_v11, %v1630_v16 }
 0x15c   :  { %v1726_v57 = vrot.slane %v1719_v50, %v22765_v14  ;;  %v22241_v54 = vpack.c.bf16 %v1702_v37, %v1634_v44 }
 0x15d   :  { %v1327_v48 = vpop.trf.xlu1  ;;  %v22914_v49 = vpop.trf.xlu0 }
 0x15e   :  { %v1751_v6 = vcombine.low %v1726_v57, %v1734_v62  ;;  %v1752_v29 = vcombine.high %v1726_v57, %v1734_v62 }
 0x160   :  { %v1759_v27 = vrot.slane %v1751_v6, %v22772_v21  ;;  %v1766_v45 = vrot.slane %v1752_v29, %v22772_v21  ;;  %v35_v6 = vsub.s32 0, %v22760_v9 }
 0x161   :  { %v1391_v51 = vpop.trf.xlu1  ;;  %v22916_v52 = vpop.trf.xlu0 }
 0x162   :  { %v1771_v55 = vcombine.low %v1327_v48, %v1391_v51  ;;  %v1767_v35 = vcombine.low %v1743_v22, %v1759_v27  ;;  %v1768_v41 = vcombine.high %v1743_v22, %v1759_v27 }
 0x164   :  { %v1778_v4 = vrot.slane %v1771_v55, %v22765_v14  ;;  %v1750_v55 = vrot.slane %v1736_v33, %v22772_v21 }
 0x165   :  { %v1455_v58 = vpop.trf.xlu1  ;;  %v22921_v60 = vpop.trf.xlu0 }
 0x166   :  { %v1803_v24 = vcombine.low %v1778_v4, %v1786_v61  ;;  %v1804_v30 = vcombine.high %v1778_v4, %v1786_v61  ;;  %v1769_v59 = vcombine.low %v1750_v55, %v1766_v45  ;;  %v1770_v62 = vcombine.high %v1750_v55, %v1766_v45  ;;  %v22987_v61 = vld [vmem:[%s25245_s0] sm:$0xff] }
 0x167   :  { %v36_v12 = vrot.slane %v22987_v61, %v35_v6 }
 0x168   :  { %v1811_v31 = vrot.slane %v1803_v24, %v22772_v21  ;;  %v1818_v46 = vrot.slane %v1804_v30, %v22772_v21 }
 0x169   :  { %v1519_v7 = vpop.trf.xlu1  ;;  %v22928_v8 = vpop.trf.xlu0 }
 0x16a   :  { %v1787_v63 = vcombine.low %v1455_v58, %v1519_v7 }
 0x16c   :  { %v1794_v25 = vrot.slane %v1787_v63, %v22765_v14  ;;  %v92_v63 = vrot.slane %v22975_v5, %v35_v6 }
 0x16d   :  { %v22940_v13 = vpop.trf.xlu1  ;;  %v22942_v20 = vpop.trf.xlu0 }
 0x16e   :  { %25353 = vst [vmem:[#allocation14_spill] sm:$0xff] %v22940_v13  ;;  %v1819_v28 = vcombine.low %v1794_v25, %v1802_v23  ;;  %v1820_v15 = vcombine.high %v1794_v25, %v1802_v23  ;;  %21201 = vmatprep.mubr.msk.f32.mxu0 %vm1871_vm1, %v22940_v13 }
 0x170   :  { %v1827_v32 = vrot.slane %v1819_v28, %v22772_v21  ;;  %v1834_v38 = vrot.slane %v1820_v15, %v22772_v21 }
 0x171   :  { %v22952_v34 = vpop.trf.xlu1  ;;  %v22955_v39 = vpop.trf.xlu0 }
 0x172   :  { %v1835_v40 = vcombine.low %v1811_v31, %v1827_v32  ;;  %v1836_v42 = vcombine.high %v1811_v31, %v1827_v32  ;;  %v1837_v57 = vcombine.low %v1818_v46, %v1834_v38  ;;  %v1838_v58 = vcombine.high %v1818_v46, %v1834_v38 }
 0x174   :  { %v22221_v48 = vpack.c.bf16 %v1835_v40, %v1767_v35  ;;  %v22229_v50 = vpack.c.bf16 %v1836_v42, %v1768_v41  ;;  %v22237_v4 = vpack.c.bf16 %v1837_v57, %v1769_v59  ;;  %v22245_v3 = vpack.c.bf16 %v1838_v58, %v1770_v62 }
 0x175   :  { %v22959_v51 = vpop.trf.xlu1  ;;  %v22962_v56 = vpop.trf.xlu0 }
 0x176   :  { %22222 = vmatprep.subr.bf16.mxu0 %v22221_v48  ;;  %22230 = vmatprep.subr.bf16.mxu1 %v22229_v50 }
 0x177   :  { %22224 = vmatpush3.bf16.msra.mxu0 %v22221_v48  ;;  %22232 = vmatpush3.bf16.msra.mxu1 %v22229_v50 }
 0x178   :  { %22234 = vmatprep.subr.bf16.mxu0 %v22233_v53  ;;  %22242 = vmatprep.subr.bf16.mxu1 %v22241_v54 }
 0x179   :  { %v22964_v1 = vpop.trf.xlu1  ;;  %v22966_v2 = vpop.trf.xlu0 }
 0x17a   :  { %21202 = vmatmul.mubr.msk.f32.vlgmr.msra.gmra.mrb[0].mxu0 %vm1871_vm1, %v22952_v34  ;;  %21234 = vmatmul.mubr.msk.f32.vlgmr.msra.gmra.mrb[0].mxu1 %vm1871_vm1, %v22914_v49 }
 0x17b   :  { %22236 = vmatpush3.bf16.msra.mxu0 %v22233_v53  ;;  %22244 = vmatpush3.bf16.msra.mxu1 %v22241_v54 }
 0x17c   :  { %22238 = vmatprep.subr.bf16.mxu0 %v22237_v4  ;;  %22246 = vmatprep.subr.bf16.mxu1 %v22245_v3 }
 0x17d   :  { %v22978_v7 = vpop.trf.xlu1  ;;  %21204 = vmatprep.mubr.msk.f32.mxu0 %vm1871_vm1, %v22959_v51  ;;  %21236 = vmatprep.mubr.msk.f32.mxu1 %vm1871_vm1, %v22916_v52  ;;  %v22990_v10 = vpop.trf.xlu0 }
 0x17e   :  { %21205 = vmatmul.mubr.msk.f32.gmra.mrb[2].mxu0 %vm1871_vm1, %v22964_v1  ;;  %21237 = vmatmul.mubr.msk.f32.gmra.mrb[2].mxu1 %vm1871_vm1, %v22921_v60 }
 0x17f   :  { %22240 = vmatpush3.bf16.msra.mxu0 %v22237_v4  ;;  %22248 = vmatpush3.bf16.msra.mxu1 %v22245_v3 }
 0x180   :  { %21207 = vmatprep.mubr.msk.f32.mxu0 %vm1871_vm1, %v22978_v7  ;;  %21239 = vmatprep.mubr.msk.f32.mxu1 %vm1871_vm1, %v22928_v8 }
 0x181   :  { %v23001_v17 = vpop.trf.xlu1  ;;  %94 = vbcast.lane.b32.xlu0 %v92_v63, 256  ;;  %v23003_v19 = vpop.trf.xlu0 }
 0x182   :  { %25354 = vst [vmem:[#allocation15_spill] sm:$0xff] %v23003_v19  ;;  %21208 = vmatmul.mubr.msk.f32.gmra.mrb[4].mxu0 %vm1871_vm1, %v23001_v17  ;;  %21240 = vmatmul.mubr.msk.f32.gmra.mrb[4].mxu1 %vm1871_vm1, %v22942_v20 }
 0x183   :  { %21242 = vmatprep.mubr.msk.f32.mxu1 %vm1871_vm1, %v22955_v39 }
 0x184   :  { %38 = vbcast.lane.b32.xlu1 %v36_v12, 256 }
 0x185   :  { %v23011_v23 = vpop.trf.xlu1  ;;  %v23013_v24 = vpop.trf.xlu0 }
 0x186   :  { %25355 = vst [vmem:[#allocation16_spill] sm:$0xff] %v23013_v24  ;;  %21210 = vmatprep.mubr.msk.f32.mxu0 %vm1871_vm1, %v23011_v23  ;;  %21243 = vmatmul.mubr.msk.f32.gmra.mrb[6].mxu1 %vm1871_vm1, %v22962_v56 }
 0x187   :  { %21245 = vmatprep.mubr.msk.f32.mxu1 %vm1871_vm1, %v22966_v2 }
 0x189   :  { %v23021_v25 = vpop.trf.xlu1  ;;  %v23023_v26 = vpop.trf.xlu0 }
 0x18a   :  { %25356 = vst [vmem:[#allocation17_spill] sm:$0xff] %v23023_v26  ;;  %21211 = vmatmul.mubr.msk.f32.gmra.mrb[6].mxu0 %vm1871_vm1, %v23021_v25  ;;  %21246 = vmatmul.mubr.msk.f32.gmra.mrb[8].mxu1 %vm1871_vm1, %v22990_v10 }
 0x18b   :  { %21248 = vmatprep.mubr.msk.f32.mxu1 %vm1871_vm1, %v23003_v19 }
 0x18d   :  { %v23031_v27 = vpop.trf.xlu1  ;;  %v23033_v28 = vpop.trf.xlu0 }
 0x18e   :  { %25357 = vst [vmem:[#allocation18_spill] sm:$0xff] %v23033_v28  ;;  %21213 = vmatprep.mubr.msk.f32.mxu0 %vm1871_vm1, %v23031_v27  ;;  %21249 = vmatmul.mubr.msk.f32.gmra.mrb[10].mxu1 %vm1871_vm1, %v23013_v24 }
 0x18f   :  { %21251 = vmatprep.mubr.msk.f32.mxu1 %vm1871_vm1, %v23023_v26 }
 0x191   :  { %v23041_v15 = vpop.trf.xlu1  ;;  %v23043_v11 = vpop.trf.xlu0 }
 0x192   :  { %25358 = vst [vmem:[#allocation19_spill] sm:$0xff] %v23043_v11  ;;  %21214 = vmatmul.mubr.msk.f32.gmra.mrb[8].mxu0 %vm1871_vm1, %v23041_v15  ;;  %21252 = vmatmul.mubr.msk.f32.gmra.mrb[12].mxu1 %vm1871_vm1, %v23033_v28 }
 0x193   :  { %21254 = vmatprep.mubr.msk.f32.mxu1 %vm1871_vm1, %v23043_v11 }
 0x195   :  { %v23051_v16 = vpop.trf.xlu1  ;;  %v23053_v18 = vpop.trf.xlu0 }
 0x196   :  { %25359 = vst [vmem:[#allocation20_spill] sm:$0xff] %v23051_v16  ;;  %25360 = vst [vmem:[#allocation21_spill] sm:$0xff] %v23053_v18  ;;  %21216 = vmatprep.mubr.msk.f32.mxu0 %vm1871_vm1, %v23051_v16  ;;  %21255 = vmatmul.mubr.msk.f32.gmra.mrb[14].mxu1 %vm1871_vm1, %v23053_v18 }
 0x199   :  { %v23059_v22 = vpop.trf.xlu1  ;;  %v23061_v29 = vpop.trf.xlu0 }
 0x19a   :  { %25361 = vst [vmem:[#allocation22_spill] sm:$0xff] %v23059_v22  ;;  %25362 = vst [vmem:[#allocation23_spill] sm:$0xff] %v23061_v29  ;;  %21217 = vmatmul.mubr.msk.f32.gmra.mrb[10].mxu0 %vm1871_vm1, %v23059_v22  ;;  %21297 = vmatprep.mubr.msk.f32.mxu1 %vm1871_vm1, %v23061_v29 }
 0x19d   :  { %v23067_v30 = vpop.trf.xlu1  ;;  %v23069_v31 = vpop.trf.xlu0 }
 0x19e   :  { %25363 = vst [vmem:[#allocation24_spill] sm:$0xff] %v23067_v30  ;;  %25364 = vst [vmem:[#allocation25_spill] sm:$0xff] %v23069_v31  ;;  %21219 = vmatprep.mubr.msk.f32.mxu0 %vm1871_vm1, %v23067_v30  ;;  %21298 = vmatmul.mubr.msk.f32.vlgmr.msra.gmra.mrb[16].mxu1 %vm1871_vm1, %v23069_v31 }
 0x1a1   :  { %v23075_v32 = vpop.trf.xlu1  ;;  %v23077_v33 = vpop.trf.xlu0 }
 0x1a2   :  { %25365 = vst [vmem:[#allocation26_spill] sm:$0xff] %v23075_v32  ;;  %25366 = vst [vmem:[#allocation27_spill] sm:$0xff] %v23077_v33  ;;  %21220 = vmatmul.mubr.msk.f32.gmra.mrb[12].mxu0 %vm1871_vm1, %v23075_v32  ;;  %21300 = vmatprep.mubr.msk.f32.mxu1 %vm1871_vm1, %v23077_v33 }
 0x1a5   :  { %v23083_v35 = vpop.trf.xlu1  ;;  %v23085_v36 = vpop.trf.xlu0 }
 0x1a6   :  { %25367 = vst [vmem:[#allocation28_spill] sm:$0xff] %v23083_v35  ;;  %25368 = vst [vmem:[#allocation29_spill] sm:$0xff] %v23085_v36  ;;  %21222 = vmatprep.mubr.msk.f32.mxu0 %vm1871_vm1, %v23083_v35  ;;  %21301 = vmatmul.mubr.msk.f32.gmra.mrb[18].mxu1 %vm1871_vm1, %v23085_v36 }
 0x1a9   :  { %v23091_v37 = vpop.trf.xlu1  ;;  %v23093_v38 = vpop.trf.xlu0 }
 0x1aa   :  { %25369 = vst [vmem:[#allocation30_spill] sm:$0xff] %v23091_v37  ;;  %25370 = vst [vmem:[#allocation31_spill] sm:$0xff] %v23093_v38  ;;  %21223 = vmatmul.mubr.msk.f32.gmra.mrb[14].mxu0 %vm1871_vm1, %v23091_v37  ;;  %21303 = vmatprep.mubr.msk.f32.mxu1 %vm1871_vm1, %v23093_v38 }
 0x1ad   :  { %v23099_v40 = vpop.trf.xlu1  ;;  %v23101_v41 = vpop.trf.xlu0 }
 0x1ae   :  { %25371 = vst [vmem:[#allocation32_spill] sm:$0xff] %v23099_v40  ;;  %25372 = vst [vmem:[#allocation33_spill] sm:$0xff] %v23101_v41  ;;  %21265 = vmatprep.mubr.msk.f32.mxu0 %vm1871_vm1, %v23099_v40  ;;  %21304 = vmatmul.mubr.msk.f32.gmra.mrb[20].mxu1 %vm1871_vm1, %v23101_v41 }
 0x1b1   :  { %v23107_v42 = vpop.trf.xlu1  ;;  %v23109_v43 = vpop.trf.xlu0 }
 0x1b2   :  { %25373 = vst [vmem:[#allocation34_spill] sm:$0xff] %v23107_v42  ;;  %25374 = vst [vmem:[#allocation35_spill] sm:$0xff] %v23109_v43  ;;  %21266 = vmatmul.mubr.msk.f32.vlgmr.msra.gmra.mrb[16].mxu0 %vm1871_vm1, %v23107_v42  ;;  %21306 = vmatprep.mubr.msk.f32.mxu1 %vm1871_vm1, %v23109_v43 }
 0x1b5   :  { %v23115_v44 = vpop.trf.xlu1  ;;  %v23117_v45 = vpop.trf.xlu0 }
 0x1b6   :  { %25375 = vst [vmem:[#allocation36_spill] sm:$0xff] %v23115_v44  ;;  %25376 = vst [vmem:[#allocation37_spill] sm:$0xff] %v23117_v45  ;;  %21268 = vmatprep.mubr.msk.f32.mxu0 %vm1871_vm1, %v23115_v44  ;;  %21307 = vmatmul.mubr.msk.f32.gmra.mrb[22].mxu1 %vm1871_vm1, %v23117_v45 }
 0x1b9   :  { %v23123_v46 = vpop.trf.xlu1  ;;  %v23125_v48 = vpop.trf.xlu0 }
 0x1ba   :  { %25377 = vst [vmem:[#allocation38_spill] sm:$0xff] %v23123_v46  ;;  %25378 = vst [vmem:[#allocation39_spill] sm:$0xff] %v23125_v48  ;;  %21269 = vmatmul.mubr.msk.f32.gmra.mrb[18].mxu0 %vm1871_vm1, %v23123_v46  ;;  %21309 = vmatprep.mubr.msk.f32.mxu1 %vm1871_vm1, %v23125_v48 }
 0x1bd   :  { %v23131_v50 = vpop.trf.xlu1  ;;  %v23133_v53 = vpop.trf.xlu0 }
 0x1be   :  { %25379 = vst [vmem:[#allocation40_spill] sm:$0xff] %v23131_v50  ;;  %25380 = vst [vmem:[#allocation41_spill] sm:$0xff] %v23133_v53  ;;  %21271 = vmatprep.mubr.msk.f32.mxu0 %vm1871_vm1, %v23131_v50  ;;  %21310 = vmatmul.mubr.msk.f32.gmra.mrb[24].mxu1 %vm1871_vm1, %v23133_v53 }
 0x1c1   :  { %v23139_v54 = vpop.trf.xlu1  ;;  %v23141_v55 = vpop.trf.xlu0 }
 0x1c2   :  { %25381 = vst [vmem:[#allocation42_spill] sm:$0xff] %v23139_v54  ;;  %25382 = vst [vmem:[#allocation43_spill] sm:$0xff] %v23141_v55  ;;  %21272 = vmatmul.mubr.msk.f32.gmra.mrb[20].mxu0 %vm1871_vm1, %v23139_v54  ;;  %21312 = vmatprep.mubr.msk.f32.mxu1 %vm1871_vm1, %v23141_v55 }
 0x1c5   :  { %v23147_v57 = vpop.trf.xlu1  ;;  %v23149_v58 = vpop.trf.xlu0 }
 0x1c6   :  { %25383 = vst [vmem:[#allocation44_spill] sm:$0xff] %v23147_v57  ;;  %25384 = vst [vmem:[#allocation45_spill] sm:$0xff] %v23149_v58  ;;  %21274 = vmatprep.mubr.msk.f32.mxu0 %vm1871_vm1, %v23147_v57  ;;  %21313 = vmatmul.mubr.msk.f32.gmra.mrb[26].mxu1 %vm1871_vm1, %v23149_v58 }
 0x1c9   :  { %v23155_v59 = vpop.trf.xlu1  ;;  %v23157_v62 = vpop.trf.xlu0 }
 0x1ca   :  { %25385 = vst [vmem:[#allocation46_spill] sm:$0xff] %v23155_v59  ;;  %25386 = vst [vmem:[#allocation47_spill] sm:$0xff] %v23157_v62  ;;  %21275 = vmatmul.mubr.msk.f32.gmra.mrb[22].mxu0 %vm1871_vm1, %v23155_v59  ;;  %21315 = vmatprep.mubr.msk.f32.mxu1 %vm1871_vm1, %v23157_v62 }
 0x1cd   :  { %v23163_v4 = vpop.trf.xlu1  ;;  %v23165_v3 = vpop.trf.xlu0 }
 0x1ce   :  { %25387 = vst [vmem:[#allocation48_spill] sm:$0xff] %v23163_v4  ;;  %25388 = vst [vmem:[#allocation49_spill] sm:$0xff] %v23165_v3  ;;  %21277 = vmatprep.mubr.msk.f32.mxu0 %vm1871_vm1, %v23163_v4  ;;  %21316 = vmatmul.mubr.msk.f32.gmra.mrb[28].mxu1 %vm1871_vm1, %v23165_v3 }
 0x1d1   :  { %v23171_v6 = vpop.trf.xlu1  ;;  %v23173_v63 = vpop.trf.xlu0 }
 0x1d2   :  { %25389 = vst [vmem:[#allocation50_spill] sm:$0xff] %v23171_v6  ;;  %25390 = vst [vmem:[#allocation51_spill] sm:$0xff] %v23173_v63  ;;  %21278 = vmatmul.mubr.msk.f32.gmra.mrb[24].mxu0 %vm1871_vm1, %v23171_v6  ;;  %21318 = vmatprep.mubr.msk.f32.mxu1 %vm1871_vm1, %v23173_v63 }
 0x1d5   :  { %v23179_v12 = vpop.trf.xlu1  ;;  %v23181_v0 = vpop.trf.xlu0 }
 0x1d6   :  { %25391 = vst [vmem:[#allocation52_spill] sm:$0xff] %v23179_v12  ;;  %25392 = vst [vmem:[#allocation53_spill] sm:$0xff] %v23181_v0  ;;  %21280 = vmatprep.mubr.msk.f32.mxu0 %vm1871_vm1, %v23179_v12  ;;  %21319 = vmatmul.mubr.msk.f32.gmra.mrb[30].mxu1 %vm1871_vm1, %v23181_v0  ;;  %v145_v0 = vld [vmem:[%s25246_s1] sm:$0xf] }
 0x1d7   :  { %21361 = vmatprep.mubr.msk.f32.mxu1 %vm1871_vm1, %v22910_v47 }
 0x1d9   :  { %v23189_v3 = vpop.trf.xlu1 }
 0x1da   :  { %25393 = vst [vmem:[#allocation54_spill] sm:$0xff] %v23189_v3  ;;  %21281 = vmatmul.mubr.msk.f32.gmra.mrb[26].mxu0 %vm1871_vm1, %v23189_v3 }
 0x1dd   :  { %v23193_v62 = vpop.trf.xlu1 }
 0x1de   :  { %25394 = vst [vmem:[#allocation55_spill] sm:$0xff] %v23193_v62  ;;  %21283 = vmatprep.mubr.msk.f32.mxu0 %vm1871_vm1, %v23193_v62 }
 0x1e1   :  { %v23197_v63 = vpop.trf.xlu1 }
 0x1e2   :  { %25395 = vst [vmem:[#allocation56_spill] sm:$0xff] %v23197_v63  ;;  %21284 = vmatmul.mubr.msk.f32.gmra.mrb[28].mxu0 %vm1871_vm1, %v23197_v63  ;;  %v162_v63 = vld [vmem:[%s25247_s2] sm:$0xf] }
 0x1e5   :  { %v23201_v58 = vpop.trf.xlu1 }
 0x1e6   :  { %25396 = vst [vmem:[#allocation57_spill] sm:$0xff] %v23201_v58  ;;  %21286 = vmatprep.mubr.msk.f32.mxu0 %vm1871_vm1, %v23201_v58 }
 0x1e9   :  { %v23205_v47 = vpop.trf.xlu1 }
 0x1ea   :  { %25397 = vst [vmem:[#allocation58_spill] sm:$0xff] %v23205_v47  ;;  %21287 = vmatmul.mubr.msk.f32.gmra.mrb[30].mxu0 %vm1871_vm1, %v23205_v47 }
 0x1eb   :  { %21329 = vmatprep.mubr.msk.f32.mxu0 %vm1871_vm1, %v22940_v13 }
 0x1f3   :  { %v95_v58 = vpop.permute.xlu0 %94 }
 0x1f4   :  { %v154_v12 = vmul.f32 %v145_v0, %v95_v58 }
 0x1f6   :  { %v39_v62 = vpop.permute.xlu1 %38  ;;  %v171_v53 = vadd.f32 %v162_v63, %v154_v12 }
 0x1f7   :  { %v146_v3 = vmul.f32 %v145_v0, %v39_v62 }
 0x1f8   :  { %187 = vst [vmem:[#allocation2 + $0x20] sm:$0xf] %v171_v53 }
 0x1f9   :  { %v163_v55 = vadd.f32 %v162_v63, %v146_v3 }
 0x1fb   :  { %179 = vst [vmem:[#allocation2] sm:$0xf] %v163_v55 }
 0x24d   :  { %v21203_v47 = vpop.f32.mrb[0].mxu0  ;;  %v21235_v6 = vpop.f32.mrb[0].mxu1 }
 0x24e   :  { %v1986_v48 = vpop.f32.mrb[1].mxu0  ;;  %v2211_v13 = vpop.f32.mrb[1].mxu1 }
 0x24f   :  { %2740 = vxpose.xlu1.b32.start [1/16] (narrow) %v1986_v48, 8  ;;  %2772 = vxpose.xlu0.b32.start [1/16] (narrow) %v2211_v13, 8 }
 0x251   :  { %v21206_v4 = vpop.f32.mrb[2].mxu0  ;;  %v21238_v45 = vpop.f32.mrb[2].mxu1 }
 0x252   :  { %v1996_v59 = vpop.f32.mrb[3].mxu0  ;;  %v2221_v43 = vpop.f32.mrb[3].mxu1 }
 0x253   :  { %2741 = vxpose.xlu1.b32.cont [2/16] (narrow) %v21203_v47, 8  ;;  %2773 = vxpose.xlu0.b32.cont [2/16] (narrow) %v21235_v6, 8 }
 0x255   :  { %v21209_v57 = vpop.f32.mrb[4].mxu0  ;;  %v21241_v62 = vpop.f32.mrb[4].mxu1 }
 0x256   :  { %v2006_v3 = vpop.f32.mrb[5].mxu0  ;;  %v2231_v55 = vpop.f32.mrb[5].mxu1 }
 0x257   :  { %2742 = vxpose.xlu1.b32.cont [3/16] (narrow) %v1996_v59, 8  ;;  %2774 = vxpose.xlu0.b32.cont [3/16] (narrow) %v2221_v43, 8 }
 0x259   :  { %v21244_v0 = vpop.f32.mrb[6].mxu1 }
 0x25a   :  { %v2241_v53 = vpop.f32.mrb[7].mxu1 }
 0x25b   :  { %2743 = vxpose.xlu1.b32.cont [4/16] (narrow) %v21206_v4, 8  ;;  %2775 = vxpose.xlu0.b32.cont [4/16] (narrow) %v21238_v45, 8 }
 0x25d   :  { %v21212_v58 = vpop.f32.mrb[6].mxu0  ;;  %v21247_v63 = vpop.f32.mrb[8].mxu1 }
 0x25e   :  { %v2016_v48 = vpop.f32.mrb[7].mxu0  ;;  %v2251_v13 = vpop.f32.mrb[9].mxu1 }
 0x25f   :  { %2744 = vxpose.xlu1.b32.cont [5/16] (narrow) %v2006_v3, 8  ;;  %2776 = vxpose.xlu0.b32.cont [5/16] (narrow) %v2231_v55, 8 }
 0x261   :  { %v21250_v12 = vpop.f32.mrb[10].mxu1 }
 0x262   :  { %v2261_v41 = vpop.f32.mrb[11].mxu1 }
 0x263   :  { %2745 = vxpose.xlu1.b32.cont [6/16] (narrow) %v21209_v57, 8  ;;  %2777 = vxpose.xlu0.b32.cont [6/16] (narrow) %v21241_v62, 8 }
 0x265   :  { %v21215_v47 = vpop.f32.mrb[8].mxu0  ;;  %v21253_v6 = vpop.f32.mrb[12].mxu1 }
 0x266   :  { %v2026_v54 = vpop.f32.mrb[9].mxu0  ;;  %v2271_v38 = vpop.f32.mrb[13].mxu1 }
 0x267   :  { %2746 = vxpose.xlu1.b32.cont [7/16] (narrow) %v2016_v48, 8  ;;  %2778 = vxpose.xlu0.b32.cont [7/16] (narrow) %v2241_v53, 8 }
 0x269   :  { %v21256_v43 = vpop.f32.mrb[14].mxu1 }
 0x26a   :  { %v2281_v45 = vpop.f32.mrb[15].mxu1 }
 0x26b   :  { %2747 = vxpose.xlu1.b32.cont [8/16] (narrow) %v21212_v58, 8  ;;  %2779 = vxpose.xlu0.b32.cont [8/16] (narrow) %v21244_v0, 8 }
 0x26d   :  { %v21218_v59 = vpop.f32.mrb[10].mxu0 }
 0x26e   :  { %v2036_v4 = vpop.f32.mrb[11].mxu0 }
 0x26f   :  { %2748 = vxpose.xlu1.b32.cont [9/16] (narrow) %v2026_v54, 8  ;;  %2780 = vxpose.xlu0.b32.cont [9/16] (narrow) %v2251_v13, 8 }
 0x271   :  { %v21299_v3 = vpop.f32.mrb[16].mxu1 }
 0x272   :  { %v2661_v55 = vpop.f32.mrb[17].mxu1 }
 0x273   :  { %2749 = vxpose.xlu1.b32.cont [10/16] (narrow) %v21215_v47, 8  ;;  %2781 = vxpose.xlu0.b32.cont [10/16] (narrow) %v21247_v63, 8 }
 0x275   :  { %v21221_v57 = vpop.f32.mrb[12].mxu0 }
 0x276   :  { %v2046_v62 = vpop.f32.mrb[13].mxu0 }
 0x277   :  { %2750 = vxpose.xlu1.b32.cont [11/16] (narrow) %v2036_v4, 8  ;;  %2782 = vxpose.xlu0.b32.cont [11/16] (narrow) %v2261_v41, 8 }
 0x279   :  { %v21302_v50 = vpop.f32.mrb[18].mxu1 }
 0x27a   :  { %v2671_v53 = vpop.f32.mrb[19].mxu1 }
 0x27b   :  { %2751 = vxpose.xlu1.b32.cont [12/16] (narrow) %v21218_v59, 8  ;;  %2783 = vxpose.xlu0.b32.cont [12/16] (narrow) %v21250_v12, 8 }
 0x27d   :  { %v21224_v48 = vpop.f32.mrb[14].mxu0 }
 0x27e   :  { %v2056_v58 = vpop.f32.mrb[15].mxu0 }
 0x27f   :  { %2752 = vxpose.xlu1.b32.cont [13/16] (narrow) %v2046_v62, 8  ;;  %2784 = vxpose.xlu0.b32.cont [13/16] (narrow) %v2271_v38, 8 }
 0x281   :  { %v21305_v0 = vpop.f32.mrb[20].mxu1 }
 0x282   :  { %v2681_v54 = vpop.f32.mrb[21].mxu1 }
 0x283   :  { %2753 = vxpose.xlu1.b32.cont [14/16] (narrow) %v21221_v57, 8  ;;  %2785 = vxpose.xlu0.b32.cont [14/16] (narrow) %v21253_v6, 8 }
 0x285   :  { %v21267_v13 = vpop.f32.mrb[16].mxu0 }
 0x286   :  { %v2436_v47 = vpop.f32.mrb[17].mxu0 }
 0x287   :  { %2754 = vxpose.xlu1.b32.cont [15/16] (narrow) %v2056_v58, 8  ;;  %2786 = vxpose.xlu0.b32.cont [15/16] (narrow) %v2281_v45, 8 }
 0x289   :  { %v21308_v63 = vpop.f32.mrb[22].mxu1 }
 0x28a   :  { %v2691_v41 = vpop.f32.mrb[23].mxu1 }
 0x28b   :  { %2755 = vxpose.xlu1.b32.end [16/16] (narrow) %v21224_v48, 8  ;;  %2787 = vxpose.xlu0.b32.end [16/16] (narrow) %v21256_v43, 8 }
 0x28d   :  { %v21270_v4 = vpop.f32.mrb[18].mxu0 }
 0x28e   :  { %v2446_v59 = vpop.f32.mrb[19].mxu0 }
 0x28f   :  { %2804 = vxpose.xlu1.b32.start [1/16] (narrow) %v2436_v47, 8  ;;  %2836 = vxpose.xlu0.b32.start [1/16] (narrow) %v2661_v55, 8 }
 0x291   :  { %v21311_v12 = vpop.f32.mrb[24].mxu1 }
 0x292   :  { %v2701_v38 = vpop.f32.mrb[25].mxu1 }
 0x293   :  { %2805 = vxpose.xlu1.b32.cont [2/16] (narrow) %v21267_v13, 8  ;;  %2837 = vxpose.xlu0.b32.cont [2/16] (narrow) %v21299_v3, 8 }
 0x295   :  { %v21273_v62 = vpop.f32.mrb[20].mxu0 }
 0x296   :  { %v2456_v57 = vpop.f32.mrb[21].mxu0 }
 0x297   :  { %2806 = vxpose.xlu1.b32.cont [3/16] (narrow) %v2446_v59, 8  ;;  %2838 = vxpose.xlu0.b32.cont [3/16] (narrow) %v2671_v53, 8 }
 0x299   :  { %v21314_v6 = vpop.f32.mrb[26].mxu1 }
 0x29a   :  { %v2711_v45 = vpop.f32.mrb[27].mxu1 }
 0x29b   :  { %2807 = vxpose.xlu1.b32.cont [4/16] (narrow) %v21270_v4, 8  ;;  %2839 = vxpose.xlu0.b32.cont [4/16] (narrow) %v21302_v50, 8 }
 0x29d   :  { %v21276_v58 = vpop.f32.mrb[22].mxu0 }
 0x29e   :  { %v2466_v48 = vpop.f32.mrb[23].mxu0 }
 0x29f   :  { %2808 = vxpose.xlu1.b32.cont [5/16] (narrow) %v2456_v57, 8  ;;  %2840 = vxpose.xlu0.b32.cont [5/16] (narrow) %v2681_v54, 8 }
 0x2a1   :  { %v21317_v43 = vpop.f32.mrb[28].mxu1 }
 0x2a2   :  { %v2721_v55 = vpop.f32.mrb[29].mxu1 }
 0x2a3   :  { %2809 = vxpose.xlu1.b32.cont [6/16] (narrow) %v21273_v62, 8  ;;  %2841 = vxpose.xlu0.b32.cont [6/16] (narrow) %v21305_v0, 8 }
 0x2a5   :  { %v21279_v47 = vpop.f32.mrb[24].mxu0 }
 0x2a6   :  { %v2476_v13 = vpop.f32.mrb[25].mxu0 }
 0x2a7   :  { %2810 = vxpose.xlu1.b32.cont [7/16] (narrow) %v2466_v48, 8  ;;  %2842 = vxpose.xlu0.b32.cont [7/16] (narrow) %v2691_v41, 8 }
 0x2a9   :  { %v21320_v3 = vpop.f32.mrb[30].mxu1 }
 0x2aa   :  { %v2731_v53 = vpop.f32.mrb[31].mxu1 }
 0x2ab   :  { %2811 = vxpose.xlu1.b32.cont [8/16] (narrow) %v21276_v58, 8  ;;  %2843 = vxpose.xlu0.b32.cont [8/16] (narrow) %v21308_v63, 8 }
 0x2ad   :  { %v21282_v59 = vpop.f32.mrb[26].mxu0 }
 0x2ae   :  { %v2486_v4 = vpop.f32.mrb[27].mxu0 }
 0x2af   :  { %2812 = vxpose.xlu1.b32.cont [9/16] (narrow) %v2476_v13, 8  ;;  %2844 = vxpose.xlu0.b32.cont [9/16] (narrow) %v2701_v38, 8  ;;  %v25398_v13 = vmov 0.0  }
 0x2b3   :  { %2813 = vxpose.xlu1.b32.cont [10/16] (narrow) %v21279_v47, 8  ;;  %2845 = vxpose.xlu0.b32.cont [10/16] (narrow) %v21311_v12, 8 }
 0x2b5   :  { %v21285_v50 = vpop.f32.mrb[28].mxu0 }
 0x2b6   :  { %v2496_v54 = vpop.f32.mrb[29].mxu0 }
 0x2b7   :  { %2814 = vxpose.xlu1.b32.cont [11/16] (narrow) %v2486_v4, 8  ;;  %2846 = vxpose.xlu0.b32.cont [11/16] (narrow) %v2711_v45, 8 }
 0x2bb   :  { %2815 = vxpose.xlu1.b32.cont [12/16] (narrow) %v21282_v59, 8  ;;  %2847 = vxpose.xlu0.b32.cont [12/16] (narrow) %v21314_v6, 8 }
 0x2bd   :  { %v21288_v0 = vpop.f32.mrb[30].mxu0 }
 0x2be   :  { %v2506_v62 = vpop.f32.mrb[31].mxu0 }
 0x2bf   :  { %2816 = vxpose.xlu1.b32.cont [13/16] (narrow) %v2496_v54, 8  ;;  %2848 = vxpose.xlu0.b32.cont [13/16] (narrow) %v2721_v55, 8  ;;  %v2893_v55 = vld [vmem:[#allocation2] sm:$0xf] }
 0x2c3   :  { %2817 = vxpose.xlu1.b32.cont [14/16] (narrow) %v21285_v50, 8  ;;  %2849 = vxpose.xlu0.b32.cont [14/16] (narrow) %v21317_v43, 8 }
 0x2c7   :  { %2818 = vxpose.xlu1.b32.cont [15/16] (narrow) %v2506_v62, 8  ;;  %2850 = vxpose.xlu0.b32.cont [15/16] (narrow) %v2731_v53, 8  ;;  %v2894_v53 = vld [vmem:[#allocation2 + $0x20] sm:$0xf] }
 0x2cb   :  { %2819 = vxpose.xlu1.b32.end [16/16] (narrow) %v21288_v0, 8  ;;  %2851 = vxpose.xlu0.b32.end [16/16] (narrow) %v21320_v3, 8 }
 0x2cf   :  { %v2756_v63 = vpop.trf.xlu1  ;;  %v2788_v41 = vpop.trf.xlu0 }
 0x30f   :  { %v2820_v38 = vpop.trf.xlu1  ;;  %v2852_v12 = vpop.trf.xlu0 }
 0x310   :  { %v2868_v57 = vcombine.low %v2756_v63, %v2820_v38  ;;  %v2876_v58 = vcombine.low %v2788_v41, %v2852_v12 }
 0x312   :  { %v2875_v45 = vrot.slane %v2868_v57, %v22765_v14  ;;  %v2883_v6 = vrot.slane %v2876_v58, %v22765_v14 }
 0x314   :  { %v2884_v48 = vcombine.low %v2875_v45, %v2883_v6 }
 0x316   :  { %v2891_v47 = vrot.slane %v2884_v48, %v22772_v21 }
 0x318   :  { %v2892_v43 = vcombine.high %v2891_v47, %v25398_v13  ;;  %v2895_v59 = vadd.f32 %v2893_v55, %v2891_v47  ;;  %v213_v55 = vld [vmem:[#allocation4] sm:$0xf] }
 0x31a   :  { %v2896_v4 = vadd.f32 %v2894_v53, %v2892_v43  ;;  %22483 = vtanh.f32 %v2895_v59  ;;  %v20089_v3 = vmul.f32 -1.442695, %v2895_v59  ;;  %v214_v53 = vld [vmem:[#allocation4 + $0x4] sm:$0xf] }
 0x31c   :  { %22485 = vtanh.f32 %v2896_v4  ;;  %v20090_v50 = vmul.f32 -1.442695, %v2896_v4 }
 0x31d   :  { %22487 = vpow2.f32 %v20089_v3 }
 0x31e   :  { %22489 = vpow2.f32 %v20090_v50 }
 0x324   :  { %v22484_v54 = vpop.eup %22483 }
 0x325   :  { %2923 = vrot.lane.b32.xlu1 %v22484_v54, %s22710_s12 }
 0x326   :  { %v22486_v0 = vpop.eup %22485 }
 0x327   :  { %v22488_v62 = vpop.eup %22487  ;;  %2925 = vrot.lane.b32.xlu0 %v22486_v0, %s22710_s12 }
 0x328   :  { %v22490_v63 = vpop.eup %22489  ;;  %v2905_v41 = vadd.f32 1.0, %v22488_v62 }
 0x329   :  { %v2906_v38 = vadd.f32 1.0, %v22490_v63 }
 0x32a   :  { %22491 = vrcp.f32 %v2905_v41 }
 0x32b   :  { %22493 = vrcp.f32 %v2906_v38 }
 0x334   :  { %v22492_v12 = vpop.eup %22491 }
 0x335   :  { %2913 = vrot.lane.b32.xlu1 %v22492_v12, %s22711_s13  ;;  %v22494_v57 = vpop.eup %22493 }
 0x339   :  { %2915 = vrot.lane.b32.xlu1 %v22494_v57, %s22711_s13 }
 0x397   :  { %v2924_v58 = vpop.permute.xlu1 %2923 }
 0x398   :  { %v2929_v45 = vmul.f32 %v22492_v12, %v2924_v58 }
 0x399   :  { %v2926_v6 = vpop.permute.xlu0 %2925 }
 0x39a   :  { %2933 = vrot.lane.b32.xlu1 %v2929_v45, %s22712_s14  ;;  %v2930_v48 = vmul.f32 %v22494_v57, %v2926_v6 }
 0x39e   :  { %2935 = vrot.lane.b32.xlu1 %v2930_v48, %s22712_s14 }
 0x3a7   :  { %v2914_v47 = vpop.permute.xlu1 %2913 }
 0x3a8   :  { %v2919_v59 = vmul.f32 %v2914_v47, %v213_v55 }
 0x3ab   :  { %v2916_v43 = vpop.permute.xlu1 %2915 }
 0x3ac   :  { %v2920_v50 = vmul.f32 %v2916_v43, %v214_v53 }
 0x40c   :  { %v2934_v4 = vpop.permute.xlu1 %2933 }
 0x40d   :  { %v23227_v3 = vadd.f32 %v2934_v4, %v2919_v59 }
 0x40f   :  { %25399 = vst [vmem:[#allocation59_spill] sm:$0xff] %v23227_v3  ;;  %22495 = vtanh.f32 %v23227_v3 }
 0x410   :  { %v2936_v54 = vpop.permute.xlu1 %2935 }
 0x411   :  { %v23230_v0 = vadd.f32 %v2936_v54, %v2920_v50 }
 0x413   :  { %25400 = vst [vmem:[#allocation60_spill] sm:$0xff] %v23230_v0  ;;  %22497 = vtanh.f32 %v23230_v0 }
 0x419   :  { %v22496_v62 = vpop.eup %22495 }
 0x41a   :  { %2945 = vrot.lane.b32.xlu0 %v22496_v62, %s22712_s14 }
 0x41d   :  { %v22498_v63 = vpop.eup %22497 }
 0x41e   :  { %2947 = vrot.lane.b32.xlu1 %v22498_v63, %s22712_s14 }
 0x48c   :  { %v2946_v41 = vpop.permute.xlu0 %2945 }
 0x48d   :  { %v2951_v38 = vmul.f32 %v22492_v12, %v2946_v41 }
 0x48f   :  { %2955 = vrot.lane.b32.xlu0 %v2951_v38, %s22710_s12 }
 0x490   :  { %v2948_v58 = vpop.permute.xlu1 %2947 }
 0x491   :  { %v2952_v45 = vmul.f32 %v22494_v57, %v2948_v58 }
 0x493   :  { %2957 = vrot.lane.b32.xlu1 %v2952_v45, %s22710_s12 }
 0x501   :  { %v2956_v6 = vpop.permute.xlu0 %2955 }
 0x502   :  { %2962 = vst.msk [vmem:[#allocation5] sm:$0xf] %vm26_vm0, %v2956_v6  ;;  %2964 = vxpose.xlu0.b32.start.end [1/1] (short) (narrow) %v2956_v6, 32 }
 0x505   :  { %v2958_v48 = vpop.permute.xlu1 %2957 }
 0x506   :  { %2963 = vst.msk [vmem:[#allocation5 + $0x20] sm:$0xf] %vm26_vm0, %v2958_v48  ;;  %2996 = vxpose.xlu1.b32.start.end [1/1] (short) (narrow) %v2958_v48, 32 }
 0x582   :  { %v2980_v47 = vpop.trf.xlu0 }
 0x583   :  { %v3028_v55 = vcombine.high %v2980_v47, %v25398_v13  ;;  %v3035_v43 = vrot.slane %v2980_v47, %v22765_v14 }
 0x585   :  { %v3042_v53 = vrot.slane %v3028_v55, %v22765_v14 }
 0x586   :  { %v3012_v12 = vpop.trf.xlu1  ;;  %v2981_v4 = vpop.trf.xlu0 }
 0x587   :  { %v3043_v59 = vcombine.high %v3012_v12, %v25398_v13  ;;  %v3050_v57 = vrot.slane %v3012_v12, %v22765_v14  ;;  %v3101_v41 = vrot.slane %v2981_v4, %v22765_v14  ;;  %v3094_v48 = vcombine.high %v2981_v4, %v25398_v13 }
 0x589   :  { %v3057_v50 = vrot.slane %v3043_v59, %v22765_v14  ;;  %v3058_v54 = vcombine.low %v3035_v43, %v3050_v57  ;;  %v3059_v62 = vcombine.high %v3035_v43, %v3050_v57  ;;  %v3108_v59 = vrot.slane %v3094_v48, %v22765_v14 }
 0x58a   :  { %v3013_v63 = vpop.trf.xlu1 }
 0x58b   :  { %v3073_v38 = vrot.slane %v3059_v62, %v22772_v21  ;;  %v3066_v58 = vrot.slane %v3058_v54, %v22772_v21  ;;  %v3075_v45 = vcombine.high %v3042_v53, %v3057_v50  ;;  %v3116_v6 = vrot.slane %v3013_v63, %v22765_v14 }
 0x58c   :  { %v3109_v47 = vcombine.high %v3013_v63, %v25398_v13  ;;  %v3074_v0 = vcombine.low %v3042_v53, %v3057_v50 }
 0x58d   :  { %3356 = vxpose.xlu1.b32.start.end [1/1] (short) (narrow) %v3073_v38, 8  ;;  %3292 = vxpose.xlu0.b32.start.end [1/1] (short) (narrow) %v3066_v58, 8  ;;  %v3124_v55 = vcombine.low %v3101_v41, %v3116_v6  ;;  %v3090_v12 = vcombine.high %v3066_v58, %v25398_v13  ;;  %v3089_v43 = vrot.slane %v3075_v45, %v22772_v21  ;;  %v2982_v58 = vpop.trf.xlu0 }
 0x58e   :  { %v3123_v57 = vrot.slane %v3109_v47, %v22765_v14  ;;  %v3125_v54 = vcombine.high %v3101_v41, %v3116_v6  ;;  %v3091_v4 = vcombine.high %v3073_v38, %v25398_v13  ;;  %v3014_v36 = vpop.trf.xlu1  ;;  %v3082_v45 = vrot.slane %v3074_v0, %v22772_v21 }
 0x58f   :  { %v3132_v62 = vrot.slane %v3124_v55, %v22772_v21  ;;  %v3167_v48 = vrot.slane %v2982_v58, %v22765_v14  ;;  %v3182_v6 = vrot.slane %v3014_v36, %v22765_v14  ;;  %v3175_v50 = vcombine.high %v3014_v36, %v25398_v13 }
 0x590   :  { %v3139_v63 = vrot.slane %v3125_v54, %v22772_v21  ;;  %v3140_v3 = vcombine.low %v3108_v59, %v3123_v57  ;;  %v3141_v47 = vcombine.high %v3108_v59, %v3123_v57  ;;  %v3092_v53 = vcombine.high %v3082_v45, %v25398_v13 }
 0x591   :  { %3324 = vxpose.xlu0.b32.start.end [1/1] (short) (narrow) %v3090_v12, 8  ;;  %3484 = vxpose.xlu1.b32.start.end [1/1] (short) (narrow) %v3089_v43, 8  ;;  %v3160_v38 = vcombine.high %v2982_v58, %v25398_v13  ;;  %v3190_v55 = vcombine.low %v3167_v48, %v3182_v6  ;;  %v3093_v12 = vcombine.high %v3089_v43, %v25398_v13 }
 0x592   :  { %v3148_v41 = vrot.slane %v3140_v3, %v22772_v21  ;;  %v3155_v0 = vrot.slane %v3141_v47, %v22772_v21  ;;  %v3189_v54 = vrot.slane %v3175_v50, %v22765_v14  ;;  %v3156_v59 = vcombine.high %v3132_v62, %v25398_v13  ;;  %v2983_v47 = vpop.trf.xlu0 }
 0x593   :  { %v3174_v3 = vrot.slane %v3160_v38, %v22765_v14  ;;  %v3198_v36 = vrot.slane %v3190_v55, %v22772_v21  ;;  %v3157_v43 = vcombine.high %v3139_v63, %v25398_v13  ;;  %v3226_v55 = vcombine.high %v2983_v47, %v25398_v13 }
 0x594   :  { %v3158_v50 = vcombine.high %v3148_v41, %v25398_v13 }
 0x595   :  { %3388 = vxpose.xlu0.b32.start.end [1/1] (short) (narrow) %v3091_v4, 8  ;;  %3548 = vxpose.xlu1.b32.start.end [1/1] (short) (narrow) %v3132_v62, 8  ;;  %v3191_v4 = vcombine.high %v3167_v48, %v3182_v6  ;;  %v3206_v58 = vcombine.low %v3174_v3, %v3189_v54  ;;  %v3233_v62 = vrot.slane %v2983_v47, %v22765_v14 }
 0x596   :  { %v3207_v6 = vcombine.high %v3174_v3, %v3189_v54  ;;  %v3222_v54 = vcombine.high %v3198_v36, %v25398_v13 }
 0x597   :  { %v3205_v57 = vrot.slane %v3191_v4, %v22772_v21  ;;  %v3214_v48 = vrot.slane %v3206_v58, %v22772_v21  ;;  %v3159_v4 = vcombine.high %v3155_v0, %v25398_v13  ;;  %v3240_v58 = vrot.slane %v3226_v55, %v22765_v14 }
 0x599   :  { %3420 = vxpose.xlu0.b32.start.end [1/1] (short) (narrow) %v3082_v45, 8  ;;  %3612 = vxpose.xlu1.b32.start.end [1/1] (short) (narrow) %v3139_v63, 8  ;;  %v3015_v45 = vpop.trf.xlu1  ;;  %v3221_v63 = vrot.slane %v3207_v6, %v22772_v21  ;;  %v3223_v47 = vcombine.high %v3205_v57, %v25398_v13 }
 0x59a   :  { %v3241_v38 = vcombine.high %v3015_v45, %v25398_v13 }
 0x59d   :  { %3452 = vxpose.xlu0.b32.start.end [1/1] (short) (narrow) %v3092_v53, 8  ;;  %3676 = vxpose.xlu1.b32.start.end [1/1] (short) (narrow) %v3148_v41, 8  ;;  %v3248_v53 = vrot.slane %v3015_v45, %v22765_v14 }
 0x5a1   :  { %3516 = vxpose.xlu0.b32.start.end [1/1] (short) (narrow) %v3093_v12, 8  ;;  %3740 = vxpose.xlu1.b32.start.end [1/1] (short) (narrow) %v3155_v0, 8  ;;  %v3256_v12 = vcombine.low %v3233_v62, %v3248_v53 }
 0x5a3   :  { %v3264_v41 = vrot.slane %v3256_v12, %v22772_v21 }
 0x5a5   :  { %3580 = vxpose.xlu0.b32.start.end [1/1] (short) (narrow) %v3156_v59, 8  ;;  %3804 = vxpose.xlu1.b32.start.end [1/1] (short) (narrow) %v3198_v36, 8  ;;  %v3255_v59 = vrot.slane %v3241_v38, %v22765_v14 }
 0x5a7   :  { %v3272_v45 = vcombine.low %v3240_v58, %v3255_v59  ;;  %v3273_v6 = vcombine.high %v3240_v58, %v3255_v59 }
 0x5a9   :  { %3644 = vxpose.xlu0.b32.start.end [1/1] (short) (narrow) %v3157_v43, 8  ;;  %3868 = vxpose.xlu1.b32.start.end [1/1] (short) (narrow) %v3205_v57, 8  ;;  %v3257_v43 = vcombine.high %v3233_v62, %v3248_v53  ;;  %v3280_v0 = vrot.slane %v3272_v45, %v22772_v21  ;;  %v3287_v36 = vrot.slane %v3273_v6, %v22772_v21 }
 0x5aa   :  { %v3225_v53 = vcombine.high %v3221_v63, %v25398_v13  ;;  %v3288_v62 = vcombine.high %v3264_v41, %v25398_v13 }
 0x5ab   :  { %v3271_v3 = vrot.slane %v3257_v43, %v22772_v21  ;;  %v3290_v38 = vcombine.high %v3280_v0, %v25398_v13  ;;  %v3291_v55 = vcombine.high %v3287_v36, %v25398_v13 }
 0x5ad   :  { %3708 = vxpose.xlu0.b32.start.end [1/1] (short) (narrow) %v3158_v50, 8  ;;  %3932 = vxpose.xlu1.b32.start.end [1/1] (short) (narrow) %v3214_v48, 8  ;;  %v3224_v50 = vcombine.high %v3214_v48, %v25398_v13  ;;  %v3289_v57 = vcombine.high %v3271_v3, %v25398_v13 }
 0x5b1   :  { %3772 = vxpose.xlu0.b32.start.end [1/1] (short) (narrow) %v3159_v4, 8  ;;  %3996 = vxpose.xlu1.b32.start.end [1/1] (short) (narrow) %v3221_v63, 8 }
 0x5b5   :  { %3836 = vxpose.xlu0.b32.start.end [1/1] (short) (narrow) %v3222_v54, 8  ;;  %4060 = vxpose.xlu1.b32.start.end [1/1] (short) (narrow) %v3264_v41, 8 }
 0x5b9   :  { %3900 = vxpose.xlu0.b32.start.end [1/1] (short) (narrow) %v3223_v47, 8  ;;  %4124 = vxpose.xlu1.b32.start.end [1/1] (short) (narrow) %v3271_v3, 8  ;;  %v42_v47 = vsub.s32 1, %v22760_v9 }
 0x5bd   :  { %3964 = vxpose.xlu0.b32.start.end [1/1] (short) (narrow) %v3224_v50, 8  ;;  %4188 = vxpose.xlu1.b32.start.end [1/1] (short) (narrow) %v3280_v0, 8  ;;  %v43_v0 = vrot.slane %v22987_v61, %v42_v47  ;;  %v99_v50 = vrot.slane %v22975_v5, %v42_v47 }
 0x5c1   :  { %4028 = vxpose.xlu0.b32.start.end [1/1] (short) (narrow) %v3225_v53, 8  ;;  %4252 = vxpose.xlu1.b32.start.end [1/1] (short) (narrow) %v3287_v36, 8 }
 0x5c5   :  { %4092 = vxpose.xlu0.b32.start.end [1/1] (short) (narrow) %v3288_v62, 8 }
 0x5c9   :  { %4156 = vxpose.xlu0.b32.start.end [1/1] (short) (narrow) %v3289_v57, 8 }
 0x5cd   :  { %4220 = vxpose.xlu0.b32.start.end [1/1] (short) (narrow) %v3290_v38, 8 }
 0x5d1   :  { %4284 = vxpose.xlu0.b32.start.end [1/1] (short) (narrow) %v3291_v55, 8 }
 0x5df   :  { %45 = vbcast.lane.b32.xlu1 %v43_v0, 256 }
 0x5fa   :  { %101 = vbcast.lane.b32.xlu0 %v99_v50, 256 }
 0x60d   :  { %v3372_v48 = vpop.trf.xlu1  ;;  %v3308_v12 = vpop.trf.xlu0 }
 0x60e   :  { %v4316_v9 = vcombine.low %v3308_v12, %v3372_v48 }
 0x611   :  { %v3340_v4 = vpop.trf.xlu0  ;;  %v3500_v59 = vpop.trf.xlu1 }
 0x615   :  { %v3404_v58 = vpop.trf.xlu0  ;;  %v3564_v63 = vpop.trf.xlu1 }
 0x616   :  { %v4324_v55 = vcombine.low %v3340_v4, %v3404_v58 }
 0x618   :  { %v23306_v5 = vrot.slane %v4324_v55, %v22765_v14 }
 0x619   :  { %v3436_v43 = vpop.trf.xlu0  ;;  %v3628_v54 = vpop.trf.xlu1 }
 0x61a   :  { %v4332_v13 = vcombine.low %v3436_v43, %v3500_v59  ;;  %v4384_v61 = vcombine.low %v3564_v63, %v3628_v54  ;;  %v23315_v59 = vrot.slane %v4316_v9, %v22765_v14 }
 0x61c   :  { %v23309_v47 = vrot.slane %v4332_v13, %v22765_v14  ;;  %v4391_v12 = vrot.slane %v4384_v61, %v22765_v14  ;;  %v4348_v63 = vcombine.low %v23315_v59, %v23306_v5 }
 0x61d   :  { %v3468_v41 = vpop.trf.xlu0  ;;  %v3692_v45 = vpop.trf.xlu1 }
 0x621   :  { %v3532_v3 = vpop.trf.xlu0  ;;  %v3756_v6 = vpop.trf.xlu1 }
 0x622   :  { %v4340_v38 = vcombine.low %v3468_v41, %v3532_v3  ;;  %v4400_v41 = vcombine.low %v3692_v45, %v3756_v6  ;;  %v4356_v6 = vrot.slane %v4348_v63, %v22772_v21 }
 0x624   :  { %v23303_v44 = vrot.slane %v4340_v38, %v22765_v14  ;;  %v4407_v43 = vrot.slane %v4400_v41, %v22765_v14 }
 0x625   :  { %v3596_v36 = vpop.trf.xlu0  ;;  %v23298_v53 = vpop.trf.xlu1 }
 0x626   :  { %v4364_v48 = vcombine.low %v23309_v47, %v23303_v44 }
 0x628   :  { %v4372_v9 = vrot.slane %v4364_v48, %v22772_v21 }
 0x629   :  { %v3660_v62 = vpop.trf.xlu0  ;;  %v23300_v57 = vpop.trf.xlu1 }
 0x62a   :  { %v4392_v46 = vcombine.low %v3596_v36, %v3660_v62  ;;  %v4380_v62 = vcombine.low %v4356_v6, %v4372_v9  ;;  %v4381_v55 = vcombine.high %v4356_v6, %v4372_v9  ;;  %v4452_v6 = vcombine.low %v23298_v53, %v23300_v57 }
 0x62b   :  { %v4349_v53 = vcombine.high %v23315_v59, %v23306_v5 }
 0x62c   :  { %v23312_v0 = vrot.slane %v4392_v46, %v22765_v14 }
 0x62d   :  { %v3724_v33 = vpop.trf.xlu0  ;;  %v3948_v31 = vpop.trf.xlu1 }
 0x62e   :  { %v4416_v13 = vcombine.low %v4391_v12, %v23312_v0 }
 0x630   :  { %v4424_v50 = vrot.slane %v4416_v13, %v22772_v21 }
 0x631   :  { %v3788_v4 = vpop.trf.xlu0  ;;  %v4012_v45 = vpop.trf.xlu1 }
 0x632   :  { %v4408_v58 = vcombine.low %v3724_v33, %v3788_v4  ;;  %v4468_v37 = vcombine.low %v3948_v31, %v4012_v45  ;;  %v4459_v31 = vrot.slane %v4452_v6, %v22765_v14 }
 0x634   :  { %v4415_v46 = vrot.slane %v4408_v58, %v22765_v14 }
 0x635   :  { %v3852_v54 = vpop.trf.xlu0  ;;  %v4076_v4 = vpop.trf.xlu1 }
 0x636   :  { %v4432_v3 = vcombine.low %v4407_v43, %v4415_v46 }
 0x638   :  { %v4440_v33 = vrot.slane %v4432_v3, %v22772_v21 }
 0x639   :  { %v3916_v36 = vpop.trf.xlu0  ;;  %v4140_v29 = vpop.trf.xlu1 }
 0x63a   :  { %v4448_v38 = vcombine.low %v4424_v50, %v4440_v33  ;;  %v4449_v61 = vcombine.high %v4424_v50, %v4440_v33  ;;  %v4460_v3 = vcombine.low %v3852_v54, %v3916_v36  ;;  %v4520_v33 = vcombine.low %v4076_v4, %v4140_v29 }
 0x63b   :  { %v4417_v29 = vcombine.high %v4391_v12, %v23312_v0  ;;  %v4363_v4 = vrot.slane %v4349_v53, %v22772_v21 }
 0x63c   :  { %v22249_v41 = vpack.c.bf16 %v4448_v38, %v4380_v62  ;;  %v22257_v42 = vpack.c.bf16 %v4449_v61, %v4381_v55  ;;  %v4467_v62 = vrot.slane %v4460_v3, %v22765_v14  ;;  %v4433_v61 = vcombine.high %v4407_v43, %v4415_v46 }
 0x63d   :  { %v3980_v58 = vpop.trf.xlu0  ;;  %v4204_v40 = vpop.trf.xlu1  ;;  %v4527_v45 = vrot.slane %v4520_v33, %v22765_v14  ;;  %v4431_v5 = vrot.slane %v4417_v29, %v22772_v21 }
 0x63e   :  { %22250 = vmatprep.subr.bf16.mxu0 %v22249_v41  ;;  %22258 = vmatprep.subr.bf16.mxu1 %v22257_v42 }
 0x63f   :  { %22252 = vmatpush3.bf16.msra.mxu0 %v22249_v41  ;;  %22260 = vmatpush3.bf16.msra.mxu1 %v22257_v42  ;;  %v4475_v42 = vrot.slane %v4468_v37, %v22765_v14  ;;  %v4484_v37 = vcombine.low %v4459_v31, %v4467_v62 }
 0x641   :  { %v4044_v48 = vpop.trf.xlu0  ;;  %v4268_v35 = vpop.trf.xlu1 }
 0x642   :  { %v4476_v18 = vcombine.low %v3980_v58, %v4044_v48  ;;  %v4536_v55 = vcombine.low %v4204_v40, %v4268_v35  ;;  %v4447_v40 = vrot.slane %v4433_v61, %v22772_v21 }
 0x644   :  { %v4483_v50 = vrot.slane %v4476_v18, %v22765_v14  ;;  %v4365_v18 = vcombine.high %v23309_v47, %v23303_v44  ;;  %v4492_v47 = vrot.slane %v4484_v37, %v22772_v21 }
 0x645   :  { %v4108_v63 = vpop.trf.xlu0 }
 0x646   :  { %v4500_v54 = vcombine.low %v4475_v42, %v4483_v50  ;;  %v4379_v44 = vrot.slane %v4365_v18, %v22772_v21  ;;  %v4501_v58 = vcombine.high %v4475_v42, %v4483_v50 }
 0x648   :  { %v4508_v43 = vrot.slane %v4500_v54, %v22772_v21  ;;  %v4383_v53 = vcombine.high %v4363_v4, %v4379_v44  ;;  %v4515_v18 = vrot.slane %v4501_v58, %v22772_v21  ;;  %v25412_v58 = vld [vmem:[#allocation29_spill] sm:$0xff] }
 0x649   :  { %v4172_v13 = vpop.trf.xlu0 }
 0x64a   :  { %v4528_v11 = vcombine.low %v4108_v63, %v4172_v13  ;;  %v4450_v63 = vcombine.low %v4431_v5, %v4447_v40  ;;  %v4451_v13 = vcombine.high %v4431_v5, %v4447_v40  ;;  %v4516_v3 = vcombine.low %v4492_v47, %v4508_v43  ;;  %v25402_v40 = vld [vmem:[#allocation19_spill] sm:$0xff] }
 0x64b   :  { %v4517_v6 = vcombine.high %v4492_v47, %v4508_v43  ;;  %v25403_v43 = vld [vmem:[#allocation30_spill] sm:$0xff]  ;;  %v25406_v5 = vld [vmem:[#allocation23_spill] sm:$0xff]  ;;  %v25409_v47 = vld [vmem:[#allocation36_spill] sm:$0xff] }
 0x64c   :  { %v4535_v38 = vrot.slane %v4528_v11, %v22765_v14  ;;  %v4543_v11 = vrot.slane %v4536_v55, %v22765_v14  ;;  %v4485_v55 = vcombine.high %v4459_v31, %v4467_v62  ;;  %v22273_v42 = vpack.c.bf16 %v4451_v13, %v4383_v53  ;;  %v25415_v13 = vld [vmem:[#allocation42_spill] sm:$0xff]  ;;  %v25425_v53 = vld [vmem:[#allocation52_spill] sm:$0xff] }
 0x64d   :  { %v4236_v9 = vpop.trf.xlu0 }
 0x64e   :  { %v4552_v57 = vcombine.low %v4527_v45, %v4535_v38  ;;  %v4553_v48 = vcombine.high %v4527_v45, %v4535_v38  ;;  %v4499_v38 = vrot.slane %v4485_v55, %v22772_v21  ;;  %v25420_v55 = vld [vmem:[#allocation37_spill] sm:$0xff] }
 0x650   :  { %v4560_v0 = vrot.slane %v4552_v57, %v22772_v21  ;;  %v4567_v29 = vrot.slane %v4553_v48, %v22772_v21  ;;  %v4518_v31 = vcombine.low %v4499_v38, %v4515_v18  ;;  %v4519_v37 = vcombine.high %v4499_v38, %v4515_v18  ;;  %v25413_v48 = vld [vmem:[#allocation40_spill] sm:$0xff]  ;;  %v25426_v18 = vld [vmem:[#allocation43_spill] sm:$0xff] }
 0x651   :  { %v4300_v41 = vpop.trf.xlu0  ;;  %v25430_v38 = vld [vmem:[#allocation47_spill] sm:$0xff] }
 0x652   :  { %v4544_v36 = vcombine.low %v4236_v9, %v4300_v41 }
 0x654   :  { %v4551_v35 = vrot.slane %v4544_v36, %v22765_v14  ;;  %v4382_v36 = vcombine.low %v4363_v4, %v4379_v44  ;;  %v25405_v4 = vld [vmem:[#allocation32_spill] sm:$0xff]  ;;  %v25408_v44 = vld [vmem:[#allocation25_spill] sm:$0xff] }
 0x656   :  { %v4568_v46 = vcombine.low %v4543_v11, %v4551_v35  ;;  %v4569_v59 = vcombine.high %v4543_v11, %v4551_v35  ;;  %v22265_v50 = vpack.c.bf16 %v4450_v63, %v4382_v36  ;;  %v25401_v35 = vld [vmem:[#allocation28_spill] sm:$0xff]  ;;  %v25414_v63 = vld [vmem:[#allocation31_spill] sm:$0xff]  ;;  %v25424_v36 = vld [vmem:[#allocation41_spill] sm:$0xff] }
 0x658   :  { %v4576_v12 = vrot.slane %v4568_v46, %v22772_v21  ;;  %v4583_v61 = vrot.slane %v4569_v59, %v22772_v21  ;;  %v25404_v46 = vld [vmem:[#allocation21_spill] sm:$0xff]  ;;  %v25407_v59 = vld [vmem:[#allocation34_spill] sm:$0xff] }
 0x65a   :  { %v4584_v9 = vcombine.low %v4560_v0, %v4576_v12  ;;  %v4585_v33 = vcombine.high %v4560_v0, %v4576_v12  ;;  %v4586_v45 = vcombine.low %v4567_v29, %v4583_v61  ;;  %v4587_v62 = vcombine.high %v4567_v29, %v4583_v61  ;;  %v25410_v0 = vld [vmem:[#allocation27_spill] sm:$0xff]  ;;  %v25411_v12 = vld [vmem:[#allocation38_spill] sm:$0xff]  ;;  %v25421_v61 = vld [vmem:[#allocation48_spill] sm:$0xff] }
 0x65b   :  { %v25427_v29 = vld [vmem:[#allocation54_spill] sm:$0xff] }
 0x65c   :  { %v22253_v41 = vpack.c.bf16 %v4584_v9, %v4516_v3  ;;  %v22261_v54 = vpack.c.bf16 %v4585_v33, %v4517_v6  ;;  %v22269_v57 = vpack.c.bf16 %v4586_v45, %v4518_v31  ;;  %v22277_v11 = vpack.c.bf16 %v4587_v62, %v4519_v37  ;;  %v25416_v3 = vld [vmem:[#allocation33_spill] sm:$0xff]  ;;  %v25417_v9 = vld [vmem:[#allocation44_spill] sm:$0xff]  ;;  %v25418_v6 = vld [vmem:[#allocation35_spill] sm:$0xff] }
 0x65d   :  { %v25419_v33 = vld [vmem:[#allocation46_spill] sm:$0xff]  ;;  %v25431_v45 = vld [vmem:[#allocation56_spill] sm:$0xff]  ;;  %v25432_v62 = vld [vmem:[#allocation49_spill] sm:$0xff] }
 0x65e   :  { %22254 = vmatprep.subr.bf16.mxu0 %v22253_v41  ;;  %22262 = vmatprep.subr.bf16.mxu1 %v22261_v54  ;;  %v25433_v31 = vld [vmem:[#allocation57_spill] sm:$0xff]  ;;  %v25434_v37 = vld [vmem:[#allocation51_spill] sm:$0xff] }
 0x65f   :  { %22256 = vmatpush3.bf16.msra.mxu0 %v22253_v41  ;;  %22264 = vmatpush3.bf16.msra.mxu1 %v22261_v54  ;;  %v25422_v41 = vld [vmem:[#allocation39_spill] sm:$0xff]  ;;  %v25423_v54 = vld [vmem:[#allocation50_spill] sm:$0xff] }
 0x660   :  { %22266 = vmatprep.subr.bf16.mxu0 %v22265_v50  ;;  %22274 = vmatprep.subr.bf16.mxu1 %v22273_v42 }
 0x662   :  { %21330 = vmatmul.mubr.msk.f32.vlgmr.msra.gmra.mrb[32].mxu0 %vm1871_vm1, %v22952_v34  ;;  %21362 = vmatmul.mubr.msk.f32.vlgmr.msra.gmra.mrb[32].mxu1 %vm1871_vm1, %v22914_v49 }
 0x663   :  { %21332 = vmatprep.mubr.msk.f32.mxu0 %vm1871_vm1, %v22959_v51  ;;  %21364 = vmatprep.mubr.msk.f32.mxu1 %vm1871_vm1, %v22916_v52 }
 0x664   :  { %22268 = vmatpush3.bf16.msra.mxu0 %v22265_v50  ;;  %22276 = vmatpush3.bf16.msra.mxu1 %v22273_v42  ;;  %v25428_v50 = vld [vmem:[#allocation45_spill] sm:$0xff]  ;;  %v25429_v42 = vld [vmem:[#allocation55_spill] sm:$0xff] }
 0x665   :  { %22270 = vmatprep.subr.bf16.mxu0 %v22269_v57  ;;  %22278 = vmatprep.subr.bf16.mxu1 %v22277_v11 }
 0x666   :  { %21333 = vmatmul.mubr.msk.f32.gmra.mrb[34].mxu0 %vm1871_vm1, %v22964_v1  ;;  %21365 = vmatmul.mubr.msk.f32.gmra.mrb[34].mxu1 %vm1871_vm1, %v22921_v60 }
 0x667   :  { %21335 = vmatprep.mubr.msk.f32.mxu0 %vm1871_vm1, %v22978_v7  ;;  %21367 = vmatprep.mubr.msk.f32.mxu1 %vm1871_vm1, %v22928_v8 }
 0x668   :  { %22272 = vmatpush3.bf16.msra.mxu0 %v22269_v57  ;;  %22280 = vmatpush3.bf16.msra.mxu1 %v22277_v11  ;;  %v25435_v57 = vld [vmem:[#allocation58_spill] sm:$0xff]  ;;  %v25436_v11 = vld [vmem:[#allocation53_spill] sm:$0xff] }
 0x66a   :  { %21336 = vmatmul.mubr.msk.f32.gmra.mrb[36].mxu0 %vm1871_vm1, %v23001_v17  ;;  %21368 = vmatmul.mubr.msk.f32.gmra.mrb[36].mxu1 %vm1871_vm1, %v22942_v20 }
 0x66b   :  { %21338 = vmatprep.mubr.msk.f32.mxu0 %vm1871_vm1, %v23011_v23  ;;  %21370 = vmatprep.mubr.msk.f32.mxu1 %vm1871_vm1, %v22955_v39 }
 0x66e   :  { %21339 = vmatmul.mubr.msk.f32.gmra.mrb[38].mxu0 %vm1871_vm1, %v23021_v25  ;;  %21371 = vmatmul.mubr.msk.f32.gmra.mrb[38].mxu1 %vm1871_vm1, %v22962_v56 }
 0x66f   :  { %21341 = vmatprep.mubr.msk.f32.mxu0 %vm1871_vm1, %v23031_v27  ;;  %21373 = vmatprep.mubr.msk.f32.mxu1 %vm1871_vm1, %v22966_v2 }
 0x672   :  { %21342 = vmatmul.mubr.msk.f32.gmra.mrb[40].mxu0 %vm1871_vm1, %v23041_v15  ;;  %21374 = vmatmul.mubr.msk.f32.gmra.mrb[40].mxu1 %vm1871_vm1, %v22990_v10 }
 0x673   :  { %21344 = vmatprep.mubr.msk.f32.mxu0 %vm1871_vm1, %v23051_v16  ;;  %21376 = vmatprep.mubr.msk.f32.mxu1 %vm1871_vm1, %v23003_v19 }
 0x676   :  { %21345 = vmatmul.mubr.msk.f32.gmra.mrb[42].mxu0 %vm1871_vm1, %v23059_v22  ;;  %21377 = vmatmul.mubr.msk.f32.gmra.mrb[42].mxu1 %vm1871_vm1, %v23013_v24 }
 0x677   :  { %21347 = vmatprep.mubr.msk.f32.mxu0 %vm1871_vm1, %v23067_v30  ;;  %21379 = vmatprep.mubr.msk.f32.mxu1 %vm1871_vm1, %v23023_v26 }
 0x67a   :  { %21348 = vmatmul.mubr.msk.f32.gmra.mrb[44].mxu0 %vm1871_vm1, %v23075_v32  ;;  %21380 = vmatmul.mubr.msk.f32.gmra.mrb[44].mxu1 %vm1871_vm1, %v23033_v28 }
 0x67b   :  { %21350 = vmatprep.mubr.msk.f32.mxu0 %vm1871_vm1, %v25401_v35  ;;  %21382 = vmatprep.mubr.msk.f32.mxu1 %vm1871_vm1, %v25402_v40 }
 0x67e   :  { %21351 = vmatmul.mubr.msk.f32.gmra.mrb[46].mxu0 %vm1871_vm1, %v25403_v43  ;;  %21383 = vmatmul.mubr.msk.f32.gmra.mrb[46].mxu1 %vm1871_vm1, %v25404_v46 }
 0x67f   :  { %21393 = vmatprep.mubr.msk.f32.mxu0 %vm1871_vm1, %v25405_v4  ;;  %21425 = vmatprep.mubr.msk.f32.mxu1 %vm1871_vm1, %v25406_v5 }
 0x682   :  { %21394 = vmatmul.mubr.msk.f32.vlgmr.msra.gmra.mrb[48].mxu0 %vm1871_vm1, %v25407_v59  ;;  %21426 = vmatmul.mubr.msk.f32.vlgmr.msra.gmra.mrb[48].mxu1 %vm1871_vm1, %v25408_v44 }
 0x683   :  { %21396 = vmatprep.mubr.msk.f32.mxu0 %vm1871_vm1, %v25409_v47  ;;  %21428 = vmatprep.mubr.msk.f32.mxu1 %vm1871_vm1, %v25410_v0 }
 0x686   :  { %21397 = vmatmul.mubr.msk.f32.gmra.mrb[50].mxu0 %vm1871_vm1, %v25411_v12  ;;  %21429 = vmatmul.mubr.msk.f32.gmra.mrb[50].mxu1 %vm1871_vm1, %v25412_v58 }
 0x687   :  { %21399 = vmatprep.mubr.msk.f32.mxu0 %vm1871_vm1, %v25413_v48  ;;  %21431 = vmatprep.mubr.msk.f32.mxu1 %vm1871_vm1, %v25414_v63 }
 0x68a   :  { %21400 = vmatmul.mubr.msk.f32.gmra.mrb[52].mxu0 %vm1871_vm1, %v25415_v13  ;;  %21432 = vmatmul.mubr.msk.f32.gmra.mrb[52].mxu1 %vm1871_vm1, %v25416_v3 }
 0x68b   :  { %21402 = vmatprep.mubr.msk.f32.mxu0 %vm1871_vm1, %v25417_v9  ;;  %21434 = vmatprep.mubr.msk.f32.mxu1 %vm1871_vm1, %v25418_v6 }
 0x68e   :  { %21403 = vmatmul.mubr.msk.f32.gmra.mrb[54].mxu0 %vm1871_vm1, %v25419_v33  ;;  %21435 = vmatmul.mubr.msk.f32.gmra.mrb[54].mxu1 %vm1871_vm1, %v25420_v55 }
 0x68f   :  { %21405 = vmatprep.mubr.msk.f32.mxu0 %vm1871_vm1, %v25421_v61  ;;  %21437 = vmatprep.mubr.msk.f32.mxu1 %vm1871_vm1, %v25422_v41 }
 0x692   :  { %21406 = vmatmul.mubr.msk.f32.gmra.mrb[56].mxu0 %vm1871_vm1, %v25423_v54  ;;  %21438 = vmatmul.mubr.msk.f32.gmra.mrb[56].mxu1 %vm1871_vm1, %v25424_v36 }
 0x693   :  { %21408 = vmatprep.mubr.msk.f32.mxu0 %vm1871_vm1, %v25425_v53  ;;  %21440 = vmatprep.mubr.msk.f32.mxu1 %vm1871_vm1, %v25426_v18 }
 0x696   :  { %21409 = vmatmul.mubr.msk.f32.gmra.mrb[58].mxu0 %vm1871_vm1, %v25427_v29  ;;  %21441 = vmatmul.mubr.msk.f32.gmra.mrb[58].mxu1 %vm1871_vm1, %v25428_v50  ;;  %v102_v50 = vpop.permute.xlu0 %101 }
 0x697   :  { %21411 = vmatprep.mubr.msk.f32.mxu0 %vm1871_vm1, %v25429_v42  ;;  %21443 = vmatprep.mubr.msk.f32.mxu1 %vm1871_vm1, %v25430_v38  ;;  %v25437_v42 = vld [vmem:[#allocation14_spill] sm:$0xff]  ;;  %v25438_v38 = vld [vmem:[#allocation13_spill] sm:$0xff] }
 0x69a   :  { %21412 = vmatmul.mubr.msk.f32.gmra.mrb[60].mxu0 %vm1871_vm1, %v25431_v45  ;;  %21444 = vmatmul.mubr.msk.f32.gmra.mrb[60].mxu1 %vm1871_vm1, %v25432_v62  ;;  %v46_v45 = vpop.permute.xlu1 %45 }
 0x69b   :  { %21414 = vmatprep.mubr.msk.f32.mxu0 %vm1871_vm1, %v25433_v31  ;;  %21446 = vmatprep.mubr.msk.f32.mxu1 %vm1871_vm1, %v25434_v37  ;;  %v22611_v31 = vld [vmem:[%s25246_s1] sm:$0xf] }
 0x69c   :  { %v147_v62 = vmul.f32 %v22611_v31, %v46_v45  ;;  %v22612_v37 = vld [vmem:[%s25247_s2] sm:$0xf] }
 0x69e   :  { %21415 = vmatmul.mubr.msk.f32.gmra.mrb[62].mxu0 %vm1871_vm1, %v25435_v57  ;;  %21447 = vmatmul.mubr.msk.f32.gmra.mrb[62].mxu1 %vm1871_vm1, %v25436_v11  ;;  %v164_v57 = vadd.f32 %v22612_v37, %v147_v62  ;;  %v155_v11 = vmul.f32 %v22611_v31, %v102_v50 }
 0x69f   :  { %21457 = vmatprep.mubr.msk.f32.mxu0 %vm1871_vm1, %v25437_v42  ;;  %21489 = vmatprep.mubr.msk.f32.mxu1 %vm1871_vm1, %v25438_v38 }
 0x6a0   :  { %180 = vst [vmem:[#allocation2 + $0x4] sm:$0xf] %v164_v57  ;;  %v172_v29 = vadd.f32 %v22612_v37, %v155_v11 }
 0x6a2   :  { %188 = vst [vmem:[#allocation2 + $0x24] sm:$0xf] %v172_v29 }
 0x735   :  { %v21331_v42 = vpop.f32.mrb[32].mxu0  ;;  %v21363_v18 = vpop.f32.mrb[32].mxu1 }
 0x736   :  { %v4654_v53 = vpop.f32.mrb[33].mxu0  ;;  %v4799_v38 = vpop.f32.mrb[33].mxu1 }
 0x737   :  { %5200 = vxpose.xlu0.b32.start [1/16] (narrow) %v4799_v38, 8  ;;  %5168 = vxpose.xlu1.b32.start [1/16] (narrow) %v4654_v53, 8 }
 0x739   :  { %v21334_v36 = vpop.f32.mrb[34].mxu0  ;;  %v21366_v54 = vpop.f32.mrb[34].mxu1 }
 0x73a   :  { %v4664_v41 = vpop.f32.mrb[35].mxu0  ;;  %v4809_v45 = vpop.f32.mrb[35].mxu1 }
 0x73b   :  { %5201 = vxpose.xlu0.b32.cont [2/16] (narrow) %v21363_v18, 8  ;;  %5169 = vxpose.xlu1.b32.cont [2/16] (narrow) %v21331_v42, 8 }
 0x73d   :  { %v21337_v61 = vpop.f32.mrb[36].mxu0  ;;  %v21369_v55 = vpop.f32.mrb[36].mxu1 }
 0x73e   :  { %v4674_v62 = vpop.f32.mrb[37].mxu0  ;;  %v4819_v57 = vpop.f32.mrb[37].mxu1 }
 0x73f   :  { %5202 = vxpose.xlu0.b32.cont [3/16] (narrow) %v4809_v45, 8  ;;  %5170 = vxpose.xlu1.b32.cont [3/16] (narrow) %v4664_v41, 8 }
 0x741   :  { %v21340_v50 = vpop.f32.mrb[38].mxu0  ;;  %v21372_v29 = vpop.f32.mrb[38].mxu1 }
 0x742   :  { %v4684_v31 = vpop.f32.mrb[39].mxu0  ;;  %v4829_v37 = vpop.f32.mrb[39].mxu1 }
 0x743   :  { %5203 = vxpose.xlu0.b32.cont [4/16] (narrow) %v21366_v54, 8  ;;  %5171 = vxpose.xlu1.b32.cont [4/16] (narrow) %v21334_v36, 8 }
 0x745   :  { %v21343_v38 = vpop.f32.mrb[40].mxu0  ;;  %v21375_v53 = vpop.f32.mrb[40].mxu1 }
 0x746   :  { %v4694_v11 = vpop.f32.mrb[41].mxu0  ;;  %v4839_v33 = vpop.f32.mrb[41].mxu1 }
 0x747   :  { %5204 = vxpose.xlu0.b32.cont [5/16] (narrow) %v4819_v57, 8  ;;  %5172 = vxpose.xlu1.b32.cont [5/16] (narrow) %v4674_v62, 8 }
 0x749   :  { %v21346_v18 = vpop.f32.mrb[42].mxu0  ;;  %v21378_v42 = vpop.f32.mrb[42].mxu1 }
 0x74a   :  { %v4704_v6 = vpop.f32.mrb[43].mxu0  ;;  %v4849_v9 = vpop.f32.mrb[43].mxu1 }
 0x74b   :  { %5205 = vxpose.xlu0.b32.cont [6/16] (narrow) %v21369_v55, 8  ;;  %5173 = vxpose.xlu1.b32.cont [6/16] (narrow) %v21337_v61, 8 }
 0x74d   :  { %v21349_v45 = vpop.f32.mrb[44].mxu0  ;;  %v21381_v41 = vpop.f32.mrb[44].mxu1 }
 0x74e   :  { %v4714_v3 = vpop.f32.mrb[45].mxu0  ;;  %v4859_v13 = vpop.f32.mrb[45].mxu1 }
 0x74f   :  { %5206 = vxpose.xlu0.b32.cont [7/16] (narrow) %v4829_v37, 8  ;;  %5174 = vxpose.xlu1.b32.cont [7/16] (narrow) %v4684_v31, 8 }
 0x751   :  { %v21352_v54 = vpop.f32.mrb[46].mxu0  ;;  %v21384_v36 = vpop.f32.mrb[46].mxu1 }
 0x752   :  { %v4724_v63 = vpop.f32.mrb[47].mxu0  ;;  %v4869_v48 = vpop.f32.mrb[47].mxu1 }
 0x753   :  { %5207 = vxpose.xlu0.b32.cont [8/16] (narrow) %v21372_v29, 8  ;;  %5175 = vxpose.xlu1.b32.cont [8/16] (narrow) %v21340_v50, 8 }
 0x755   :  { %v21395_v57 = vpop.f32.mrb[48].mxu0  ;;  %v21427_v62 = vpop.f32.mrb[48].mxu1 }
 0x756   :  { %v4944_v58 = vpop.f32.mrb[49].mxu0  ;;  %v5089_v12 = vpop.f32.mrb[49].mxu1 }
 0x757   :  { %5208 = vxpose.xlu0.b32.cont [9/16] (narrow) %v4839_v33, 8  ;;  %5176 = vxpose.xlu1.b32.cont [9/16] (narrow) %v4694_v11, 8 }
 0x759   :  { %v21398_v55 = vpop.f32.mrb[50].mxu0  ;;  %v21430_v61 = vpop.f32.mrb[50].mxu1 }
 0x75a   :  { %v4954_v0 = vpop.f32.mrb[51].mxu0  ;;  %v5099_v47 = vpop.f32.mrb[51].mxu1 }
 0x75b   :  { %5209 = vxpose.xlu0.b32.cont [10/16] (narrow) %v21375_v53, 8  ;;  %5177 = vxpose.xlu1.b32.cont [10/16] (narrow) %v21343_v38, 8 }
 0x75d   :  { %v21401_v37 = vpop.f32.mrb[52].mxu0  ;;  %v21433_v31 = vpop.f32.mrb[52].mxu1 }
 0x75e   :  { %v4964_v44 = vpop.f32.mrb[53].mxu0  ;;  %v5109_v59 = vpop.f32.mrb[53].mxu1 }
 0x75f   :  { %5210 = vxpose.xlu0.b32.cont [11/16] (narrow) %v4849_v9, 8  ;;  %5178 = vxpose.xlu1.b32.cont [11/16] (narrow) %v4704_v6, 8 }
 0x761   :  { %v21404_v29 = vpop.f32.mrb[54].mxu0  ;;  %v21436_v50 = vpop.f32.mrb[54].mxu1 }
 0x762   :  { %v4974_v5 = vpop.f32.mrb[55].mxu0  ;;  %v5119_v4 = vpop.f32.mrb[55].mxu1 }
 0x763   :  { %5211 = vxpose.xlu0.b32.cont [12/16] (narrow) %v21378_v42, 8  ;;  %5179 = vxpose.xlu1.b32.cont [12/16] (narrow) %v21346_v18, 8 }
 0x765   :  { %v21407_v33 = vpop.f32.mrb[56].mxu0  ;;  %v21439_v11 = vpop.f32.mrb[56].mxu1 }
 0x766   :  { %v4984_v46 = vpop.f32.mrb[57].mxu0  ;;  %v5129_v43 = vpop.f32.mrb[57].mxu1 }
 0x767   :  { %5212 = vxpose.xlu0.b32.cont [13/16] (narrow) %v4859_v13, 8  ;;  %5180 = vxpose.xlu1.b32.cont [13/16] (narrow) %v4714_v3, 8 }
 0x769   :  { %v21410_v53 = vpop.f32.mrb[58].mxu0  ;;  %v21442_v38 = vpop.f32.mrb[58].mxu1 }
 0x76a   :  { %v4994_v40 = vpop.f32.mrb[59].mxu0  ;;  %v5139_v35 = vpop.f32.mrb[59].mxu1 }
 0x76b   :  { %5213 = vxpose.xlu0.b32.cont [14/16] (narrow) %v21381_v41, 8  ;;  %5181 = vxpose.xlu1.b32.cont [14/16] (narrow) %v21349_v45, 8 }
 0x76d   :  { %v21413_v9 = vpop.f32.mrb[60].mxu0  ;;  %v21445_v6 = vpop.f32.mrb[60].mxu1 }
 0x76e   :  { %v5004_v28 = vpop.f32.mrb[61].mxu0  ;;  %v5149_v32 = vpop.f32.mrb[61].mxu1 }
 0x76f   :  { %5214 = vxpose.xlu0.b32.cont [15/16] (narrow) %v4869_v48, 8  ;;  %5182 = vxpose.xlu1.b32.cont [15/16] (narrow) %v4724_v63, 8 }
 0x771   :  { %v21416_v42 = vpop.f32.mrb[62].mxu0  ;;  %v21448_v18 = vpop.f32.mrb[62].mxu1 }
 0x772   :  { %v5014_v26 = vpop.f32.mrb[63].mxu0  ;;  %v5159_v30 = vpop.f32.mrb[63].mxu1 }
 0x773   :  { %5215 = vxpose.xlu0.b32.end [16/16] (narrow) %v21384_v36, 8  ;;  %5183 = vxpose.xlu1.b32.end [16/16] (narrow) %v21352_v54, 8 }
 0x777   :  { %5264 = vxpose.xlu0.b32.start [1/16] (narrow) %v5089_v12, 8  ;;  %5232 = vxpose.xlu1.b32.start [1/16] (narrow) %v4944_v58, 8 }
 0x77b   :  { %5265 = vxpose.xlu0.b32.cont [2/16] (narrow) %v21427_v62, 8  ;;  %5233 = vxpose.xlu1.b32.cont [2/16] (narrow) %v21395_v57, 8 }
 0x77f   :  { %5266 = vxpose.xlu0.b32.cont [3/16] (narrow) %v5099_v47, 8  ;;  %5234 = vxpose.xlu1.b32.cont [3/16] (narrow) %v4954_v0, 8  ;;  %v25439_v0 = vmov 0.0  }
 0x783   :  { %5267 = vxpose.xlu0.b32.cont [4/16] (narrow) %v21430_v61, 8  ;;  %5235 = vxpose.xlu1.b32.cont [4/16] (narrow) %v21398_v55, 8 }
 0x787   :  { %5268 = vxpose.xlu0.b32.cont [5/16] (narrow) %v5109_v59, 8  ;;  %5236 = vxpose.xlu1.b32.cont [5/16] (narrow) %v4964_v44, 8 }
 0x78b   :  { %5269 = vxpose.xlu0.b32.cont [6/16] (narrow) %v21433_v31, 8  ;;  %5237 = vxpose.xlu1.b32.cont [6/16] (narrow) %v21401_v37, 8 }
 0x78f   :  { %5270 = vxpose.xlu0.b32.cont [7/16] (narrow) %v5119_v4, 8  ;;  %5238 = vxpose.xlu1.b32.cont [7/16] (narrow) %v4974_v5, 8 }
 0x793   :  { %5271 = vxpose.xlu0.b32.cont [8/16] (narrow) %v21436_v50, 8  ;;  %5239 = vxpose.xlu1.b32.cont [8/16] (narrow) %v21404_v29, 8 }
 0x797   :  { %5272 = vxpose.xlu0.b32.cont [9/16] (narrow) %v5129_v43, 8  ;;  %5240 = vxpose.xlu1.b32.cont [9/16] (narrow) %v4984_v46, 8 }
 0x79b   :  { %5273 = vxpose.xlu0.b32.cont [10/16] (narrow) %v21439_v11, 8  ;;  %5241 = vxpose.xlu1.b32.cont [10/16] (narrow) %v21407_v33, 8  ;;  %v25440_v33 = vld [vmem:[#allocation59_spill] sm:$0xff] }
 0x79f   :  { %5274 = vxpose.xlu0.b32.cont [11/16] (narrow) %v5139_v35, 8  ;;  %5242 = vxpose.xlu1.b32.cont [11/16] (narrow) %v4994_v40, 8 }
 0x7a3   :  { %5275 = vxpose.xlu0.b32.cont [12/16] (narrow) %v21442_v38, 8  ;;  %5243 = vxpose.xlu1.b32.cont [12/16] (narrow) %v21410_v53, 8 }
 0x7a7   :  { %5276 = vxpose.xlu0.b32.cont [13/16] (narrow) %v5149_v32, 8  ;;  %5244 = vxpose.xlu1.b32.cont [13/16] (narrow) %v5004_v28, 8  ;;  %v5322_v28 = vld [vmem:[#allocation2 + $0x4] sm:$0xf] }
 0x7ab   :  { %5277 = vxpose.xlu0.b32.cont [14/16] (narrow) %v21445_v6, 8  ;;  %5245 = vxpose.xlu1.b32.cont [14/16] (narrow) %v21413_v9, 8  ;;  %v25441_v9 = vld [vmem:[#allocation60_spill] sm:$0xff] }
 0x7af   :  { %5278 = vxpose.xlu0.b32.cont [15/16] (narrow) %v5159_v30, 8  ;;  %5246 = vxpose.xlu1.b32.cont [15/16] (narrow) %v5014_v26, 8  ;;  %v5323_v26 = vld [vmem:[#allocation2 + $0x24] sm:$0xf] }
 0x7b3   :  { %5279 = vxpose.xlu0.b32.end [16/16] (narrow) %v21448_v18, 8  ;;  %5247 = vxpose.xlu1.b32.end [16/16] (narrow) %v21416_v42, 8 }
 0x7b7   :  { %v5184_v4 = vpop.trf.xlu1  ;;  %v5216_v5 = vpop.trf.xlu0 }
 0x7f7   :  { %v5248_v59 = vpop.trf.xlu1  ;;  %v5280_v44 = vpop.trf.xlu0 }
 0x7f8   :  { %v5296_v43 = vcombine.low %v5184_v4, %v5248_v59  ;;  %v5304_v46 = vcombine.low %v5216_v5, %v5280_v44 }
 0x7fa   :  { %v5303_v47 = vrot.slane %v5296_v43, %v22765_v14  ;;  %v5311_v35 = vrot.slane %v5304_v46, %v22765_v14 }
 0x7fc   :  { %v5312_v40 = vcombine.low %v5303_v47, %v5311_v35 }
 0x7fe   :  { %v5319_v32 = vrot.slane %v5312_v40, %v22772_v21 }
 0x800   :  { %v5320_v12 = vcombine.high %v5319_v32, %v25439_v0  ;;  %v5324_v30 = vadd.f32 %v5322_v28, %v5319_v32 }
 0x802   :  { %v5325_v58 = vadd.f32 %v5323_v26, %v5320_v12  ;;  %22499 = vtanh.f32 %v5324_v30  ;;  %v20155_v48 = vmul.f32 -1.442695, %v5324_v30 }
 0x804   :  { %22501 = vtanh.f32 %v5325_v58  ;;  %v20156_v63 = vmul.f32 -1.442695, %v5325_v58 }
 0x805   :  { %22503 = vpow2.f32 %v20155_v48 }
 0x806   :  { %22505 = vpow2.f32 %v20156_v63 }
 0x80c   :  { %v22500_v13 = vpop.eup %22499 }
 0x80d   :  { %5352 = vrot.lane.b32.xlu1 %v22500_v13, %s22710_s12 }
 0x80e   :  { %v22502_v3 = vpop.eup %22501 }
 0x80f   :  { %v22504_v45 = vpop.eup %22503  ;;  %5354 = vrot.lane.b32.xlu0 %v22502_v3, %s22710_s12 }
 0x810   :  { %v22506_v41 = vpop.eup %22505  ;;  %v5334_v54 = vadd.f32 1.0, %v22504_v45 }
 0x811   :  { %v5335_v36 = vadd.f32 1.0, %v22506_v41 }
 0x812   :  { %22507 = vrcp.f32 %v5334_v54 }
 0x813   :  { %22509 = vrcp.f32 %v5335_v36 }
 0x81c   :  { %v22508_v57 = vpop.eup %22507 }
 0x81d   :  { %5342 = vrot.lane.b32.xlu1 %v22508_v57, %s22711_s13  ;;  %v22510_v62 = vpop.eup %22509 }
 0x821   :  { %5344 = vrot.lane.b32.xlu1 %v22510_v62, %s22711_s13 }
 0x87f   :  { %v5353_v55 = vpop.permute.xlu1 %5352 }
 0x880   :  { %v5358_v61 = vmul.f32 %v22508_v57, %v5353_v55 }
 0x881   :  { %v5355_v37 = vpop.permute.xlu0 %5354 }
 0x882   :  { %5362 = vrot.lane.b32.xlu1 %v5358_v61, %s22712_s14  ;;  %v5359_v31 = vmul.f32 %v22510_v62, %v5355_v37 }
 0x886   :  { %5364 = vrot.lane.b32.xlu1 %v5359_v31, %s22712_s14 }
 0x88f   :  { %v5343_v29 = vpop.permute.xlu1 %5342 }
 0x890   :  { %v5348_v11 = vmul.f32 %v5343_v29, %v25440_v33 }
 0x893   :  { %v5345_v50 = vpop.permute.xlu1 %5344 }
 0x894   :  { %v5349_v6 = vmul.f32 %v5345_v50, %v25441_v9 }
 0x8f4   :  { %v5363_v53 = vpop.permute.xlu1 %5362 }
 0x8f5   :  { %v23501_v38 = vadd.f32 %v5363_v53, %v5348_v11 }
 0x8f7   :  { %22511 = vtanh.f32 %v23501_v38 }
 0x8f8   :  { %v5365_v42 = vpop.permute.xlu1 %5364 }
 0x8f9   :  { %v23505_v18 = vadd.f32 %v5365_v42, %v5349_v6 }
 0x8fb   :  { %22513 = vtanh.f32 %v23505_v18 }
 0x901   :  { %v22512_v4 = vpop.eup %22511 }
 0x902   :  { %5374 = vrot.lane.b32.xlu0 %v22512_v4, %s22712_s14 }
 0x905   :  { %v22514_v5 = vpop.eup %22513 }
 0x906   :  { %5376 = vrot.lane.b32.xlu1 %v22514_v5, %s22712_s14 }
 0x974   :  { %v5375_v59 = vpop.permute.xlu0 %5374 }
 0x975   :  { %v5380_v44 = vmul.f32 %v22508_v57, %v5375_v59 }
 0x977   :  { %5384 = vrot.lane.b32.xlu0 %v5380_v44, %s22710_s12 }
 0x978   :  { %v5377_v43 = vpop.permute.xlu1 %5376 }
 0x979   :  { %v5381_v46 = vmul.f32 %v22510_v62, %v5377_v43 }
 0x97b   :  { %5386 = vrot.lane.b32.xlu1 %v5381_v46, %s22710_s12 }
 0x9e9   :  { %v5385_v47 = vpop.permute.xlu0 %5384 }
 0x9ea   :  { %5391 = vst.msk [vmem:[#allocation5 + $0x4] sm:$0xf] %vm26_vm0, %v5385_v47  ;;  %5393 = vxpose.xlu0.b32.start.end [1/1] (short) (narrow) %v5385_v47, 32 }
 0x9ed   :  { %v5387_v35 = vpop.permute.xlu1 %5386 }
 0x9ee   :  { %5392 = vst.msk [vmem:[#allocation5 + $0x24] sm:$0xf] %vm26_vm0, %v5387_v35  ;;  %5425 = vxpose.xlu1.b32.start.end [1/1] (short) (narrow) %v5387_v35, 32 }
 0xa6a   :  { %v5409_v40 = vpop.trf.xlu0 }
 0xa6b   :  { %v5457_v32 = vcombine.high %v5409_v40, %v25439_v0  ;;  %v5464_v28 = vrot.slane %v5409_v40, %v22765_v14 }
 0xa6d   :  { %v5471_v58 = vrot.slane %v5457_v32, %v22765_v14 }
 0xa6e   :  { %v5441_v12 = vpop.trf.xlu1  ;;  %v5410_v48 = vpop.trf.xlu0 }
 0xa6f   :  { %v5472_v30 = vcombine.high %v5441_v12, %v25439_v0  ;;  %v5479_v26 = vrot.slane %v5441_v12, %v22765_v14  ;;  %v5530_v41 = vrot.slane %v5410_v48, %v22765_v14  ;;  %v5523_v55 = vcombine.high %v5410_v48, %v25439_v0 }
 0xa71   :  { %v5486_v63 = vrot.slane %v5472_v30, %v22765_v14  ;;  %v5487_v13 = vcombine.low %v5464_v28, %v5479_v26  ;;  %v5488_v3 = vcombine.high %v5464_v28, %v5479_v26  ;;  %v5537_v50 = vrot.slane %v5523_v55, %v22765_v14 }
 0xa72   :  { %v5442_v45 = vpop.trf.xlu1  ;;  %v5411_v5 = vpop.trf.xlu0 }
 0xa73   :  { %v5502_v54 = vrot.slane %v5488_v3, %v22772_v21  ;;  %v5495_v36 = vrot.slane %v5487_v13, %v22772_v21  ;;  %v5504_v57 = vcombine.high %v5471_v58, %v5486_v63  ;;  %v5545_v62 = vrot.slane %v5442_v45, %v22765_v14 }
 0xa74   :  { %v5538_v61 = vcombine.high %v5442_v45, %v25439_v0  ;;  %v5503_v6 = vcombine.low %v5471_v58, %v5486_v63  ;;  %v5596_v43 = vrot.slane %v5411_v5, %v22765_v14  ;;  %v5589_v28 = vcombine.high %v5411_v5, %v25439_v0 }
 0xa75   :  { %5785 = vxpose.xlu1.b32.start.end [1/1] (short) (narrow) %v5502_v54, 8  ;;  %5721 = vxpose.xlu0.b32.start.end [1/1] (short) (narrow) %v5495_v36, 8  ;;  %v5553_v37 = vcombine.low %v5530_v41, %v5545_v62  ;;  %v5519_v31 = vcombine.high %v5495_v36, %v25439_v0  ;;  %v5518_v29 = vrot.slane %v5504_v57, %v22772_v21 }
 0xa76   :  { %v5552_v33 = vrot.slane %v5538_v61, %v22765_v14  ;;  %v5554_v11 = vcombine.high %v5530_v41, %v5545_v62  ;;  %v5520_v9 = vcombine.high %v5502_v54, %v25439_v0  ;;  %v5443_v59 = vpop.trf.xlu1  ;;  %v5511_v44 = vrot.slane %v5503_v6, %v22772_v21  ;;  %v5412_v36 = vpop.trf.xlu0 }
 0xa77   :  { %v5561_v53 = vrot.slane %v5553_v37, %v22772_v21  ;;  %v5611_v47 = vrot.slane %v5443_v59, %v22765_v14  ;;  %v5604_v32 = vcombine.high %v5443_v59, %v25439_v0  ;;  %v5522_v26 = vcombine.high %v5518_v29, %v25439_v0 }
 0xa78   :  { %v5568_v42 = vrot.slane %v5554_v11, %v22772_v21  ;;  %v5569_v4 = vcombine.low %v5537_v50, %v5552_v33  ;;  %v5570_v35 = vcombine.high %v5537_v50, %v5552_v33  ;;  %v5521_v40 = vcombine.high %v5511_v44, %v25439_v0 }
 0xa79   :  { %5753 = vxpose.xlu0.b32.start.end [1/1] (short) (narrow) %v5519_v31, 8  ;;  %5913 = vxpose.xlu1.b32.start.end [1/1] (short) (narrow) %v5518_v29, 8  ;;  %v5619_v12 = vcombine.low %v5596_v43, %v5611_v47  ;;  %v5618_v58 = vrot.slane %v5604_v32, %v22765_v14  ;;  %v5603_v48 = vrot.slane %v5589_v28, %v22765_v14 }
 0xa7a   :  { %v5577_v46 = vrot.slane %v5569_v4, %v22772_v21  ;;  %v5584_v30 = vrot.slane %v5570_v35, %v22772_v21  ;;  %v5620_v63 = vcombine.high %v5596_v43, %v5611_v47  ;;  %v5585_v13 = vcombine.high %v5561_v53, %v25439_v0  ;;  %v5444_v54 = vpop.trf.xlu1 }
 0xa7b   :  { %v5627_v3 = vrot.slane %v5619_v12, %v22772_v21  ;;  %v5635_v41 = vcombine.low %v5603_v48, %v5618_v58  ;;  %v5586_v57 = vcombine.high %v5568_v42, %v25439_v0  ;;  %v5677_v62 = vrot.slane %v5444_v54, %v22765_v14 }
 0xa7c   :  { %v5634_v45 = vrot.slane %v5620_v63, %v22772_v21  ;;  %v5662_v61 = vrot.slane %v5412_v36, %v22765_v14  ;;  %v5636_v37 = vcombine.high %v5603_v48, %v5618_v58  ;;  %v5587_v31 = vcombine.high %v5577_v46, %v25439_v0 }
 0xa7d   :  { %5817 = vxpose.xlu0.b32.start.end [1/1] (short) (narrow) %v5520_v9, 8  ;;  %5977 = vxpose.xlu1.b32.start.end [1/1] (short) (narrow) %v5561_v53, 8  ;;  %v5643_v55 = vrot.slane %v5635_v41, %v22772_v21  ;;  %v5670_v29 = vcombine.high %v5444_v54, %v25439_v0  ;;  %v5655_v50 = vcombine.high %v5412_v36, %v25439_v0 }
 0xa7e   :  { %v5685_v33 = vcombine.low %v5662_v61, %v5677_v62  ;;  %v5650_v11 = vrot.slane %v5636_v37, %v22772_v21  ;;  %v5588_v53 = vcombine.high %v5584_v30, %v25439_v0  ;;  %v5651_v4 = vcombine.high %v5627_v3, %v25439_v0 }
 0xa7f   :  { %v5684_v9 = vrot.slane %v5670_v29, %v22765_v14  ;;  %v5669_v6 = vrot.slane %v5655_v50, %v22765_v14  ;;  %v5652_v43 = vcombine.high %v5634_v45, %v25439_v0  ;;  %v5653_v35 = vcombine.high %v5643_v55, %v25439_v0  ;;  %v22614_v50 = vld [vmem:[%s25245_s0 + $0x8] sm:$0xff] }
 0xa80   :  { %v5693_v5 = vrot.slane %v5685_v33, %v22772_v21  ;;  %v5654_v32 = vcombine.high %v5650_v11, %v25439_v0 }
 0xa81   :  { %5849 = vxpose.xlu0.b32.start.end [1/1] (short) (narrow) %v5511_v44, 8  ;;  %6041 = vxpose.xlu1.b32.start.end [1/1] (short) (narrow) %v5568_v42, 8  ;;  %v5686_v42 = vcombine.high %v5662_v61, %v5677_v62  ;;  %v5701_v44 = vcombine.low %v5669_v6, %v5684_v9  ;;  %v5702_v47 = vcombine.high %v5669_v6, %v5684_v9  ;;  %v25442_v62 = vld [vmem:[#allocation12_spill] sm:$0xff] }
 0xa82   :  { %v5717_v28 = vcombine.high %v5693_v5, %v25439_v0 }
 0xa83   :  { %v5700_v59 = vrot.slane %v5686_v42, %v22772_v21 }
 0xa85   :  { %5881 = vxpose.xlu0.b32.start.end [1/1] (short) (narrow) %v5521_v40, 8  ;;  %6105 = vxpose.xlu1.b32.start.end [1/1] (short) (narrow) %v5577_v46, 8  ;;  %v5709_v46 = vrot.slane %v5701_v44, %v22772_v21  ;;  %v5716_v40 = vrot.slane %v5702_v47, %v22772_v21  ;;  %v5718_v12 = vcombine.high %v5700_v59, %v25439_v0 }
 0xa89   :  { %5945 = vxpose.xlu0.b32.start.end [1/1] (short) (narrow) %v5522_v26, 8  ;;  %6169 = vxpose.xlu1.b32.start.end [1/1] (short) (narrow) %v5584_v30, 8  ;;  %v5719_v30 = vcombine.high %v5709_v46, %v25439_v0  ;;  %v5720_v26 = vcombine.high %v5716_v40, %v25439_v0 }
 0xa8d   :  { %6009 = vxpose.xlu0.b32.start.end [1/1] (short) (narrow) %v5585_v13, 8  ;;  %6233 = vxpose.xlu1.b32.start.end [1/1] (short) (narrow) %v5627_v3, 8 }
 0xa91   :  { %6073 = vxpose.xlu0.b32.start.end [1/1] (short) (narrow) %v5586_v57, 8  ;;  %6297 = vxpose.xlu1.b32.start.end [1/1] (short) (narrow) %v5634_v45, 8 }
 0xa95   :  { %6137 = vxpose.xlu0.b32.start.end [1/1] (short) (narrow) %v5587_v31, 8  ;;  %6361 = vxpose.xlu1.b32.start.end [1/1] (short) (narrow) %v5643_v55, 8  ;;  %v49_v55 = vsub.s32 2, %v25442_v62  ;;  %v22613_v31 = vld [vmem:[%s25245_s0] sm:$0xff] }
 0xa97   :  { %v50_v29 = vrot.slane %v22613_v31, %v49_v55  ;;  %v106_v33 = vrot.slane %v22614_v50, %v49_v55 }
 0xa99   :  { %6201 = vxpose.xlu0.b32.start.end [1/1] (short) (narrow) %v5588_v53, 8  ;;  %6425 = vxpose.xlu1.b32.start.end [1/1] (short) (narrow) %v5650_v11, 8 }
 0xa9d   :  { %6265 = vxpose.xlu0.b32.start.end [1/1] (short) (narrow) %v5651_v4, 8  ;;  %6489 = vxpose.xlu1.b32.start.end [1/1] (short) (narrow) %v5693_v5, 8 }
 0xaa1   :  { %6329 = vxpose.xlu0.b32.start.end [1/1] (short) (narrow) %v5652_v43, 8  ;;  %6553 = vxpose.xlu1.b32.start.end [1/1] (short) (narrow) %v5700_v59, 8 }
 0xaa5   :  { %6393 = vxpose.xlu0.b32.start.end [1/1] (short) (narrow) %v5653_v35, 8  ;;  %6617 = vxpose.xlu1.b32.start.end [1/1] (short) (narrow) %v5709_v46, 8 }
 0xaa9   :  { %6457 = vxpose.xlu0.b32.start.end [1/1] (short) (narrow) %v5654_v32, 8  ;;  %6681 = vxpose.xlu1.b32.start.end [1/1] (short) (narrow) %v5716_v40, 8 }
 0xaad   :  { %6521 = vxpose.xlu0.b32.start.end [1/1] (short) (narrow) %v5717_v28, 8 }
 0xab1   :  { %6585 = vxpose.xlu0.b32.start.end [1/1] (short) (narrow) %v5718_v12, 8 }
 0xab5   :  { %6649 = vxpose.xlu0.b32.start.end [1/1] (short) (narrow) %v5719_v30, 8 }
 0xab9   :  { %6713 = vxpose.xlu0.b32.start.end [1/1] (short) (narrow) %v5720_v26, 8 }
 0xac7   :  { %52 = vbcast.lane.b32.xlu1 %v50_v29, 256 }
 0xae2   :  { %108 = vbcast.lane.b32.xlu0 %v106_v33, 256 }
 0xaf5   :  { %v5801_v58 = vpop.trf.xlu1  ;;  %v5737_v48 = vpop.trf.xlu0 }
 0xaf6   :  { %v6745_v43 = vcombine.low %v5737_v48, %v5801_v58 }
 0xaf8   :  { %v23594_v26 = vrot.slane %v6745_v43, %v22765_v14 }
 0xaf9   :  { %v5769_v63 = vpop.trf.xlu0  ;;  %v5929_v13 = vpop.trf.xlu1 }
 0xafd   :  { %v5833_v3 = vpop.trf.xlu0  ;;  %v5993_v45 = vpop.trf.xlu1 }
 0xafe   :  { %v6753_v4 = vcombine.low %v5769_v63, %v5833_v3 }
 0xb00   :  { %v23585_v40 = vrot.slane %v6753_v4, %v22765_v14 }
 0xb01   :  { %v5865_v41 = vpop.trf.xlu0  ;;  %v6057_v54 = vpop.trf.xlu1 }
 0xb02   :  { %v6761_v5 = vcombine.low %v5865_v41, %v5929_v13  ;;  %v6813_v47 = vcombine.low %v5993_v45, %v6057_v54  ;;  %v6777_v13 = vcombine.low %v23594_v26, %v23585_v40 }
 0xb04   :  { %v23588_v32 = vrot.slane %v6761_v5, %v22765_v14  ;;  %v6820_v48 = vrot.slane %v6813_v47, %v22765_v14 }
 0xb05   :  { %v5897_v36 = vpop.trf.xlu0  ;;  %v6121_v57 = vpop.trf.xlu1 }
 0xb09   :  { %v5961_v61 = vpop.trf.xlu0  ;;  %v6185_v37 = vpop.trf.xlu1 }
 0xb0a   :  { %v6769_v42 = vcombine.low %v5897_v36, %v5961_v61  ;;  %v6829_v12 = vcombine.low %v6121_v57, %v6185_v37  ;;  %v6785_v61 = vrot.slane %v6777_v13, %v22772_v21 }
 0xb0c   :  { %v23582_v46 = vrot.slane %v6769_v42, %v22765_v14  ;;  %v6836_v45 = vrot.slane %v6829_v12, %v22765_v14 }
 0xb0d   :  { %v6025_v11 = vpop.trf.xlu0  ;;  %v23577_v53 = vpop.trf.xlu1 }
 0xb0e   :  { %v6793_v58 = vcombine.low %v23588_v32, %v23582_v46 }
 0xb10   :  { %v6801_v57 = vrot.slane %v6793_v58, %v22772_v21 }
 0xb11   :  { %v6089_v9 = vpop.trf.xlu0  ;;  %v23579_v6 = vpop.trf.xlu1 }
 0xb12   :  { %v6821_v59 = vcombine.low %v6025_v11, %v6089_v9  ;;  %v6809_v50 = vcombine.low %v6785_v61, %v6801_v57  ;;  %v6810_v11 = vcombine.high %v6785_v61, %v6801_v57  ;;  %v6881_v61 = vcombine.low %v23577_v53, %v23579_v6 }
 0xb13   :  { %v6778_v53 = vcombine.high %v23594_v26, %v23585_v40  ;;  %v6794_v6 = vcombine.high %v23588_v32, %v23582_v46 }
 0xb14   :  { %v23591_v28 = vrot.slane %v6821_v59, %v22765_v14 }
 0xb15   :  { %v6153_v44 = vpop.trf.xlu0  ;;  %v6377_v35 = vpop.trf.xlu1  ;;  %v6808_v46 = vrot.slane %v6794_v6, %v22772_v21 }
 0xb16   :  { %v6845_v3 = vcombine.low %v6820_v48, %v23591_v28 }
 0xb18   :  { %v6853_v37 = vrot.slane %v6845_v3, %v22772_v21 }
 0xb19   :  { %v6217_v30 = vpop.trf.xlu0  ;;  %v6441_v36 = vpop.trf.xlu1 }
 0xb1a   :  { %v6837_v63 = vcombine.low %v6153_v44, %v6217_v30  ;;  %v6897_v13 = vcombine.low %v6377_v35, %v6441_v36  ;;  %v6888_v35 = vrot.slane %v6881_v61, %v22765_v14 }
 0xb1c   :  { %v6844_v41 = vrot.slane %v6837_v63, %v22765_v14 }
 0xb1d   :  { %v6281_v54 = vpop.trf.xlu0  ;;  %v6505_v42 = vpop.trf.xlu1 }
 0xb1e   :  { %v6861_v55 = vcombine.low %v6836_v45, %v6844_v41 }
 0xb20   :  { %v6869_v31 = vrot.slane %v6861_v55, %v22772_v21 }
 0xb21   :  { %v6345_v29 = vpop.trf.xlu0  ;;  %v6569_v43 = vpop.trf.xlu1 }
 0xb22   :  { %v6877_v33 = vcombine.low %v6853_v37, %v6869_v31  ;;  %v6878_v9 = vcombine.high %v6853_v37, %v6869_v31  ;;  %v6889_v63 = vcombine.low %v6281_v54, %v6345_v29  ;;  %v6949_v31 = vcombine.low %v6505_v42, %v6569_v43 }
 0xb23   :  { %v6846_v42 = vcombine.high %v6820_v48, %v23591_v28 }
 0xb24   :  { %v22281_v4 = vpack.c.bf16 %v6877_v33, %v6809_v50  ;;  %v22289_v5 = vpack.c.bf16 %v6878_v9, %v6810_v11  ;;  %v6896_v50 = vrot.slane %v6889_v63, %v22765_v14  ;;  %v6904_v33 = vrot.slane %v6897_v13, %v22765_v14 }
 0xb25   :  { %v6409_v59 = vpop.trf.xlu0  ;;  %v6633_v12 = vpop.trf.xlu1  ;;  %v6956_v36 = vrot.slane %v6949_v31, %v22765_v14  ;;  %v6860_v40 = vrot.slane %v6846_v42, %v22772_v21 }
 0xb26   :  { %22282 = vmatprep.subr.bf16.mxu0 %v22281_v4  ;;  %22290 = vmatprep.subr.bf16.mxu1 %v22289_v5 }
 0xb27   :  { %22284 = vmatpush3.bf16.msra.mxu0 %v22281_v4  ;;  %22292 = vmatpush3.bf16.msra.mxu1 %v22289_v5  ;;  %v6862_v4 = vcombine.high %v6836_v45, %v6844_v41 }
 0xb29   :  { %v6473_v44 = vpop.trf.xlu0  ;;  %v6697_v55 = vpop.trf.xlu1  ;;  %v6876_v41 = vrot.slane %v6862_v4, %v22772_v21 }
 0xb2a   :  { %v6905_v58 = vcombine.low %v6409_v59, %v6473_v44  ;;  %v6965_v9 = vcombine.low %v6633_v12, %v6697_v55  ;;  %v6913_v59 = vcombine.low %v6888_v35, %v6896_v50 }
 0xb2b   :  { %v6879_v13 = vcombine.low %v6860_v40, %v6876_v41 }
 0xb2c   :  { %v6912_v37 = vrot.slane %v6905_v58, %v22765_v14  ;;  %v6972_v43 = vrot.slane %v6965_v9, %v22765_v14  ;;  %v6921_v32 = vrot.slane %v6913_v59, %v22772_v21  ;;  %v6914_v9 = vcombine.high %v6888_v35, %v6896_v50 }
 0xb2d   :  { %v6537_v47 = vpop.trf.xlu0 }
 0xb2e   :  { %v6929_v54 = vcombine.low %v6904_v33, %v6912_v37  ;;  %v6930_v58 = vcombine.high %v6904_v33, %v6912_v37 }
 0xb30   :  { %v6944_v6 = vrot.slane %v6930_v58, %v22772_v21  ;;  %v25454_v58 = vld [vmem:[#allocation25_spill] sm:$0xff] }
 0xb31   :  { %v6601_v30 = vpop.trf.xlu0 }
 0xb32   :  { %v6957_v3 = vcombine.low %v6537_v47, %v6601_v30  ;;  %v6937_v47 = vrot.slane %v6929_v54, %v22772_v21  ;;  %v6792_v30 = vrot.slane %v6778_v53, %v22772_v21 }
 0xb34   :  { %v6964_v11 = vrot.slane %v6957_v3, %v22765_v14  ;;  %v6880_v3 = vcombine.high %v6860_v40, %v6876_v41  ;;  %v6945_v55 = vcombine.low %v6921_v32, %v6937_v47  ;;  %v6946_v61 = vcombine.high %v6921_v32, %v6937_v47  ;;  %v25444_v41 = vld [vmem:[#allocation17_spill] sm:$0xff]  ;;  %v25445_v47 = vld [vmem:[#allocation26_spill] sm:$0xff]  ;;  %v25448_v40 = vld [vmem:[#allocation19_spill] sm:$0xff] }
 0xb35   :  { %v6665_v57 = vpop.trf.xlu0  ;;  %v6812_v53 = vcombine.high %v6792_v30, %v6808_v46  ;;  %v25451_v32 = vld [vmem:[#allocation32_spill] sm:$0xff] }
 0xb36   :  { %v6981_v44 = vcombine.low %v6956_v36, %v6964_v11  ;;  %v6982_v63 = vcombine.high %v6956_v36, %v6964_v11  ;;  %v6928_v11 = vrot.slane %v6914_v9, %v22772_v21  ;;  %v25462_v9 = vld [vmem:[#allocation33_spill] sm:$0xff] }
 0xb37   :  { %v22305_v33 = vpack.c.bf16 %v6880_v3, %v6812_v53  ;;  %v25457_v3 = vld [vmem:[#allocation38_spill] sm:$0xff]  ;;  %v25467_v53 = vld [vmem:[#allocation48_spill] sm:$0xff] }
 0xb38   :  { %v6989_v28 = vrot.slane %v6981_v44, %v22772_v21  ;;  %v6996_v42 = vrot.slane %v6982_v63, %v22772_v21  ;;  %v6947_v35 = vcombine.low %v6928_v11, %v6944_v6  ;;  %v6948_v59 = vcombine.high %v6928_v11, %v6944_v6  ;;  %v25455_v63 = vld [vmem:[#allocation36_spill] sm:$0xff]  ;;  %v25468_v6 = vld [vmem:[#allocation39_spill] sm:$0xff] }
 0xb39   :  { %v6729_v5 = vpop.trf.xlu0  ;;  %v25472_v11 = vld [vmem:[#allocation43_spill] sm:$0xff] }
 0xb3a   :  { %v6973_v29 = vcombine.low %v6665_v57, %v6729_v5 }
 0xb3c   :  { %v6980_v45 = vrot.slane %v6973_v29, %v22765_v14  ;;  %v6811_v29 = vcombine.low %v6792_v30, %v6808_v46  ;;  %v25447_v30 = vld [vmem:[#allocation28_spill] sm:$0xff]  ;;  %v25450_v46 = vld [vmem:[#allocation21_spill] sm:$0xff] }
 0xb3e   :  { %v6997_v12 = vcombine.low %v6972_v43, %v6980_v45  ;;  %v6998_v26 = vcombine.high %v6972_v43, %v6980_v45  ;;  %v22297_v37 = vpack.c.bf16 %v6879_v13, %v6811_v29  ;;  %v25443_v45 = vld [vmem:[#allocation24_spill] sm:$0xff]  ;;  %v25456_v13 = vld [vmem:[#allocation27_spill] sm:$0xff]  ;;  %v25466_v29 = vld [vmem:[#allocation37_spill] sm:$0xff] }
 0xb40   :  { %v7005_v48 = vrot.slane %v6997_v12, %v22772_v21  ;;  %v7012_v4 = vrot.slane %v6998_v26, %v22772_v21  ;;  %v25446_v12 = vld [vmem:[#allocation18_spill] sm:$0xff] }
 0xb41   :  { %v25449_v26 = vld [vmem:[#allocation30_spill] sm:$0xff] }
 0xb42   :  { %v7013_v57 = vcombine.low %v6989_v28, %v7005_v48  ;;  %v7014_v31 = vcombine.high %v6989_v28, %v7005_v48  ;;  %v7015_v36 = vcombine.low %v6996_v42, %v7012_v4  ;;  %v7016_v50 = vcombine.high %v6996_v42, %v7012_v4  ;;  %v25452_v28 = vld [vmem:[#allocation23_spill] sm:$0xff]  ;;  %v25453_v48 = vld [vmem:[#allocation34_spill] sm:$0xff]  ;;  %v25463_v4 = vld [vmem:[#allocation44_spill] sm:$0xff] }
 0xb43   :  { %v25469_v42 = vld [vmem:[#allocation50_spill] sm:$0xff] }
 0xb44   :  { %v22285_v5 = vpack.c.bf16 %v7013_v57, %v6945_v55  ;;  %v22293_v54 = vpack.c.bf16 %v7014_v31, %v6946_v61  ;;  %v22301_v44 = vpack.c.bf16 %v7015_v36, %v6947_v35  ;;  %v22309_v43 = vpack.c.bf16 %v7016_v50, %v6948_v59  ;;  %v25458_v55 = vld [vmem:[#allocation29_spill] sm:$0xff]  ;;  %v25459_v57 = vld [vmem:[#allocation40_spill] sm:$0xff]  ;;  %v25460_v61 = vld [vmem:[#allocation31_spill] sm:$0xff] }
 0xb45   :  { %v25461_v31 = vld [vmem:[#allocation42_spill] sm:$0xff]  ;;  %v25474_v50 = vld [vmem:[#allocation45_spill] sm:$0xff]  ;;  %v25475_v35 = vld [vmem:[#allocation55_spill] sm:$0xff] }
 0xb46   :  { %22286 = vmatprep.subr.bf16.mxu0 %v22285_v5  ;;  %22294 = vmatprep.subr.bf16.mxu1 %v22293_v54  ;;  %v25473_v36 = vld [vmem:[#allocation54_spill] sm:$0xff]  ;;  %v25476_v59 = vld [vmem:[#allocation47_spill] sm:$0xff] }
 0xb47   :  { %22288 = vmatpush3.bf16.msra.mxu0 %v22285_v5  ;;  %22296 = vmatpush3.bf16.msra.mxu1 %v22293_v54  ;;  %v25464_v5 = vld [vmem:[#allocation35_spill] sm:$0xff]  ;;  %v25465_v54 = vld [vmem:[#allocation46_spill] sm:$0xff] }
 0xb48   :  { %22298 = vmatprep.subr.bf16.mxu0 %v22297_v37  ;;  %22306 = vmatprep.subr.bf16.mxu1 %v22305_v33 }
 0xb4a   :  { %21458 = vmatmul.mubr.msk.f32.vlgmr.msra.gmra.mrb[64].mxu0 %vm1871_vm1, %v22952_v34  ;;  %21490 = vmatmul.mubr.msk.f32.vlgmr.msra.gmra.mrb[64].mxu1 %vm1871_vm1, %v22914_v49 }
 0xb4b   :  { %21460 = vmatprep.mubr.msk.f32.mxu0 %vm1871_vm1, %v22959_v51  ;;  %21492 = vmatprep.mubr.msk.f32.mxu1 %vm1871_vm1, %v22916_v52 }
 0xb4c   :  { %22300 = vmatpush3.bf16.msra.mxu0 %v22297_v37  ;;  %22308 = vmatpush3.bf16.msra.mxu1 %v22305_v33  ;;  %v25470_v37 = vld [vmem:[#allocation41_spill] sm:$0xff]  ;;  %v25471_v33 = vld [vmem:[#allocation52_spill] sm:$0xff] }
 0xb4d   :  { %22302 = vmatprep.subr.bf16.mxu0 %v22301_v44  ;;  %22310 = vmatprep.subr.bf16.mxu1 %v22309_v43 }
 0xb4e   :  { %21461 = vmatmul.mubr.msk.f32.gmra.mrb[66].mxu0 %vm1871_vm1, %v22964_v1  ;;  %21493 = vmatmul.mubr.msk.f32.gmra.mrb[66].mxu1 %vm1871_vm1, %v22921_v60 }
 0xb4f   :  { %21463 = vmatprep.mubr.msk.f32.mxu0 %vm1871_vm1, %v22978_v7  ;;  %21495 = vmatprep.mubr.msk.f32.mxu1 %vm1871_vm1, %v22928_v8 }
 0xb50   :  { %22304 = vmatpush3.bf16.msra.mxu0 %v22301_v44  ;;  %22312 = vmatpush3.bf16.msra.mxu1 %v22309_v43  ;;  %v25477_v44 = vld [vmem:[#allocation56_spill] sm:$0xff]  ;;  %v25478_v43 = vld [vmem:[#allocation49_spill] sm:$0xff] }
 0xb52   :  { %21464 = vmatmul.mubr.msk.f32.gmra.mrb[68].mxu0 %vm1871_vm1, %v23001_v17  ;;  %21496 = vmatmul.mubr.msk.f32.gmra.mrb[68].mxu1 %vm1871_vm1, %v22942_v20 }
 0xb53   :  { %21466 = vmatprep.mubr.msk.f32.mxu0 %vm1871_vm1, %v23011_v23  ;;  %21498 = vmatprep.mubr.msk.f32.mxu1 %vm1871_vm1, %v22955_v39 }
 0xb56   :  { %21467 = vmatmul.mubr.msk.f32.gmra.mrb[70].mxu0 %vm1871_vm1, %v23021_v25  ;;  %21499 = vmatmul.mubr.msk.f32.gmra.mrb[70].mxu1 %vm1871_vm1, %v22962_v56 }
 0xb57   :  { %21469 = vmatprep.mubr.msk.f32.mxu0 %vm1871_vm1, %v23031_v27  ;;  %21501 = vmatprep.mubr.msk.f32.mxu1 %vm1871_vm1, %v22966_v2 }
 0xb5a   :  { %21470 = vmatmul.mubr.msk.f32.gmra.mrb[72].mxu0 %vm1871_vm1, %v23041_v15  ;;  %21502 = vmatmul.mubr.msk.f32.gmra.mrb[72].mxu1 %vm1871_vm1, %v22990_v10 }
 0xb5b   :  { %21472 = vmatprep.mubr.msk.f32.mxu0 %vm1871_vm1, %v23051_v16  ;;  %21504 = vmatprep.mubr.msk.f32.mxu1 %vm1871_vm1, %v23003_v19 }
 0xb5e   :  { %21473 = vmatmul.mubr.msk.f32.gmra.mrb[74].mxu0 %vm1871_vm1, %v23059_v22  ;;  %21505 = vmatmul.mubr.msk.f32.gmra.mrb[74].mxu1 %vm1871_vm1, %v23013_v24 }
 0xb5f   :  { %21475 = vmatprep.mubr.msk.f32.mxu0 %vm1871_vm1, %v25443_v45  ;;  %21507 = vmatprep.mubr.msk.f32.mxu1 %vm1871_vm1, %v25444_v41 }
 0xb62   :  { %21476 = vmatmul.mubr.msk.f32.gmra.mrb[76].mxu0 %vm1871_vm1, %v25445_v47  ;;  %21508 = vmatmul.mubr.msk.f32.gmra.mrb[76].mxu1 %vm1871_vm1, %v25446_v12 }
 0xb63   :  { %21478 = vmatprep.mubr.msk.f32.mxu0 %vm1871_vm1, %v25447_v30  ;;  %21510 = vmatprep.mubr.msk.f32.mxu1 %vm1871_vm1, %v25448_v40 }
 0xb66   :  { %21479 = vmatmul.mubr.msk.f32.gmra.mrb[78].mxu0 %vm1871_vm1, %v25449_v26  ;;  %21511 = vmatmul.mubr.msk.f32.gmra.mrb[78].mxu1 %vm1871_vm1, %v25450_v46 }
 0xb67   :  { %21521 = vmatprep.mubr.msk.f32.mxu0 %vm1871_vm1, %v25451_v32  ;;  %21553 = vmatprep.mubr.msk.f32.mxu1 %vm1871_vm1, %v25452_v28 }
 0xb6a   :  { %21522 = vmatmul.mubr.msk.f32.vlgmr.msra.gmra.mrb[80].mxu0 %vm1871_vm1, %v25453_v48  ;;  %21554 = vmatmul.mubr.msk.f32.vlgmr.msra.gmra.mrb[80].mxu1 %vm1871_vm1, %v25454_v58 }
 0xb6b   :  { %21524 = vmatprep.mubr.msk.f32.mxu0 %vm1871_vm1, %v25455_v63  ;;  %21556 = vmatprep.mubr.msk.f32.mxu1 %vm1871_vm1, %v25456_v13 }
 0xb6e   :  { %21525 = vmatmul.mubr.msk.f32.gmra.mrb[82].mxu0 %vm1871_vm1, %v25457_v3  ;;  %21557 = vmatmul.mubr.msk.f32.gmra.mrb[82].mxu1 %vm1871_vm1, %v25458_v55 }
 0xb6f   :  { %21527 = vmatprep.mubr.msk.f32.mxu0 %vm1871_vm1, %v25459_v57  ;;  %21559 = vmatprep.mubr.msk.f32.mxu1 %vm1871_vm1, %v25460_v61 }
 0xb72   :  { %21528 = vmatmul.mubr.msk.f32.gmra.mrb[84].mxu0 %vm1871_vm1, %v25461_v31  ;;  %21560 = vmatmul.mubr.msk.f32.gmra.mrb[84].mxu1 %vm1871_vm1, %v25462_v9 }
 0xb73   :  { %21530 = vmatprep.mubr.msk.f32.mxu0 %vm1871_vm1, %v25463_v4  ;;  %21562 = vmatprep.mubr.msk.f32.mxu1 %vm1871_vm1, %v25464_v5 }
 0xb76   :  { %21531 = vmatmul.mubr.msk.f32.gmra.mrb[86].mxu0 %vm1871_vm1, %v25465_v54  ;;  %21563 = vmatmul.mubr.msk.f32.gmra.mrb[86].mxu1 %vm1871_vm1, %v25466_v29 }
 0xb77   :  { %21533 = vmatprep.mubr.msk.f32.mxu0 %vm1871_vm1, %v25467_v53  ;;  %21565 = vmatprep.mubr.msk.f32.mxu1 %vm1871_vm1, %v25468_v6 }
 0xb7a   :  { %21534 = vmatmul.mubr.msk.f32.gmra.mrb[88].mxu0 %vm1871_vm1, %v25469_v42  ;;  %21566 = vmatmul.mubr.msk.f32.gmra.mrb[88].mxu1 %vm1871_vm1, %v25470_v37  ;;  %v109_v37 = vpop.permute.xlu0 %108 }
 0xb7b   :  { %21536 = vmatprep.mubr.msk.f32.mxu0 %vm1871_vm1, %v25471_v33  ;;  %21568 = vmatprep.mubr.msk.f32.mxu1 %vm1871_vm1, %v25472_v11  ;;  %v25479_v33 = vld [vmem:[#allocation57_spill] sm:$0xff]  ;;  %v25480_v11 = vld [vmem:[#allocation51_spill] sm:$0xff] }
 0xb7e   :  { %21537 = vmatmul.mubr.msk.f32.gmra.mrb[90].mxu0 %vm1871_vm1, %v25473_v36  ;;  %21569 = vmatmul.mubr.msk.f32.gmra.mrb[90].mxu1 %vm1871_vm1, %v25474_v50  ;;  %v25481_v36 = vld [vmem:[#allocation58_spill] sm:$0xff]  ;;  %v25482_v50 = vld [vmem:[#allocation53_spill] sm:$0xff] }
 0xb7f   :  { %21539 = vmatprep.mubr.msk.f32.mxu0 %vm1871_vm1, %v25475_v35  ;;  %21571 = vmatprep.mubr.msk.f32.mxu1 %vm1871_vm1, %v25476_v59  ;;  %v25483_v35 = vld [vmem:[#allocation14_spill] sm:$0xff]  ;;  %v25484_v59 = vld [vmem:[#allocation13_spill] sm:$0xff] }
 0xb82   :  { %21540 = vmatmul.mubr.msk.f32.gmra.mrb[92].mxu0 %vm1871_vm1, %v25477_v44  ;;  %21572 = vmatmul.mubr.msk.f32.gmra.mrb[92].mxu1 %vm1871_vm1, %v25478_v43  ;;  %v53_v44 = vpop.permute.xlu1 %52 }
 0xb83   :  { %21542 = vmatprep.mubr.msk.f32.mxu0 %vm1871_vm1, %v25479_v33  ;;  %21574 = vmatprep.mubr.msk.f32.mxu1 %vm1871_vm1, %v25480_v11  ;;  %v22615_v33 = vld [vmem:[%s25246_s1] sm:$0xf] }
 0xb84   :  { %v148_v43 = vmul.f32 %v22615_v33, %v53_v44  ;;  %v22616_v11 = vld [vmem:[%s25247_s2] sm:$0xf] }
 0xb86   :  { %21543 = vmatmul.mubr.msk.f32.gmra.mrb[94].mxu0 %vm1871_vm1, %v25481_v36  ;;  %21575 = vmatmul.mubr.msk.f32.gmra.mrb[94].mxu1 %vm1871_vm1, %v25482_v50  ;;  %v165_v36 = vadd.f32 %v22616_v11, %v148_v43  ;;  %v156_v50 = vmul.f32 %v22615_v33, %v109_v37 }
 0xb87   :  { %21585 = vmatprep.mubr.msk.f32.mxu0 %vm1871_vm1, %v25483_v35  ;;  %21617 = vmatprep.mubr.msk.f32.mxu1 %vm1871_vm1, %v25484_v59 }
 0xb88   :  { %181 = vst [vmem:[#allocation2 + $0x8] sm:$0xf] %v165_v36  ;;  %v173_v42 = vadd.f32 %v22616_v11, %v156_v50 }
 0xb8a   :  { %189 = vst [vmem:[#allocation2 + $0x28] sm:$0xf] %v173_v42 }
 0xc1d   :  { %v21459_v35 = vpop.f32.mrb[64].mxu0  ;;  %v21491_v6 = vpop.f32.mrb[64].mxu1 }
 0xc1e   :  { %v7083_v53 = vpop.f32.mrb[65].mxu0  ;;  %v7228_v59 = vpop.f32.mrb[65].mxu1 }
 0xc1f   :  { %7629 = vxpose.xlu0.b32.start [1/16] (narrow) %v7228_v59, 8  ;;  %7597 = vxpose.xlu1.b32.start [1/16] (narrow) %v7083_v53, 8 }
 0xc21   :  { %v21462_v29 = vpop.f32.mrb[66].mxu0  ;;  %v21494_v54 = vpop.f32.mrb[66].mxu1 }
 0xc22   :  { %v7093_v5 = vpop.f32.mrb[67].mxu0  ;;  %v7238_v44 = vpop.f32.mrb[67].mxu1 }
 0xc23   :  { %7630 = vxpose.xlu0.b32.cont [2/16] (narrow) %v21491_v6, 8  ;;  %7598 = vxpose.xlu1.b32.cont [2/16] (narrow) %v21459_v35, 8 }
 0xc25   :  { %v21465_v4 = vpop.f32.mrb[68].mxu0  ;;  %v21497_v9 = vpop.f32.mrb[68].mxu1 }
 0xc26   :  { %v7103_v43 = vpop.f32.mrb[69].mxu0  ;;  %v7248_v36 = vpop.f32.mrb[69].mxu1 }
 0xc27   :  { %7631 = vxpose.xlu0.b32.cont [3/16] (narrow) %v7238_v44, 8  ;;  %7599 = vxpose.xlu1.b32.cont [3/16] (narrow) %v7093_v5, 8 }
 0xc29   :  { %v21468_v37 = vpop.f32.mrb[70].mxu0  ;;  %v21500_v42 = vpop.f32.mrb[70].mxu1 }
 0xc2a   :  { %v7113_v33 = vpop.f32.mrb[71].mxu0  ;;  %v7258_v11 = vpop.f32.mrb[71].mxu1 }
 0xc2b   :  { %7632 = vxpose.xlu0.b32.cont [4/16] (narrow) %v21494_v54, 8  ;;  %7600 = vxpose.xlu1.b32.cont [4/16] (narrow) %v21462_v29, 8 }
 0xc2d   :  { %v21471_v50 = vpop.f32.mrb[72].mxu0  ;;  %v21503_v53 = vpop.f32.mrb[72].mxu1 }
 0xc2e   :  { %v7123_v59 = vpop.f32.mrb[73].mxu0  ;;  %v7268_v31 = vpop.f32.mrb[73].mxu1 }
 0xc2f   :  { %7633 = vxpose.xlu0.b32.cont [5/16] (narrow) %v7248_v36, 8  ;;  %7601 = vxpose.xlu1.b32.cont [5/16] (narrow) %v7103_v43, 8 }
 0xc31   :  { %v21474_v6 = vpop.f32.mrb[74].mxu0  ;;  %v21506_v35 = vpop.f32.mrb[74].mxu1 }
 0xc32   :  { %v7133_v61 = vpop.f32.mrb[75].mxu0  ;;  %v7278_v57 = vpop.f32.mrb[75].mxu1 }
 0xc33   :  { %7634 = vxpose.xlu0.b32.cont [6/16] (narrow) %v21497_v9, 8  ;;  %7602 = vxpose.xlu1.b32.cont [6/16] (narrow) %v21465_v4, 8 }
 0xc35   :  { %v21477_v44 = vpop.f32.mrb[76].mxu0  ;;  %v21509_v5 = vpop.f32.mrb[76].mxu1 }
 0xc36   :  { %v7143_v55 = vpop.f32.mrb[77].mxu0  ;;  %v7288_v3 = vpop.f32.mrb[77].mxu1 }
 0xc37   :  { %7635 = vxpose.xlu0.b32.cont [7/16] (narrow) %v7258_v11, 8  ;;  %7603 = vxpose.xlu1.b32.cont [7/16] (narrow) %v7113_v33, 8 }
 0xc39   :  { %v21480_v54 = vpop.f32.mrb[78].mxu0  ;;  %v21512_v29 = vpop.f32.mrb[78].mxu1 }
 0xc3a   :  { %v7153_v13 = vpop.f32.mrb[79].mxu0  ;;  %v7298_v63 = vpop.f32.mrb[79].mxu1 }
 0xc3b   :  { %7636 = vxpose.xlu0.b32.cont [8/16] (narrow) %v21500_v42, 8  ;;  %7604 = vxpose.xlu1.b32.cont [8/16] (narrow) %v21468_v37, 8 }
 0xc3d   :  { %v21523_v36 = vpop.f32.mrb[80].mxu0  ;;  %v21555_v43 = vpop.f32.mrb[80].mxu1 }
 0xc3e   :  { %v7373_v58 = vpop.f32.mrb[81].mxu0  ;;  %v7518_v48 = vpop.f32.mrb[81].mxu1 }
 0xc3f   :  { %7637 = vxpose.xlu0.b32.cont [9/16] (narrow) %v7268_v31, 8  ;;  %7605 = vxpose.xlu1.b32.cont [9/16] (narrow) %v7123_v59, 8 }
 0xc41   :  { %v21526_v9 = vpop.f32.mrb[82].mxu0  ;;  %v21558_v4 = vpop.f32.mrb[82].mxu1 }
 0xc42   :  { %v7383_v28 = vpop.f32.mrb[83].mxu0  ;;  %v7528_v32 = vpop.f32.mrb[83].mxu1 }
 0xc43   :  { %7638 = vxpose.xlu0.b32.cont [10/16] (narrow) %v21503_v53, 8  ;;  %7606 = vxpose.xlu1.b32.cont [10/16] (narrow) %v21471_v50, 8 }
 0xc45   :  { %v21529_v11 = vpop.f32.mrb[84].mxu0  ;;  %v21561_v33 = vpop.f32.mrb[84].mxu1 }
 0xc46   :  { %v7393_v46 = vpop.f32.mrb[85].mxu0  ;;  %v7538_v26 = vpop.f32.mrb[85].mxu1 }
 0xc47   :  { %7639 = vxpose.xlu0.b32.cont [11/16] (narrow) %v7278_v57, 8  ;;  %7607 = vxpose.xlu1.b32.cont [11/16] (narrow) %v7133_v61, 8 }
 0xc49   :  { %v21532_v42 = vpop.f32.mrb[86].mxu0  ;;  %v21564_v37 = vpop.f32.mrb[86].mxu1 }
 0xc4a   :  { %v7403_v40 = vpop.f32.mrb[87].mxu0  ;;  %v7548_v30 = vpop.f32.mrb[87].mxu1 }
 0xc4b   :  { %7640 = vxpose.xlu0.b32.cont [12/16] (narrow) %v21506_v35, 8  ;;  %7608 = vxpose.xlu1.b32.cont [12/16] (narrow) %v21474_v6, 8 }
 0xc4d   :  { %v21535_v31 = vpop.f32.mrb[88].mxu0  ;;  %v21567_v59 = vpop.f32.mrb[88].mxu1 }
 0xc4e   :  { %v7413_v12 = vpop.f32.mrb[89].mxu0  ;;  %v7558_v47 = vpop.f32.mrb[89].mxu1 }
 0xc4f   :  { %7641 = vxpose.xlu0.b32.cont [13/16] (narrow) %v7288_v3, 8  ;;  %7609 = vxpose.xlu1.b32.cont [13/16] (narrow) %v7143_v55, 8 }
 0xc51   :  { %v21538_v53 = vpop.f32.mrb[90].mxu0  ;;  %v21570_v50 = vpop.f32.mrb[90].mxu1 }
 0xc52   :  { %v7423_v41 = vpop.f32.mrb[91].mxu0  ;;  %v7568_v45 = vpop.f32.mrb[91].mxu1 }
 0xc53   :  { %7642 = vxpose.xlu0.b32.cont [14/16] (narrow) %v21509_v5, 8  ;;  %7610 = vxpose.xlu1.b32.cont [14/16] (narrow) %v21477_v44, 8 }
 0xc55   :  { %v21541_v57 = vpop.f32.mrb[92].mxu0  ;;  %v21573_v61 = vpop.f32.mrb[92].mxu1 }
 0xc56   :  { %v7433_v24 = vpop.f32.mrb[93].mxu0  ;;  %v7578_v22 = vpop.f32.mrb[93].mxu1 }
 0xc57   :  { %7643 = vxpose.xlu0.b32.cont [15/16] (narrow) %v7298_v63, 8  ;;  %7611 = vxpose.xlu1.b32.cont [15/16] (narrow) %v7153_v13, 8 }
 0xc59   :  { %v21544_v35 = vpop.f32.mrb[94].mxu0  ;;  %v21576_v6 = vpop.f32.mrb[94].mxu1 }
 0xc5a   :  { %v7443_v19 = vpop.f32.mrb[95].mxu0  ;;  %v7588_v16 = vpop.f32.mrb[95].mxu1 }
 0xc5b   :  { %7644 = vxpose.xlu0.b32.end [16/16] (narrow) %v21512_v29, 8  ;;  %7612 = vxpose.xlu1.b32.end [16/16] (narrow) %v21480_v54, 8 }
 0xc5f   :  { %7693 = vxpose.xlu0.b32.start [1/16] (narrow) %v7518_v48, 8  ;;  %7661 = vxpose.xlu1.b32.start [1/16] (narrow) %v7373_v58, 8 }
 0xc63   :  { %7694 = vxpose.xlu0.b32.cont [2/16] (narrow) %v21555_v43, 8  ;;  %7662 = vxpose.xlu1.b32.cont [2/16] (narrow) %v21523_v36, 8 }
 0xc67   :  { %7695 = vxpose.xlu0.b32.cont [3/16] (narrow) %v7528_v32, 8  ;;  %7663 = vxpose.xlu1.b32.cont [3/16] (narrow) %v7383_v28, 8 }
 0xc6b   :  { %7696 = vxpose.xlu0.b32.cont [4/16] (narrow) %v21558_v4, 8  ;;  %7664 = vxpose.xlu1.b32.cont [4/16] (narrow) %v21526_v9, 8 }
 0xc6f   :  { %7697 = vxpose.xlu0.b32.cont [5/16] (narrow) %v7538_v26, 8  ;;  %7665 = vxpose.xlu1.b32.cont [5/16] (narrow) %v7393_v46, 8 }
 0xc73   :  { %7698 = vxpose.xlu0.b32.cont [6/16] (narrow) %v21561_v33, 8  ;;  %7666 = vxpose.xlu1.b32.cont [6/16] (narrow) %v21529_v11, 8 }
 0xc77   :  { %7699 = vxpose.xlu0.b32.cont [7/16] (narrow) %v7548_v30, 8  ;;  %7667 = vxpose.xlu1.b32.cont [7/16] (narrow) %v7403_v40, 8 }
 0xc7b   :  { %7700 = vxpose.xlu0.b32.cont [8/16] (narrow) %v21564_v37, 8  ;;  %7668 = vxpose.xlu1.b32.cont [8/16] (narrow) %v21532_v42, 8 }
 0xc7f   :  { %7701 = vxpose.xlu0.b32.cont [9/16] (narrow) %v7558_v47, 8  ;;  %7669 = vxpose.xlu1.b32.cont [9/16] (narrow) %v7413_v12, 8 }
 0xc83   :  { %7702 = vxpose.xlu0.b32.cont [10/16] (narrow) %v21567_v59, 8  ;;  %7670 = vxpose.xlu1.b32.cont [10/16] (narrow) %v21535_v31, 8 }
 0xc87   :  { %7703 = vxpose.xlu0.b32.cont [11/16] (narrow) %v7568_v45, 8  ;;  %7671 = vxpose.xlu1.b32.cont [11/16] (narrow) %v7423_v41, 8 }
 0xc8b   :  { %7704 = vxpose.xlu0.b32.cont [12/16] (narrow) %v21570_v50, 8  ;;  %7672 = vxpose.xlu1.b32.cont [12/16] (narrow) %v21538_v53, 8 }
 0xc8f   :  { %7705 = vxpose.xlu0.b32.cont [13/16] (narrow) %v7578_v22, 8  ;;  %7673 = vxpose.xlu1.b32.cont [13/16] (narrow) %v7433_v24, 8  ;;  %v7751_v24 = vld [vmem:[#allocation2 + $0x8] sm:$0xf] }
 0xc93   :  { %7706 = vxpose.xlu0.b32.cont [14/16] (narrow) %v21573_v61, 8  ;;  %7674 = vxpose.xlu1.b32.cont [14/16] (narrow) %v21541_v57, 8 }
 0xc97   :  { %7707 = vxpose.xlu0.b32.cont [15/16] (narrow) %v7588_v16, 8  ;;  %7675 = vxpose.xlu1.b32.cont [15/16] (narrow) %v7443_v19, 8  ;;  %v7752_v19 = vld [vmem:[#allocation2 + $0x28] sm:$0xf] }
 0xc9b   :  { %7708 = vxpose.xlu0.b32.end [16/16] (narrow) %v21576_v6, 8  ;;  %7676 = vxpose.xlu1.b32.end [16/16] (narrow) %v21544_v35, 8 }
 0xc9f   :  { %v7613_v30 = vpop.trf.xlu1  ;;  %v7645_v40 = vpop.trf.xlu0 }
 0xcdf   :  { %v7677_v26 = vpop.trf.xlu1  ;;  %v7709_v46 = vpop.trf.xlu0 }
 0xce0   :  { %v7725_v47 = vcombine.low %v7613_v30, %v7677_v26  ;;  %v7733_v12 = vcombine.low %v7645_v40, %v7709_v46 }
 0xce2   :  { %v7732_v32 = vrot.slane %v7725_v47, %v22765_v14  ;;  %v7740_v45 = vrot.slane %v7733_v12, %v22765_v14 }
 0xce4   :  { %v7741_v41 = vcombine.low %v7732_v32, %v7740_v45 }
 0xce6   :  { %v7748_v22 = vrot.slane %v7741_v41, %v22772_v21 }
 0xce8   :  { %v7749_v28 = vcombine.high %v7748_v22, %v25439_v0  ;;  %v7753_v16 = vadd.f32 %v7751_v24, %v7748_v22 }
 0xcea   :  { %v7754_v48 = vadd.f32 %v7752_v19, %v7749_v28  ;;  %22515 = vtanh.f32 %v7753_v16  ;;  %v20221_v58 = vmul.f32 -1.442695, %v7753_v16 }
 0xcec   :  { %22517 = vtanh.f32 %v7754_v48  ;;  %v20222_v63 = vmul.f32 -1.442695, %v7754_v48 }
 0xced   :  { %22519 = vpow2.f32 %v20221_v58 }
 0xcee   :  { %22521 = vpow2.f32 %v20222_v63 }
 0xcf4   :  { %v22516_v13 = vpop.eup %22515 }
 0xcf5   :  { %7781 = vrot.lane.b32.xlu1 %v22516_v13, %s22710_s12 }
 0xcf6   :  { %v22518_v3 = vpop.eup %22517 }
 0xcf7   :  { %v22520_v55 = vpop.eup %22519  ;;  %7783 = vrot.lane.b32.xlu0 %v22518_v3, %s22710_s12 }
 0xcf8   :  { %v22522_v44 = vpop.eup %22521  ;;  %v7763_v5 = vadd.f32 1.0, %v22520_v55 }
 0xcf9   :  { %v7764_v54 = vadd.f32 1.0, %v22522_v44 }
 0xcfa   :  { %22523 = vrcp.f32 %v7763_v5 }
 0xcfb   :  { %22525 = vrcp.f32 %v7764_v54 }
 0xd04   :  { %v22524_v29 = vpop.eup %22523 }
 0xd05   :  { %7771 = vrot.lane.b32.xlu1 %v22524_v29, %s22711_s13  ;;  %v22526_v36 = vpop.eup %22525 }
 0xd09   :  { %7773 = vrot.lane.b32.xlu1 %v22526_v36, %s22711_s13 }
 0xd67   :  { %v7782_v43 = vpop.permute.xlu1 %7781 }
 0xd68   :  { %v7787_v9 = vmul.f32 %v22524_v29, %v7782_v43 }
 0xd69   :  { %v7784_v4 = vpop.permute.xlu0 %7783 }
 0xd6a   :  { %7791 = vrot.lane.b32.xlu1 %v7787_v9, %s22712_s14  ;;  %v7788_v11 = vmul.f32 %v22526_v36, %v7784_v4 }
 0xd6e   :  { %7793 = vrot.lane.b32.xlu1 %v7788_v11, %s22712_s14 }
 0xd77   :  { %v7772_v33 = vpop.permute.xlu1 %7771 }
 0xd78   :  { %v7777_v37 = vmul.f32 %v7772_v33, %v23501_v38 }
 0xd7b   :  { %v7774_v42 = vpop.permute.xlu1 %7773 }
 0xd7c   :  { %v7778_v53 = vmul.f32 %v7774_v42, %v23505_v18 }
 0xddc   :  { %v7792_v31 = vpop.permute.xlu1 %7791 }
 0xddd   :  { %v23780_v59 = vadd.f32 %v7792_v31, %v7777_v37 }
 0xddf   :  { %22527 = vtanh.f32 %v23780_v59 }
 0xde0   :  { %v7794_v50 = vpop.permute.xlu1 %7793 }
 0xde1   :  { %v23784_v57 = vadd.f32 %v7794_v50, %v7778_v53 }
 0xde3   :  { %22529 = vtanh.f32 %v23784_v57 }
 0xde9   :  { %v22528_v61 = vpop.eup %22527 }
 0xdea   :  { %7803 = vrot.lane.b32.xlu0 %v22528_v61, %s22712_s14 }
 0xded   :  { %v22530_v35 = vpop.eup %22529 }
 0xdee   :  { %7805 = vrot.lane.b32.xlu1 %v22530_v35, %s22712_s14 }
 0xe5c   :  { %v7804_v6 = vpop.permute.xlu0 %7803 }
 0xe5d   :  { %v7809_v38 = vmul.f32 %v22524_v29, %v7804_v6 }
 0xe5f   :  { %7813 = vrot.lane.b32.xlu0 %v7809_v38, %s22710_s12 }
 0xe60   :  { %v7806_v30 = vpop.permute.xlu1 %7805 }
 0xe61   :  { %v7810_v40 = vmul.f32 %v22526_v36, %v7806_v30 }
 0xe63   :  { %7815 = vrot.lane.b32.xlu1 %v7810_v40, %s22710_s12 }
 0xed1   :  { %v7814_v18 = vpop.permute.xlu0 %7813 }
 0xed2   :  { %7820 = vst.msk [vmem:[#allocation5 + $0x8] sm:$0xf] %vm26_vm0, %v7814_v18  ;;  %7822 = vxpose.xlu0.b32.start.end [1/1] (short) (narrow) %v7814_v18, 32 }
 0xed5   :  { %v7816_v26 = vpop.permute.xlu1 %7815 }
 0xed6   :  { %7821 = vst.msk [vmem:[#allocation5 + $0x28] sm:$0xf] %vm26_vm0, %v7816_v26  ;;  %7854 = vxpose.xlu1.b32.start.end [1/1] (short) (narrow) %v7816_v26, 32 }
 0xf52   :  { %v7838_v46 = vpop.trf.xlu0 }
 0xf53   :  { %v7886_v47 = vcombine.high %v7838_v46, %v25439_v0  ;;  %v7893_v12 = vrot.slane %v7838_v46, %v22765_v14 }
 0xf55   :  { %v7900_v22 = vrot.slane %v7886_v47, %v22765_v14 }
 0xf56   :  { %v7870_v32 = vpop.trf.xlu1  ;;  %v7839_v24 = vpop.trf.xlu0 }
 0xf57   :  { %v7901_v45 = vcombine.high %v7870_v32, %v25439_v0  ;;  %v7908_v41 = vrot.slane %v7870_v32, %v22765_v14  ;;  %v7959_v58 = vrot.slane %v7839_v24, %v22765_v14  ;;  %v7952_v44 = vcombine.high %v7839_v24, %v25439_v0 }
 0xf59   :  { %v7915_v28 = vrot.slane %v7901_v45, %v22765_v14  ;;  %v7916_v16 = vcombine.low %v7893_v12, %v7908_v41  ;;  %v7917_v19 = vcombine.high %v7893_v12, %v7908_v41  ;;  %v7966_v43 = vrot.slane %v7952_v44, %v22765_v14 }
 0xf5a   :  { %v7871_v48 = vpop.trf.xlu1  ;;  %v7840_v53 = vpop.trf.xlu0 }
 0xf5b   :  { %v7931_v63 = vrot.slane %v7917_v19, %v22772_v21  ;;  %v7924_v13 = vrot.slane %v7916_v16, %v22772_v21  ;;  %v7933_v3 = vcombine.high %v7900_v22, %v7915_v28  ;;  %v7974_v55 = vrot.slane %v7871_v48, %v22765_v14 }
 0xf5c   :  { %v7967_v5 = vcombine.high %v7871_v48, %v25439_v0  ;;  %v7932_v42 = vcombine.low %v7900_v22, %v7915_v28  ;;  %v8025_v35 = vrot.slane %v7840_v53, %v22765_v14  ;;  %v8018_v26 = vcombine.high %v7840_v53, %v25439_v0 }
 0xf5d   :  { %8214 = vxpose.xlu1.b32.start.end [1/1] (short) (narrow) %v7931_v63, 8  ;;  %8150 = vxpose.xlu0.b32.start.end [1/1] (short) (narrow) %v7924_v13, 8  ;;  %v7982_v54 = vcombine.low %v7959_v58, %v7974_v55  ;;  %v7948_v29 = vcombine.high %v7924_v13, %v25439_v0  ;;  %v7947_v36 = vrot.slane %v7933_v3, %v22772_v21 }
 0xf5e   :  { %v7981_v9 = vrot.slane %v7967_v5, %v22765_v14  ;;  %v7983_v4 = vcombine.high %v7959_v58, %v7974_v55  ;;  %v7949_v33 = vcombine.high %v7931_v63, %v25439_v0  ;;  %v7872_v50 = vpop.trf.xlu1  ;;  %v7940_v61 = vrot.slane %v7932_v42, %v22772_v21  ;;  %v7841_v48 = vpop.trf.xlu0 }
 0xf5f   :  { %v7990_v11 = vrot.slane %v7982_v54, %v22772_v21  ;;  %v8040_v38 = vrot.slane %v7872_v50, %v22765_v14  ;;  %v8033_v18 = vcombine.high %v7872_v50, %v25439_v0  ;;  %v7951_v12 = vcombine.high %v7947_v36, %v25439_v0 }
 0xf60   :  { %v7997_v37 = vrot.slane %v7983_v4, %v22772_v21  ;;  %v7998_v31 = vcombine.low %v7966_v43, %v7981_v9  ;;  %v7999_v30 = vcombine.high %v7966_v43, %v7981_v9  ;;  %v7950_v40 = vcombine.high %v7940_v61, %v25439_v0 }
 0xf61   :  { %8182 = vxpose.xlu0.b32.start.end [1/1] (short) (narrow) %v7948_v29, 8  ;;  %8342 = vxpose.xlu1.b32.start.end [1/1] (short) (narrow) %v7947_v36, 8  ;;  %v8048_v46 = vcombine.low %v8025_v35, %v8040_v38  ;;  %v8047_v32 = vrot.slane %v8033_v18, %v22765_v14  ;;  %v8032_v45 = vrot.slane %v8018_v26, %v22765_v14 }
 0xf62   :  { %v8006_v6 = vrot.slane %v7998_v31, %v22772_v21  ;;  %v8013_v47 = vrot.slane %v7999_v30, %v22772_v21  ;;  %v8049_v41 = vcombine.high %v8025_v35, %v8040_v38  ;;  %v8014_v22 = vcombine.high %v7990_v11, %v25439_v0  ;;  %v7873_v19 = vpop.trf.xlu1 }
 0xf63   :  { %v8056_v24 = vrot.slane %v8048_v46, %v22772_v21  ;;  %v8064_v16 = vcombine.low %v8032_v45, %v8047_v32  ;;  %v8015_v58 = vcombine.high %v7997_v37, %v25439_v0  ;;  %v8106_v63 = vrot.slane %v7873_v19, %v22765_v14 }
 0xf64   :  { %v8063_v28 = vrot.slane %v8049_v41, %v22772_v21  ;;  %v8091_v3 = vrot.slane %v7841_v48, %v22765_v14  ;;  %v8065_v55 = vcombine.high %v8032_v45, %v8047_v32  ;;  %v8016_v44 = vcombine.high %v8006_v6, %v25439_v0 }
 0xf65   :  { %8246 = vxpose.xlu0.b32.start.end [1/1] (short) (narrow) %v7949_v33, 8  ;;  %8406 = vxpose.xlu1.b32.start.end [1/1] (short) (narrow) %v7990_v11, 8  ;;  %v8072_v13 = vrot.slane %v8064_v16, %v22772_v21  ;;  %v8099_v5 = vcombine.high %v7873_v19, %v25439_v0  ;;  %v8084_v54 = vcombine.high %v7841_v48, %v25439_v0  ;;  %v56_v19 = vsub.s32 3, %v25442_v62 }
 0xf66   :  { %v8114_v29 = vcombine.low %v8091_v3, %v8106_v63  ;;  %v8079_v36 = vrot.slane %v8065_v55, %v22772_v21  ;;  %v8017_v43 = vcombine.high %v8013_v47, %v25439_v0  ;;  %v8115_v11 = vcombine.high %v8091_v3, %v8106_v63  ;;  %v22617_v63 = vld [vmem:[%s25245_s0] sm:$0xff]  ;;  %v22618_v3 = vld [vmem:[%s25245_s0 + $0x8] sm:$0xff] }
 0xf67   :  { %v8113_v9 = vrot.slane %v8099_v5, %v22765_v14  ;;  %v8098_v4 = vrot.slane %v8084_v54, %v22765_v14  ;;  %v8080_v33 = vcombine.high %v8056_v24, %v25439_v0  ;;  %v8081_v53 = vcombine.high %v8063_v28, %v25439_v0 }
 0xf68   :  { %v8122_v42 = vrot.slane %v8114_v29, %v22772_v21  ;;  %v8082_v35 = vcombine.high %v8072_v13, %v25439_v0  ;;  %v8083_v38 = vcombine.high %v8079_v36, %v25439_v0  ;;  %v113_v55 = vrot.slane %v22618_v3, %v56_v19 }
 0xf69   :  { %8278 = vxpose.xlu0.b32.start.end [1/1] (short) (narrow) %v7940_v61, 8  ;;  %8470 = vxpose.xlu1.b32.start.end [1/1] (short) (narrow) %v7997_v37, 8  ;;  %v8129_v37 = vrot.slane %v8115_v11, %v22772_v21  ;;  %v8130_v31 = vcombine.low %v8098_v4, %v8113_v9  ;;  %v8131_v61 = vcombine.high %v8098_v4, %v8113_v9 }
 0xf6a   :  { %v8146_v30 = vcombine.high %v8122_v42, %v25439_v0 }
 0xf6b   :  { %v8138_v50 = vrot.slane %v8130_v31, %v22772_v21 }
 0xf6d   :  { %8310 = vxpose.xlu0.b32.start.end [1/1] (short) (narrow) %v7950_v40, 8  ;;  %8534 = vxpose.xlu1.b32.start.end [1/1] (short) (narrow) %v8006_v6, 8  ;;  %v8145_v6 = vrot.slane %v8131_v61, %v22772_v21  ;;  %v8147_v40 = vcombine.high %v8129_v37, %v25439_v0  ;;  %v8148_v18 = vcombine.high %v8138_v50, %v25439_v0 }
 0xf6f   :  { %v8149_v26 = vcombine.high %v8145_v6, %v25439_v0 }
 0xf71   :  { %8374 = vxpose.xlu0.b32.start.end [1/1] (short) (narrow) %v7951_v12, 8  ;;  %8598 = vxpose.xlu1.b32.start.end [1/1] (short) (narrow) %v8013_v47, 8 }
 0xf75   :  { %8438 = vxpose.xlu0.b32.start.end [1/1] (short) (narrow) %v8014_v22, 8  ;;  %8662 = vxpose.xlu1.b32.start.end [1/1] (short) (narrow) %v8056_v24, 8 }
 0xf79   :  { %8502 = vxpose.xlu0.b32.start.end [1/1] (short) (narrow) %v8015_v58, 8  ;;  %8726 = vxpose.xlu1.b32.start.end [1/1] (short) (narrow) %v8063_v28, 8 }
 0xf7d   :  { %8566 = vxpose.xlu0.b32.start.end [1/1] (short) (narrow) %v8016_v44, 8  ;;  %8790 = vxpose.xlu1.b32.start.end [1/1] (short) (narrow) %v8072_v13, 8  ;;  %v57_v13 = vrot.slane %v22617_v63, %v56_v19 }
 0xf81   :  { %8630 = vxpose.xlu0.b32.start.end [1/1] (short) (narrow) %v8017_v43, 8  ;;  %8854 = vxpose.xlu1.b32.start.end [1/1] (short) (narrow) %v8079_v36, 8 }
 0xf85   :  { %8694 = vxpose.xlu0.b32.start.end [1/1] (short) (narrow) %v8080_v33, 8  ;;  %8918 = vxpose.xlu1.b32.start.end [1/1] (short) (narrow) %v8122_v42, 8 }
 0xf89   :  { %8758 = vxpose.xlu0.b32.start.end [1/1] (short) (narrow) %v8081_v53, 8  ;;  %8982 = vxpose.xlu1.b32.start.end [1/1] (short) (narrow) %v8129_v37, 8 }
 0xf8d   :  { %8822 = vxpose.xlu0.b32.start.end [1/1] (short) (narrow) %v8082_v35, 8  ;;  %9046 = vxpose.xlu1.b32.start.end [1/1] (short) (narrow) %v8138_v50, 8 }
 0xf91   :  { %8886 = vxpose.xlu0.b32.start.end [1/1] (short) (narrow) %v8083_v38, 8  ;;  %9110 = vxpose.xlu1.b32.start.end [1/1] (short) (narrow) %v8145_v6, 8 }
 0xf95   :  { %8950 = vxpose.xlu0.b32.start.end [1/1] (short) (narrow) %v8146_v30, 8 }
 0xf99   :  { %9014 = vxpose.xlu0.b32.start.end [1/1] (short) (narrow) %v8147_v40, 8 }
 0xf9d   :  { %9078 = vxpose.xlu0.b32.start.end [1/1] (short) (narrow) %v8148_v18, 8 }
 0xfa1   :  { %9142 = vxpose.xlu0.b32.start.end [1/1] (short) (narrow) %v8149_v26, 8 }
 0xfaf   :  { %59 = vbcast.lane.b32.xlu1 %v57_v13, 256 }
 0xfca   :  { %115 = vbcast.lane.b32.xlu0 %v113_v55, 256 }
 0xfdd   :  { %v8230_v46 = vpop.trf.xlu1  ;;  %v8166_v47 = vpop.trf.xlu0 }
 0xfde   :  { %v9174_v33 = vcombine.low %v8166_v47, %v8230_v46 }
 0xfe0   :  { %v23873_v38 = vrot.slane %v9174_v33, %v22765_v14 }
 0xfe1   :  { %v8198_v12 = vpop.trf.xlu0  ;;  %v8358_v32 = vpop.trf.xlu1 }
 0xfe5   :  { %v8262_v45 = vpop.trf.xlu0  ;;  %v8422_v41 = vpop.trf.xlu1 }
 0xfe6   :  { %v9182_v43 = vcombine.low %v8198_v12, %v8262_v45 }
 0xfe8   :  { %v23864_v53 = vrot.slane %v9182_v43, %v22765_v14 }
 0xfe9   :  { %v8294_v22 = vpop.trf.xlu0  ;;  %v8486_v24 = vpop.trf.xlu1 }
 0xfea   :  { %v9190_v9 = vcombine.low %v8294_v22, %v8358_v32  ;;  %v9242_v37 = vcombine.low %v8422_v41, %v8486_v24  ;;  %v9206_v26 = vcombine.low %v23873_v38, %v23864_v53 }
 0xfec   :  { %v23867_v50 = vrot.slane %v9190_v9, %v22765_v14  ;;  %v9249_v40 = vrot.slane %v9242_v37, %v22765_v14  ;;  %v9214_v24 = vrot.slane %v9206_v26, %v22772_v21 }
 0xfed   :  { %v8326_v28 = vpop.trf.xlu0  ;;  %v8550_v16 = vpop.trf.xlu1 }
 0xff1   :  { %v8390_v48 = vpop.trf.xlu0  ;;  %v8614_v58 = vpop.trf.xlu1 }
 0xff2   :  { %v9198_v36 = vcombine.low %v8326_v28, %v8390_v48  ;;  %v9258_v35 = vcombine.low %v8550_v16, %v8614_v58 }
 0xff4   :  { %v23861_v42 = vrot.slane %v9198_v36, %v22765_v14  ;;  %v9265_v47 = vrot.slane %v9258_v35, %v22765_v14 }
 0xff5   :  { %v8454_v44 = vpop.trf.xlu0  ;;  %v23856_v5 = vpop.trf.xlu1 }
 0xff6   :  { %v9222_v30 = vcombine.low %v23867_v50, %v23861_v42 }
 0xff8   :  { %v9230_v41 = vrot.slane %v9222_v30, %v22772_v21 }
 0xff9   :  { %v8518_v54 = vpop.trf.xlu0  ;;  %v23858_v29 = vpop.trf.xlu1 }
 0xffa   :  { %v9250_v4 = vcombine.low %v8454_v44, %v8518_v54  ;;  %v9238_v48 = vcombine.low %v9214_v24, %v9230_v41  ;;  %v9239_v63 = vcombine.high %v9214_v24, %v9230_v41  ;;  %v9310_v26 = vcombine.low %v23856_v5, %v23858_v29 }
 0xffb   :  { %v9207_v5 = vcombine.high %v23873_v38, %v23864_v53  ;;  %v9223_v29 = vcombine.high %v23867_v50, %v23861_v42 }
 0xffc   :  { %v23870_v61 = vrot.slane %v9250_v4, %v22765_v14 }
 0xffd   :  { %v8582_v11 = vpop.trf.xlu0  ;;  %v8806_v31 = vpop.trf.xlu1  ;;  %v9237_v42 = vrot.slane %v9223_v29, %v22772_v21 }
 0xffe   :  { %v9274_v46 = vcombine.low %v9249_v40, %v23870_v61 }
0x1000   :  { %v9282_v28 = vrot.slane %v9274_v46, %v22772_v21 }
0x1001   :  { %v8646_v6 = vpop.trf.xlu0  ;;  %v8870_v45 = vpop.trf.xlu1 }
0x1002   :  { %v9266_v18 = vcombine.low %v8582_v11, %v8646_v6  ;;  %v9326_v35 = vcombine.low %v8806_v31, %v8870_v45  ;;  %v9317_v31 = vrot.slane %v9310_v26, %v22765_v14 }
0x1004   :  { %v9273_v12 = vrot.slane %v9266_v18, %v22765_v14  ;;  %v9333_v24 = vrot.slane %v9326_v35, %v22765_v14 }
0x1005   :  { %v8710_v32 = vpop.trf.xlu0  ;;  %v8934_v3 = vpop.trf.xlu1 }
0x1006   :  { %v9290_v22 = vcombine.low %v9265_v47, %v9273_v12 }
0x1008   :  { %v9298_v16 = vrot.slane %v9290_v22, %v22772_v21 }
0x1009   :  { %v8774_v19 = vpop.trf.xlu0  ;;  %v8998_v43 = vpop.trf.xlu1 }
0x100a   :  { %v9306_v58 = vcombine.low %v9282_v28, %v9298_v16  ;;  %v9307_v13 = vcombine.high %v9282_v28, %v9298_v16  ;;  %v9318_v37 = vcombine.low %v8710_v32, %v8774_v19  ;;  %v9378_v41 = vcombine.low %v8934_v3, %v8998_v43 }
0x100c   :  { %v22313_v55 = vpack.c.bf16 %v9306_v58, %v9238_v48  ;;  %v22321_v44 = vpack.c.bf16 %v9307_v13, %v9239_v63  ;;  %v9325_v22 = vrot.slane %v9318_v37, %v22765_v14  ;;  %v9291_v48 = vcombine.high %v9265_v47, %v9273_v12 }
0x100d   :  { %v8838_v54 = vpop.trf.xlu0  ;;  %v9062_v4 = vpop.trf.xlu1  ;;  %v9385_v45 = vrot.slane %v9378_v41, %v22765_v14  ;;  %v9275_v63 = vcombine.high %v9249_v40, %v23870_v61 }
0x100e   :  { %22314 = vmatprep.subr.bf16.mxu0 %v22313_v55  ;;  %22322 = vmatprep.subr.bf16.mxu1 %v22321_v44  ;;  %v9342_v13 = vcombine.low %v9317_v31, %v9325_v22  ;;  %v9305_v12 = vrot.slane %v9291_v48, %v22772_v21 }
0x100f   :  { %22316 = vmatpush3.bf16.msra.mxu0 %v22313_v55  ;;  %22324 = vmatpush3.bf16.msra.mxu1 %v22321_v44  ;;  %v9289_v53 = vrot.slane %v9275_v63, %v22772_v21  ;;  %v25485_v63 = vld [vmem:[#allocation20_spill] sm:$0xff] }
0x1010   :  { %v9350_v50 = vrot.slane %v9342_v13, %v22772_v21  ;;  %v25486_v13 = vld [vmem:[#allocation15_spill] sm:$0xff] }
0x1011   :  { %v8902_v36 = vpop.trf.xlu0  ;;  %v9126_v30 = vpop.trf.xlu1 }
0x1012   :  { %v9334_v33 = vcombine.low %v8838_v54, %v8902_v36  ;;  %v9394_v16 = vcombine.low %v9062_v4, %v9126_v30  ;;  %v9221_v36 = vrot.slane %v9207_v5, %v22772_v21  ;;  %v9308_v4 = vcombine.low %v9289_v53, %v9305_v12 }
0x1013   :  { %v9343_v30 = vcombine.high %v9317_v31, %v9325_v22 }
0x1014   :  { %v9341_v46 = vrot.slane %v9334_v33, %v22765_v14  ;;  %v9401_v55 = vrot.slane %v9394_v16, %v22765_v14  ;;  %v9240_v16 = vcombine.low %v9221_v36, %v9237_v42  ;;  %v9241_v48 = vcombine.high %v9221_v36, %v9237_v42  ;;  %v25493_v36 = vld [vmem:[#allocation28_spill] sm:$0xff]  ;;  %v25496_v42 = vld [vmem:[#allocation21_spill] sm:$0xff] }
0x1015   :  { %v8966_v9 = vpop.trf.xlu0 }
0x1016   :  { %v9358_v32 = vcombine.low %v9333_v24, %v9341_v46  ;;  %v9359_v43 = vcombine.high %v9333_v24, %v9341_v46  ;;  %v22329_v46 = vpack.c.bf16 %v9308_v4, %v9240_v16  ;;  %v25502_v4 = vld [vmem:[#allocation27_spill] sm:$0xff]  ;;  %v25512_v16 = vld [vmem:[#allocation37_spill] sm:$0xff] }
0x1018   :  { %v9366_v44 = vrot.slane %v9358_v32, %v22772_v21 }
0x1019   :  { %v9030_v11 = vpop.trf.xlu0 }
0x101a   :  { %v9386_v6 = vcombine.low %v8966_v9, %v9030_v11  ;;  %v9309_v11 = vcombine.high %v9289_v53, %v9305_v12  ;;  %v9374_v33 = vcombine.low %v9350_v50, %v9366_v44  ;;  %v9375_v35 = vcombine.high %v9350_v50, %v9366_v44  ;;  %v25490_v12 = vld [vmem:[#allocation17_spill] sm:$0xff]  ;;  %v25491_v44 = vld [vmem:[#allocation26_spill] sm:$0xff]  ;;  %v25494_v53 = vld [vmem:[#allocation19_spill] sm:$0xff] }
0x101b   :  { %v25497_v50 = vld [vmem:[#allocation32_spill] sm:$0xff] }
0x101c   :  { %v9393_v28 = vrot.slane %v9386_v6, %v22765_v14  ;;  %v22337_v24 = vpack.c.bf16 %v9309_v11, %v9241_v48  ;;  %v25503_v11 = vld [vmem:[#allocation38_spill] sm:$0xff]  ;;  %v25513_v48 = vld [vmem:[#allocation48_spill] sm:$0xff] }
0x101d   :  { %v9094_v18 = vpop.trf.xlu0 }
0x101e   :  { %v9410_v3 = vcombine.low %v9385_v45, %v9393_v28  ;;  %v9411_v9 = vcombine.high %v9385_v45, %v9393_v28  ;;  %v9357_v28 = vrot.slane %v9343_v30, %v22772_v21  ;;  %v25508_v30 = vld [vmem:[#allocation33_spill] sm:$0xff] }
0x1020   :  { %v9418_v61 = vrot.slane %v9410_v3, %v22772_v21  ;;  %v9425_v32 = vrot.slane %v9411_v9, %v22772_v21  ;;  %v25487_v3 = vld [vmem:[#allocation22_spill] sm:$0xff]  ;;  %v25501_v9 = vld [vmem:[#allocation36_spill] sm:$0xff] }
0x1021   :  { %v9158_v58 = vpop.trf.xlu0 }
0x1022   :  { %v9402_v19 = vcombine.low %v9094_v18, %v9158_v58  ;;  %v9373_v58 = vrot.slane %v9359_v43, %v22772_v21  ;;  %v25500_v43 = vld [vmem:[#allocation25_spill] sm:$0xff] }
0x1024   :  { %v9409_v47 = vrot.slane %v9402_v19, %v22765_v14  ;;  %v9376_v31 = vcombine.low %v9357_v28, %v9373_v58  ;;  %v9377_v19 = vcombine.high %v9357_v28, %v9373_v58  ;;  %v25514_v58 = vld [vmem:[#allocation39_spill] sm:$0xff] }
0x1025   :  { %v25518_v28 = vld [vmem:[#allocation43_spill] sm:$0xff] }
0x1026   :  { %v9426_v54 = vcombine.low %v9401_v55, %v9409_v47  ;;  %v9427_v38 = vcombine.high %v9401_v55, %v9409_v47  ;;  %v25488_v55 = vld [vmem:[#allocation16_spill] sm:$0xff] }
0x1027   :  { %v25489_v47 = vld [vmem:[#allocation24_spill] sm:$0xff] }
0x1028   :  { %v9434_v40 = vrot.slane %v9426_v54, %v22772_v21  ;;  %v9441_v18 = vrot.slane %v9427_v38, %v22772_v21  ;;  %v25492_v54 = vld [vmem:[#allocation18_spill] sm:$0xff] }
0x1029   :  { %v25495_v38 = vld [vmem:[#allocation30_spill] sm:$0xff] }
0x102a   :  { %v9442_v37 = vcombine.low %v9418_v61, %v9434_v40  ;;  %v9443_v6 = vcombine.high %v9418_v61, %v9434_v40  ;;  %v9444_v45 = vcombine.low %v9425_v32, %v9441_v18  ;;  %v9445_v22 = vcombine.high %v9425_v32, %v9441_v18  ;;  %v25498_v61 = vld [vmem:[#allocation23_spill] sm:$0xff]  ;;  %v25499_v40 = vld [vmem:[#allocation34_spill] sm:$0xff]  ;;  %v25509_v18 = vld [vmem:[#allocation44_spill] sm:$0xff] }
0x102b   :  { %v25515_v32 = vld [vmem:[#allocation50_spill] sm:$0xff] }
0x102c   :  { %v22317_v26 = vpack.c.bf16 %v9442_v37, %v9374_v33  ;;  %v22325_v41 = vpack.c.bf16 %v9443_v6, %v9375_v35  ;;  %v22333_v5 = vpack.c.bf16 %v9444_v45, %v9376_v31  ;;  %v22341_v29 = vpack.c.bf16 %v9445_v22, %v9377_v19  ;;  %v25504_v33 = vld [vmem:[#allocation29_spill] sm:$0xff]  ;;  %v25505_v37 = vld [vmem:[#allocation40_spill] sm:$0xff]  ;;  %v25506_v35 = vld [vmem:[#allocation31_spill] sm:$0xff] }
0x102d   :  { %v25507_v6 = vld [vmem:[#allocation42_spill] sm:$0xff]  ;;  %v25520_v22 = vld [vmem:[#allocation45_spill] sm:$0xff]  ;;  %v25521_v31 = vld [vmem:[#allocation55_spill] sm:$0xff] }
0x102e   :  { %22318 = vmatprep.subr.bf16.mxu0 %v22317_v26  ;;  %22326 = vmatprep.subr.bf16.mxu1 %v22325_v41  ;;  %v25519_v45 = vld [vmem:[#allocation54_spill] sm:$0xff]  ;;  %v25522_v19 = vld [vmem:[#allocation47_spill] sm:$0xff] }
0x102f   :  { %22320 = vmatpush3.bf16.msra.mxu0 %v22317_v26  ;;  %22328 = vmatpush3.bf16.msra.mxu1 %v22325_v41  ;;  %v25510_v26 = vld [vmem:[#allocation35_spill] sm:$0xff]  ;;  %v25511_v41 = vld [vmem:[#allocation46_spill] sm:$0xff] }
0x1030   :  { %22330 = vmatprep.subr.bf16.mxu0 %v22329_v46  ;;  %22338 = vmatprep.subr.bf16.mxu1 %v22337_v24 }
0x1032   :  { %21586 = vmatmul.mubr.msk.f32.vlgmr.msra.gmra.mrb[96].mxu0 %vm1871_vm1, %v22952_v34  ;;  %21618 = vmatmul.mubr.msk.f32.vlgmr.msra.gmra.mrb[96].mxu1 %vm1871_vm1, %v22914_v49 }
0x1033   :  { %21588 = vmatprep.mubr.msk.f32.mxu0 %vm1871_vm1, %v22959_v51  ;;  %21620 = vmatprep.mubr.msk.f32.mxu1 %vm1871_vm1, %v22916_v52 }
0x1034   :  { %22332 = vmatpush3.bf16.msra.mxu0 %v22329_v46  ;;  %22340 = vmatpush3.bf16.msra.mxu1 %v22337_v24  ;;  %v25516_v46 = vld [vmem:[#allocation41_spill] sm:$0xff]  ;;  %v25517_v24 = vld [vmem:[#allocation52_spill] sm:$0xff] }
0x1035   :  { %22334 = vmatprep.subr.bf16.mxu0 %v22333_v5  ;;  %22342 = vmatprep.subr.bf16.mxu1 %v22341_v29 }
0x1036   :  { %21589 = vmatmul.mubr.msk.f32.gmra.mrb[98].mxu0 %vm1871_vm1, %v22964_v1  ;;  %21621 = vmatmul.mubr.msk.f32.gmra.mrb[98].mxu1 %vm1871_vm1, %v22921_v60 }
0x1037   :  { %21591 = vmatprep.mubr.msk.f32.mxu0 %vm1871_vm1, %v22978_v7  ;;  %21623 = vmatprep.mubr.msk.f32.mxu1 %vm1871_vm1, %v22928_v8 }
0x1038   :  { %22336 = vmatpush3.bf16.msra.mxu0 %v22333_v5  ;;  %22344 = vmatpush3.bf16.msra.mxu1 %v22341_v29  ;;  %v25523_v5 = vld [vmem:[#allocation56_spill] sm:$0xff]  ;;  %v25524_v29 = vld [vmem:[#allocation49_spill] sm:$0xff] }
0x103a   :  { %21592 = vmatmul.mubr.msk.f32.gmra.mrb[100].mxu0 %vm1871_vm1, %v23001_v17  ;;  %21624 = vmatmul.mubr.msk.f32.gmra.mrb[100].mxu1 %vm1871_vm1, %v22942_v20 }
0x103b   :  { %21594 = vmatprep.mubr.msk.f32.mxu0 %vm1871_vm1, %v23011_v23  ;;  %21626 = vmatprep.mubr.msk.f32.mxu1 %vm1871_vm1, %v22955_v39 }
0x103e   :  { %21595 = vmatmul.mubr.msk.f32.gmra.mrb[102].mxu0 %vm1871_vm1, %v23021_v25  ;;  %21627 = vmatmul.mubr.msk.f32.gmra.mrb[102].mxu1 %vm1871_vm1, %v22962_v56 }
0x103f   :  { %21597 = vmatprep.mubr.msk.f32.mxu0 %vm1871_vm1, %v23031_v27  ;;  %21629 = vmatprep.mubr.msk.f32.mxu1 %vm1871_vm1, %v22966_v2 }
0x1042   :  { %21598 = vmatmul.mubr.msk.f32.gmra.mrb[104].mxu0 %vm1871_vm1, %v23041_v15  ;;  %21630 = vmatmul.mubr.msk.f32.gmra.mrb[104].mxu1 %vm1871_vm1, %v22990_v10 }
0x1043   :  { %21600 = vmatprep.mubr.msk.f32.mxu0 %vm1871_vm1, %v25485_v63  ;;  %21632 = vmatprep.mubr.msk.f32.mxu1 %vm1871_vm1, %v25486_v13 }
0x1046   :  { %21601 = vmatmul.mubr.msk.f32.gmra.mrb[106].mxu0 %vm1871_vm1, %v25487_v3  ;;  %21633 = vmatmul.mubr.msk.f32.gmra.mrb[106].mxu1 %vm1871_vm1, %v25488_v55 }
0x1047   :  { %21603 = vmatprep.mubr.msk.f32.mxu0 %vm1871_vm1, %v25489_v47  ;;  %21635 = vmatprep.mubr.msk.f32.mxu1 %vm1871_vm1, %v25490_v12 }
0x104a   :  { %21604 = vmatmul.mubr.msk.f32.gmra.mrb[108].mxu0 %vm1871_vm1, %v25491_v44  ;;  %21636 = vmatmul.mubr.msk.f32.gmra.mrb[108].mxu1 %vm1871_vm1, %v25492_v54 }
0x104b   :  { %21606 = vmatprep.mubr.msk.f32.mxu0 %vm1871_vm1, %v25493_v36  ;;  %21638 = vmatprep.mubr.msk.f32.mxu1 %vm1871_vm1, %v25494_v53 }
0x104e   :  { %21607 = vmatmul.mubr.msk.f32.gmra.mrb[110].mxu0 %vm1871_vm1, %v25495_v38  ;;  %21639 = vmatmul.mubr.msk.f32.gmra.mrb[110].mxu1 %vm1871_vm1, %v25496_v42 }
0x104f   :  { %21649 = vmatprep.mubr.msk.f32.mxu0 %vm1871_vm1, %v25497_v50  ;;  %21681 = vmatprep.mubr.msk.f32.mxu1 %vm1871_vm1, %v25498_v61 }
0x1052   :  { %21650 = vmatmul.mubr.msk.f32.vlgmr.msra.gmra.mrb[112].mxu0 %vm1871_vm1, %v25499_v40  ;;  %21682 = vmatmul.mubr.msk.f32.vlgmr.msra.gmra.mrb[112].mxu1 %vm1871_vm1, %v25500_v43 }
0x1053   :  { %21652 = vmatprep.mubr.msk.f32.mxu0 %vm1871_vm1, %v25501_v9  ;;  %21684 = vmatprep.mubr.msk.f32.mxu1 %vm1871_vm1, %v25502_v4 }
0x1056   :  { %21653 = vmatmul.mubr.msk.f32.gmra.mrb[114].mxu0 %vm1871_vm1, %v25503_v11  ;;  %21685 = vmatmul.mubr.msk.f32.gmra.mrb[114].mxu1 %vm1871_vm1, %v25504_v33 }
0x1057   :  { %21655 = vmatprep.mubr.msk.f32.mxu0 %vm1871_vm1, %v25505_v37  ;;  %21687 = vmatprep.mubr.msk.f32.mxu1 %vm1871_vm1, %v25506_v35 }
0x105a   :  { %21656 = vmatmul.mubr.msk.f32.gmra.mrb[116].mxu0 %vm1871_vm1, %v25507_v6  ;;  %21688 = vmatmul.mubr.msk.f32.gmra.mrb[116].mxu1 %vm1871_vm1, %v25508_v30 }
0x105b   :  { %21658 = vmatprep.mubr.msk.f32.mxu0 %vm1871_vm1, %v25509_v18  ;;  %21690 = vmatprep.mubr.msk.f32.mxu1 %vm1871_vm1, %v25510_v26 }
0x105e   :  { %21659 = vmatmul.mubr.msk.f32.gmra.mrb[118].mxu0 %vm1871_vm1, %v25511_v41  ;;  %21691 = vmatmul.mubr.msk.f32.gmra.mrb[118].mxu1 %vm1871_vm1, %v25512_v16 }
0x105f   :  { %21661 = vmatprep.mubr.msk.f32.mxu0 %vm1871_vm1, %v25513_v48  ;;  %21693 = vmatprep.mubr.msk.f32.mxu1 %vm1871_vm1, %v25514_v58 }
0x1062   :  { %21662 = vmatmul.mubr.msk.f32.gmra.mrb[120].mxu0 %vm1871_vm1, %v25515_v32  ;;  %21694 = vmatmul.mubr.msk.f32.gmra.mrb[120].mxu1 %vm1871_vm1, %v25516_v46  ;;  %v116_v46 = vpop.permute.xlu0 %115 }
0x1063   :  { %21664 = vmatprep.mubr.msk.f32.mxu0 %vm1871_vm1, %v25517_v24  ;;  %21696 = vmatprep.mubr.msk.f32.mxu1 %vm1871_vm1, %v25518_v28  ;;  %v25525_v24 = vld [vmem:[#allocation57_spill] sm:$0xff]  ;;  %v25526_v28 = vld [vmem:[#allocation51_spill] sm:$0xff] }
0x1066   :  { %21665 = vmatmul.mubr.msk.f32.gmra.mrb[122].mxu0 %vm1871_vm1, %v25519_v45  ;;  %21697 = vmatmul.mubr.msk.f32.gmra.mrb[122].mxu1 %vm1871_vm1, %v25520_v22  ;;  %v25527_v45 = vld [vmem:[#allocation58_spill] sm:$0xff]  ;;  %v25528_v22 = vld [vmem:[#allocation53_spill] sm:$0xff] }
0x1067   :  { %21667 = vmatprep.mubr.msk.f32.mxu0 %vm1871_vm1, %v25521_v31  ;;  %21699 = vmatprep.mubr.msk.f32.mxu1 %vm1871_vm1, %v25522_v19  ;;  %v25529_v31 = vld [vmem:[#allocation14_spill] sm:$0xff]  ;;  %v25530_v19 = vld [vmem:[#allocation13_spill] sm:$0xff] }
0x106a   :  { %21668 = vmatmul.mubr.msk.f32.gmra.mrb[124].mxu0 %vm1871_vm1, %v25523_v5  ;;  %21700 = vmatmul.mubr.msk.f32.gmra.mrb[124].mxu1 %vm1871_vm1, %v25524_v29  ;;  %v60_v5 = vpop.permute.xlu1 %59 }
0x106b   :  { %21670 = vmatprep.mubr.msk.f32.mxu0 %vm1871_vm1, %v25525_v24  ;;  %21702 = vmatprep.mubr.msk.f32.mxu1 %vm1871_vm1, %v25526_v28  ;;  %v22619_v24 = vld [vmem:[%s25246_s1] sm:$0xf] }
0x106c   :  { %v149_v29 = vmul.f32 %v22619_v24, %v60_v5  ;;  %v22620_v28 = vld [vmem:[%s25247_s2] sm:$0xf] }
0x106e   :  { %21671 = vmatmul.mubr.msk.f32.gmra.mrb[126].mxu0 %vm1871_vm1, %v25527_v45  ;;  %21703 = vmatmul.mubr.msk.f32.gmra.mrb[126].mxu1 %vm1871_vm1, %v25528_v22  ;;  %v166_v45 = vadd.f32 %v22620_v28, %v149_v29  ;;  %v157_v22 = vmul.f32 %v22619_v24, %v116_v46 }
0x106f   :  { %21713 = vmatprep.mubr.msk.f32.mxu0 %vm1871_vm1, %v25529_v31  ;;  %21745 = vmatprep.mubr.msk.f32.mxu1 %vm1871_vm1, %v25530_v19 }
0x1070   :  { %182 = vst [vmem:[#allocation2 + $0xc] sm:$0xf] %v166_v45  ;;  %v174_v32 = vadd.f32 %v22620_v28, %v157_v22 }
0x1072   :  { %190 = vst [vmem:[#allocation2 + $0x2c] sm:$0xf] %v174_v32 }
0x1105   :  { %v21587_v31 = vpop.f32.mrb[96].mxu0  ;;  %v21619_v58 = vpop.f32.mrb[96].mxu1 }
0x1106   :  { %v9512_v48 = vpop.f32.mrb[97].mxu0  ;;  %v9657_v19 = vpop.f32.mrb[97].mxu1 }
0x1107   :  { %10058 = vxpose.xlu0.b32.start [1/16] (narrow) %v9657_v19, 8  ;;  %10026 = vxpose.xlu1.b32.start [1/16] (narrow) %v9512_v48, 8 }
0x1109   :  { %v21590_v16 = vpop.f32.mrb[98].mxu0  ;;  %v21622_v41 = vpop.f32.mrb[98].mxu1 }
0x110a   :  { %v9522_v26 = vpop.f32.mrb[99].mxu0  ;;  %v9667_v5 = vpop.f32.mrb[99].mxu1 }
0x110b   :  { %10059 = vxpose.xlu0.b32.cont [2/16] (narrow) %v21619_v58, 8  ;;  %10027 = vxpose.xlu1.b32.cont [2/16] (narrow) %v21587_v31, 8 }
0x110d   :  { %v21593_v18 = vpop.f32.mrb[100].mxu0  ;;  %v21625_v30 = vpop.f32.mrb[100].mxu1 }
0x110e   :  { %v9532_v29 = vpop.f32.mrb[101].mxu0  ;;  %v9677_v45 = vpop.f32.mrb[101].mxu1 }
0x110f   :  { %10060 = vxpose.xlu0.b32.cont [3/16] (narrow) %v9667_v5, 8  ;;  %10028 = vxpose.xlu1.b32.cont [3/16] (narrow) %v9522_v26, 8 }
0x1111   :  { %v21596_v46 = vpop.f32.mrb[102].mxu0  ;;  %v21628_v32 = vpop.f32.mrb[102].mxu1 }
0x1112   :  { %v9542_v24 = vpop.f32.mrb[103].mxu0  ;;  %v9687_v28 = vpop.f32.mrb[103].mxu1 }
0x1113   :  { %10061 = vxpose.xlu0.b32.cont [4/16] (narrow) %v21622_v41, 8  ;;  %10029 = vxpose.xlu1.b32.cont [4/16] (narrow) %v21590_v16, 8 }
0x1115   :  { %v21599_v22 = vpop.f32.mrb[104].mxu0  ;;  %v21631_v48 = vpop.f32.mrb[104].mxu1 }
0x1116   :  { %v9552_v19 = vpop.f32.mrb[105].mxu0  ;;  %v9697_v6 = vpop.f32.mrb[105].mxu1 }
0x1117   :  { %10062 = vxpose.xlu0.b32.cont [5/16] (narrow) %v9677_v45, 8  ;;  %10030 = vxpose.xlu1.b32.cont [5/16] (narrow) %v9532_v29, 8 }
0x1119   :  { %v21602_v58 = vpop.f32.mrb[106].mxu0  ;;  %v21634_v31 = vpop.f32.mrb[106].mxu1 }
0x111a   :  { %v9562_v35 = vpop.f32.mrb[107].mxu0  ;;  %v9707_v37 = vpop.f32.mrb[107].mxu1 }
0x111b   :  { %10063 = vxpose.xlu0.b32.cont [6/16] (narrow) %v21625_v30, 8  ;;  %10031 = vxpose.xlu1.b32.cont [6/16] (narrow) %v21593_v18, 8 }
0x111d   :  { %v21605_v5 = vpop.f32.mrb[108].mxu0  ;;  %v21637_v26 = vpop.f32.mrb[108].mxu1 }
0x111e   :  { %v9572_v33 = vpop.f32.mrb[109].mxu0  ;;  %v9717_v11 = vpop.f32.mrb[109].mxu1 }
0x111f   :  { %10064 = vxpose.xlu0.b32.cont [7/16] (narrow) %v9687_v28, 8  ;;  %10032 = vxpose.xlu1.b32.cont [7/16] (narrow) %v9542_v24, 8 }
0x1121   :  { %v21608_v41 = vpop.f32.mrb[110].mxu0  ;;  %v21640_v16 = vpop.f32.mrb[110].mxu1 }
0x1122   :  { %v9582_v4 = vpop.f32.mrb[111].mxu0  ;;  %v9727_v9 = vpop.f32.mrb[111].mxu1 }
0x1123   :  { %10065 = vxpose.xlu0.b32.cont [8/16] (narrow) %v21628_v32, 8  ;;  %10033 = vxpose.xlu1.b32.cont [8/16] (narrow) %v21596_v46, 8 }
0x1125   :  { %v21651_v45 = vpop.f32.mrb[112].mxu0  ;;  %v21683_v29 = vpop.f32.mrb[112].mxu1 }
0x1126   :  { %v9802_v43 = vpop.f32.mrb[113].mxu0  ;;  %v9947_v40 = vpop.f32.mrb[113].mxu1 }
0x1127   :  { %10066 = vxpose.xlu0.b32.cont [9/16] (narrow) %v9697_v6, 8  ;;  %10034 = vxpose.xlu1.b32.cont [9/16] (narrow) %v9552_v19, 8 }
0x1129   :  { %v21654_v30 = vpop.f32.mrb[114].mxu0  ;;  %v21686_v18 = vpop.f32.mrb[114].mxu1 }
0x112a   :  { %v9812_v61 = vpop.f32.mrb[115].mxu0  ;;  %v9957_v50 = vpop.f32.mrb[115].mxu1 }
0x112b   :  { %10067 = vxpose.xlu0.b32.cont [10/16] (narrow) %v21631_v48, 8  ;;  %10035 = vxpose.xlu1.b32.cont [10/16] (narrow) %v21599_v22, 8 }
0x112d   :  { %v21657_v28 = vpop.f32.mrb[116].mxu0  ;;  %v21689_v24 = vpop.f32.mrb[116].mxu1 }
0x112e   :  { %v9822_v42 = vpop.f32.mrb[117].mxu0  ;;  %v9967_v38 = vpop.f32.mrb[117].mxu1 }
0x112f   :  { %10068 = vxpose.xlu0.b32.cont [11/16] (narrow) %v9707_v37, 8  ;;  %10036 = vxpose.xlu1.b32.cont [11/16] (narrow) %v9562_v35, 8 }
0x1131   :  { %v21660_v32 = vpop.f32.mrb[118].mxu0  ;;  %v21692_v46 = vpop.f32.mrb[118].mxu1 }
0x1132   :  { %v9832_v53 = vpop.f32.mrb[119].mxu0  ;;  %v9977_v36 = vpop.f32.mrb[119].mxu1 }
0x1133   :  { %10069 = vxpose.xlu0.b32.cont [12/16] (narrow) %v21634_v31, 8  ;;  %10037 = vxpose.xlu1.b32.cont [12/16] (narrow) %v21602_v58, 8 }
0x1135   :  { %v21663_v6 = vpop.f32.mrb[120].mxu0  ;;  %v21695_v19 = vpop.f32.mrb[120].mxu1 }
0x1136   :  { %v9842_v54 = vpop.f32.mrb[121].mxu0  ;;  %v9987_v44 = vpop.f32.mrb[121].mxu1 }
0x1137   :  { %10070 = vxpose.xlu0.b32.cont [13/16] (narrow) %v9717_v11, 8  ;;  %10038 = vxpose.xlu1.b32.cont [13/16] (narrow) %v9572_v33, 8 }
0x1139   :  { %v21666_v48 = vpop.f32.mrb[122].mxu0  ;;  %v21698_v22 = vpop.f32.mrb[122].mxu1 }
0x113a   :  { %v9852_v12 = vpop.f32.mrb[123].mxu0  ;;  %v9997_v47 = vpop.f32.mrb[123].mxu1 }
0x113b   :  { %10071 = vxpose.xlu0.b32.cont [14/16] (narrow) %v21637_v26, 8  ;;  %10039 = vxpose.xlu1.b32.cont [14/16] (narrow) %v21605_v5, 8 }
0x113d   :  { %v21669_v37 = vpop.f32.mrb[124].mxu0  ;;  %v21701_v35 = vpop.f32.mrb[124].mxu1 }
0x113e   :  { %v9862_v55 = vpop.f32.mrb[125].mxu0  ;;  %v10007_v3 = vpop.f32.mrb[125].mxu1 }
0x113f   :  { %10072 = vxpose.xlu0.b32.cont [15/16] (narrow) %v9727_v9, 8  ;;  %10040 = vxpose.xlu1.b32.cont [15/16] (narrow) %v9582_v4, 8 }
0x1141   :  { %v21672_v31 = vpop.f32.mrb[126].mxu0  ;;  %v21704_v58 = vpop.f32.mrb[126].mxu1 }
0x1142   :  { %v9872_v13 = vpop.f32.mrb[127].mxu0  ;;  %v10017_v63 = vpop.f32.mrb[127].mxu1 }
0x1143   :  { %10073 = vxpose.xlu0.b32.end [16/16] (narrow) %v21640_v16, 8  ;;  %10041 = vxpose.xlu1.b32.end [16/16] (narrow) %v21608_v41, 8 }
0x1147   :  { %10122 = vxpose.xlu0.b32.start [1/16] (narrow) %v9947_v40, 8  ;;  %10090 = vxpose.xlu1.b32.start [1/16] (narrow) %v9802_v43, 8 }
0x114b   :  { %10123 = vxpose.xlu0.b32.cont [2/16] (narrow) %v21683_v29, 8  ;;  %10091 = vxpose.xlu1.b32.cont [2/16] (narrow) %v21651_v45, 8 }
0x114f   :  { %10124 = vxpose.xlu0.b32.cont [3/16] (narrow) %v9957_v50, 8  ;;  %10092 = vxpose.xlu1.b32.cont [3/16] (narrow) %v9812_v61, 8 }
0x1153   :  { %10125 = vxpose.xlu0.b32.cont [4/16] (narrow) %v21686_v18, 8  ;;  %10093 = vxpose.xlu1.b32.cont [4/16] (narrow) %v21654_v30, 8 }
0x1157   :  { %10126 = vxpose.xlu0.b32.cont [5/16] (narrow) %v9967_v38, 8  ;;  %10094 = vxpose.xlu1.b32.cont [5/16] (narrow) %v9822_v42, 8 }
0x115b   :  { %10127 = vxpose.xlu0.b32.cont [6/16] (narrow) %v21689_v24, 8  ;;  %10095 = vxpose.xlu1.b32.cont [6/16] (narrow) %v21657_v28, 8 }
0x115f   :  { %10128 = vxpose.xlu0.b32.cont [7/16] (narrow) %v9977_v36, 8  ;;  %10096 = vxpose.xlu1.b32.cont [7/16] (narrow) %v9832_v53, 8 }
0x1163   :  { %10129 = vxpose.xlu0.b32.cont [8/16] (narrow) %v21692_v46, 8  ;;  %10097 = vxpose.xlu1.b32.cont [8/16] (narrow) %v21660_v32, 8 }
0x1167   :  { %10130 = vxpose.xlu0.b32.cont [9/16] (narrow) %v9987_v44, 8  ;;  %10098 = vxpose.xlu1.b32.cont [9/16] (narrow) %v9842_v54, 8 }
0x116b   :  { %10131 = vxpose.xlu0.b32.cont [10/16] (narrow) %v21695_v19, 8  ;;  %10099 = vxpose.xlu1.b32.cont [10/16] (narrow) %v21663_v6, 8 }
0x116f   :  { %10132 = vxpose.xlu0.b32.cont [11/16] (narrow) %v9997_v47, 8  ;;  %10100 = vxpose.xlu1.b32.cont [11/16] (narrow) %v9852_v12, 8 }
0x1173   :  { %10133 = vxpose.xlu0.b32.cont [12/16] (narrow) %v21698_v22, 8  ;;  %10101 = vxpose.xlu1.b32.cont [12/16] (narrow) %v21666_v48, 8 }
0x1177   :  { %10134 = vxpose.xlu0.b32.cont [13/16] (narrow) %v10007_v3, 8  ;;  %10102 = vxpose.xlu1.b32.cont [13/16] (narrow) %v9862_v55, 8  ;;  %v10180_v55 = vld [vmem:[#allocation2 + $0xc] sm:$0xf] }
0x117b   :  { %10135 = vxpose.xlu0.b32.cont [14/16] (narrow) %v21701_v35, 8  ;;  %10103 = vxpose.xlu1.b32.cont [14/16] (narrow) %v21669_v37, 8 }
0x117f   :  { %10136 = vxpose.xlu0.b32.cont [15/16] (narrow) %v10017_v63, 8  ;;  %10104 = vxpose.xlu1.b32.cont [15/16] (narrow) %v9872_v13, 8  ;;  %v10181_v13 = vld [vmem:[#allocation2 + $0x2c] sm:$0xf] }
0x1183   :  { %10137 = vxpose.xlu0.b32.end [16/16] (narrow) %v21704_v58, 8  ;;  %10105 = vxpose.xlu1.b32.end [16/16] (narrow) %v21672_v31, 8 }
0x1187   :  { %v10042_v36 = vpop.trf.xlu1  ;;  %v10074_v53 = vpop.trf.xlu0 }
0x11c7   :  { %v10106_v38 = vpop.trf.xlu1  ;;  %v10138_v42 = vpop.trf.xlu0 }
0x11c8   :  { %v10154_v44 = vcombine.low %v10042_v36, %v10106_v38  ;;  %v10162_v54 = vcombine.low %v10074_v53, %v10138_v42 }
0x11ca   :  { %v10161_v50 = vrot.slane %v10154_v44, %v22765_v14  ;;  %v10169_v47 = vrot.slane %v10162_v54, %v22765_v14 }
0x11cc   :  { %v10170_v12 = vcombine.low %v10161_v50, %v10169_v47 }
0x11ce   :  { %v10177_v3 = vrot.slane %v10170_v12, %v22772_v21 }
0x11d0   :  { %v10178_v61 = vcombine.high %v10177_v3, %v25439_v0  ;;  %v10182_v63 = vadd.f32 %v10180_v55, %v10177_v3 }
0x11d2   :  { %v10183_v40 = vadd.f32 %v10181_v13, %v10178_v61  ;;  %22531 = vtanh.f32 %v10182_v63  ;;  %v20287_v43 = vmul.f32 -1.442695, %v10182_v63 }
0x11d4   :  { %22533 = vtanh.f32 %v10183_v40  ;;  %v20288_v9 = vmul.f32 -1.442695, %v10183_v40 }
0x11d5   :  { %22535 = vpow2.f32 %v20287_v43 }
0x11d6   :  { %22537 = vpow2.f32 %v20288_v9 }
0x11dc   :  { %v22532_v4 = vpop.eup %22531 }
0x11dd   :  { %10210 = vrot.lane.b32.xlu1 %v22532_v4, %s22710_s12 }
0x11de   :  { %v22534_v11 = vpop.eup %22533 }
0x11df   :  { %v22536_v33 = vpop.eup %22535  ;;  %10212 = vrot.lane.b32.xlu0 %v22534_v11, %s22710_s12 }
0x11e0   :  { %v22538_v5 = vpop.eup %22537  ;;  %v10192_v26 = vadd.f32 1.0, %v22536_v33 }
0x11e1   :  { %v10193_v41 = vadd.f32 1.0, %v22538_v5 }
0x11e2   :  { %22539 = vrcp.f32 %v10192_v26 }
0x11e3   :  { %22541 = vrcp.f32 %v10193_v41 }
0x11ec   :  { %v22540_v16 = vpop.eup %22539 }
0x11ed   :  { %10200 = vrot.lane.b32.xlu1 %v22540_v16, %s22711_s13  ;;  %v22542_v45 = vpop.eup %22541 }
0x11f1   :  { %10202 = vrot.lane.b32.xlu1 %v22542_v45, %s22711_s13 }
0x124f   :  { %v10211_v29 = vpop.permute.xlu1 %10210 }
0x1250   :  { %v10216_v30 = vmul.f32 %v22540_v16, %v10211_v29 }
0x1251   :  { %v10213_v18 = vpop.permute.xlu0 %10212 }
0x1252   :  { %10220 = vrot.lane.b32.xlu1 %v10216_v30, %s22712_s14  ;;  %v10217_v28 = vmul.f32 %v22542_v45, %v10213_v18 }
0x1256   :  { %10222 = vrot.lane.b32.xlu1 %v10217_v28, %s22712_s14 }
0x125f   :  { %v10201_v24 = vpop.permute.xlu1 %10200 }
0x1260   :  { %v10206_v46 = vmul.f32 %v10201_v24, %v23780_v59 }
0x1263   :  { %v10203_v32 = vpop.permute.xlu1 %10202 }
0x1264   :  { %v10207_v48 = vmul.f32 %v10203_v32, %v23784_v57 }
0x12c4   :  { %v10221_v6 = vpop.permute.xlu1 %10220 }
0x12c5   :  { %v24059_v19 = vadd.f32 %v10221_v6, %v10206_v46 }
0x12c7   :  { %22543 = vtanh.f32 %v24059_v19 }
0x12c8   :  { %v10223_v22 = vpop.permute.xlu1 %10222 }
0x12c9   :  { %v24063_v37 = vadd.f32 %v10223_v22, %v10207_v48 }
0x12cb   :  { %22545 = vtanh.f32 %v24063_v37 }
0x12d1   :  { %v22544_v35 = vpop.eup %22543 }
0x12d2   :  { %10232 = vrot.lane.b32.xlu0 %v22544_v35, %s22712_s14 }
0x12d5   :  { %v22546_v31 = vpop.eup %22545 }
0x12d6   :  { %10234 = vrot.lane.b32.xlu1 %v22546_v31, %s22712_s14 }
0x1344   :  { %v10233_v58 = vpop.permute.xlu0 %10232 }
0x1345   :  { %v10238_v59 = vmul.f32 %v22540_v16, %v10233_v58 }
0x1347   :  { %10242 = vrot.lane.b32.xlu0 %v10238_v59, %s22710_s12 }
0x1348   :  { %v10235_v36 = vpop.permute.xlu1 %10234 }
0x1349   :  { %v10239_v53 = vmul.f32 %v22542_v45, %v10235_v36 }
0x134b   :  { %10244 = vrot.lane.b32.xlu1 %v10239_v53, %s22710_s12 }
0x13b9   :  { %v10243_v57 = vpop.permute.xlu0 %10242 }
0x13ba   :  { %10249 = vst.msk [vmem:[#allocation5 + $0xc] sm:$0xf] %vm26_vm0, %v10243_v57  ;;  %10251 = vxpose.xlu0.b32.start.end [1/1] (short) (narrow) %v10243_v57, 32 }
0x13bd   :  { %v10245_v38 = vpop.permute.xlu1 %10244 }
0x13be   :  { %10250 = vst.msk [vmem:[#allocation5 + $0x2c] sm:$0xf] %vm26_vm0, %v10245_v38  ;;  %10283 = vxpose.xlu1.b32.start.end [1/1] (short) (narrow) %v10245_v38, 32 }
0x143a   :  { %v10267_v42 = vpop.trf.xlu0 }
0x143b   :  { %v10315_v44 = vcombine.high %v10267_v42, %v25439_v0  ;;  %v10322_v54 = vrot.slane %v10267_v42, %v22765_v14 }
0x143d   :  { %v10329_v3 = vrot.slane %v10315_v44, %v22765_v14 }
0x143e   :  { %v10299_v50 = vpop.trf.xlu1  ;;  %v10268_v55 = vpop.trf.xlu0 }
0x143f   :  { %v10330_v47 = vcombine.high %v10299_v50, %v25439_v0  ;;  %v10337_v12 = vrot.slane %v10299_v50, %v22765_v14  ;;  %v10388_v43 = vrot.slane %v10268_v55, %v22765_v14  ;;  %v10381_v5 = vcombine.high %v10268_v55, %v25439_v0 }
0x1441   :  { %v10344_v61 = vrot.slane %v10330_v47, %v22765_v14  ;;  %v10345_v63 = vcombine.low %v10322_v54, %v10337_v12  ;;  %v10346_v13 = vcombine.high %v10322_v54, %v10337_v12  ;;  %v10395_v29 = vrot.slane %v10381_v5, %v22765_v14 }
0x1442   :  { %v10300_v40 = vpop.trf.xlu1  ;;  %v10269_v48 = vpop.trf.xlu0 }
0x1443   :  { %v10360_v9 = vrot.slane %v10346_v13, %v22772_v21  ;;  %v10353_v4 = vrot.slane %v10345_v63, %v22772_v21  ;;  %v10362_v11 = vcombine.high %v10329_v3, %v10344_v61  ;;  %v10403_v33 = vrot.slane %v10300_v40, %v22765_v14 }
0x1444   :  { %v10396_v26 = vcombine.high %v10300_v40, %v25439_v0  ;;  %v10361_v32 = vcombine.low %v10329_v3, %v10344_v61  ;;  %v10454_v31 = vrot.slane %v10269_v48, %v22765_v14  ;;  %v10447_v38 = vcombine.high %v10269_v48, %v25439_v0 }
0x1445   :  { %10643 = vxpose.xlu1.b32.start.end [1/1] (short) (narrow) %v10360_v9, 8  ;;  %10579 = vxpose.xlu0.b32.start.end [1/1] (short) (narrow) %v10353_v4, 8  ;;  %v10411_v41 = vcombine.low %v10388_v43, %v10403_v33  ;;  %v10377_v16 = vcombine.high %v10353_v4, %v25439_v0  ;;  %v10376_v45 = vrot.slane %v10362_v11, %v22772_v21 }
0x1446   :  { %v10410_v30 = vrot.slane %v10396_v26, %v22765_v14  ;;  %v10412_v18 = vcombine.high %v10388_v43, %v10403_v33  ;;  %v10378_v24 = vcombine.high %v10360_v9, %v25439_v0  ;;  %v10301_v22 = vpop.trf.xlu1  ;;  %v10369_v35 = vrot.slane %v10361_v32, %v22772_v21  ;;  %v10270_v40 = vpop.trf.xlu0 }
0x1447   :  { %v10419_v28 = vrot.slane %v10411_v41, %v22772_v21  ;;  %v10469_v59 = vrot.slane %v10301_v22, %v22765_v14  ;;  %v10462_v57 = vcombine.high %v10301_v22, %v25439_v0  ;;  %v10380_v54 = vcombine.high %v10376_v45, %v25439_v0 }
0x1448   :  { %v10426_v46 = vrot.slane %v10412_v18, %v22772_v21  ;;  %v10427_v6 = vcombine.low %v10395_v29, %v10410_v30  ;;  %v10428_v36 = vcombine.high %v10395_v29, %v10410_v30  ;;  %v10379_v53 = vcombine.high %v10369_v35, %v25439_v0 }
0x1449   :  { %10611 = vxpose.xlu0.b32.start.end [1/1] (short) (narrow) %v10377_v16, 8  ;;  %10771 = vxpose.xlu1.b32.start.end [1/1] (short) (narrow) %v10376_v45, 8  ;;  %v10477_v42 = vcombine.low %v10454_v31, %v10469_v59  ;;  %v10476_v50 = vrot.slane %v10462_v57, %v22765_v14  ;;  %v10461_v47 = vrot.slane %v10447_v38, %v22765_v14 }
0x144a   :  { %v10435_v58 = vrot.slane %v10427_v6, %v22772_v21  ;;  %v10442_v44 = vrot.slane %v10428_v36, %v22772_v21  ;;  %v10478_v12 = vcombine.high %v10454_v31, %v10469_v59  ;;  %v10443_v3 = vcombine.high %v10419_v28, %v25439_v0  ;;  %v10302_v13 = vpop.trf.xlu1 }
0x144b   :  { %v10485_v55 = vrot.slane %v10477_v42, %v22772_v21  ;;  %v10493_v63 = vcombine.low %v10461_v47, %v10476_v50  ;;  %v10444_v43 = vcombine.high %v10426_v46, %v25439_v0  ;;  %v10535_v9 = vrot.slane %v10302_v13, %v22765_v14 }
0x144c   :  { %v10492_v61 = vrot.slane %v10478_v12, %v22772_v21  ;;  %v10520_v11 = vrot.slane %v10270_v40, %v22765_v14  ;;  %v10494_v33 = vcombine.high %v10461_v47, %v10476_v50  ;;  %v10445_v5 = vcombine.high %v10435_v58, %v25439_v0 }
0x144d   :  { %10675 = vxpose.xlu0.b32.start.end [1/1] (short) (narrow) %v10378_v24, 8  ;;  %10835 = vxpose.xlu1.b32.start.end [1/1] (short) (narrow) %v10419_v28, 8  ;;  %v10501_v4 = vrot.slane %v10493_v63, %v22772_v21  ;;  %v10528_v26 = vcombine.high %v10302_v13, %v25439_v0  ;;  %v10513_v41 = vcombine.high %v10270_v40, %v25439_v0  ;;  %v63_v13 = vsub.s32 4, %v25442_v62 }
0x144e   :  { %v10543_v16 = vcombine.low %v10520_v11, %v10535_v9  ;;  %v10508_v45 = vrot.slane %v10494_v33, %v22772_v21  ;;  %v10446_v29 = vcombine.high %v10442_v44, %v25439_v0  ;;  %v10544_v28 = vcombine.high %v10520_v11, %v10535_v9  ;;  %v22621_v9 = vld [vmem:[%s25245_s0] sm:$0xff]  ;;  %v22622_v11 = vld [vmem:[%s25245_s0 + $0x8] sm:$0xff] }
0x144f   :  { %v10542_v30 = vrot.slane %v10528_v26, %v22765_v14  ;;  %v10527_v18 = vrot.slane %v10513_v41, %v22765_v14  ;;  %v10509_v24 = vcombine.high %v10485_v55, %v25439_v0  ;;  %v10510_v48 = vcombine.high %v10492_v61, %v25439_v0 }
0x1450   :  { %v10551_v32 = vrot.slane %v10543_v16, %v22772_v21  ;;  %v10511_v31 = vcombine.high %v10501_v4, %v25439_v0  ;;  %v10512_v59 = vcombine.high %v10508_v45, %v25439_v0  ;;  %v120_v33 = vrot.slane %v22622_v11, %v63_v13 }
0x1451   :  { %10707 = vxpose.xlu0.b32.start.end [1/1] (short) (narrow) %v10369_v35, 8  ;;  %10899 = vxpose.xlu1.b32.start.end [1/1] (short) (narrow) %v10426_v46, 8  ;;  %v10558_v46 = vrot.slane %v10544_v28, %v22772_v21  ;;  %v10559_v6 = vcombine.low %v10527_v18, %v10542_v30  ;;  %v10560_v35 = vcombine.high %v10527_v18, %v10542_v30 }
0x1452   :  { %v10575_v36 = vcombine.high %v10551_v32, %v25439_v0 }
0x1453   :  { %v10567_v22 = vrot.slane %v10559_v6, %v22772_v21 }
0x1455   :  { %10739 = vxpose.xlu0.b32.start.end [1/1] (short) (narrow) %v10379_v53, 8  ;;  %10963 = vxpose.xlu1.b32.start.end [1/1] (short) (narrow) %v10435_v58, 8  ;;  %v10574_v58 = vrot.slane %v10560_v35, %v22772_v21  ;;  %v10576_v53 = vcombine.high %v10558_v46, %v25439_v0  ;;  %v10577_v57 = vcombine.high %v10567_v22, %v25439_v0 }
0x1457   :  { %v10578_v38 = vcombine.high %v10574_v58, %v25439_v0 }
0x1459   :  { %10803 = vxpose.xlu0.b32.start.end [1/1] (short) (narrow) %v10380_v54, 8  ;;  %11027 = vxpose.xlu1.b32.start.end [1/1] (short) (narrow) %v10442_v44, 8 }
0x145d   :  { %10867 = vxpose.xlu0.b32.start.end [1/1] (short) (narrow) %v10443_v3, 8  ;;  %11091 = vxpose.xlu1.b32.start.end [1/1] (short) (narrow) %v10485_v55, 8 }
0x1461   :  { %10931 = vxpose.xlu0.b32.start.end [1/1] (short) (narrow) %v10444_v43, 8  ;;  %11155 = vxpose.xlu1.b32.start.end [1/1] (short) (narrow) %v10492_v61, 8 }
0x1465   :  { %10995 = vxpose.xlu0.b32.start.end [1/1] (short) (narrow) %v10445_v5, 8  ;;  %11219 = vxpose.xlu1.b32.start.end [1/1] (short) (narrow) %v10501_v4, 8  ;;  %v64_v4 = vrot.slane %v22621_v9, %v63_v13 }
0x1469   :  { %11059 = vxpose.xlu0.b32.start.end [1/1] (short) (narrow) %v10446_v29, 8  ;;  %11283 = vxpose.xlu1.b32.start.end [1/1] (short) (narrow) %v10508_v45, 8 }
0x146d   :  { %11123 = vxpose.xlu0.b32.start.end [1/1] (short) (narrow) %v10509_v24, 8  ;;  %11347 = vxpose.xlu1.b32.start.end [1/1] (short) (narrow) %v10551_v32, 8 }
0x1471   :  { %11187 = vxpose.xlu0.b32.start.end [1/1] (short) (narrow) %v10510_v48, 8  ;;  %11411 = vxpose.xlu1.b32.start.end [1/1] (short) (narrow) %v10558_v46, 8 }
0x1475   :  { %11251 = vxpose.xlu0.b32.start.end [1/1] (short) (narrow) %v10511_v31, 8  ;;  %11475 = vxpose.xlu1.b32.start.end [1/1] (short) (narrow) %v10567_v22, 8 }
0x1479   :  { %11315 = vxpose.xlu0.b32.start.end [1/1] (short) (narrow) %v10512_v59, 8  ;;  %11539 = vxpose.xlu1.b32.start.end [1/1] (short) (narrow) %v10574_v58, 8 }
0x147d   :  { %11379 = vxpose.xlu0.b32.start.end [1/1] (short) (narrow) %v10575_v36, 8 }
0x1481   :  { %11443 = vxpose.xlu0.b32.start.end [1/1] (short) (narrow) %v10576_v53, 8 }
0x1485   :  { %11507 = vxpose.xlu0.b32.start.end [1/1] (short) (narrow) %v10577_v57, 8 }
0x1489   :  { %11571 = vxpose.xlu0.b32.start.end [1/1] (short) (narrow) %v10578_v38, 8 }
0x1497   :  { %66 = vbcast.lane.b32.xlu1 %v64_v4, 256 }
0x14b2   :  { %122 = vbcast.lane.b32.xlu0 %v120_v33, 256 }
0x14c5   :  { %v10659_v42 = vpop.trf.xlu1  ;;  %v10595_v44 = vpop.trf.xlu0 }
0x14c6   :  { %v11603_v24 = vcombine.low %v10595_v44, %v10659_v42 }
0x14c8   :  { %v24152_v59 = vrot.slane %v11603_v24, %v22765_v14 }
0x14c9   :  { %v10627_v54 = vpop.trf.xlu0  ;;  %v10787_v50 = vpop.trf.xlu1 }
0x14cd   :  { %v10691_v47 = vpop.trf.xlu0  ;;  %v10851_v12 = vpop.trf.xlu1 }
0x14ce   :  { %v11611_v29 = vcombine.low %v10627_v54, %v10691_v47 }
0x14d0   :  { %v24143_v48 = vrot.slane %v11611_v29, %v22765_v14 }
0x14d1   :  { %v10723_v3 = vpop.trf.xlu0  ;;  %v10915_v55 = vpop.trf.xlu1 }
0x14d2   :  { %v11619_v30 = vcombine.low %v10723_v3, %v10787_v50  ;;  %v11671_v46 = vcombine.low %v10851_v12, %v10915_v55  ;;  %v11635_v38 = vcombine.low %v24152_v59, %v24143_v48 }
0x14d4   :  { %v24146_v22 = vrot.slane %v11619_v30, %v22765_v14  ;;  %v11678_v53 = vrot.slane %v11671_v46, %v22765_v14  ;;  %v11643_v55 = vrot.slane %v11635_v38, %v22772_v21 }
0x14d5   :  { %v10755_v61 = vpop.trf.xlu0  ;;  %v10979_v63 = vpop.trf.xlu1 }
0x14d9   :  { %v10819_v40 = vpop.trf.xlu0  ;;  %v11043_v43 = vpop.trf.xlu1 }
0x14da   :  { %v11627_v45 = vcombine.low %v10755_v61, %v10819_v40  ;;  %v11687_v31 = vcombine.low %v10979_v63, %v11043_v43 }
0x14dc   :  { %v24140_v32 = vrot.slane %v11627_v45, %v22765_v14  ;;  %v11694_v44 = vrot.slane %v11687_v31, %v22765_v14 }
0x14dd   :  { %v10883_v5 = vpop.trf.xlu0  ;;  %v24135_v26 = vpop.trf.xlu1 }
0x14de   :  { %v11651_v36 = vcombine.low %v24146_v22, %v24140_v32 }
0x14e0   :  { %v11659_v12 = vrot.slane %v11651_v36, %v22772_v21 }
0x14e1   :  { %v10947_v41 = vpop.trf.xlu0  ;;  %v24137_v16 = vpop.trf.xlu1 }
0x14e2   :  { %v11679_v18 = vcombine.low %v10883_v5, %v10947_v41  ;;  %v11667_v40 = vcombine.low %v11643_v55, %v11659_v12  ;;  %v11668_v9 = vcombine.high %v11643_v55, %v11659_v12  ;;  %v11739_v38 = vcombine.low %v24135_v26, %v24137_v16 }
0x14e3   :  { %v11636_v26 = vcombine.high %v24152_v59, %v24143_v48  ;;  %v11652_v16 = vcombine.high %v24146_v22, %v24140_v32 }
0x14e4   :  { %v24149_v35 = vrot.slane %v11679_v18, %v22765_v14 }
0x14e5   :  { %v11011_v28 = vpop.trf.xlu0  ;;  %v11235_v6 = vpop.trf.xlu1  ;;  %v11666_v32 = vrot.slane %v11652_v16, %v22772_v21 }
0x14e6   :  { %v11703_v42 = vcombine.low %v11678_v53, %v24149_v35 }
0x14e8   :  { %v11711_v61 = vrot.slane %v11703_v42, %v22772_v21 }
0x14e9   :  { %v11075_v58 = vpop.trf.xlu0  ;;  %v11299_v47 = vpop.trf.xlu1 }
0x14ea   :  { %v11695_v57 = vcombine.low %v11011_v28, %v11075_v58  ;;  %v11755_v31 = vcombine.low %v11235_v6, %v11299_v47  ;;  %v11746_v6 = vrot.slane %v11739_v38, %v22765_v14 }
0x14ec   :  { %v11702_v54 = vrot.slane %v11695_v57, %v22765_v14  ;;  %v11762_v55 = vrot.slane %v11755_v31, %v22765_v14 }
0x14ed   :  { %v11139_v50 = vpop.trf.xlu0  ;;  %v11363_v11 = vpop.trf.xlu1 }
0x14ee   :  { %v11719_v3 = vcombine.low %v11694_v44, %v11702_v54 }
0x14f0   :  { %v11727_v63 = vrot.slane %v11719_v3, %v22772_v21 }
0x14f1   :  { %v11203_v13 = vpop.trf.xlu0  ;;  %v11427_v29 = vpop.trf.xlu1 }
0x14f2   :  { %v11735_v43 = vcombine.low %v11711_v61, %v11727_v63  ;;  %v11736_v4 = vcombine.high %v11711_v61, %v11727_v63  ;;  %v11747_v46 = vcombine.low %v11139_v50, %v11203_v13  ;;  %v11807_v12 = vcombine.low %v11363_v11, %v11427_v29 }
0x14f4   :  { %v22345_v33 = vpack.c.bf16 %v11735_v43, %v11667_v40  ;;  %v22353_v5 = vpack.c.bf16 %v11736_v4, %v11668_v9  ;;  %v11754_v3 = vrot.slane %v11747_v46, %v22765_v14  ;;  %v11720_v40 = vcombine.high %v11694_v44, %v11702_v54 }
0x14f5   :  { %v11267_v41 = vpop.trf.xlu0  ;;  %v11491_v18 = vpop.trf.xlu1  ;;  %v11814_v47 = vrot.slane %v11807_v12, %v22765_v14  ;;  %v11704_v9 = vcombine.high %v11678_v53, %v24149_v35 }
0x14f6   :  { %22346 = vmatprep.subr.bf16.mxu0 %v22345_v33  ;;  %22354 = vmatprep.subr.bf16.mxu1 %v22353_v5  ;;  %v11771_v4 = vcombine.low %v11746_v6, %v11754_v3  ;;  %v11734_v54 = vrot.slane %v11720_v40, %v22772_v21 }
0x14f7   :  { %22348 = vmatpush3.bf16.msra.mxu0 %v22345_v33  ;;  %22356 = vmatpush3.bf16.msra.mxu1 %v22353_v5  ;;  %v11718_v48 = vrot.slane %v11704_v9, %v22772_v21  ;;  %v25531_v9 = vld [vmem:[#allocation20_spill] sm:$0xff] }
0x14f8   :  { %v11779_v22 = vrot.slane %v11771_v4, %v22772_v21  ;;  %v25532_v4 = vld [vmem:[#allocation15_spill] sm:$0xff] }
0x14f9   :  { %v11331_v45 = vpop.trf.xlu0  ;;  %v11555_v36 = vpop.trf.xlu1 }
0x14fa   :  { %v11763_v24 = vcombine.low %v11267_v41, %v11331_v45  ;;  %v11823_v63 = vcombine.low %v11491_v18, %v11555_v36  ;;  %v11650_v45 = vrot.slane %v11636_v26, %v22772_v21  ;;  %v11737_v18 = vcombine.low %v11718_v48, %v11734_v54 }
0x14fb   :  { %v11772_v36 = vcombine.high %v11746_v6, %v11754_v3 }
0x14fc   :  { %v11770_v42 = vrot.slane %v11763_v24, %v22765_v14  ;;  %v11830_v33 = vrot.slane %v11823_v63, %v22765_v14  ;;  %v11669_v63 = vcombine.low %v11650_v45, %v11666_v32  ;;  %v11670_v40 = vcombine.high %v11650_v45, %v11666_v32  ;;  %v25539_v45 = vld [vmem:[#allocation28_spill] sm:$0xff]  ;;  %v25542_v32 = vld [vmem:[#allocation21_spill] sm:$0xff] }
0x14fd   :  { %v11395_v30 = vpop.trf.xlu0 }
0x14fe   :  { %v11787_v50 = vcombine.low %v11762_v55, %v11770_v42  ;;  %v11788_v29 = vcombine.high %v11762_v55, %v11770_v42  ;;  %v22361_v42 = vpack.c.bf16 %v11737_v18, %v11669_v63  ;;  %v25548_v18 = vld [vmem:[#allocation27_spill] sm:$0xff]  ;;  %v25558_v63 = vld [vmem:[#allocation37_spill] sm:$0xff] }
0x1500   :  { %v11795_v5 = vrot.slane %v11787_v50, %v22772_v21 }
0x1501   :  { %v11459_v28 = vpop.trf.xlu0 }
0x1502   :  { %v11815_v58 = vcombine.low %v11395_v30, %v11459_v28  ;;  %v11738_v28 = vcombine.high %v11718_v48, %v11734_v54  ;;  %v11803_v24 = vcombine.low %v11779_v22, %v11795_v5  ;;  %v11804_v31 = vcombine.high %v11779_v22, %v11795_v5  ;;  %v25536_v54 = vld [vmem:[#allocation17_spill] sm:$0xff]  ;;  %v25537_v5 = vld [vmem:[#allocation26_spill] sm:$0xff]  ;;  %v25540_v48 = vld [vmem:[#allocation19_spill] sm:$0xff] }
0x1503   :  { %v25543_v22 = vld [vmem:[#allocation32_spill] sm:$0xff] }
0x1504   :  { %v11822_v61 = vrot.slane %v11815_v58, %v22765_v14  ;;  %v22369_v55 = vpack.c.bf16 %v11738_v28, %v11670_v40  ;;  %v25549_v28 = vld [vmem:[#allocation38_spill] sm:$0xff]  ;;  %v25559_v40 = vld [vmem:[#allocation48_spill] sm:$0xff] }
0x1505   :  { %v11523_v57 = vpop.trf.xlu0 }
0x1506   :  { %v11839_v11 = vcombine.low %v11814_v47, %v11822_v61  ;;  %v11840_v30 = vcombine.high %v11814_v47, %v11822_v61  ;;  %v11786_v61 = vrot.slane %v11772_v36, %v22772_v21  ;;  %v25554_v36 = vld [vmem:[#allocation33_spill] sm:$0xff] }
0x1508   :  { %v11847_v35 = vrot.slane %v11839_v11, %v22772_v21  ;;  %v11854_v50 = vrot.slane %v11840_v30, %v22772_v21  ;;  %v25533_v11 = vld [vmem:[#allocation22_spill] sm:$0xff]  ;;  %v25547_v30 = vld [vmem:[#allocation36_spill] sm:$0xff] }
0x1509   :  { %v11587_v43 = vpop.trf.xlu0 }
0x150a   :  { %v11831_v13 = vcombine.low %v11523_v57, %v11587_v43  ;;  %v11802_v43 = vrot.slane %v11788_v29, %v22772_v21  ;;  %v25546_v29 = vld [vmem:[#allocation25_spill] sm:$0xff] }
0x150c   :  { %v11838_v44 = vrot.slane %v11831_v13, %v22765_v14  ;;  %v11805_v6 = vcombine.low %v11786_v61, %v11802_v43  ;;  %v11806_v13 = vcombine.high %v11786_v61, %v11802_v43  ;;  %v25560_v43 = vld [vmem:[#allocation39_spill] sm:$0xff] }
0x150d   :  { %v25564_v61 = vld [vmem:[#allocation43_spill] sm:$0xff] }
0x150e   :  { %v11855_v41 = vcombine.low %v11830_v33, %v11838_v44  ;;  %v11856_v59 = vcombine.high %v11830_v33, %v11838_v44  ;;  %v25534_v33 = vld [vmem:[#allocation16_spill] sm:$0xff] }
0x150f   :  { %v25535_v44 = vld [vmem:[#allocation24_spill] sm:$0xff] }
0x1510   :  { %v11863_v53 = vrot.slane %v11855_v41, %v22772_v21  ;;  %v11870_v57 = vrot.slane %v11856_v59, %v22772_v21  ;;  %v25538_v41 = vld [vmem:[#allocation18_spill] sm:$0xff] }
0x1511   :  { %v25541_v59 = vld [vmem:[#allocation30_spill] sm:$0xff] }
0x1512   :  { %v11871_v46 = vcombine.low %v11847_v35, %v11863_v53  ;;  %v11872_v58 = vcombine.high %v11847_v35, %v11863_v53  ;;  %v11873_v47 = vcombine.low %v11854_v50, %v11870_v57  ;;  %v11874_v3 = vcombine.high %v11854_v50, %v11870_v57  ;;  %v25544_v35 = vld [vmem:[#allocation23_spill] sm:$0xff]  ;;  %v25545_v53 = vld [vmem:[#allocation34_spill] sm:$0xff]  ;;  %v25555_v57 = vld [vmem:[#allocation44_spill] sm:$0xff] }
0x1513   :  { %v25561_v50 = vld [vmem:[#allocation50_spill] sm:$0xff] }
0x1514   :  { %v22349_v38 = vpack.c.bf16 %v11871_v46, %v11803_v24  ;;  %v22357_v12 = vpack.c.bf16 %v11872_v58, %v11804_v31  ;;  %v22365_v26 = vpack.c.bf16 %v11873_v47, %v11805_v6  ;;  %v22373_v16 = vpack.c.bf16 %v11874_v3, %v11806_v13  ;;  %v25550_v24 = vld [vmem:[#allocation29_spill] sm:$0xff]  ;;  %v25551_v46 = vld [vmem:[#allocation40_spill] sm:$0xff]  ;;  %v25552_v31 = vld [vmem:[#allocation31_spill] sm:$0xff] }
0x1515   :  { %v25553_v58 = vld [vmem:[#allocation42_spill] sm:$0xff]  ;;  %v25566_v3 = vld [vmem:[#allocation45_spill] sm:$0xff]  ;;  %v25567_v6 = vld [vmem:[#allocation55_spill] sm:$0xff] }
0x1516   :  { %22350 = vmatprep.subr.bf16.mxu0 %v22349_v38  ;;  %22358 = vmatprep.subr.bf16.mxu1 %v22357_v12  ;;  %v25565_v47 = vld [vmem:[#allocation54_spill] sm:$0xff]  ;;  %v25568_v13 = vld [vmem:[#allocation47_spill] sm:$0xff] }
0x1517   :  { %22352 = vmatpush3.bf16.msra.mxu0 %v22349_v38  ;;  %22360 = vmatpush3.bf16.msra.mxu1 %v22357_v12  ;;  %v25556_v38 = vld [vmem:[#allocation35_spill] sm:$0xff]  ;;  %v25557_v12 = vld [vmem:[#allocation46_spill] sm:$0xff] }
0x1518   :  { %22362 = vmatprep.subr.bf16.mxu0 %v22361_v42  ;;  %22370 = vmatprep.subr.bf16.mxu1 %v22369_v55 }
0x151a   :  { %21714 = vmatmul.mubr.msk.f32.vlgmr.msra.gmra.mrb[128].mxu0 %vm1871_vm1, %v22952_v34  ;;  %21746 = vmatmul.mubr.msk.f32.vlgmr.msra.gmra.mrb[128].mxu1 %vm1871_vm1, %v22914_v49 }
0x151b   :  { %21716 = vmatprep.mubr.msk.f32.mxu0 %vm1871_vm1, %v22959_v51  ;;  %21748 = vmatprep.mubr.msk.f32.mxu1 %vm1871_vm1, %v22916_v52 }
0x151c   :  { %22364 = vmatpush3.bf16.msra.mxu0 %v22361_v42  ;;  %22372 = vmatpush3.bf16.msra.mxu1 %v22369_v55  ;;  %v25562_v42 = vld [vmem:[#allocation41_spill] sm:$0xff]  ;;  %v25563_v55 = vld [vmem:[#allocation52_spill] sm:$0xff] }
0x151d   :  { %22366 = vmatprep.subr.bf16.mxu0 %v22365_v26  ;;  %22374 = vmatprep.subr.bf16.mxu1 %v22373_v16 }
0x151e   :  { %21717 = vmatmul.mubr.msk.f32.gmra.mrb[130].mxu0 %vm1871_vm1, %v22964_v1  ;;  %21749 = vmatmul.mubr.msk.f32.gmra.mrb[130].mxu1 %vm1871_vm1, %v22921_v60 }
0x151f   :  { %21719 = vmatprep.mubr.msk.f32.mxu0 %vm1871_vm1, %v22978_v7  ;;  %21751 = vmatprep.mubr.msk.f32.mxu1 %vm1871_vm1, %v22928_v8 }
0x1520   :  { %22368 = vmatpush3.bf16.msra.mxu0 %v22365_v26  ;;  %22376 = vmatpush3.bf16.msra.mxu1 %v22373_v16  ;;  %v25569_v26 = vld [vmem:[#allocation56_spill] sm:$0xff]  ;;  %v25570_v16 = vld [vmem:[#allocation49_spill] sm:$0xff] }
0x1522   :  { %21720 = vmatmul.mubr.msk.f32.gmra.mrb[132].mxu0 %vm1871_vm1, %v23001_v17  ;;  %21752 = vmatmul.mubr.msk.f32.gmra.mrb[132].mxu1 %vm1871_vm1, %v22942_v20 }
0x1523   :  { %21722 = vmatprep.mubr.msk.f32.mxu0 %vm1871_vm1, %v23011_v23  ;;  %21754 = vmatprep.mubr.msk.f32.mxu1 %vm1871_vm1, %v22955_v39 }
0x1526   :  { %21723 = vmatmul.mubr.msk.f32.gmra.mrb[134].mxu0 %vm1871_vm1, %v23021_v25  ;;  %21755 = vmatmul.mubr.msk.f32.gmra.mrb[134].mxu1 %vm1871_vm1, %v22962_v56 }
0x1527   :  { %21725 = vmatprep.mubr.msk.f32.mxu0 %vm1871_vm1, %v23031_v27  ;;  %21757 = vmatprep.mubr.msk.f32.mxu1 %vm1871_vm1, %v22966_v2 }
0x152a   :  { %21726 = vmatmul.mubr.msk.f32.gmra.mrb[136].mxu0 %vm1871_vm1, %v23041_v15  ;;  %21758 = vmatmul.mubr.msk.f32.gmra.mrb[136].mxu1 %vm1871_vm1, %v22990_v10 }
0x152b   :  { %21728 = vmatprep.mubr.msk.f32.mxu0 %vm1871_vm1, %v25531_v9  ;;  %21760 = vmatprep.mubr.msk.f32.mxu1 %vm1871_vm1, %v25532_v4 }
0x152e   :  { %21729 = vmatmul.mubr.msk.f32.gmra.mrb[138].mxu0 %vm1871_vm1, %v25533_v11  ;;  %21761 = vmatmul.mubr.msk.f32.gmra.mrb[138].mxu1 %vm1871_vm1, %v25534_v33 }
0x152f   :  { %21731 = vmatprep.mubr.msk.f32.mxu0 %vm1871_vm1, %v25535_v44  ;;  %21763 = vmatprep.mubr.msk.f32.mxu1 %vm1871_vm1, %v25536_v54 }
0x1532   :  { %21732 = vmatmul.mubr.msk.f32.gmra.mrb[140].mxu0 %vm1871_vm1, %v25537_v5  ;;  %21764 = vmatmul.mubr.msk.f32.gmra.mrb[140].mxu1 %vm1871_vm1, %v25538_v41 }
0x1533   :  { %21734 = vmatprep.mubr.msk.f32.mxu0 %vm1871_vm1, %v25539_v45  ;;  %21766 = vmatprep.mubr.msk.f32.mxu1 %vm1871_vm1, %v25540_v48 }
0x1536   :  { %21735 = vmatmul.mubr.msk.f32.gmra.mrb[142].mxu0 %vm1871_vm1, %v25541_v59  ;;  %21767 = vmatmul.mubr.msk.f32.gmra.mrb[142].mxu1 %vm1871_vm1, %v25542_v32 }
0x1537   :  { %21777 = vmatprep.mubr.msk.f32.mxu0 %vm1871_vm1, %v25543_v22  ;;  %21809 = vmatprep.mubr.msk.f32.mxu1 %vm1871_vm1, %v25544_v35 }
0x153a   :  { %21778 = vmatmul.mubr.msk.f32.vlgmr.msra.gmra.mrb[144].mxu0 %vm1871_vm1, %v25545_v53  ;;  %21810 = vmatmul.mubr.msk.f32.vlgmr.msra.gmra.mrb[144].mxu1 %vm1871_vm1, %v25546_v29 }
0x153b   :  { %21780 = vmatprep.mubr.msk.f32.mxu0 %vm1871_vm1, %v25547_v30  ;;  %21812 = vmatprep.mubr.msk.f32.mxu1 %vm1871_vm1, %v25548_v18 }
0x153e   :  { %21781 = vmatmul.mubr.msk.f32.gmra.mrb[146].mxu0 %vm1871_vm1, %v25549_v28  ;;  %21813 = vmatmul.mubr.msk.f32.gmra.mrb[146].mxu1 %vm1871_vm1, %v25550_v24 }
0x153f   :  { %21783 = vmatprep.mubr.msk.f32.mxu0 %vm1871_vm1, %v25551_v46  ;;  %21815 = vmatprep.mubr.msk.f32.mxu1 %vm1871_vm1, %v25552_v31 }
0x1542   :  { %21784 = vmatmul.mubr.msk.f32.gmra.mrb[148].mxu0 %vm1871_vm1, %v25553_v58  ;;  %21816 = vmatmul.mubr.msk.f32.gmra.mrb[148].mxu1 %vm1871_vm1, %v25554_v36 }
0x1543   :  { %21786 = vmatprep.mubr.msk.f32.mxu0 %vm1871_vm1, %v25555_v57  ;;  %21818 = vmatprep.mubr.msk.f32.mxu1 %vm1871_vm1, %v25556_v38 }
0x1546   :  { %21787 = vmatmul.mubr.msk.f32.gmra.mrb[150].mxu0 %vm1871_vm1, %v25557_v12  ;;  %21819 = vmatmul.mubr.msk.f32.gmra.mrb[150].mxu1 %vm1871_vm1, %v25558_v63 }
0x1547   :  { %21789 = vmatprep.mubr.msk.f32.mxu0 %vm1871_vm1, %v25559_v40  ;;  %21821 = vmatprep.mubr.msk.f32.mxu1 %vm1871_vm1, %v25560_v43 }
0x154a   :  { %21790 = vmatmul.mubr.msk.f32.gmra.mrb[152].mxu0 %vm1871_vm1, %v25561_v50  ;;  %21822 = vmatmul.mubr.msk.f32.gmra.mrb[152].mxu1 %vm1871_vm1, %v25562_v42  ;;  %v123_v42 = vpop.permute.xlu0 %122 }
0x154b   :  { %21792 = vmatprep.mubr.msk.f32.mxu0 %vm1871_vm1, %v25563_v55  ;;  %21824 = vmatprep.mubr.msk.f32.mxu1 %vm1871_vm1, %v25564_v61  ;;  %v25571_v55 = vld [vmem:[#allocation57_spill] sm:$0xff]  ;;  %v25572_v61 = vld [vmem:[#allocation51_spill] sm:$0xff] }
0x154e   :  { %21793 = vmatmul.mubr.msk.f32.gmra.mrb[154].mxu0 %vm1871_vm1, %v25565_v47  ;;  %21825 = vmatmul.mubr.msk.f32.gmra.mrb[154].mxu1 %vm1871_vm1, %v25566_v3  ;;  %v25573_v47 = vld [vmem:[#allocation58_spill] sm:$0xff]  ;;  %v25574_v3 = vld [vmem:[#allocation53_spill] sm:$0xff] }
0x154f   :  { %21795 = vmatprep.mubr.msk.f32.mxu0 %vm1871_vm1, %v25567_v6  ;;  %21827 = vmatprep.mubr.msk.f32.mxu1 %vm1871_vm1, %v25568_v13  ;;  %v25575_v6 = vld [vmem:[#allocation14_spill] sm:$0xff]  ;;  %v25576_v13 = vld [vmem:[#allocation13_spill] sm:$0xff] }
0x1552   :  { %21796 = vmatmul.mubr.msk.f32.gmra.mrb[156].mxu0 %vm1871_vm1, %v25569_v26  ;;  %21828 = vmatmul.mubr.msk.f32.gmra.mrb[156].mxu1 %vm1871_vm1, %v25570_v16  ;;  %v67_v26 = vpop.permute.xlu1 %66 }
0x1553   :  { %21798 = vmatprep.mubr.msk.f32.mxu0 %vm1871_vm1, %v25571_v55  ;;  %21830 = vmatprep.mubr.msk.f32.mxu1 %vm1871_vm1, %v25572_v61  ;;  %v22623_v55 = vld [vmem:[%s25246_s1] sm:$0xf] }
0x1554   :  { %v150_v16 = vmul.f32 %v22623_v55, %v67_v26  ;;  %v22624_v61 = vld [vmem:[%s25247_s2] sm:$0xf] }
0x1556   :  { %21799 = vmatmul.mubr.msk.f32.gmra.mrb[158].mxu0 %vm1871_vm1, %v25573_v47  ;;  %21831 = vmatmul.mubr.msk.f32.gmra.mrb[158].mxu1 %vm1871_vm1, %v25574_v3  ;;  %v167_v47 = vadd.f32 %v22624_v61, %v150_v16  ;;  %v158_v3 = vmul.f32 %v22623_v55, %v123_v42 }
0x1557   :  { %21841 = vmatprep.mubr.msk.f32.mxu0 %vm1871_vm1, %v25575_v6  ;;  %21873 = vmatprep.mubr.msk.f32.mxu1 %vm1871_vm1, %v25576_v13 }
0x1558   :  { %183 = vst [vmem:[#allocation2 + $0x10] sm:$0xf] %v167_v47  ;;  %v175_v50 = vadd.f32 %v22624_v61, %v158_v3 }
0x155a   :  { %191 = vst [vmem:[#allocation2 + $0x30] sm:$0xf] %v175_v50 }
0x15ed   :  { %v21715_v6 = vpop.f32.mrb[128].mxu0  ;;  %v21747_v43 = vpop.f32.mrb[128].mxu1 }
0x15ee   :  { %v11941_v40 = vpop.f32.mrb[129].mxu0  ;;  %v12086_v13 = vpop.f32.mrb[129].mxu1 }
0x15ef   :  { %12487 = vxpose.xlu0.b32.start [1/16] (narrow) %v12086_v13, 8  ;;  %12455 = vxpose.xlu1.b32.start [1/16] (narrow) %v11941_v40, 8 }
0x15f1   :  { %v21718_v63 = vpop.f32.mrb[130].mxu0  ;;  %v21750_v12 = vpop.f32.mrb[130].mxu1 }
0x15f2   :  { %v11951_v38 = vpop.f32.mrb[131].mxu0  ;;  %v12096_v26 = vpop.f32.mrb[131].mxu1 }
0x15f3   :  { %12488 = vxpose.xlu0.b32.cont [2/16] (narrow) %v21747_v43, 8  ;;  %12456 = vxpose.xlu1.b32.cont [2/16] (narrow) %v21715_v6, 8 }
0x15f5   :  { %v21721_v57 = vpop.f32.mrb[132].mxu0  ;;  %v21753_v36 = vpop.f32.mrb[132].mxu1 }
0x15f6   :  { %v11961_v16 = vpop.f32.mrb[133].mxu0  ;;  %v12106_v47 = vpop.f32.mrb[133].mxu1 }
0x15f7   :  { %12489 = vxpose.xlu0.b32.cont [3/16] (narrow) %v12096_v26, 8  ;;  %12457 = vxpose.xlu1.b32.cont [3/16] (narrow) %v11951_v38, 8 }
0x15f9   :  { %v21724_v42 = vpop.f32.mrb[134].mxu0  ;;  %v21756_v50 = vpop.f32.mrb[134].mxu1 }
0x15fa   :  { %v11971_v55 = vpop.f32.mrb[135].mxu0  ;;  %v12116_v61 = vpop.f32.mrb[135].mxu1 }
0x15fb   :  { %12490 = vxpose.xlu0.b32.cont [4/16] (narrow) %v21750_v12, 8  ;;  %12458 = vxpose.xlu1.b32.cont [4/16] (narrow) %v21718_v63, 8 }
0x15fd   :  { %v21727_v3 = vpop.f32.mrb[136].mxu0  ;;  %v21759_v40 = vpop.f32.mrb[136].mxu1 }
0x15fe   :  { %v11981_v13 = vpop.f32.mrb[137].mxu0  ;;  %v12126_v58 = vpop.f32.mrb[137].mxu1 }
0x15ff   :  { %12491 = vxpose.xlu0.b32.cont [5/16] (narrow) %v12106_v47, 8  ;;  %12459 = vxpose.xlu1.b32.cont [5/16] (narrow) %v11961_v16, 8 }
0x1601   :  { %v21730_v43 = vpop.f32.mrb[138].mxu0  ;;  %v21762_v6 = vpop.f32.mrb[138].mxu1 }
0x1602   :  { %v11991_v31 = vpop.f32.mrb[139].mxu0  ;;  %v12136_v46 = vpop.f32.mrb[139].mxu1 }
0x1603   :  { %12492 = vxpose.xlu0.b32.cont [6/16] (narrow) %v21753_v36, 8  ;;  %12460 = vxpose.xlu1.b32.cont [6/16] (narrow) %v21721_v57, 8 }
0x1605   :  { %v21733_v26 = vpop.f32.mrb[140].mxu0  ;;  %v21765_v38 = vpop.f32.mrb[140].mxu1 }
0x1606   :  { %v12001_v24 = vpop.f32.mrb[141].mxu0  ;;  %v12146_v28 = vpop.f32.mrb[141].mxu1 }
0x1607   :  { %12493 = vxpose.xlu0.b32.cont [7/16] (narrow) %v12116_v61, 8  ;;  %12461 = vxpose.xlu1.b32.cont [7/16] (narrow) %v11971_v55, 8 }
0x1609   :  { %v21736_v12 = vpop.f32.mrb[142].mxu0  ;;  %v21768_v63 = vpop.f32.mrb[142].mxu1 }
0x160a   :  { %v12011_v18 = vpop.f32.mrb[143].mxu0  ;;  %v12156_v30 = vpop.f32.mrb[143].mxu1 }
0x160b   :  { %12494 = vxpose.xlu0.b32.cont [8/16] (narrow) %v21756_v50, 8  ;;  %12462 = vxpose.xlu1.b32.cont [8/16] (narrow) %v21724_v42, 8 }
0x160d   :  { %v21779_v47 = vpop.f32.mrb[144].mxu0  ;;  %v21811_v16 = vpop.f32.mrb[144].mxu1 }
0x160e   :  { %v12231_v29 = vpop.f32.mrb[145].mxu0  ;;  %v12376_v53 = vpop.f32.mrb[145].mxu1 }
0x160f   :  { %12495 = vxpose.xlu0.b32.cont [9/16] (narrow) %v12126_v58, 8  ;;  %12463 = vxpose.xlu1.b32.cont [9/16] (narrow) %v11981_v13, 8 }
0x1611   :  { %v21782_v36 = vpop.f32.mrb[146].mxu0  ;;  %v21814_v57 = vpop.f32.mrb[146].mxu1 }
0x1612   :  { %v12241_v35 = vpop.f32.mrb[147].mxu0  ;;  %v12386_v22 = vpop.f32.mrb[147].mxu1 }
0x1613   :  { %12496 = vxpose.xlu0.b32.cont [10/16] (narrow) %v21759_v40, 8  ;;  %12464 = vxpose.xlu1.b32.cont [10/16] (narrow) %v21727_v3, 8 }
0x1615   :  { %v21785_v61 = vpop.f32.mrb[148].mxu0  ;;  %v21817_v55 = vpop.f32.mrb[148].mxu1 }
0x1616   :  { %v12251_v32 = vpop.f32.mrb[149].mxu0  ;;  %v12396_v59 = vpop.f32.mrb[149].mxu1 }
0x1617   :  { %12497 = vxpose.xlu0.b32.cont [11/16] (narrow) %v12136_v46, 8  ;;  %12465 = vxpose.xlu1.b32.cont [11/16] (narrow) %v11991_v31, 8 }
0x1619   :  { %v21788_v50 = vpop.f32.mrb[150].mxu0  ;;  %v21820_v42 = vpop.f32.mrb[150].mxu1 }
0x161a   :  { %v12261_v48 = vpop.f32.mrb[151].mxu0  ;;  %v12406_v45 = vpop.f32.mrb[151].mxu1 }
0x161b   :  { %12498 = vxpose.xlu0.b32.cont [12/16] (narrow) %v21762_v6, 8  ;;  %12466 = vxpose.xlu1.b32.cont [12/16] (narrow) %v21730_v43, 8 }
0x161d   :  { %v21791_v58 = vpop.f32.mrb[152].mxu0  ;;  %v21823_v13 = vpop.f32.mrb[152].mxu1 }
0x161e   :  { %v12271_v41 = vpop.f32.mrb[153].mxu0  ;;  %v12416_v5 = vpop.f32.mrb[153].mxu1 }
0x161f   :  { %12499 = vxpose.xlu0.b32.cont [13/16] (narrow) %v12146_v28, 8  ;;  %12467 = vxpose.xlu1.b32.cont [13/16] (narrow) %v12001_v24, 8 }
0x1621   :  { %v21794_v40 = vpop.f32.mrb[154].mxu0  ;;  %v21826_v3 = vpop.f32.mrb[154].mxu1 }
0x1622   :  { %v12281_v54 = vpop.f32.mrb[155].mxu0  ;;  %v12426_v44 = vpop.f32.mrb[155].mxu1 }
0x1623   :  { %12500 = vxpose.xlu0.b32.cont [14/16] (narrow) %v21765_v38, 8  ;;  %12468 = vxpose.xlu1.b32.cont [14/16] (narrow) %v21733_v26, 8 }
0x1625   :  { %v21797_v46 = vpop.f32.mrb[156].mxu0  ;;  %v21829_v31 = vpop.f32.mrb[156].mxu1 }
0x1626   :  { %v12291_v33 = vpop.f32.mrb[157].mxu0  ;;  %v12436_v11 = vpop.f32.mrb[157].mxu1 }
0x1627   :  { %12501 = vxpose.xlu0.b32.cont [15/16] (narrow) %v12156_v30, 8  ;;  %12469 = vxpose.xlu1.b32.cont [15/16] (narrow) %v12011_v18, 8 }
0x1629   :  { %v21800_v6 = vpop.f32.mrb[158].mxu0  ;;  %v21832_v43 = vpop.f32.mrb[158].mxu1 }
0x162a   :  { %v12301_v4 = vpop.f32.mrb[159].mxu0  ;;  %v12446_v9 = vpop.f32.mrb[159].mxu1 }
0x162b   :  { %12502 = vxpose.xlu0.b32.end [16/16] (narrow) %v21768_v63, 8  ;;  %12470 = vxpose.xlu1.b32.end [16/16] (narrow) %v21736_v12, 8 }
0x162f   :  { %12551 = vxpose.xlu0.b32.start [1/16] (narrow) %v12376_v53, 8  ;;  %12519 = vxpose.xlu1.b32.start [1/16] (narrow) %v12231_v29, 8 }
0x1633   :  { %12552 = vxpose.xlu0.b32.cont [2/16] (narrow) %v21811_v16, 8  ;;  %12520 = vxpose.xlu1.b32.cont [2/16] (narrow) %v21779_v47, 8 }
0x1637   :  { %12553 = vxpose.xlu0.b32.cont [3/16] (narrow) %v12386_v22, 8  ;;  %12521 = vxpose.xlu1.b32.cont [3/16] (narrow) %v12241_v35, 8 }
0x163b   :  { %12554 = vxpose.xlu0.b32.cont [4/16] (narrow) %v21814_v57, 8  ;;  %12522 = vxpose.xlu1.b32.cont [4/16] (narrow) %v21782_v36, 8 }
0x163f   :  { %12555 = vxpose.xlu0.b32.cont [5/16] (narrow) %v12396_v59, 8  ;;  %12523 = vxpose.xlu1.b32.cont [5/16] (narrow) %v12251_v32, 8 }
0x1643   :  { %12556 = vxpose.xlu0.b32.cont [6/16] (narrow) %v21817_v55, 8  ;;  %12524 = vxpose.xlu1.b32.cont [6/16] (narrow) %v21785_v61, 8 }
0x1647   :  { %12557 = vxpose.xlu0.b32.cont [7/16] (narrow) %v12406_v45, 8  ;;  %12525 = vxpose.xlu1.b32.cont [7/16] (narrow) %v12261_v48, 8 }
0x164b   :  { %12558 = vxpose.xlu0.b32.cont [8/16] (narrow) %v21820_v42, 8  ;;  %12526 = vxpose.xlu1.b32.cont [8/16] (narrow) %v21788_v50, 8 }
0x164f   :  { %12559 = vxpose.xlu0.b32.cont [9/16] (narrow) %v12416_v5, 8  ;;  %12527 = vxpose.xlu1.b32.cont [9/16] (narrow) %v12271_v41, 8 }
0x1653   :  { %12560 = vxpose.xlu0.b32.cont [10/16] (narrow) %v21823_v13, 8  ;;  %12528 = vxpose.xlu1.b32.cont [10/16] (narrow) %v21791_v58, 8 }
0x1657   :  { %12561 = vxpose.xlu0.b32.cont [11/16] (narrow) %v12426_v44, 8  ;;  %12529 = vxpose.xlu1.b32.cont [11/16] (narrow) %v12281_v54, 8 }
0x165b   :  { %12562 = vxpose.xlu0.b32.cont [12/16] (narrow) %v21826_v3, 8  ;;  %12530 = vxpose.xlu1.b32.cont [12/16] (narrow) %v21794_v40, 8 }
0x165f   :  { %12563 = vxpose.xlu0.b32.cont [13/16] (narrow) %v12436_v11, 8  ;;  %12531 = vxpose.xlu1.b32.cont [13/16] (narrow) %v12291_v33, 8  ;;  %v12609_v33 = vld [vmem:[#allocation2 + $0x10] sm:$0xf] }
0x1663   :  { %12564 = vxpose.xlu0.b32.cont [14/16] (narrow) %v21829_v31, 8  ;;  %12532 = vxpose.xlu1.b32.cont [14/16] (narrow) %v21797_v46, 8 }
0x1667   :  { %12565 = vxpose.xlu0.b32.cont [15/16] (narrow) %v12446_v9, 8  ;;  %12533 = vxpose.xlu1.b32.cont [15/16] (narrow) %v12301_v4, 8  ;;  %v12610_v4 = vld [vmem:[#allocation2 + $0x30] sm:$0xf] }
0x166b   :  { %12566 = vxpose.xlu0.b32.end [16/16] (narrow) %v21832_v43, 8  ;;  %12534 = vxpose.xlu1.b32.end [16/16] (narrow) %v21800_v6, 8 }
0x166f   :  { %v12471_v45 = vpop.trf.xlu1  ;;  %v12503_v48 = vpop.trf.xlu0 }
0x16af   :  { %v12535_v59 = vpop.trf.xlu1  ;;  %v12567_v32 = vpop.trf.xlu0 }
0x16b0   :  { %v12583_v5 = vcombine.low %v12471_v45, %v12535_v59  ;;  %v12591_v41 = vcombine.low %v12503_v48, %v12567_v32 }
0x16b2   :  { %v12590_v22 = vrot.slane %v12583_v5, %v22765_v14  ;;  %v12598_v44 = vrot.slane %v12591_v41, %v22765_v14 }
0x16b4   :  { %v12599_v54 = vcombine.low %v12590_v22, %v12598_v44 }
0x16b6   :  { %v12606_v11 = vrot.slane %v12599_v54, %v22772_v21 }
0x16b8   :  { %v12607_v35 = vcombine.high %v12606_v11, %v25439_v0  ;;  %v12611_v9 = vadd.f32 %v12609_v33, %v12606_v11 }
0x16ba   :  { %v12612_v53 = vadd.f32 %v12610_v4, %v12607_v35  ;;  %22547 = vtanh.f32 %v12611_v9  ;;  %v20353_v29 = vmul.f32 -1.442695, %v12611_v9 }
0x16bc   :  { %22549 = vtanh.f32 %v12612_v53  ;;  %v20354_v30 = vmul.f32 -1.442695, %v12612_v53 }
0x16bd   :  { %22551 = vpow2.f32 %v20353_v29 }
0x16be   :  { %22553 = vpow2.f32 %v20354_v30 }
0x16c4   :  { %v22548_v18 = vpop.eup %22547 }
0x16c5   :  { %12639 = vrot.lane.b32.xlu1 %v22548_v18, %s22710_s12 }
0x16c6   :  { %v22550_v28 = vpop.eup %22549 }
0x16c7   :  { %v22552_v24 = vpop.eup %22551  ;;  %12641 = vrot.lane.b32.xlu0 %v22550_v28, %s22710_s12 }
0x16c8   :  { %v22554_v26 = vpop.eup %22553  ;;  %v12621_v38 = vadd.f32 1.0, %v22552_v24 }
0x16c9   :  { %v12622_v12 = vadd.f32 1.0, %v22554_v26 }
0x16ca   :  { %22555 = vrcp.f32 %v12621_v38 }
0x16cb   :  { %22557 = vrcp.f32 %v12622_v12 }
0x16d4   :  { %v22556_v63 = vpop.eup %22555 }
0x16d5   :  { %12629 = vrot.lane.b32.xlu1 %v22556_v63, %s22711_s13  ;;  %v22558_v47 = vpop.eup %22557 }
0x16d9   :  { %12631 = vrot.lane.b32.xlu1 %v22558_v47, %s22711_s13 }
0x1737   :  { %v12640_v16 = vpop.permute.xlu1 %12639 }
0x1738   :  { %v12645_v36 = vmul.f32 %v22556_v63, %v12640_v16 }
0x1739   :  { %v12642_v57 = vpop.permute.xlu0 %12641 }
0x173a   :  { %12649 = vrot.lane.b32.xlu1 %v12645_v36, %s22712_s14  ;;  %v12646_v61 = vmul.f32 %v22558_v47, %v12642_v57 }
0x173e   :  { %12651 = vrot.lane.b32.xlu1 %v12646_v61, %s22712_s14 }
0x1747   :  { %v12630_v55 = vpop.permute.xlu1 %12629 }
0x1748   :  { %v12635_v42 = vmul.f32 %v12630_v55, %v24059_v19 }
0x174b   :  { %v12632_v50 = vpop.permute.xlu1 %12631 }
0x174c   :  { %v12636_v40 = vmul.f32 %v12632_v50, %v24063_v37 }
0x17ac   :  { %v12650_v58 = vpop.permute.xlu1 %12649 }
0x17ad   :  { %v24338_v13 = vadd.f32 %v12650_v58, %v12635_v42 }
0x17af   :  { %22559 = vtanh.f32 %v24338_v13 }
0x17b0   :  { %v12652_v3 = vpop.permute.xlu1 %12651 }
0x17b1   :  { %v24342_v46 = vadd.f32 %v12652_v3, %v12636_v40 }
0x17b3   :  { %22561 = vtanh.f32 %v24342_v46 }
0x17b9   :  { %v22560_v31 = vpop.eup %22559 }
0x17ba   :  { %12661 = vrot.lane.b32.xlu0 %v22560_v31, %s22712_s14 }
0x17bd   :  { %v22562_v6 = vpop.eup %22561 }
0x17be   :  { %12663 = vrot.lane.b32.xlu1 %v22562_v6, %s22712_s14 }
0x182c   :  { %v12662_v43 = vpop.permute.xlu0 %12661 }
0x182d   :  { %v12667_v19 = vmul.f32 %v22556_v63, %v12662_v43 }
0x182f   :  { %12671 = vrot.lane.b32.xlu0 %v12667_v19, %s22710_s12 }
0x1830   :  { %v12664_v45 = vpop.permute.xlu1 %12663 }
0x1831   :  { %v12668_v48 = vmul.f32 %v22558_v47, %v12664_v45 }
0x1833   :  { %12673 = vrot.lane.b32.xlu1 %v12668_v48, %s22710_s12 }
0x18a1   :  { %v12672_v37 = vpop.permute.xlu0 %12671 }
0x18a2   :  { %12678 = vst.msk [vmem:[#allocation5 + $0x10] sm:$0xf] %vm26_vm0, %v12672_v37  ;;  %12680 = vxpose.xlu0.b32.start.end [1/1] (short) (narrow) %v12672_v37, 32 }
0x18a5   :  { %v12674_v59 = vpop.permute.xlu1 %12673 }
0x18a6   :  { %12679 = vst.msk [vmem:[#allocation5 + $0x30] sm:$0xf] %vm26_vm0, %v12674_v59  ;;  %12712 = vxpose.xlu1.b32.start.end [1/1] (short) (narrow) %v12674_v59, 32 }
0x1922   :  { %v12696_v32 = vpop.trf.xlu0 }
0x1923   :  { %v12744_v5 = vcombine.high %v12696_v32, %v25439_v0  ;;  %v12751_v41 = vrot.slane %v12696_v32, %v22765_v14 }
0x1925   :  { %v12758_v11 = vrot.slane %v12744_v5, %v22765_v14 }
0x1926   :  { %v12728_v22 = vpop.trf.xlu1  ;;  %v12697_v33 = vpop.trf.xlu0 }
0x1927   :  { %v12759_v44 = vcombine.high %v12728_v22, %v25439_v0  ;;  %v12766_v54 = vrot.slane %v12728_v22, %v22765_v14  ;;  %v12817_v29 = vrot.slane %v12697_v33, %v22765_v14  ;;  %v12810_v26 = vcombine.high %v12697_v33, %v25439_v0 }
0x1929   :  { %v12773_v35 = vrot.slane %v12759_v44, %v22765_v14  ;;  %v12774_v9 = vcombine.low %v12751_v41, %v12766_v54  ;;  %v12775_v4 = vcombine.high %v12751_v41, %v12766_v54  ;;  %v12824_v16 = vrot.slane %v12810_v26, %v22765_v14 }
0x192a   :  { %v12729_v53 = vpop.trf.xlu1  ;;  %v12698_v40 = vpop.trf.xlu0 }
0x192b   :  { %v12789_v30 = vrot.slane %v12775_v4, %v22772_v21  ;;  %v12782_v18 = vrot.slane %v12774_v9, %v22772_v21  ;;  %v12791_v28 = vcombine.high %v12758_v11, %v12773_v35  ;;  %v12832_v24 = vrot.slane %v12729_v53, %v22765_v14 }
0x192c   :  { %v12825_v38 = vcombine.high %v12729_v53, %v25439_v0  ;;  %v12790_v50 = vcombine.low %v12758_v11, %v12773_v35  ;;  %v12883_v6 = vrot.slane %v12698_v40, %v22765_v14  ;;  %v12876_v59 = vcombine.high %v12698_v40, %v25439_v0 }
0x192d   :  { %13072 = vxpose.xlu1.b32.start.end [1/1] (short) (narrow) %v12789_v30, 8  ;;  %13008 = vxpose.xlu0.b32.start.end [1/1] (short) (narrow) %v12782_v18, 8  ;;  %v12840_v12 = vcombine.low %v12817_v29, %v12832_v24  ;;  %v12806_v63 = vcombine.high %v12782_v18, %v25439_v0  ;;  %v12805_v47 = vrot.slane %v12791_v28, %v22772_v21 }
0x192e   :  { %v12839_v36 = vrot.slane %v12825_v38, %v22765_v14  ;;  %v12841_v57 = vcombine.high %v12817_v29, %v12832_v24  ;;  %v12807_v55 = vcombine.high %v12789_v30, %v25439_v0  ;;  %v12730_v3 = vpop.trf.xlu1  ;;  %v12798_v31 = vrot.slane %v12790_v50, %v22772_v21  ;;  %v12699_v53 = vpop.trf.xlu0 }
0x192f   :  { %v12848_v61 = vrot.slane %v12840_v12, %v22772_v21  ;;  %v12898_v19 = vrot.slane %v12730_v3, %v22765_v14  ;;  %v12891_v37 = vcombine.high %v12730_v3, %v25439_v0  ;;  %v12809_v41 = vcombine.high %v12805_v47, %v25439_v0 }
0x1930   :  { %v12855_v42 = vrot.slane %v12841_v57, %v22772_v21  ;;  %v12856_v58 = vcombine.low %v12824_v16, %v12839_v36  ;;  %v12857_v45 = vcombine.high %v12824_v16, %v12839_v36  ;;  %v12808_v48 = vcombine.high %v12798_v31, %v25439_v0 }
0x1931   :  { %13040 = vxpose.xlu0.b32.start.end [1/1] (short) (narrow) %v12806_v63, 8  ;;  %13200 = vxpose.xlu1.b32.start.end [1/1] (short) (narrow) %v12805_v47, 8  ;;  %v12906_v32 = vcombine.low %v12883_v6, %v12898_v19  ;;  %v12905_v22 = vrot.slane %v12891_v37, %v22765_v14  ;;  %v12890_v44 = vrot.slane %v12876_v59, %v22765_v14 }
0x1932   :  { %v12864_v43 = vrot.slane %v12856_v58, %v22772_v21  ;;  %v12871_v5 = vrot.slane %v12857_v45, %v22772_v21  ;;  %v12907_v54 = vcombine.high %v12883_v6, %v12898_v19  ;;  %v12872_v11 = vcombine.high %v12848_v61, %v25439_v0  ;;  %v12731_v4 = vpop.trf.xlu1 }
0x1933   :  { %v12914_v33 = vrot.slane %v12906_v32, %v22772_v21  ;;  %v12922_v9 = vcombine.low %v12890_v44, %v12905_v22  ;;  %v12873_v29 = vcombine.high %v12855_v42, %v25439_v0  ;;  %v12964_v30 = vrot.slane %v12731_v4, %v22765_v14 }
0x1934   :  { %v12921_v35 = vrot.slane %v12907_v54, %v22772_v21  ;;  %v12949_v28 = vrot.slane %v12699_v53, %v22765_v14  ;;  %v12923_v24 = vcombine.high %v12890_v44, %v12905_v22  ;;  %v12874_v26 = vcombine.high %v12864_v43, %v25439_v0 }
0x1935   :  { %13104 = vxpose.xlu0.b32.start.end [1/1] (short) (narrow) %v12807_v55, 8  ;;  %13264 = vxpose.xlu1.b32.start.end [1/1] (short) (narrow) %v12848_v61, 8  ;;  %v12930_v18 = vrot.slane %v12922_v9, %v22772_v21  ;;  %v12957_v38 = vcombine.high %v12731_v4, %v25439_v0  ;;  %v12942_v12 = vcombine.high %v12699_v53, %v25439_v0  ;;  %v70_v4 = vsub.s32 5, %v25442_v62 }
0x1936   :  { %v12972_v63 = vcombine.low %v12949_v28, %v12964_v30  ;;  %v12937_v47 = vrot.slane %v12923_v24, %v22772_v21  ;;  %v12875_v16 = vcombine.high %v12871_v5, %v25439_v0  ;;  %v12973_v61 = vcombine.high %v12949_v28, %v12964_v30  ;;  %v22625_v30 = vld [vmem:[%s25245_s0] sm:$0xff]  ;;  %v22626_v28 = vld [vmem:[%s25245_s0 + $0x8] sm:$0xff] }
0x1937   :  { %v12971_v36 = vrot.slane %v12957_v38, %v22765_v14  ;;  %v12956_v57 = vrot.slane %v12942_v12, %v22765_v14  ;;  %v12938_v55 = vcombine.high %v12914_v33, %v25439_v0  ;;  %v12939_v40 = vcombine.high %v12921_v35, %v25439_v0 }
0x1938   :  { %v12980_v50 = vrot.slane %v12972_v63, %v22772_v21  ;;  %v12940_v6 = vcombine.high %v12930_v18, %v25439_v0  ;;  %v12941_v19 = vcombine.high %v12937_v47, %v25439_v0  ;;  %v127_v24 = vrot.slane %v22626_v28, %v70_v4 }
0x1939   :  { %13136 = vxpose.xlu0.b32.start.end [1/1] (short) (narrow) %v12798_v31, 8  ;;  %13328 = vxpose.xlu1.b32.start.end [1/1] (short) (narrow) %v12855_v42, 8  ;;  %v12987_v42 = vrot.slane %v12973_v61, %v22772_v21  ;;  %v12988_v58 = vcombine.low %v12956_v57, %v12971_v36  ;;  %v12989_v31 = vcombine.high %v12956_v57, %v12971_v36 }
0x193a   :  { %v13004_v45 = vcombine.high %v12980_v50, %v25439_v0 }
0x193b   :  { %v12996_v3 = vrot.slane %v12988_v58, %v22772_v21 }
0x193d   :  { %13168 = vxpose.xlu0.b32.start.end [1/1] (short) (narrow) %v12808_v48, 8  ;;  %13392 = vxpose.xlu1.b32.start.end [1/1] (short) (narrow) %v12864_v43, 8  ;;  %v13003_v43 = vrot.slane %v12989_v31, %v22772_v21  ;;  %v13005_v48 = vcombine.high %v12987_v42, %v25439_v0  ;;  %v13006_v37 = vcombine.high %v12996_v3, %v25439_v0 }
0x193f   :  { %v13007_v59 = vcombine.high %v13003_v43, %v25439_v0 }
0x1941   :  { %13232 = vxpose.xlu0.b32.start.end [1/1] (short) (narrow) %v12809_v41, 8  ;;  %13456 = vxpose.xlu1.b32.start.end [1/1] (short) (narrow) %v12871_v5, 8 }
0x1945   :  { %13296 = vxpose.xlu0.b32.start.end [1/1] (short) (narrow) %v12872_v11, 8  ;;  %13520 = vxpose.xlu1.b32.start.end [1/1] (short) (narrow) %v12914_v33, 8 }
0x1949   :  { %13360 = vxpose.xlu0.b32.start.end [1/1] (short) (narrow) %v12873_v29, 8  ;;  %13584 = vxpose.xlu1.b32.start.end [1/1] (short) (narrow) %v12921_v35, 8 }
0x194d   :  { %13424 = vxpose.xlu0.b32.start.end [1/1] (short) (narrow) %v12874_v26, 8  ;;  %13648 = vxpose.xlu1.b32.start.end [1/1] (short) (narrow) %v12930_v18, 8  ;;  %v71_v18 = vrot.slane %v22625_v30, %v70_v4 }
0x1951   :  { %13488 = vxpose.xlu0.b32.start.end [1/1] (short) (narrow) %v12875_v16, 8  ;;  %13712 = vxpose.xlu1.b32.start.end [1/1] (short) (narrow) %v12937_v47, 8 }
0x1955   :  { %13552 = vxpose.xlu0.b32.start.end [1/1] (short) (narrow) %v12938_v55, 8  ;;  %13776 = vxpose.xlu1.b32.start.end [1/1] (short) (narrow) %v12980_v50, 8 }
0x1959   :  { %13616 = vxpose.xlu0.b32.start.end [1/1] (short) (narrow) %v12939_v40, 8  ;;  %13840 = vxpose.xlu1.b32.start.end [1/1] (short) (narrow) %v12987_v42, 8 }
0x195d   :  { %13680 = vxpose.xlu0.b32.start.end [1/1] (short) (narrow) %v12940_v6, 8  ;;  %13904 = vxpose.xlu1.b32.start.end [1/1] (short) (narrow) %v12996_v3, 8 }
0x1961   :  { %13744 = vxpose.xlu0.b32.start.end [1/1] (short) (narrow) %v12941_v19, 8  ;;  %13968 = vxpose.xlu1.b32.start.end [1/1] (short) (narrow) %v13003_v43, 8 }
0x1965   :  { %13808 = vxpose.xlu0.b32.start.end [1/1] (short) (narrow) %v13004_v45, 8 }
0x1969   :  { %13872 = vxpose.xlu0.b32.start.end [1/1] (short) (narrow) %v13005_v48, 8 }
0x196d   :  { %13936 = vxpose.xlu0.b32.start.end [1/1] (short) (narrow) %v13006_v37, 8 }
0x1971   :  { %14000 = vxpose.xlu0.b32.start.end [1/1] (short) (narrow) %v13007_v59, 8 }
0x197f   :  { %73 = vbcast.lane.b32.xlu1 %v71_v18, 256 }
0x199a   :  { %129 = vbcast.lane.b32.xlu0 %v127_v24, 256 }
0x19ad   :  { %v13088_v32 = vpop.trf.xlu1  ;;  %v13024_v5 = vpop.trf.xlu0 }
0x19ae   :  { %v14032_v55 = vcombine.low %v13024_v5, %v13088_v32 }
0x19b0   :  { %v24431_v19 = vrot.slane %v14032_v55, %v22765_v14 }
0x19b1   :  { %v13056_v41 = vpop.trf.xlu0  ;;  %v13216_v22 = vpop.trf.xlu1 }
0x19b5   :  { %v13120_v44 = vpop.trf.xlu0  ;;  %v13280_v54 = vpop.trf.xlu1 }
0x19b6   :  { %v14040_v16 = vcombine.low %v13056_v41, %v13120_v44 }
0x19b8   :  { %v24422_v40 = vrot.slane %v14040_v16, %v22765_v14 }
0x19b9   :  { %v13152_v11 = vpop.trf.xlu0  ;;  %v13344_v33 = vpop.trf.xlu1 }
0x19ba   :  { %v14048_v36 = vcombine.low %v13152_v11, %v13216_v22  ;;  %v14100_v42 = vcombine.low %v13280_v54, %v13344_v33  ;;  %v14064_v59 = vcombine.low %v24431_v19, %v24422_v40 }
0x19bc   :  { %v24425_v3 = vrot.slane %v14048_v36, %v22765_v14  ;;  %v14107_v48 = vrot.slane %v14100_v42, %v22765_v14  ;;  %v14072_v33 = vrot.slane %v14064_v59, %v22772_v21 }
0x19bd   :  { %v13184_v35 = vpop.trf.xlu0  ;;  %v13408_v9 = vpop.trf.xlu1 }
0x19c1   :  { %v13248_v53 = vpop.trf.xlu0  ;;  %v13472_v29 = vpop.trf.xlu1 }
0x19c2   :  { %v14056_v47 = vcombine.low %v13184_v35, %v13248_v53  ;;  %v14116_v6 = vcombine.low %v13408_v9, %v13472_v29 }
0x19c4   :  { %v24419_v50 = vrot.slane %v14056_v47, %v22765_v14  ;;  %v14123_v5 = vrot.slane %v14116_v6, %v22765_v14 }
0x19c5   :  { %v13312_v26 = vpop.trf.xlu0  ;;  %v24414_v38 = vpop.trf.xlu1 }
0x19c6   :  { %v14080_v45 = vcombine.low %v24425_v3, %v24419_v50 }
0x19c8   :  { %v14088_v54 = vrot.slane %v14080_v45, %v22772_v21 }
0x19c9   :  { %v13376_v12 = vpop.trf.xlu0  ;;  %v24416_v63 = vpop.trf.xlu1 }
0x19ca   :  { %v14108_v57 = vcombine.low %v13312_v26, %v13376_v12  ;;  %v14096_v53 = vcombine.low %v14072_v33, %v14088_v54  ;;  %v14097_v30 = vcombine.high %v14072_v33, %v14088_v54  ;;  %v14168_v59 = vcombine.low %v24414_v38, %v24416_v63 }
0x19cb   :  { %v14065_v38 = vcombine.high %v24431_v19, %v24422_v40  ;;  %v14081_v63 = vcombine.high %v24425_v3, %v24419_v50 }
0x19cc   :  { %v24428_v31 = vrot.slane %v14108_v57, %v22765_v14 }
0x19cd   :  { %v13440_v61 = vpop.trf.xlu0  ;;  %v13664_v58 = vpop.trf.xlu1  ;;  %v14095_v50 = vrot.slane %v14081_v63, %v22772_v21 }
0x19ce   :  { %v14132_v32 = vcombine.low %v14107_v48, %v24428_v31 }
0x19d0   :  { %v14140_v35 = vrot.slane %v14132_v32, %v22772_v21 }
0x19d1   :  { %v13504_v43 = vpop.trf.xlu0  ;;  %v13728_v44 = vpop.trf.xlu1 }
0x19d2   :  { %v14124_v37 = vcombine.low %v13440_v61, %v13504_v43  ;;  %v14184_v6 = vcombine.low %v13664_v58, %v13728_v44  ;;  %v14175_v58 = vrot.slane %v14168_v59, %v22765_v14 }
0x19d4   :  { %v14131_v41 = vrot.slane %v14124_v37, %v22765_v14  ;;  %v14191_v33 = vrot.slane %v14184_v6, %v22765_v14 }
0x19d5   :  { %v13568_v22 = vpop.trf.xlu0  ;;  %v13792_v28 = vpop.trf.xlu1 }
0x19d6   :  { %v14148_v11 = vcombine.low %v14123_v5, %v14131_v41 }
0x19d8   :  { %v14156_v9 = vrot.slane %v14148_v11, %v22772_v21 }
0x19d9   :  { %v13632_v4 = vpop.trf.xlu0  ;;  %v13856_v16 = vpop.trf.xlu1 }
0x19da   :  { %v14164_v29 = vcombine.low %v14140_v35, %v14156_v9  ;;  %v14165_v18 = vcombine.high %v14140_v35, %v14156_v9  ;;  %v14176_v42 = vcombine.low %v13568_v22, %v13632_v4  ;;  %v14236_v54 = vcombine.low %v13792_v28, %v13856_v16 }
0x19dc   :  { %v22377_v24 = vpack.c.bf16 %v14164_v29, %v14096_v53  ;;  %v22385_v26 = vpack.c.bf16 %v14165_v18, %v14097_v30  ;;  %v14183_v11 = vrot.slane %v14176_v42, %v22765_v14  ;;  %v14149_v53 = vcombine.high %v14123_v5, %v14131_v41 }
0x19dd   :  { %v13696_v12 = vpop.trf.xlu0  ;;  %v13920_v57 = vpop.trf.xlu1  ;;  %v14243_v44 = vrot.slane %v14236_v54, %v22765_v14  ;;  %v14133_v30 = vcombine.high %v14107_v48, %v24428_v31 }
0x19de   :  { %22378 = vmatprep.subr.bf16.mxu0 %v22377_v24  ;;  %22386 = vmatprep.subr.bf16.mxu1 %v22385_v26  ;;  %v14200_v18 = vcombine.low %v14175_v58, %v14183_v11  ;;  %v14163_v41 = vrot.slane %v14149_v53, %v22772_v21 }
0x19df   :  { %22380 = vmatpush3.bf16.msra.mxu0 %v22377_v24  ;;  %22388 = vmatpush3.bf16.msra.mxu1 %v22385_v26  ;;  %v14147_v40 = vrot.slane %v14133_v30, %v22772_v21  ;;  %v25577_v30 = vld [vmem:[#allocation20_spill] sm:$0xff] }
0x19e0   :  { %v14208_v3 = vrot.slane %v14200_v18, %v22772_v21  ;;  %v25578_v18 = vld [vmem:[#allocation15_spill] sm:$0xff] }
0x19e1   :  { %v13760_v47 = vpop.trf.xlu0  ;;  %v13984_v45 = vpop.trf.xlu1 }
0x19e2   :  { %v14192_v55 = vcombine.low %v13696_v12, %v13760_v47  ;;  %v14252_v9 = vcombine.low %v13920_v57, %v13984_v45  ;;  %v14079_v47 = vrot.slane %v14065_v38, %v22772_v21  ;;  %v14166_v57 = vcombine.low %v14147_v40, %v14163_v41 }
0x19e3   :  { %v14201_v45 = vcombine.high %v14175_v58, %v14183_v11 }
0x19e4   :  { %v14199_v32 = vrot.slane %v14192_v55, %v22765_v14  ;;  %v14259_v24 = vrot.slane %v14252_v9, %v22765_v14  ;;  %v14098_v9 = vcombine.low %v14079_v47, %v14095_v50  ;;  %v14099_v53 = vcombine.high %v14079_v47, %v14095_v50  ;;  %v25585_v47 = vld [vmem:[#allocation28_spill] sm:$0xff]  ;;  %v25588_v50 = vld [vmem:[#allocation21_spill] sm:$0xff] }
0x19e5   :  { %v13824_v36 = vpop.trf.xlu0 }
0x19e6   :  { %v14216_v22 = vcombine.low %v14191_v33, %v14199_v32  ;;  %v14217_v16 = vcombine.high %v14191_v33, %v14199_v32  ;;  %v22393_v32 = vpack.c.bf16 %v14166_v57, %v14098_v9  ;;  %v25594_v57 = vld [vmem:[#allocation27_spill] sm:$0xff]  ;;  %v25604_v9 = vld [vmem:[#allocation37_spill] sm:$0xff] }
0x19e8   :  { %v14224_v26 = vrot.slane %v14216_v22, %v22772_v21 }
0x19e9   :  { %v13888_v61 = vpop.trf.xlu0 }
0x19ea   :  { %v14244_v43 = vcombine.low %v13824_v36, %v13888_v61  ;;  %v14167_v61 = vcombine.high %v14147_v40, %v14163_v41  ;;  %v14232_v55 = vcombine.low %v14208_v3, %v14224_v26  ;;  %v14233_v6 = vcombine.high %v14208_v3, %v14224_v26  ;;  %v25582_v41 = vld [vmem:[#allocation17_spill] sm:$0xff]  ;;  %v25583_v26 = vld [vmem:[#allocation26_spill] sm:$0xff]  ;;  %v25586_v40 = vld [vmem:[#allocation19_spill] sm:$0xff] }
0x19eb   :  { %v25589_v3 = vld [vmem:[#allocation32_spill] sm:$0xff] }
0x19ec   :  { %v14251_v35 = vrot.slane %v14244_v43, %v22765_v14  ;;  %v22401_v33 = vpack.c.bf16 %v14167_v61, %v14099_v53  ;;  %v25595_v61 = vld [vmem:[#allocation38_spill] sm:$0xff]  ;;  %v25605_v53 = vld [vmem:[#allocation48_spill] sm:$0xff] }
0x19ed   :  { %v13952_v37 = vpop.trf.xlu0 }
0x19ee   :  { %v14268_v28 = vcombine.low %v14243_v44, %v14251_v35  ;;  %v14269_v36 = vcombine.high %v14243_v44, %v14251_v35  ;;  %v14215_v35 = vrot.slane %v14201_v45, %v22772_v21  ;;  %v25600_v45 = vld [vmem:[#allocation33_spill] sm:$0xff] }
0x19f0   :  { %v14276_v31 = vrot.slane %v14268_v28, %v22772_v21  ;;  %v14283_v22 = vrot.slane %v14269_v36, %v22772_v21  ;;  %v25579_v28 = vld [vmem:[#allocation22_spill] sm:$0xff]  ;;  %v25593_v36 = vld [vmem:[#allocation36_spill] sm:$0xff] }
0x19f1   :  { %v14016_v29 = vpop.trf.xlu0 }
0x19f2   :  { %v14260_v4 = vcombine.low %v13952_v37, %v14016_v29  ;;  %v14231_v29 = vrot.slane %v14217_v16, %v22772_v21  ;;  %v25592_v16 = vld [vmem:[#allocation25_spill] sm:$0xff] }
0x19f4   :  { %v14267_v5 = vrot.slane %v14260_v4, %v22765_v14  ;;  %v14234_v58 = vcombine.low %v14215_v35, %v14231_v29  ;;  %v14235_v4 = vcombine.high %v14215_v35, %v14231_v29  ;;  %v25606_v29 = vld [vmem:[#allocation39_spill] sm:$0xff] }
0x19f5   :  { %v25610_v35 = vld [vmem:[#allocation43_spill] sm:$0xff] }
0x19f6   :  { %v14284_v12 = vcombine.low %v14259_v24, %v14267_v5  ;;  %v14285_v19 = vcombine.high %v14259_v24, %v14267_v5  ;;  %v25580_v24 = vld [vmem:[#allocation16_spill] sm:$0xff] }
0x19f7   :  { %v25581_v5 = vld [vmem:[#allocation24_spill] sm:$0xff] }
0x19f8   :  { %v14292_v48 = vrot.slane %v14284_v12, %v22772_v21  ;;  %v14299_v37 = vrot.slane %v14285_v19, %v22772_v21  ;;  %v25584_v12 = vld [vmem:[#allocation18_spill] sm:$0xff] }
0x19f9   :  { %v25587_v19 = vld [vmem:[#allocation30_spill] sm:$0xff] }
0x19fa   :  { %v14300_v42 = vcombine.low %v14276_v31, %v14292_v48  ;;  %v14301_v43 = vcombine.high %v14276_v31, %v14292_v48  ;;  %v14302_v44 = vcombine.low %v14283_v22, %v14299_v37  ;;  %v14303_v11 = vcombine.high %v14283_v22, %v14299_v37  ;;  %v25590_v31 = vld [vmem:[#allocation23_spill] sm:$0xff]  ;;  %v25591_v48 = vld [vmem:[#allocation34_spill] sm:$0xff]  ;;  %v25601_v37 = vld [vmem:[#allocation44_spill] sm:$0xff] }
0x19fb   :  { %v25607_v22 = vld [vmem:[#allocation50_spill] sm:$0xff] }
0x19fc   :  { %v22381_v59 = vpack.c.bf16 %v14300_v42, %v14232_v55  ;;  %v22389_v54 = vpack.c.bf16 %v14301_v43, %v14233_v6  ;;  %v22397_v38 = vpack.c.bf16 %v14302_v44, %v14234_v58  ;;  %v22405_v63 = vpack.c.bf16 %v14303_v11, %v14235_v4  ;;  %v25596_v55 = vld [vmem:[#allocation29_spill] sm:$0xff]  ;;  %v25597_v42 = vld [vmem:[#allocation40_spill] sm:$0xff]  ;;  %v25598_v6 = vld [vmem:[#allocation31_spill] sm:$0xff] }
0x19fd   :  { %v25599_v43 = vld [vmem:[#allocation42_spill] sm:$0xff]  ;;  %v25612_v11 = vld [vmem:[#allocation45_spill] sm:$0xff]  ;;  %v25613_v58 = vld [vmem:[#allocation55_spill] sm:$0xff] }
0x19fe   :  { %22382 = vmatprep.subr.bf16.mxu0 %v22381_v59  ;;  %22390 = vmatprep.subr.bf16.mxu1 %v22389_v54  ;;  %v25611_v44 = vld [vmem:[#allocation54_spill] sm:$0xff]  ;;  %v25614_v4 = vld [vmem:[#allocation47_spill] sm:$0xff] }
0x19ff   :  { %22384 = vmatpush3.bf16.msra.mxu0 %v22381_v59  ;;  %22392 = vmatpush3.bf16.msra.mxu1 %v22389_v54  ;;  %v25602_v59 = vld [vmem:[#allocation35_spill] sm:$0xff]  ;;  %v25603_v54 = vld [vmem:[#allocation46_spill] sm:$0xff] }
0x1a00   :  { %22394 = vmatprep.subr.bf16.mxu0 %v22393_v32  ;;  %22402 = vmatprep.subr.bf16.mxu1 %v22401_v33 }
0x1a02   :  { %21842 = vmatmul.mubr.msk.f32.vlgmr.msra.gmra.mrb[160].mxu0 %vm1871_vm1, %v22952_v34  ;;  %21874 = vmatmul.mubr.msk.f32.vlgmr.msra.gmra.mrb[160].mxu1 %vm1871_vm1, %v22914_v49 }
0x1a03   :  { %21844 = vmatprep.mubr.msk.f32.mxu0 %vm1871_vm1, %v22959_v51  ;;  %21876 = vmatprep.mubr.msk.f32.mxu1 %vm1871_vm1, %v22916_v52 }
0x1a04   :  { %22396 = vmatpush3.bf16.msra.mxu0 %v22393_v32  ;;  %22404 = vmatpush3.bf16.msra.mxu1 %v22401_v33  ;;  %v25608_v32 = vld [vmem:[#allocation41_spill] sm:$0xff]  ;;  %v25609_v33 = vld [vmem:[#allocation52_spill] sm:$0xff] }
0x1a05   :  { %22398 = vmatprep.subr.bf16.mxu0 %v22397_v38  ;;  %22406 = vmatprep.subr.bf16.mxu1 %v22405_v63 }
0x1a06   :  { %21845 = vmatmul.mubr.msk.f32.gmra.mrb[162].mxu0 %vm1871_vm1, %v22964_v1  ;;  %21877 = vmatmul.mubr.msk.f32.gmra.mrb[162].mxu1 %vm1871_vm1, %v22921_v60 }
0x1a07   :  { %21847 = vmatprep.mubr.msk.f32.mxu0 %vm1871_vm1, %v22978_v7  ;;  %21879 = vmatprep.mubr.msk.f32.mxu1 %vm1871_vm1, %v22928_v8 }
0x1a08   :  { %22400 = vmatpush3.bf16.msra.mxu0 %v22397_v38  ;;  %22408 = vmatpush3.bf16.msra.mxu1 %v22405_v63  ;;  %v25615_v38 = vld [vmem:[#allocation56_spill] sm:$0xff]  ;;  %v25616_v63 = vld [vmem:[#allocation49_spill] sm:$0xff] }
0x1a0a   :  { %21848 = vmatmul.mubr.msk.f32.gmra.mrb[164].mxu0 %vm1871_vm1, %v23001_v17  ;;  %21880 = vmatmul.mubr.msk.f32.gmra.mrb[164].mxu1 %vm1871_vm1, %v22942_v20 }
0x1a0b   :  { %21850 = vmatprep.mubr.msk.f32.mxu0 %vm1871_vm1, %v23011_v23  ;;  %21882 = vmatprep.mubr.msk.f32.mxu1 %vm1871_vm1, %v22955_v39 }
0x1a0e   :  { %21851 = vmatmul.mubr.msk.f32.gmra.mrb[166].mxu0 %vm1871_vm1, %v23021_v25  ;;  %21883 = vmatmul.mubr.msk.f32.gmra.mrb[166].mxu1 %vm1871_vm1, %v22962_v56 }
0x1a0f   :  { %21853 = vmatprep.mubr.msk.f32.mxu0 %vm1871_vm1, %v23031_v27  ;;  %21885 = vmatprep.mubr.msk.f32.mxu1 %vm1871_vm1, %v22966_v2 }
0x1a12   :  { %21854 = vmatmul.mubr.msk.f32.gmra.mrb[168].mxu0 %vm1871_vm1, %v23041_v15  ;;  %21886 = vmatmul.mubr.msk.f32.gmra.mrb[168].mxu1 %vm1871_vm1, %v22990_v10 }
0x1a13   :  { %21856 = vmatprep.mubr.msk.f32.mxu0 %vm1871_vm1, %v25577_v30  ;;  %21888 = vmatprep.mubr.msk.f32.mxu1 %vm1871_vm1, %v25578_v18 }
0x1a16   :  { %21857 = vmatmul.mubr.msk.f32.gmra.mrb[170].mxu0 %vm1871_vm1, %v25579_v28  ;;  %21889 = vmatmul.mubr.msk.f32.gmra.mrb[170].mxu1 %vm1871_vm1, %v25580_v24 }
0x1a17   :  { %21859 = vmatprep.mubr.msk.f32.mxu0 %vm1871_vm1, %v25581_v5  ;;  %21891 = vmatprep.mubr.msk.f32.mxu1 %vm1871_vm1, %v25582_v41 }
0x1a1a   :  { %21860 = vmatmul.mubr.msk.f32.gmra.mrb[172].mxu0 %vm1871_vm1, %v25583_v26  ;;  %21892 = vmatmul.mubr.msk.f32.gmra.mrb[172].mxu1 %vm1871_vm1, %v25584_v12 }
0x1a1b   :  { %21862 = vmatprep.mubr.msk.f32.mxu0 %vm1871_vm1, %v25585_v47  ;;  %21894 = vmatprep.mubr.msk.f32.mxu1 %vm1871_vm1, %v25586_v40 }
0x1a1e   :  { %21863 = vmatmul.mubr.msk.f32.gmra.mrb[174].mxu0 %vm1871_vm1, %v25587_v19  ;;  %21895 = vmatmul.mubr.msk.f32.gmra.mrb[174].mxu1 %vm1871_vm1, %v25588_v50 }
0x1a1f   :  { %21905 = vmatprep.mubr.msk.f32.mxu0 %vm1871_vm1, %v25589_v3  ;;  %21937 = vmatprep.mubr.msk.f32.mxu1 %vm1871_vm1, %v25590_v31 }
0x1a22   :  { %21906 = vmatmul.mubr.msk.f32.vlgmr.msra.gmra.mrb[176].mxu0 %vm1871_vm1, %v25591_v48  ;;  %21938 = vmatmul.mubr.msk.f32.vlgmr.msra.gmra.mrb[176].mxu1 %vm1871_vm1, %v25592_v16 }
0x1a23   :  { %21908 = vmatprep.mubr.msk.f32.mxu0 %vm1871_vm1, %v25593_v36  ;;  %21940 = vmatprep.mubr.msk.f32.mxu1 %vm1871_vm1, %v25594_v57 }
0x1a26   :  { %21909 = vmatmul.mubr.msk.f32.gmra.mrb[178].mxu0 %vm1871_vm1, %v25595_v61  ;;  %21941 = vmatmul.mubr.msk.f32.gmra.mrb[178].mxu1 %vm1871_vm1, %v25596_v55 }
0x1a27   :  { %21911 = vmatprep.mubr.msk.f32.mxu0 %vm1871_vm1, %v25597_v42  ;;  %21943 = vmatprep.mubr.msk.f32.mxu1 %vm1871_vm1, %v25598_v6 }
0x1a2a   :  { %21912 = vmatmul.mubr.msk.f32.gmra.mrb[180].mxu0 %vm1871_vm1, %v25599_v43  ;;  %21944 = vmatmul.mubr.msk.f32.gmra.mrb[180].mxu1 %vm1871_vm1, %v25600_v45 }
0x1a2b   :  { %21914 = vmatprep.mubr.msk.f32.mxu0 %vm1871_vm1, %v25601_v37  ;;  %21946 = vmatprep.mubr.msk.f32.mxu1 %vm1871_vm1, %v25602_v59 }
0x1a2e   :  { %21915 = vmatmul.mubr.msk.f32.gmra.mrb[182].mxu0 %vm1871_vm1, %v25603_v54  ;;  %21947 = vmatmul.mubr.msk.f32.gmra.mrb[182].mxu1 %vm1871_vm1, %v25604_v9 }
0x1a2f   :  { %21917 = vmatprep.mubr.msk.f32.mxu0 %vm1871_vm1, %v25605_v53  ;;  %21949 = vmatprep.mubr.msk.f32.mxu1 %vm1871_vm1, %v25606_v29 }
0x1a32   :  { %21918 = vmatmul.mubr.msk.f32.gmra.mrb[184].mxu0 %vm1871_vm1, %v25607_v22  ;;  %21950 = vmatmul.mubr.msk.f32.gmra.mrb[184].mxu1 %vm1871_vm1, %v25608_v32  ;;  %v130_v32 = vpop.permute.xlu0 %129 }
0x1a33   :  { %21920 = vmatprep.mubr.msk.f32.mxu0 %vm1871_vm1, %v25609_v33  ;;  %21952 = vmatprep.mubr.msk.f32.mxu1 %vm1871_vm1, %v25610_v35  ;;  %v25617_v33 = vld [vmem:[#allocation57_spill] sm:$0xff]  ;;  %v25618_v35 = vld [vmem:[#allocation51_spill] sm:$0xff] }
0x1a36   :  { %21921 = vmatmul.mubr.msk.f32.gmra.mrb[186].mxu0 %vm1871_vm1, %v25611_v44  ;;  %21953 = vmatmul.mubr.msk.f32.gmra.mrb[186].mxu1 %vm1871_vm1, %v25612_v11  ;;  %v25619_v44 = vld [vmem:[#allocation58_spill] sm:$0xff]  ;;  %v25620_v11 = vld [vmem:[#allocation53_spill] sm:$0xff] }
0x1a37   :  { %21923 = vmatprep.mubr.msk.f32.mxu0 %vm1871_vm1, %v25613_v58  ;;  %21955 = vmatprep.mubr.msk.f32.mxu1 %vm1871_vm1, %v25614_v4  ;;  %v25621_v58 = vld [vmem:[#allocation14_spill] sm:$0xff]  ;;  %v25622_v4 = vld [vmem:[#allocation13_spill] sm:$0xff] }
0x1a3a   :  { %21924 = vmatmul.mubr.msk.f32.gmra.mrb[188].mxu0 %vm1871_vm1, %v25615_v38  ;;  %21956 = vmatmul.mubr.msk.f32.gmra.mrb[188].mxu1 %vm1871_vm1, %v25616_v63  ;;  %v74_v38 = vpop.permute.xlu1 %73 }
0x1a3b   :  { %21926 = vmatprep.mubr.msk.f32.mxu0 %vm1871_vm1, %v25617_v33  ;;  %21958 = vmatprep.mubr.msk.f32.mxu1 %vm1871_vm1, %v25618_v35  ;;  %v22627_v33 = vld [vmem:[%s25246_s1] sm:$0xf] }
0x1a3c   :  { %v151_v63 = vmul.f32 %v22627_v33, %v74_v38  ;;  %v22628_v35 = vld [vmem:[%s25247_s2] sm:$0xf] }
0x1a3e   :  { %21927 = vmatmul.mubr.msk.f32.gmra.mrb[190].mxu0 %vm1871_vm1, %v25619_v44  ;;  %21959 = vmatmul.mubr.msk.f32.gmra.mrb[190].mxu1 %vm1871_vm1, %v25620_v11  ;;  %v168_v44 = vadd.f32 %v22628_v35, %v151_v63  ;;  %v159_v11 = vmul.f32 %v22627_v33, %v130_v32 }
0x1a3f   :  { %21969 = vmatprep.mubr.msk.f32.mxu0 %vm1871_vm1, %v25621_v58  ;;  %22001 = vmatprep.mubr.msk.f32.mxu1 %vm1871_vm1, %v25622_v4 }
0x1a40   :  { %184 = vst [vmem:[#allocation2 + $0x14] sm:$0xf] %v168_v44  ;;  %v176_v22 = vadd.f32 %v22628_v35, %v159_v11 }
0x1a42   :  { %192 = vst [vmem:[#allocation2 + $0x34] sm:$0xf] %v176_v22 }
0x1ad5   :  { %v21843_v58 = vpop.f32.mrb[160].mxu0  ;;  %v21875_v29 = vpop.f32.mrb[160].mxu1 }
0x1ad6   :  { %v14370_v53 = vpop.f32.mrb[161].mxu0  ;;  %v14515_v4 = vpop.f32.mrb[161].mxu1 }
0x1ad7   :  { %14916 = vxpose.xlu0.b32.start [1/16] (narrow) %v14515_v4, 8  ;;  %14884 = vxpose.xlu1.b32.start [1/16] (narrow) %v14370_v53, 8 }
0x1ad9   :  { %v21846_v9 = vpop.f32.mrb[162].mxu0  ;;  %v21878_v54 = vpop.f32.mrb[162].mxu1 }
0x1ada   :  { %v14380_v59 = vpop.f32.mrb[163].mxu0  ;;  %v14525_v38 = vpop.f32.mrb[163].mxu1 }
0x1adb   :  { %14917 = vxpose.xlu0.b32.cont [2/16] (narrow) %v21875_v29, 8  ;;  %14885 = vxpose.xlu1.b32.cont [2/16] (narrow) %v21843_v58, 8 }
0x1add   :  { %v21849_v37 = vpop.f32.mrb[164].mxu0  ;;  %v21881_v45 = vpop.f32.mrb[164].mxu1 }
0x1ade   :  { %v14390_v63 = vpop.f32.mrb[165].mxu0  ;;  %v14535_v44 = vpop.f32.mrb[165].mxu1 }
0x1adf   :  { %14918 = vxpose.xlu0.b32.cont [3/16] (narrow) %v14525_v38, 8  ;;  %14886 = vxpose.xlu1.b32.cont [3/16] (narrow) %v14380_v59, 8 }
0x1ae1   :  { %v21852_v32 = vpop.f32.mrb[166].mxu0  ;;  %v21884_v22 = vpop.f32.mrb[166].mxu1 }
0x1ae2   :  { %v14400_v33 = vpop.f32.mrb[167].mxu0  ;;  %v14545_v35 = vpop.f32.mrb[167].mxu1 }
0x1ae3   :  { %14919 = vxpose.xlu0.b32.cont [4/16] (narrow) %v21878_v54, 8  ;;  %14887 = vxpose.xlu1.b32.cont [4/16] (narrow) %v21846_v9, 8 }
0x1ae5   :  { %v21855_v11 = vpop.f32.mrb[168].mxu0  ;;  %v21887_v53 = vpop.f32.mrb[168].mxu1 }
0x1ae6   :  { %v14410_v4 = vpop.f32.mrb[169].mxu0  ;;  %v14555_v43 = vpop.f32.mrb[169].mxu1 }
0x1ae7   :  { %14920 = vxpose.xlu0.b32.cont [5/16] (narrow) %v14535_v44, 8  ;;  %14888 = vxpose.xlu1.b32.cont [5/16] (narrow) %v14390_v63, 8 }
0x1ae9   :  { %v21858_v29 = vpop.f32.mrb[170].mxu0  ;;  %v21890_v58 = vpop.f32.mrb[170].mxu1 }
0x1aea   :  { %v14420_v6 = vpop.f32.mrb[171].mxu0  ;;  %v14565_v42 = vpop.f32.mrb[171].mxu1 }
0x1aeb   :  { %14921 = vxpose.xlu0.b32.cont [6/16] (narrow) %v21881_v45, 8  ;;  %14889 = vxpose.xlu1.b32.cont [6/16] (narrow) %v21849_v37, 8 }
0x1aed   :  { %v21861_v38 = vpop.f32.mrb[172].mxu0  ;;  %v21893_v59 = vpop.f32.mrb[172].mxu1 }
0x1aee   :  { %v14430_v55 = vpop.f32.mrb[173].mxu0  ;;  %v14575_v61 = vpop.f32.mrb[173].mxu1 }
0x1aef   :  { %14922 = vxpose.xlu0.b32.cont [7/16] (narrow) %v14545_v35, 8  ;;  %14890 = vxpose.xlu1.b32.cont [7/16] (narrow) %v14400_v33, 8 }
0x1af1   :  { %v21864_v54 = vpop.f32.mrb[174].mxu0  ;;  %v21896_v9 = vpop.f32.mrb[174].mxu1 }
0x1af2   :  { %v14440_v57 = vpop.f32.mrb[175].mxu0  ;;  %v14585_v36 = vpop.f32.mrb[175].mxu1 }
0x1af3   :  { %14923 = vxpose.xlu0.b32.cont [8/16] (narrow) %v21884_v22, 8  ;;  %14891 = vxpose.xlu1.b32.cont [8/16] (narrow) %v21852_v32, 8 }
0x1af5   :  { %v21907_v44 = vpop.f32.mrb[176].mxu0  ;;  %v21939_v63 = vpop.f32.mrb[176].mxu1 }
0x1af6   :  { %v14660_v16 = vpop.f32.mrb[177].mxu0  ;;  %v14805_v48 = vpop.f32.mrb[177].mxu1 }
0x1af7   :  { %14924 = vxpose.xlu0.b32.cont [9/16] (narrow) %v14555_v43, 8  ;;  %14892 = vxpose.xlu1.b32.cont [9/16] (narrow) %v14410_v4, 8 }
0x1af9   :  { %v21910_v45 = vpop.f32.mrb[178].mxu0  ;;  %v21942_v37 = vpop.f32.mrb[178].mxu1 }
0x1afa   :  { %v14670_v31 = vpop.f32.mrb[179].mxu0  ;;  %v14815_v3 = vpop.f32.mrb[179].mxu1 }
0x1afb   :  { %14925 = vxpose.xlu0.b32.cont [10/16] (narrow) %v21887_v53, 8  ;;  %14893 = vxpose.xlu1.b32.cont [10/16] (narrow) %v21855_v11, 8 }
0x1afd   :  { %v21913_v35 = vpop.f32.mrb[180].mxu0  ;;  %v21945_v33 = vpop.f32.mrb[180].mxu1 }
0x1afe   :  { %v14680_v50 = vpop.f32.mrb[181].mxu0  ;;  %v14825_v19 = vpop.f32.mrb[181].mxu1 }
0x1aff   :  { %14926 = vxpose.xlu0.b32.cont [11/16] (narrow) %v14565_v42, 8  ;;  %14894 = vxpose.xlu1.b32.cont [11/16] (narrow) %v14420_v6, 8 }
0x1b01   :  { %v21916_v22 = vpop.f32.mrb[182].mxu0  ;;  %v21948_v32 = vpop.f32.mrb[182].mxu1 }
0x1b02   :  { %v14690_v40 = vpop.f32.mrb[183].mxu0  ;;  %v14835_v47 = vpop.f32.mrb[183].mxu1 }
0x1b03   :  { %14927 = vxpose.xlu0.b32.cont [12/16] (narrow) %v21890_v58, 8  ;;  %14895 = vxpose.xlu1.b32.cont [12/16] (narrow) %v21858_v29, 8 }
0x1b05   :  { %v21919_v43 = vpop.f32.mrb[184].mxu0  ;;  %v21951_v4 = vpop.f32.mrb[184].mxu1 }
0x1b06   :  { %v14700_v12 = vpop.f32.mrb[185].mxu0  ;;  %v14845_v26 = vpop.f32.mrb[185].mxu1 }
0x1b07   :  { %14928 = vxpose.xlu0.b32.cont [13/16] (narrow) %v14575_v61, 8  ;;  %14896 = vxpose.xlu1.b32.cont [13/16] (narrow) %v14430_v55, 8 }
0x1b09   :  { %v21922_v53 = vpop.f32.mrb[186].mxu0  ;;  %v21954_v11 = vpop.f32.mrb[186].mxu1 }
0x1b0a   :  { %v14710_v41 = vpop.f32.mrb[187].mxu0  ;;  %v14855_v5 = vpop.f32.mrb[187].mxu1 }
0x1b0b   :  { %14929 = vxpose.xlu0.b32.cont [14/16] (narrow) %v21893_v59, 8  ;;  %14897 = vxpose.xlu1.b32.cont [14/16] (narrow) %v21861_v38, 8 }
0x1b0d   :  { %v21925_v42 = vpop.f32.mrb[188].mxu0  ;;  %v21957_v6 = vpop.f32.mrb[188].mxu1 }
0x1b0e   :  { %v14720_v24 = vpop.f32.mrb[189].mxu0  ;;  %v14865_v28 = vpop.f32.mrb[189].mxu1 }
0x1b0f   :  { %14930 = vxpose.xlu0.b32.cont [15/16] (narrow) %v14585_v36, 8  ;;  %14898 = vxpose.xlu1.b32.cont [15/16] (narrow) %v14440_v57, 8 }
0x1b11   :  { %v21928_v58 = vpop.f32.mrb[190].mxu0  ;;  %v21960_v29 = vpop.f32.mrb[190].mxu1 }
0x1b12   :  { %v14730_v18 = vpop.f32.mrb[191].mxu0  ;;  %v14875_v30 = vpop.f32.mrb[191].mxu1 }
0x1b13   :  { %14931 = vxpose.xlu0.b32.end [16/16] (narrow) %v21896_v9, 8  ;;  %14899 = vxpose.xlu1.b32.end [16/16] (narrow) %v21864_v54, 8 }
0x1b17   :  { %14980 = vxpose.xlu0.b32.start [1/16] (narrow) %v14805_v48, 8  ;;  %14948 = vxpose.xlu1.b32.start [1/16] (narrow) %v14660_v16, 8 }
0x1b1b   :  { %14981 = vxpose.xlu0.b32.cont [2/16] (narrow) %v21939_v63, 8  ;;  %14949 = vxpose.xlu1.b32.cont [2/16] (narrow) %v21907_v44, 8 }
0x1b1f   :  { %14982 = vxpose.xlu0.b32.cont [3/16] (narrow) %v14815_v3, 8  ;;  %14950 = vxpose.xlu1.b32.cont [3/16] (narrow) %v14670_v31, 8 }
0x1b23   :  { %14983 = vxpose.xlu0.b32.cont [4/16] (narrow) %v21942_v37, 8  ;;  %14951 = vxpose.xlu1.b32.cont [4/16] (narrow) %v21910_v45, 8 }
0x1b27   :  { %14984 = vxpose.xlu0.b32.cont [5/16] (narrow) %v14825_v19, 8  ;;  %14952 = vxpose.xlu1.b32.cont [5/16] (narrow) %v14680_v50, 8 }
0x1b2b   :  { %14985 = vxpose.xlu0.b32.cont [6/16] (narrow) %v21945_v33, 8  ;;  %14953 = vxpose.xlu1.b32.cont [6/16] (narrow) %v21913_v35, 8 }
0x1b2f   :  { %14986 = vxpose.xlu0.b32.cont [7/16] (narrow) %v14835_v47, 8  ;;  %14954 = vxpose.xlu1.b32.cont [7/16] (narrow) %v14690_v40, 8 }
0x1b33   :  { %14987 = vxpose.xlu0.b32.cont [8/16] (narrow) %v21948_v32, 8  ;;  %14955 = vxpose.xlu1.b32.cont [8/16] (narrow) %v21916_v22, 8 }
0x1b37   :  { %14988 = vxpose.xlu0.b32.cont [9/16] (narrow) %v14845_v26, 8  ;;  %14956 = vxpose.xlu1.b32.cont [9/16] (narrow) %v14700_v12, 8 }
0x1b3b   :  { %14989 = vxpose.xlu0.b32.cont [10/16] (narrow) %v21951_v4, 8  ;;  %14957 = vxpose.xlu1.b32.cont [10/16] (narrow) %v21919_v43, 8 }
0x1b3f   :  { %14990 = vxpose.xlu0.b32.cont [11/16] (narrow) %v14855_v5, 8  ;;  %14958 = vxpose.xlu1.b32.cont [11/16] (narrow) %v14710_v41, 8 }
0x1b43   :  { %14991 = vxpose.xlu0.b32.cont [12/16] (narrow) %v21954_v11, 8  ;;  %14959 = vxpose.xlu1.b32.cont [12/16] (narrow) %v21922_v53, 8 }
0x1b47   :  { %14992 = vxpose.xlu0.b32.cont [13/16] (narrow) %v14865_v28, 8  ;;  %14960 = vxpose.xlu1.b32.cont [13/16] (narrow) %v14720_v24, 8  ;;  %v15038_v24 = vld [vmem:[#allocation2 + $0x14] sm:$0xf] }
0x1b4b   :  { %14993 = vxpose.xlu0.b32.cont [14/16] (narrow) %v21957_v6, 8  ;;  %14961 = vxpose.xlu1.b32.cont [14/16] (narrow) %v21925_v42, 8 }
0x1b4f   :  { %14994 = vxpose.xlu0.b32.cont [15/16] (narrow) %v14875_v30, 8  ;;  %14962 = vxpose.xlu1.b32.cont [15/16] (narrow) %v14730_v18, 8  ;;  %v15039_v18 = vld [vmem:[#allocation2 + $0x34] sm:$0xf] }
0x1b53   :  { %14995 = vxpose.xlu0.b32.end [16/16] (narrow) %v21960_v29, 8  ;;  %14963 = vxpose.xlu1.b32.end [16/16] (narrow) %v21928_v58, 8 }
0x1b57   :  { %v14900_v47 = vpop.trf.xlu1  ;;  %v14932_v40 = vpop.trf.xlu0 }
0x1b97   :  { %v14964_v19 = vpop.trf.xlu1  ;;  %v14996_v50 = vpop.trf.xlu0 }
0x1b98   :  { %v15012_v26 = vcombine.low %v14900_v47, %v14964_v19  ;;  %v15020_v12 = vcombine.low %v14932_v40, %v14996_v50 }
0x1b9a   :  { %v15019_v3 = vrot.slane %v15012_v26, %v22765_v14  ;;  %v15027_v5 = vrot.slane %v15020_v12, %v22765_v14 }
0x1b9c   :  { %v15028_v41 = vcombine.low %v15019_v3, %v15027_v5 }
0x1b9e   :  { %v15035_v28 = vrot.slane %v15028_v41, %v22772_v21 }
0x1ba0   :  { %v15036_v31 = vcombine.high %v15035_v28, %v25439_v0  ;;  %v15040_v30 = vadd.f32 %v15038_v24, %v15035_v28 }
0x1ba2   :  { %v15041_v48 = vadd.f32 %v15039_v18, %v15036_v31  ;;  %22563 = vtanh.f32 %v15040_v30  ;;  %v20419_v16 = vmul.f32 -1.442695, %v15040_v30 }
0x1ba4   :  { %22565 = vtanh.f32 %v15041_v48  ;;  %v20420_v36 = vmul.f32 -1.442695, %v15041_v48 }
0x1ba5   :  { %22567 = vpow2.f32 %v20419_v16 }
0x1ba6   :  { %22569 = vpow2.f32 %v20420_v36 }
0x1bac   :  { %v22564_v57 = vpop.eup %22563 }
0x1bad   :  { %15068 = vrot.lane.b32.xlu1 %v22564_v57, %s22710_s12 }
0x1bae   :  { %v22566_v61 = vpop.eup %22565 }
0x1baf   :  { %v22568_v55 = vpop.eup %22567  ;;  %15070 = vrot.lane.b32.xlu0 %v22566_v61, %s22710_s12 }
0x1bb0   :  { %v22570_v38 = vpop.eup %22569  ;;  %v15050_v59 = vadd.f32 1.0, %v22568_v55 }
0x1bb1   :  { %v15051_v54 = vadd.f32 1.0, %v22570_v38 }
0x1bb2   :  { %22571 = vrcp.f32 %v15050_v59 }
0x1bb3   :  { %22573 = vrcp.f32 %v15051_v54 }
0x1bbc   :  { %v22572_v9 = vpop.eup %22571 }
0x1bbd   :  { %15058 = vrot.lane.b32.xlu1 %v22572_v9, %s22711_s13  ;;  %v22574_v44 = vpop.eup %22573 }
0x1bc1   :  { %15060 = vrot.lane.b32.xlu1 %v22574_v44, %s22711_s13 }
0x1c1f   :  { %v15069_v63 = vpop.permute.xlu1 %15068 }
0x1c20   :  { %v15074_v45 = vmul.f32 %v22572_v9, %v15069_v63 }
0x1c21   :  { %v15071_v37 = vpop.permute.xlu0 %15070 }
0x1c22   :  { %15078 = vrot.lane.b32.xlu1 %v15074_v45, %s22712_s14  ;;  %v15075_v35 = vmul.f32 %v22574_v44, %v15071_v37 }
0x1c26   :  { %15080 = vrot.lane.b32.xlu1 %v15075_v35, %s22712_s14 }
0x1c2f   :  { %v15059_v33 = vpop.permute.xlu1 %15058 }
0x1c30   :  { %v15064_v32 = vmul.f32 %v15059_v33, %v24338_v13 }
0x1c33   :  { %v15061_v22 = vpop.permute.xlu1 %15060 }
0x1c34   :  { %v15065_v53 = vmul.f32 %v15061_v22, %v24342_v46 }
0x1c94   :  { %v15079_v43 = vpop.permute.xlu1 %15078 }
0x1c95   :  { %v24617_v4 = vadd.f32 %v15079_v43, %v15064_v32 }
0x1c97   :  { %22575 = vtanh.f32 %v24617_v4 }
0x1c98   :  { %v15081_v11 = vpop.permute.xlu1 %15080 }
0x1c99   :  { %v24621_v42 = vadd.f32 %v15081_v11, %v15065_v53 }
0x1c9b   :  { %22577 = vtanh.f32 %v24621_v42 }
0x1ca1   :  { %v22576_v6 = vpop.eup %22575 }
0x1ca2   :  { %15090 = vrot.lane.b32.xlu0 %v22576_v6, %s22712_s14 }
0x1ca5   :  { %v22578_v58 = vpop.eup %22577 }
0x1ca6   :  { %15092 = vrot.lane.b32.xlu1 %v22578_v58, %s22712_s14 }
0x1d14   :  { %v15091_v29 = vpop.permute.xlu0 %15090 }
0x1d15   :  { %v15096_v13 = vmul.f32 %v22572_v9, %v15091_v29 }
0x1d17   :  { %15100 = vrot.lane.b32.xlu0 %v15096_v13, %s22710_s12 }
0x1d18   :  { %v15093_v47 = vpop.permute.xlu1 %15092 }
0x1d19   :  { %v15097_v40 = vmul.f32 %v22574_v44, %v15093_v47 }
0x1d1b   :  { %15102 = vrot.lane.b32.xlu1 %v15097_v40, %s22710_s12 }
0x1d89   :  { %v15101_v46 = vpop.permute.xlu0 %15100 }
0x1d8a   :  { %15107 = vst.msk [vmem:[#allocation5 + $0x14] sm:$0xf] %vm26_vm0, %v15101_v46  ;;  %15109 = vxpose.xlu0.b32.start.end [1/1] (short) (narrow) %v15101_v46, 32 }
0x1d8d   :  { %v15103_v19 = vpop.permute.xlu1 %15102 }
0x1d8e   :  { %15108 = vst.msk [vmem:[#allocation5 + $0x34] sm:$0xf] %vm26_vm0, %v15103_v19  ;;  %15141 = vxpose.xlu1.b32.start.end [1/1] (short) (narrow) %v15103_v19, 32 }
0x1e0a   :  { %v15125_v50 = vpop.trf.xlu0 }
0x1e0b   :  { %v15173_v26 = vcombine.high %v15125_v50, %v25439_v0  ;;  %v15180_v12 = vrot.slane %v15125_v50, %v22765_v14 }
0x1e0d   :  { %v15187_v28 = vrot.slane %v15173_v26, %v22765_v14 }
0x1e0e   :  { %v15157_v3 = vpop.trf.xlu1  ;;  %v15126_v24 = vpop.trf.xlu0 }
0x1e0f   :  { %v15188_v5 = vcombine.high %v15157_v3, %v25439_v0  ;;  %v15195_v41 = vrot.slane %v15157_v3, %v22765_v14  ;;  %v15246_v16 = vrot.slane %v15126_v24, %v22765_v14  ;;  %v15239_v38 = vcombine.high %v15126_v24, %v25439_v0 }
0x1e11   :  { %v15202_v31 = vrot.slane %v15188_v5, %v22765_v14  ;;  %v15203_v30 = vcombine.low %v15180_v12, %v15195_v41  ;;  %v15204_v18 = vcombine.high %v15180_v12, %v15195_v41  ;;  %v15253_v63 = vrot.slane %v15239_v38, %v22765_v14 }
0x1e12   :  { %v15158_v48 = vpop.trf.xlu1  ;;  %v15127_v53 = vpop.trf.xlu0 }
0x1e13   :  { %v15218_v36 = vrot.slane %v15204_v18, %v22772_v21  ;;  %v15211_v57 = vrot.slane %v15203_v30, %v22772_v21  ;;  %v15220_v61 = vcombine.high %v15187_v28, %v15202_v31  ;;  %v15261_v55 = vrot.slane %v15158_v48, %v22765_v14 }
0x1e14   :  { %v15254_v59 = vcombine.high %v15158_v48, %v25439_v0  ;;  %v15219_v22 = vcombine.low %v15187_v28, %v15202_v31  ;;  %v15312_v58 = vrot.slane %v15127_v53, %v22765_v14  ;;  %v15305_v19 = vcombine.high %v15127_v53, %v25439_v0 }
0x1e15   :  { %15501 = vxpose.xlu1.b32.start.end [1/1] (short) (narrow) %v15218_v36, 8  ;;  %15437 = vxpose.xlu0.b32.start.end [1/1] (short) (narrow) %v15211_v57, 8  ;;  %v15269_v54 = vcombine.low %v15246_v16, %v15261_v55  ;;  %v15235_v9 = vcombine.high %v15211_v57, %v25439_v0  ;;  %v15234_v44 = vrot.slane %v15220_v61, %v22772_v21 }
0x1e16   :  { %v15268_v45 = vrot.slane %v15254_v59, %v22765_v14  ;;  %v15270_v37 = vcombine.high %v15246_v16, %v15261_v55  ;;  %v15236_v33 = vcombine.high %v15218_v36, %v25439_v0  ;;  %v15159_v11 = vpop.trf.xlu1  ;;  %v15227_v6 = vrot.slane %v15219_v22, %v22772_v21  ;;  %v15128_v48 = vpop.trf.xlu0 }
0x1e17   :  { %v15277_v35 = vrot.slane %v15269_v54, %v22772_v21  ;;  %v15327_v13 = vrot.slane %v15159_v11, %v22765_v14  ;;  %v15320_v46 = vcombine.high %v15159_v11, %v25439_v0  ;;  %v15238_v12 = vcombine.high %v15234_v44, %v25439_v0 }
0x1e18   :  { %v15284_v32 = vrot.slane %v15270_v37, %v22772_v21  ;;  %v15285_v43 = vcombine.low %v15253_v63, %v15268_v45  ;;  %v15286_v47 = vcombine.high %v15253_v63, %v15268_v45  ;;  %v15237_v40 = vcombine.high %v15227_v6, %v25439_v0 }
0x1e19   :  { %15469 = vxpose.xlu0.b32.start.end [1/1] (short) (narrow) %v15235_v9, 8  ;;  %15629 = vxpose.xlu1.b32.start.end [1/1] (short) (narrow) %v15234_v44, 8  ;;  %v15335_v50 = vcombine.low %v15312_v58, %v15327_v13  ;;  %v15334_v3 = vrot.slane %v15320_v46, %v22765_v14  ;;  %v15319_v5 = vrot.slane %v15305_v19, %v22765_v14 }
0x1e1a   :  { %v15293_v29 = vrot.slane %v15285_v43, %v22772_v21  ;;  %v15300_v26 = vrot.slane %v15286_v47, %v22772_v21  ;;  %v15336_v41 = vcombine.high %v15312_v58, %v15327_v13  ;;  %v15301_v28 = vcombine.high %v15277_v35, %v25439_v0  ;;  %v15160_v18 = vpop.trf.xlu1 }
0x1e1b   :  { %v15343_v24 = vrot.slane %v15335_v50, %v22772_v21  ;;  %v15351_v30 = vcombine.low %v15319_v5, %v15334_v3  ;;  %v15302_v16 = vcombine.high %v15284_v32, %v25439_v0  ;;  %v15393_v36 = vrot.slane %v15160_v18, %v22765_v14 }
0x1e1c   :  { %v15350_v31 = vrot.slane %v15336_v41, %v22772_v21  ;;  %v15378_v61 = vrot.slane %v15128_v48, %v22765_v14  ;;  %v15352_v55 = vcombine.high %v15319_v5, %v15334_v3  ;;  %v15303_v38 = vcombine.high %v15293_v29, %v25439_v0 }
0x1e1d   :  { %15533 = vxpose.xlu0.b32.start.end [1/1] (short) (narrow) %v15236_v33, 8  ;;  %15693 = vxpose.xlu1.b32.start.end [1/1] (short) (narrow) %v15277_v35, 8  ;;  %v15359_v57 = vrot.slane %v15351_v30, %v22772_v21  ;;  %v15386_v59 = vcombine.high %v15160_v18, %v25439_v0  ;;  %v15371_v54 = vcombine.high %v15128_v48, %v25439_v0  ;;  %v77_v18 = vsub.s32 6, %v25442_v62 }
0x1e1e   :  { %v15401_v9 = vcombine.low %v15378_v61, %v15393_v36  ;;  %v15366_v44 = vrot.slane %v15352_v55, %v22772_v21  ;;  %v15304_v63 = vcombine.high %v15300_v26, %v25439_v0  ;;  %v15402_v35 = vcombine.high %v15378_v61, %v15393_v36  ;;  %v22629_v36 = vld [vmem:[%s25245_s0] sm:$0xff]  ;;  %v22630_v61 = vld [vmem:[%s25245_s0 + $0x8] sm:$0xff] }
0x1e1f   :  { %v15400_v45 = vrot.slane %v15386_v59, %v22765_v14  ;;  %v15385_v37 = vrot.slane %v15371_v54, %v22765_v14  ;;  %v15367_v33 = vcombine.high %v15343_v24, %v25439_v0  ;;  %v15368_v53 = vcombine.high %v15350_v31, %v25439_v0 }
0x1e20   :  { %v15409_v22 = vrot.slane %v15401_v9, %v22772_v21  ;;  %v15369_v58 = vcombine.high %v15359_v57, %v25439_v0  ;;  %v15370_v13 = vcombine.high %v15366_v44, %v25439_v0  ;;  %v134_v55 = vrot.slane %v22630_v61, %v77_v18 }
0x1e21   :  { %15565 = vxpose.xlu0.b32.start.end [1/1] (short) (narrow) %v15227_v6, 8  ;;  %15757 = vxpose.xlu1.b32.start.end [1/1] (short) (narrow) %v15284_v32, 8  ;;  %v15416_v32 = vrot.slane %v15402_v35, %v22772_v21  ;;  %v15417_v43 = vcombine.low %v15385_v37, %v15400_v45  ;;  %v15418_v6 = vcombine.high %v15385_v37, %v15400_v45 }
0x1e22   :  { %v15433_v47 = vcombine.high %v15409_v22, %v25439_v0 }
0x1e23   :  { %v15425_v11 = vrot.slane %v15417_v43, %v22772_v21 }
0x1e25   :  { %15597 = vxpose.xlu0.b32.start.end [1/1] (short) (narrow) %v15237_v40, 8  ;;  %15821 = vxpose.xlu1.b32.start.end [1/1] (short) (narrow) %v15293_v29, 8  ;;  %v15432_v29 = vrot.slane %v15418_v6, %v22772_v21  ;;  %v15434_v40 = vcombine.high %v15416_v32, %v25439_v0  ;;  %v15435_v46 = vcombine.high %v15425_v11, %v25439_v0 }
0x1e27   :  { %v15436_v19 = vcombine.high %v15432_v29, %v25439_v0 }
0x1e29   :  { %15661 = vxpose.xlu0.b32.start.end [1/1] (short) (narrow) %v15238_v12, 8  ;;  %15885 = vxpose.xlu1.b32.start.end [1/1] (short) (narrow) %v15300_v26, 8 }
0x1e2d   :  { %15725 = vxpose.xlu0.b32.start.end [1/1] (short) (narrow) %v15301_v28, 8  ;;  %15949 = vxpose.xlu1.b32.start.end [1/1] (short) (narrow) %v15343_v24, 8 }
0x1e31   :  { %15789 = vxpose.xlu0.b32.start.end [1/1] (short) (narrow) %v15302_v16, 8  ;;  %16013 = vxpose.xlu1.b32.start.end [1/1] (short) (narrow) %v15350_v31, 8 }
0x1e35   :  { %15853 = vxpose.xlu0.b32.start.end [1/1] (short) (narrow) %v15303_v38, 8  ;;  %16077 = vxpose.xlu1.b32.start.end [1/1] (short) (narrow) %v15359_v57, 8  ;;  %v78_v57 = vrot.slane %v22629_v36, %v77_v18 }
0x1e39   :  { %15917 = vxpose.xlu0.b32.start.end [1/1] (short) (narrow) %v15304_v63, 8  ;;  %16141 = vxpose.xlu1.b32.start.end [1/1] (short) (narrow) %v15366_v44, 8 }
0x1e3d   :  { %15981 = vxpose.xlu0.b32.start.end [1/1] (short) (narrow) %v15367_v33, 8  ;;  %16205 = vxpose.xlu1.b32.start.end [1/1] (short) (narrow) %v15409_v22, 8 }
0x1e41   :  { %16045 = vxpose.xlu0.b32.start.end [1/1] (short) (narrow) %v15368_v53, 8  ;;  %16269 = vxpose.xlu1.b32.start.end [1/1] (short) (narrow) %v15416_v32, 8 }
0x1e45   :  { %16109 = vxpose.xlu0.b32.start.end [1/1] (short) (narrow) %v15369_v58, 8  ;;  %16333 = vxpose.xlu1.b32.start.end [1/1] (short) (narrow) %v15425_v11, 8 }
0x1e49   :  { %16173 = vxpose.xlu0.b32.start.end [1/1] (short) (narrow) %v15370_v13, 8  ;;  %16397 = vxpose.xlu1.b32.start.end [1/1] (short) (narrow) %v15432_v29, 8 }
0x1e4d   :  { %16237 = vxpose.xlu0.b32.start.end [1/1] (short) (narrow) %v15433_v47, 8 }
0x1e51   :  { %16301 = vxpose.xlu0.b32.start.end [1/1] (short) (narrow) %v15434_v40, 8 }
0x1e55   :  { %16365 = vxpose.xlu0.b32.start.end [1/1] (short) (narrow) %v15435_v46, 8 }
0x1e59   :  { %16429 = vxpose.xlu0.b32.start.end [1/1] (short) (narrow) %v15436_v19, 8 }
0x1e67   :  { %80 = vbcast.lane.b32.xlu1 %v78_v57, 256 }
0x1e82   :  { %136 = vbcast.lane.b32.xlu0 %v134_v55, 256 }
0x1e95   :  { %v15517_v50 = vpop.trf.xlu1  ;;  %v15453_v26 = vpop.trf.xlu0 }
0x1e96   :  { %v16461_v33 = vcombine.low %v15453_v26, %v15517_v50 }
0x1e98   :  { %v24710_v13 = vrot.slane %v16461_v33, %v22765_v14 }
0x1e99   :  { %v15485_v12 = vpop.trf.xlu0  ;;  %v15645_v3 = vpop.trf.xlu1 }
0x1e9d   :  { %v15549_v5 = vpop.trf.xlu0  ;;  %v15709_v41 = vpop.trf.xlu1 }
0x1e9e   :  { %v16469_v63 = vcombine.low %v15485_v12, %v15549_v5 }
0x1ea0   :  { %v24701_v53 = vrot.slane %v16469_v63, %v22765_v14 }
0x1ea1   :  { %v15581_v28 = vpop.trf.xlu0  ;;  %v15773_v24 = vpop.trf.xlu1 }
0x1ea2   :  { %v16477_v45 = vcombine.low %v15581_v28, %v15645_v3  ;;  %v16529_v32 = vcombine.low %v15709_v41, %v15773_v24  ;;  %v16493_v19 = vcombine.low %v24710_v13, %v24701_v53 }
0x1ea4   :  { %v24704_v11 = vrot.slane %v16477_v45, %v22765_v14  ;;  %v16536_v40 = vrot.slane %v16529_v32, %v22765_v14  ;;  %v16501_v24 = vrot.slane %v16493_v19, %v22772_v21 }
0x1ea5   :  { %v15613_v31 = vpop.trf.xlu0  ;;  %v15837_v30 = vpop.trf.xlu1 }
0x1ea9   :  { %v15677_v48 = vpop.trf.xlu0  ;;  %v15901_v16 = vpop.trf.xlu1 }
0x1eaa   :  { %v16485_v44 = vcombine.low %v15613_v31, %v15677_v48  ;;  %v16545_v58 = vcombine.low %v15837_v30, %v15901_v16 }
0x1eac   :  { %v24698_v22 = vrot.slane %v16485_v44, %v22765_v14  ;;  %v16552_v26 = vrot.slane %v16545_v58, %v22765_v14 }
0x1ead   :  { %v15741_v38 = vpop.trf.xlu0  ;;  %v24693_v59 = vpop.trf.xlu1 }
0x1eae   :  { %v16509_v47 = vcombine.low %v24704_v11, %v24698_v22 }
0x1eb0   :  { %v16517_v41 = vrot.slane %v16509_v47, %v22772_v21 }
0x1eb1   :  { %v15805_v54 = vpop.trf.xlu0  ;;  %v24695_v9 = vpop.trf.xlu1 }
0x1eb2   :  { %v16537_v37 = vcombine.low %v15741_v38, %v15805_v54  ;;  %v16525_v48 = vcombine.low %v16501_v24, %v16517_v41  ;;  %v16526_v36 = vcombine.high %v16501_v24, %v16517_v41  ;;  %v16597_v19 = vcombine.low %v24693_v59, %v24695_v9 }
0x1eb3   :  { %v16494_v59 = vcombine.high %v24710_v13, %v24701_v53  ;;  %v16510_v9 = vcombine.high %v24704_v11, %v24698_v22 }
0x1eb4   :  { %v24707_v6 = vrot.slane %v16537_v37, %v22765_v14 }
0x1eb5   :  { %v15869_v35 = vpop.trf.xlu0  ;;  %v16093_v43 = vpop.trf.xlu1  ;;  %v16524_v22 = vrot.slane %v16510_v9, %v22772_v21 }
0x1eb6   :  { %v16561_v50 = vcombine.low %v16536_v40, %v24707_v6 }
0x1eb8   :  { %v16569_v31 = vrot.slane %v16561_v50, %v22772_v21 }
0x1eb9   :  { %v15933_v29 = vpop.trf.xlu0  ;;  %v16157_v5 = vpop.trf.xlu1 }
0x1eba   :  { %v16553_v46 = vcombine.low %v15869_v35, %v15933_v29  ;;  %v16613_v58 = vcombine.low %v16093_v43, %v16157_v5  ;;  %v16604_v43 = vrot.slane %v16597_v19, %v22765_v14 }
0x1ebc   :  { %v16560_v12 = vrot.slane %v16553_v46, %v22765_v14  ;;  %v16620_v24 = vrot.slane %v16613_v58, %v22765_v14 }
0x1ebd   :  { %v15997_v3 = vpop.trf.xlu0  ;;  %v16221_v61 = vpop.trf.xlu1 }
0x1ebe   :  { %v16577_v28 = vcombine.low %v16552_v26, %v16560_v12 }
0x1ec0   :  { %v16585_v30 = vrot.slane %v16577_v28, %v22772_v21 }
0x1ec1   :  { %v16061_v18 = vpop.trf.xlu0  ;;  %v16285_v63 = vpop.trf.xlu1 }
0x1ec2   :  { %v16593_v16 = vcombine.low %v16569_v31, %v16585_v30  ;;  %v16594_v57 = vcombine.high %v16569_v31, %v16585_v30  ;;  %v16605_v32 = vcombine.low %v15997_v3, %v16061_v18  ;;  %v16665_v41 = vcombine.low %v16221_v61, %v16285_v63 }
0x1ec4   :  { %v22409_v55 = vpack.c.bf16 %v16593_v16, %v16525_v48  ;;  %v22417_v38 = vpack.c.bf16 %v16594_v57, %v16526_v36  ;;  %v16612_v28 = vrot.slane %v16605_v32, %v22765_v14  ;;  %v16578_v48 = vcombine.high %v16552_v26, %v16560_v12 }
0x1ec5   :  { %v16125_v54 = vpop.trf.xlu0  ;;  %v16349_v37 = vpop.trf.xlu1  ;;  %v16672_v5 = vrot.slane %v16665_v41, %v22765_v14  ;;  %v16562_v36 = vcombine.high %v16536_v40, %v24707_v6 }
0x1ec6   :  { %22410 = vmatprep.subr.bf16.mxu0 %v22409_v55  ;;  %22418 = vmatprep.subr.bf16.mxu1 %v22417_v38  ;;  %v16629_v57 = vcombine.low %v16604_v43, %v16612_v28  ;;  %v16592_v12 = vrot.slane %v16578_v48, %v22772_v21 }
0x1ec7   :  { %22412 = vmatpush3.bf16.msra.mxu0 %v22409_v55  ;;  %22420 = vmatpush3.bf16.msra.mxu1 %v22417_v38  ;;  %v16576_v53 = vrot.slane %v16562_v36, %v22772_v21  ;;  %v25623_v36 = vld [vmem:[#allocation20_spill] sm:$0xff] }
0x1ec8   :  { %v16637_v11 = vrot.slane %v16629_v57, %v22772_v21  ;;  %v25624_v57 = vld [vmem:[#allocation15_spill] sm:$0xff] }
0x1ec9   :  { %v16189_v44 = vpop.trf.xlu0  ;;  %v16413_v47 = vpop.trf.xlu1 }
0x1eca   :  { %v16621_v33 = vcombine.low %v16125_v54, %v16189_v44  ;;  %v16681_v30 = vcombine.low %v16349_v37, %v16413_v47  ;;  %v16508_v44 = vrot.slane %v16494_v59, %v22772_v21  ;;  %v16595_v37 = vcombine.low %v16576_v53, %v16592_v12 }
0x1ecb   :  { %v16630_v47 = vcombine.high %v16604_v43, %v16612_v28 }
0x1ecc   :  { %v16628_v50 = vrot.slane %v16621_v33, %v22765_v14  ;;  %v16688_v55 = vrot.slane %v16681_v30, %v22765_v14  ;;  %v16527_v30 = vcombine.low %v16508_v44, %v16524_v22  ;;  %v16528_v48 = vcombine.high %v16508_v44, %v16524_v22  ;;  %v25631_v44 = vld [vmem:[#allocation28_spill] sm:$0xff]  ;;  %v25634_v22 = vld [vmem:[#allocation21_spill] sm:$0xff] }
0x1ecd   :  { %v16253_v45 = vpop.trf.xlu0 }
0x1ece   :  { %v16645_v3 = vcombine.low %v16620_v24, %v16628_v50  ;;  %v16646_v63 = vcombine.high %v16620_v24, %v16628_v50  ;;  %v22425_v50 = vpack.c.bf16 %v16595_v37, %v16527_v30  ;;  %v25640_v37 = vld [vmem:[#allocation27_spill] sm:$0xff]  ;;  %v25650_v30 = vld [vmem:[#allocation37_spill] sm:$0xff] }
0x1ed0   :  { %v16653_v38 = vrot.slane %v16645_v3, %v22772_v21 }
0x1ed1   :  { %v16317_v35 = vpop.trf.xlu0 }
0x1ed2   :  { %v16673_v29 = vcombine.low %v16253_v45, %v16317_v35  ;;  %v16596_v35 = vcombine.high %v16576_v53, %v16592_v12  ;;  %v16661_v33 = vcombine.low %v16637_v11, %v16653_v38  ;;  %v16662_v58 = vcombine.high %v16637_v11, %v16653_v38  ;;  %v25628_v12 = vld [vmem:[#allocation17_spill] sm:$0xff]  ;;  %v25629_v38 = vld [vmem:[#allocation26_spill] sm:$0xff]  ;;  %v25632_v53 = vld [vmem:[#allocation19_spill] sm:$0xff] }
0x1ed3   :  { %v25635_v11 = vld [vmem:[#allocation32_spill] sm:$0xff] }
0x1ed4   :  { %v16680_v31 = vrot.slane %v16673_v29, %v22765_v14  ;;  %v22433_v24 = vpack.c.bf16 %v16596_v35, %v16528_v48  ;;  %v25641_v35 = vld [vmem:[#allocation38_spill] sm:$0xff]  ;;  %v25651_v48 = vld [vmem:[#allocation48_spill] sm:$0xff] }
0x1ed5   :  { %v16381_v46 = vpop.trf.xlu0 }
0x1ed6   :  { %v16697_v61 = vcombine.low %v16672_v5, %v16680_v31  ;;  %v16698_v45 = vcombine.high %v16672_v5, %v16680_v31  ;;  %v16644_v31 = vrot.slane %v16630_v47, %v22772_v21  ;;  %v25646_v47 = vld [vmem:[#allocation33_spill] sm:$0xff] }
0x1ed8   :  { %v16705_v6 = vrot.slane %v16697_v61, %v22772_v21  ;;  %v16712_v3 = vrot.slane %v16698_v45, %v22772_v21  ;;  %v25625_v61 = vld [vmem:[#allocation22_spill] sm:$0xff]  ;;  %v25639_v45 = vld [vmem:[#allocation36_spill] sm:$0xff] }
0x1ed9   :  { %v16445_v16 = vpop.trf.xlu0 }
0x1eda   :  { %v16689_v18 = vcombine.low %v16381_v46, %v16445_v16  ;;  %v16660_v16 = vrot.slane %v16646_v63, %v22772_v21  ;;  %v25638_v63 = vld [vmem:[#allocation25_spill] sm:$0xff] }
0x1edc   :  { %v16696_v26 = vrot.slane %v16689_v18, %v22765_v14  ;;  %v16663_v43 = vcombine.low %v16644_v31, %v16660_v16  ;;  %v16664_v18 = vcombine.high %v16644_v31, %v16660_v16  ;;  %v25652_v16 = vld [vmem:[#allocation39_spill] sm:$0xff] }
0x1edd   :  { %v25656_v31 = vld [vmem:[#allocation43_spill] sm:$0xff] }
0x1ede   :  { %v16713_v54 = vcombine.low %v16688_v55, %v16696_v26  ;;  %v16714_v13 = vcombine.high %v16688_v55, %v16696_v26  ;;  %v25626_v55 = vld [vmem:[#allocation16_spill] sm:$0xff] }
0x1edf   :  { %v25627_v26 = vld [vmem:[#allocation24_spill] sm:$0xff] }
0x1ee0   :  { %v16721_v40 = vrot.slane %v16713_v54, %v22772_v21  ;;  %v16728_v46 = vrot.slane %v16714_v13, %v22772_v21  ;;  %v25630_v54 = vld [vmem:[#allocation18_spill] sm:$0xff] }
0x1ee1   :  { %v25633_v13 = vld [vmem:[#allocation30_spill] sm:$0xff] }
0x1ee2   :  { %v16729_v32 = vcombine.low %v16705_v6, %v16721_v40  ;;  %v16730_v29 = vcombine.high %v16705_v6, %v16721_v40  ;;  %v16731_v5 = vcombine.low %v16712_v3, %v16728_v46  ;;  %v16732_v28 = vcombine.high %v16712_v3, %v16728_v46  ;;  %v25636_v6 = vld [vmem:[#allocation23_spill] sm:$0xff]  ;;  %v25637_v40 = vld [vmem:[#allocation34_spill] sm:$0xff]  ;;  %v25647_v46 = vld [vmem:[#allocation44_spill] sm:$0xff] }
0x1ee3   :  { %v25653_v3 = vld [vmem:[#allocation50_spill] sm:$0xff] }
0x1ee4   :  { %v22413_v19 = vpack.c.bf16 %v16729_v32, %v16661_v33  ;;  %v22421_v41 = vpack.c.bf16 %v16730_v29, %v16662_v58  ;;  %v22429_v59 = vpack.c.bf16 %v16731_v5, %v16663_v43  ;;  %v22437_v9 = vpack.c.bf16 %v16732_v28, %v16664_v18  ;;  %v25642_v33 = vld [vmem:[#allocation29_spill] sm:$0xff]  ;;  %v25643_v32 = vld [vmem:[#allocation40_spill] sm:$0xff]  ;;  %v25644_v58 = vld [vmem:[#allocation31_spill] sm:$0xff] }
0x1ee5   :  { %v25645_v29 = vld [vmem:[#allocation42_spill] sm:$0xff]  ;;  %v25658_v28 = vld [vmem:[#allocation45_spill] sm:$0xff]  ;;  %v25659_v43 = vld [vmem:[#allocation55_spill] sm:$0xff] }
0x1ee6   :  { %22414 = vmatprep.subr.bf16.mxu0 %v22413_v19  ;;  %22422 = vmatprep.subr.bf16.mxu1 %v22421_v41  ;;  %v25657_v5 = vld [vmem:[#allocation54_spill] sm:$0xff]  ;;  %v25660_v18 = vld [vmem:[#allocation47_spill] sm:$0xff] }
0x1ee7   :  { %22416 = vmatpush3.bf16.msra.mxu0 %v22413_v19  ;;  %22424 = vmatpush3.bf16.msra.mxu1 %v22421_v41  ;;  %v25648_v19 = vld [vmem:[#allocation35_spill] sm:$0xff]  ;;  %v25649_v41 = vld [vmem:[#allocation46_spill] sm:$0xff] }
0x1ee8   :  { %22426 = vmatprep.subr.bf16.mxu0 %v22425_v50  ;;  %22434 = vmatprep.subr.bf16.mxu1 %v22433_v24 }
0x1eea   :  { %21970 = vmatmul.mubr.msk.f32.vlgmr.msra.gmra.mrb[192].mxu0 %vm1871_vm1, %v22952_v34  ;;  %22002 = vmatmul.mubr.msk.f32.vlgmr.msra.gmra.mrb[192].mxu1 %vm1871_vm1, %v22914_v49 }
0x1eeb   :  { %21972 = vmatprep.mubr.msk.f32.mxu0 %vm1871_vm1, %v22959_v51  ;;  %22004 = vmatprep.mubr.msk.f32.mxu1 %vm1871_vm1, %v22916_v52 }
0x1eec   :  { %22428 = vmatpush3.bf16.msra.mxu0 %v22425_v50  ;;  %22436 = vmatpush3.bf16.msra.mxu1 %v22433_v24  ;;  %v25654_v50 = vld [vmem:[#allocation41_spill] sm:$0xff]  ;;  %v25655_v24 = vld [vmem:[#allocation52_spill] sm:$0xff] }
0x1eed   :  { %22430 = vmatprep.subr.bf16.mxu0 %v22429_v59  ;;  %22438 = vmatprep.subr.bf16.mxu1 %v22437_v9 }
0x1eee   :  { %21973 = vmatmul.mubr.msk.f32.gmra.mrb[194].mxu0 %vm1871_vm1, %v22964_v1  ;;  %22005 = vmatmul.mubr.msk.f32.gmra.mrb[194].mxu1 %vm1871_vm1, %v22921_v60 }
0x1eef   :  { %21975 = vmatprep.mubr.msk.f32.mxu0 %vm1871_vm1, %v22978_v7  ;;  %22007 = vmatprep.mubr.msk.f32.mxu1 %vm1871_vm1, %v22928_v8 }
0x1ef0   :  { %22432 = vmatpush3.bf16.msra.mxu0 %v22429_v59  ;;  %22440 = vmatpush3.bf16.msra.mxu1 %v22437_v9  ;;  %v25661_v59 = vld [vmem:[#allocation56_spill] sm:$0xff]  ;;  %v25662_v9 = vld [vmem:[#allocation49_spill] sm:$0xff] }
0x1ef2   :  { %21976 = vmatmul.mubr.msk.f32.gmra.mrb[196].mxu0 %vm1871_vm1, %v23001_v17  ;;  %22008 = vmatmul.mubr.msk.f32.gmra.mrb[196].mxu1 %vm1871_vm1, %v22942_v20 }
0x1ef3   :  { %21978 = vmatprep.mubr.msk.f32.mxu0 %vm1871_vm1, %v23011_v23  ;;  %22010 = vmatprep.mubr.msk.f32.mxu1 %vm1871_vm1, %v22955_v39 }
0x1ef6   :  { %21979 = vmatmul.mubr.msk.f32.gmra.mrb[198].mxu0 %vm1871_vm1, %v23021_v25  ;;  %22011 = vmatmul.mubr.msk.f32.gmra.mrb[198].mxu1 %vm1871_vm1, %v22962_v56 }
0x1ef7   :  { %21981 = vmatprep.mubr.msk.f32.mxu0 %vm1871_vm1, %v23031_v27  ;;  %22013 = vmatprep.mubr.msk.f32.mxu1 %vm1871_vm1, %v22966_v2 }
0x1efa   :  { %21982 = vmatmul.mubr.msk.f32.gmra.mrb[200].mxu0 %vm1871_vm1, %v23041_v15  ;;  %22014 = vmatmul.mubr.msk.f32.gmra.mrb[200].mxu1 %vm1871_vm1, %v22990_v10 }
0x1efb   :  { %21984 = vmatprep.mubr.msk.f32.mxu0 %vm1871_vm1, %v25623_v36  ;;  %22016 = vmatprep.mubr.msk.f32.mxu1 %vm1871_vm1, %v25624_v57 }
0x1efe   :  { %21985 = vmatmul.mubr.msk.f32.gmra.mrb[202].mxu0 %vm1871_vm1, %v25625_v61  ;;  %22017 = vmatmul.mubr.msk.f32.gmra.mrb[202].mxu1 %vm1871_vm1, %v25626_v55 }
0x1eff   :  { %21987 = vmatprep.mubr.msk.f32.mxu0 %vm1871_vm1, %v25627_v26  ;;  %22019 = vmatprep.mubr.msk.f32.mxu1 %vm1871_vm1, %v25628_v12 }
0x1f02   :  { %21988 = vmatmul.mubr.msk.f32.gmra.mrb[204].mxu0 %vm1871_vm1, %v25629_v38  ;;  %22020 = vmatmul.mubr.msk.f32.gmra.mrb[204].mxu1 %vm1871_vm1, %v25630_v54 }
0x1f03   :  { %21990 = vmatprep.mubr.msk.f32.mxu0 %vm1871_vm1, %v25631_v44  ;;  %22022 = vmatprep.mubr.msk.f32.mxu1 %vm1871_vm1, %v25632_v53 }
0x1f06   :  { %21991 = vmatmul.mubr.msk.f32.gmra.mrb[206].mxu0 %vm1871_vm1, %v25633_v13  ;;  %22023 = vmatmul.mubr.msk.f32.gmra.mrb[206].mxu1 %vm1871_vm1, %v25634_v22 }
0x1f07   :  { %22033 = vmatprep.mubr.msk.f32.mxu0 %vm1871_vm1, %v25635_v11  ;;  %22065 = vmatprep.mubr.msk.f32.mxu1 %vm1871_vm1, %v25636_v6 }
0x1f0a   :  { %22034 = vmatmul.mubr.msk.f32.vlgmr.msra.gmra.mrb[208].mxu0 %vm1871_vm1, %v25637_v40  ;;  %22066 = vmatmul.mubr.msk.f32.vlgmr.msra.gmra.mrb[208].mxu1 %vm1871_vm1, %v25638_v63 }
0x1f0b   :  { %22036 = vmatprep.mubr.msk.f32.mxu0 %vm1871_vm1, %v25639_v45  ;;  %22068 = vmatprep.mubr.msk.f32.mxu1 %vm1871_vm1, %v25640_v37 }
0x1f0e   :  { %22037 = vmatmul.mubr.msk.f32.gmra.mrb[210].mxu0 %vm1871_vm1, %v25641_v35  ;;  %22069 = vmatmul.mubr.msk.f32.gmra.mrb[210].mxu1 %vm1871_vm1, %v25642_v33 }
0x1f0f   :  { %22039 = vmatprep.mubr.msk.f32.mxu0 %vm1871_vm1, %v25643_v32  ;;  %22071 = vmatprep.mubr.msk.f32.mxu1 %vm1871_vm1, %v25644_v58 }
0x1f12   :  { %22040 = vmatmul.mubr.msk.f32.gmra.mrb[212].mxu0 %vm1871_vm1, %v25645_v29  ;;  %22072 = vmatmul.mubr.msk.f32.gmra.mrb[212].mxu1 %vm1871_vm1, %v25646_v47 }
0x1f13   :  { %22042 = vmatprep.mubr.msk.f32.mxu0 %vm1871_vm1, %v25647_v46  ;;  %22074 = vmatprep.mubr.msk.f32.mxu1 %vm1871_vm1, %v25648_v19 }
0x1f16   :  { %22043 = vmatmul.mubr.msk.f32.gmra.mrb[214].mxu0 %vm1871_vm1, %v25649_v41  ;;  %22075 = vmatmul.mubr.msk.f32.gmra.mrb[214].mxu1 %vm1871_vm1, %v25650_v30 }
0x1f17   :  { %22045 = vmatprep.mubr.msk.f32.mxu0 %vm1871_vm1, %v25651_v48  ;;  %22077 = vmatprep.mubr.msk.f32.mxu1 %vm1871_vm1, %v25652_v16 }
0x1f1a   :  { %22046 = vmatmul.mubr.msk.f32.gmra.mrb[216].mxu0 %vm1871_vm1, %v25653_v3  ;;  %22078 = vmatmul.mubr.msk.f32.gmra.mrb[216].mxu1 %vm1871_vm1, %v25654_v50  ;;  %v137_v50 = vpop.permute.xlu0 %136 }
0x1f1b   :  { %22048 = vmatprep.mubr.msk.f32.mxu0 %vm1871_vm1, %v25655_v24  ;;  %22080 = vmatprep.mubr.msk.f32.mxu1 %vm1871_vm1, %v25656_v31  ;;  %v25663_v24 = vld [vmem:[#allocation57_spill] sm:$0xff]  ;;  %v25664_v31 = vld [vmem:[#allocation51_spill] sm:$0xff] }
0x1f1e   :  { %22049 = vmatmul.mubr.msk.f32.gmra.mrb[218].mxu0 %vm1871_vm1, %v25657_v5  ;;  %22081 = vmatmul.mubr.msk.f32.gmra.mrb[218].mxu1 %vm1871_vm1, %v25658_v28  ;;  %v25665_v5 = vld [vmem:[#allocation58_spill] sm:$0xff]  ;;  %v25666_v28 = vld [vmem:[#allocation53_spill] sm:$0xff] }
0x1f1f   :  { %22051 = vmatprep.mubr.msk.f32.mxu0 %vm1871_vm1, %v25659_v43  ;;  %22083 = vmatprep.mubr.msk.f32.mxu1 %vm1871_vm1, %v25660_v18  ;;  %v25667_v43 = vld [vmem:[#allocation14_spill] sm:$0xff]  ;;  %v25668_v18 = vld [vmem:[#allocation13_spill] sm:$0xff] }
0x1f22   :  { %22052 = vmatmul.mubr.msk.f32.gmra.mrb[220].mxu0 %vm1871_vm1, %v25661_v59  ;;  %22084 = vmatmul.mubr.msk.f32.gmra.mrb[220].mxu1 %vm1871_vm1, %v25662_v9  ;;  %v81_v59 = vpop.permute.xlu1 %80 }
0x1f23   :  { %22054 = vmatprep.mubr.msk.f32.mxu0 %vm1871_vm1, %v25663_v24  ;;  %22086 = vmatprep.mubr.msk.f32.mxu1 %vm1871_vm1, %v25664_v31  ;;  %v22631_v24 = vld [vmem:[%s25246_s1] sm:$0xf] }
0x1f24   :  { %v152_v9 = vmul.f32 %v22631_v24, %v81_v59  ;;  %v22632_v31 = vld [vmem:[%s25247_s2] sm:$0xf] }
0x1f26   :  { %22055 = vmatmul.mubr.msk.f32.gmra.mrb[222].mxu0 %vm1871_vm1, %v25665_v5  ;;  %22087 = vmatmul.mubr.msk.f32.gmra.mrb[222].mxu1 %vm1871_vm1, %v25666_v28  ;;  %v169_v5 = vadd.f32 %v22632_v31, %v152_v9  ;;  %v160_v28 = vmul.f32 %v22631_v24, %v137_v50 }
0x1f27   :  { %22097 = vmatprep.mubr.msk.f32.mxu0 %vm1871_vm1, %v25667_v43  ;;  %22129 = vmatprep.mubr.msk.f32.mxu1 %vm1871_vm1, %v25668_v18 }
0x1f28   :  { %185 = vst [vmem:[#allocation2 + $0x18] sm:$0xf] %v169_v5  ;;  %v177_v3 = vadd.f32 %v22632_v31, %v160_v28 }
0x1f2a   :  { %193 = vst [vmem:[#allocation2 + $0x38] sm:$0xf] %v177_v3 }
0x1fbd   :  { %v21971_v43 = vpop.f32.mrb[192].mxu0  ;;  %v22003_v16 = vpop.f32.mrb[192].mxu1 }
0x1fbe   :  { %v16799_v48 = vpop.f32.mrb[193].mxu0  ;;  %v16944_v18 = vpop.f32.mrb[193].mxu1 }
0x1fbf   :  { %17345 = vxpose.xlu0.b32.start [1/16] (narrow) %v16944_v18, 8  ;;  %17313 = vxpose.xlu1.b32.start [1/16] (narrow) %v16799_v48, 8 }
0x1fc1   :  { %v21974_v30 = vpop.f32.mrb[194].mxu0  ;;  %v22006_v41 = vpop.f32.mrb[194].mxu1 }
0x1fc2   :  { %v16809_v19 = vpop.f32.mrb[195].mxu0  ;;  %v16954_v59 = vpop.f32.mrb[195].mxu1 }
0x1fc3   :  { %17346 = vxpose.xlu0.b32.cont [2/16] (narrow) %v22003_v16, 8  ;;  %17314 = vxpose.xlu1.b32.cont [2/16] (narrow) %v21971_v43, 8 }
0x1fc5   :  { %v21977_v46 = vpop.f32.mrb[196].mxu0  ;;  %v22009_v47 = vpop.f32.mrb[196].mxu1 }
0x1fc6   :  { %v16819_v9 = vpop.f32.mrb[197].mxu0  ;;  %v16964_v5 = vpop.f32.mrb[197].mxu1 }
0x1fc7   :  { %17347 = vxpose.xlu0.b32.cont [3/16] (narrow) %v16954_v59, 8  ;;  %17315 = vxpose.xlu1.b32.cont [3/16] (narrow) %v16809_v19, 8 }
0x1fc9   :  { %v21980_v50 = vpop.f32.mrb[198].mxu0  ;;  %v22012_v3 = vpop.f32.mrb[198].mxu1 }
0x1fca   :  { %v16829_v24 = vpop.f32.mrb[199].mxu0  ;;  %v16974_v31 = vpop.f32.mrb[199].mxu1 }
0x1fcb   :  { %17348 = vxpose.xlu0.b32.cont [4/16] (narrow) %v22006_v41, 8  ;;  %17316 = vxpose.xlu1.b32.cont [4/16] (narrow) %v21974_v30, 8 }
0x1fcd   :  { %v21983_v28 = vpop.f32.mrb[200].mxu0  ;;  %v22015_v48 = vpop.f32.mrb[200].mxu1 }
0x1fce   :  { %v16839_v18 = vpop.f32.mrb[201].mxu0  ;;  %v16984_v29 = vpop.f32.mrb[201].mxu1 }
0x1fcf   :  { %17349 = vxpose.xlu0.b32.cont [5/16] (narrow) %v16964_v5, 8  ;;  %17317 = vxpose.xlu1.b32.cont [5/16] (narrow) %v16819_v9, 8 }
0x1fd1   :  { %v21986_v16 = vpop.f32.mrb[202].mxu0  ;;  %v22018_v43 = vpop.f32.mrb[202].mxu1 }
0x1fd2   :  { %v16849_v58 = vpop.f32.mrb[203].mxu0  ;;  %v16994_v32 = vpop.f32.mrb[203].mxu1 }
0x1fd3   :  { %17350 = vxpose.xlu0.b32.cont [6/16] (narrow) %v22009_v47, 8  ;;  %17318 = vxpose.xlu1.b32.cont [6/16] (narrow) %v21977_v46, 8 }
0x1fd5   :  { %v21989_v59 = vpop.f32.mrb[204].mxu0  ;;  %v22021_v19 = vpop.f32.mrb[204].mxu1 }
0x1fd6   :  { %v16859_v33 = vpop.f32.mrb[205].mxu0  ;;  %v17004_v35 = vpop.f32.mrb[205].mxu1 }
0x1fd7   :  { %17351 = vxpose.xlu0.b32.cont [7/16] (narrow) %v16974_v31, 8  ;;  %17319 = vxpose.xlu1.b32.cont [7/16] (narrow) %v16829_v24, 8 }
0x1fd9   :  { %v21992_v41 = vpop.f32.mrb[206].mxu0  ;;  %v22024_v30 = vpop.f32.mrb[206].mxu1 }
0x1fda   :  { %v16869_v37 = vpop.f32.mrb[207].mxu0  ;;  %v17014_v45 = vpop.f32.mrb[207].mxu1 }
0x1fdb   :  { %17352 = vxpose.xlu0.b32.cont [8/16] (narrow) %v22012_v3, 8  ;;  %17320 = vxpose.xlu1.b32.cont [8/16] (narrow) %v21980_v50, 8 }
0x1fdd   :  { %v22035_v5 = vpop.f32.mrb[208].mxu0  ;;  %v22067_v9 = vpop.f32.mrb[208].mxu1 }
0x1fde   :  { %v17089_v63 = vpop.f32.mrb[209].mxu0  ;;  %v17234_v40 = vpop.f32.mrb[209].mxu1 }
0x1fdf   :  { %17353 = vxpose.xlu0.b32.cont [9/16] (narrow) %v16984_v29, 8  ;;  %17321 = vxpose.xlu1.b32.cont [9/16] (narrow) %v16839_v18, 8 }
0x1fe1   :  { %v22038_v47 = vpop.f32.mrb[210].mxu0  ;;  %v22070_v46 = vpop.f32.mrb[210].mxu1 }
0x1fe2   :  { %v17099_v6 = vpop.f32.mrb[211].mxu0  ;;  %v17244_v11 = vpop.f32.mrb[211].mxu1 }
0x1fe3   :  { %17354 = vxpose.xlu0.b32.cont [10/16] (narrow) %v22015_v48, 8  ;;  %17322 = vxpose.xlu1.b32.cont [10/16] (narrow) %v21983_v28, 8 }
0x1fe5   :  { %v22041_v31 = vpop.f32.mrb[212].mxu0  ;;  %v22073_v24 = vpop.f32.mrb[212].mxu1 }
0x1fe6   :  { %v17109_v22 = vpop.f32.mrb[213].mxu0  ;;  %v17254_v13 = vpop.f32.mrb[213].mxu1 }
0x1fe7   :  { %17355 = vxpose.xlu0.b32.cont [11/16] (narrow) %v16994_v32, 8  ;;  %17323 = vxpose.xlu1.b32.cont [11/16] (narrow) %v16849_v58, 8 }
0x1fe9   :  { %v22044_v3 = vpop.f32.mrb[214].mxu0  ;;  %v22076_v50 = vpop.f32.mrb[214].mxu1 }
0x1fea   :  { %v17119_v53 = vpop.f32.mrb[215].mxu0  ;;  %v17264_v44 = vpop.f32.mrb[215].mxu1 }
0x1feb   :  { %17356 = vxpose.xlu0.b32.cont [12/16] (narrow) %v22018_v43, 8  ;;  %17324 = vxpose.xlu1.b32.cont [12/16] (narrow) %v21986_v16, 8 }
0x1fed   :  { %v22047_v29 = vpop.f32.mrb[216].mxu0  ;;  %v22079_v18 = vpop.f32.mrb[216].mxu1 }
0x1fee   :  { %v17129_v54 = vpop.f32.mrb[217].mxu0  ;;  %v17274_v38 = vpop.f32.mrb[217].mxu1 }
0x1fef   :  { %17357 = vxpose.xlu0.b32.cont [13/16] (narrow) %v17004_v35, 8  ;;  %17325 = vxpose.xlu1.b32.cont [13/16] (narrow) %v16859_v33, 8 }
0x1ff1   :  { %v22050_v48 = vpop.f32.mrb[218].mxu0  ;;  %v22082_v28 = vpop.f32.mrb[218].mxu1 }
0x1ff2   :  { %v17139_v12 = vpop.f32.mrb[219].mxu0  ;;  %v17284_v26 = vpop.f32.mrb[219].mxu1 }
0x1ff3   :  { %17358 = vxpose.xlu0.b32.cont [14/16] (narrow) %v22021_v19, 8  ;;  %17326 = vxpose.xlu1.b32.cont [14/16] (narrow) %v21989_v59, 8 }
0x1ff5   :  { %v22053_v32 = vpop.f32.mrb[220].mxu0  ;;  %v22085_v58 = vpop.f32.mrb[220].mxu1 }
0x1ff6   :  { %v17149_v55 = vpop.f32.mrb[221].mxu0  ;;  %v17294_v61 = vpop.f32.mrb[221].mxu1 }
0x1ff7   :  { %17359 = vxpose.xlu0.b32.cont [15/16] (narrow) %v17014_v45, 8  ;;  %17327 = vxpose.xlu1.b32.cont [15/16] (narrow) %v16869_v37, 8 }
0x1ff9   :  { %v22056_v43 = vpop.f32.mrb[222].mxu0  ;;  %v22088_v16 = vpop.f32.mrb[222].mxu1 }
0x1ffa   :  { %v17159_v57 = vpop.f32.mrb[223].mxu0  ;;  %v17304_v36 = vpop.f32.mrb[223].mxu1 }
0x1ffb   :  { %17360 = vxpose.xlu0.b32.end [16/16] (narrow) %v22024_v30, 8  ;;  %17328 = vxpose.xlu1.b32.end [16/16] (narrow) %v21992_v41, 8 }
0x1fff   :  { %17409 = vxpose.xlu0.b32.start [1/16] (narrow) %v17234_v40, 8  ;;  %17377 = vxpose.xlu1.b32.start [1/16] (narrow) %v17089_v63, 8 }
0x2003   :  { %17410 = vxpose.xlu0.b32.cont [2/16] (narrow) %v22067_v9, 8  ;;  %17378 = vxpose.xlu1.b32.cont [2/16] (narrow) %v22035_v5, 8 }
0x2007   :  { %17411 = vxpose.xlu0.b32.cont [3/16] (narrow) %v17244_v11, 8  ;;  %17379 = vxpose.xlu1.b32.cont [3/16] (narrow) %v17099_v6, 8 }
0x200b   :  { %17412 = vxpose.xlu0.b32.cont [4/16] (narrow) %v22070_v46, 8  ;;  %17380 = vxpose.xlu1.b32.cont [4/16] (narrow) %v22038_v47, 8 }
0x200f   :  { %17413 = vxpose.xlu0.b32.cont [5/16] (narrow) %v17254_v13, 8  ;;  %17381 = vxpose.xlu1.b32.cont [5/16] (narrow) %v17109_v22, 8 }
0x2013   :  { %17414 = vxpose.xlu0.b32.cont [6/16] (narrow) %v22073_v24, 8  ;;  %17382 = vxpose.xlu1.b32.cont [6/16] (narrow) %v22041_v31, 8 }
0x2017   :  { %17415 = vxpose.xlu0.b32.cont [7/16] (narrow) %v17264_v44, 8  ;;  %17383 = vxpose.xlu1.b32.cont [7/16] (narrow) %v17119_v53, 8 }
0x201b   :  { %17416 = vxpose.xlu0.b32.cont [8/16] (narrow) %v22076_v50, 8  ;;  %17384 = vxpose.xlu1.b32.cont [8/16] (narrow) %v22044_v3, 8 }
0x201f   :  { %17417 = vxpose.xlu0.b32.cont [9/16] (narrow) %v17274_v38, 8  ;;  %17385 = vxpose.xlu1.b32.cont [9/16] (narrow) %v17129_v54, 8 }
0x2023   :  { %17418 = vxpose.xlu0.b32.cont [10/16] (narrow) %v22079_v18, 8  ;;  %17386 = vxpose.xlu1.b32.cont [10/16] (narrow) %v22047_v29, 8 }
0x2027   :  { %17419 = vxpose.xlu0.b32.cont [11/16] (narrow) %v17284_v26, 8  ;;  %17387 = vxpose.xlu1.b32.cont [11/16] (narrow) %v17139_v12, 8 }
0x202b   :  { %17420 = vxpose.xlu0.b32.cont [12/16] (narrow) %v22082_v28, 8  ;;  %17388 = vxpose.xlu1.b32.cont [12/16] (narrow) %v22050_v48, 8 }
0x202f   :  { %17421 = vxpose.xlu0.b32.cont [13/16] (narrow) %v17294_v61, 8  ;;  %17389 = vxpose.xlu1.b32.cont [13/16] (narrow) %v17149_v55, 8  ;;  %v17467_v55 = vld [vmem:[#allocation2 + $0x18] sm:$0xf] }
0x2033   :  { %17422 = vxpose.xlu0.b32.cont [14/16] (narrow) %v22085_v58, 8  ;;  %17390 = vxpose.xlu1.b32.cont [14/16] (narrow) %v22053_v32, 8 }
0x2037   :  { %17423 = vxpose.xlu0.b32.cont [15/16] (narrow) %v17304_v36, 8  ;;  %17391 = vxpose.xlu1.b32.cont [15/16] (narrow) %v17159_v57, 8  ;;  %v17468_v57 = vld [vmem:[#allocation2 + $0x38] sm:$0xf] }
0x203b   :  { %17424 = vxpose.xlu0.b32.end [16/16] (narrow) %v22088_v16, 8  ;;  %17392 = vxpose.xlu1.b32.end [16/16] (narrow) %v22056_v43, 8 }
0x203f   :  { %v17329_v44 = vpop.trf.xlu1  ;;  %v17361_v53 = vpop.trf.xlu0 }
0x207f   :  { %v17393_v13 = vpop.trf.xlu1  ;;  %v17425_v22 = vpop.trf.xlu0 }
0x2080   :  { %v17441_v38 = vcombine.low %v17329_v44, %v17393_v13  ;;  %v17449_v54 = vcombine.low %v17361_v53, %v17425_v22 }
0x2082   :  { %v17448_v11 = vrot.slane %v17441_v38, %v22765_v14  ;;  %v17456_v26 = vrot.slane %v17449_v54, %v22765_v14 }
0x2084   :  { %v17457_v12 = vcombine.low %v17448_v11, %v17456_v26 }
0x2086   :  { %v17464_v61 = vrot.slane %v17457_v12, %v22772_v21 }
0x2088   :  { %v17465_v6 = vcombine.high %v17464_v61, %v25439_v0  ;;  %v17469_v36 = vadd.f32 %v17467_v55, %v17464_v61 }
0x208a   :  { %v17470_v40 = vadd.f32 %v17468_v57, %v17465_v6  ;;  %22579 = vtanh.f32 %v17469_v36  ;;  %v20485_v63 = vmul.f32 -1.442695, %v17469_v36 }
0x208c   :  { %22581 = vtanh.f32 %v17470_v40  ;;  %v20486_v45 = vmul.f32 -1.442695, %v17470_v40 }
0x208d   :  { %22583 = vpow2.f32 %v20485_v63 }
0x208e   :  { %22585 = vpow2.f32 %v20486_v45 }
0x2094   :  { %v22580_v37 = vpop.eup %22579 }
0x2095   :  { %17497 = vrot.lane.b32.xlu1 %v22580_v37, %s22710_s12 }
0x2096   :  { %v22582_v35 = vpop.eup %22581 }
0x2097   :  { %v22584_v33 = vpop.eup %22583  ;;  %17499 = vrot.lane.b32.xlu0 %v22582_v35, %s22710_s12 }
0x2098   :  { %v22586_v59 = vpop.eup %22585  ;;  %v17479_v19 = vadd.f32 1.0, %v22584_v33 }
0x2099   :  { %v17480_v41 = vadd.f32 1.0, %v22586_v59 }
0x209a   :  { %22587 = vrcp.f32 %v17479_v19 }
0x209b   :  { %22589 = vrcp.f32 %v17480_v41 }
0x20a4   :  { %v22588_v30 = vpop.eup %22587 }
0x20a5   :  { %17487 = vrot.lane.b32.xlu1 %v22588_v30, %s22711_s13  ;;  %v22590_v5 = vpop.eup %22589 }
0x20a9   :  { %17489 = vrot.lane.b32.xlu1 %v22590_v5, %s22711_s13 }
0x2107   :  { %v17498_v9 = vpop.permute.xlu1 %17497 }
0x2108   :  { %v17503_v47 = vmul.f32 %v22588_v30, %v17498_v9 }
0x2109   :  { %v17500_v46 = vpop.permute.xlu0 %17499 }
0x210a   :  { %17507 = vrot.lane.b32.xlu1 %v17503_v47, %s22712_s14  ;;  %v17504_v31 = vmul.f32 %v22590_v5, %v17500_v46 }
0x210e   :  { %17509 = vrot.lane.b32.xlu1 %v17504_v31, %s22712_s14 }
0x2117   :  { %v17488_v24 = vpop.permute.xlu1 %17487 }
0x2118   :  { %v17493_v50 = vmul.f32 %v17488_v24, %v24617_v4 }
0x211b   :  { %v17490_v3 = vpop.permute.xlu1 %17489 }
0x211c   :  { %v17494_v48 = vmul.f32 %v17490_v3, %v24621_v42 }
0x217c   :  { %v17508_v29 = vpop.permute.xlu1 %17507 }
0x217d   :  { %v24896_v18 = vadd.f32 %v17508_v29, %v17493_v50 }
0x217f   :  { %22591 = vtanh.f32 %v24896_v18 }
0x2180   :  { %v17510_v28 = vpop.permute.xlu1 %17509 }
0x2181   :  { %v24900_v32 = vadd.f32 %v17510_v28, %v17494_v48 }
0x2183   :  { %22593 = vtanh.f32 %v24900_v32 }
0x2189   :  { %v22592_v58 = vpop.eup %22591 }
0x218a   :  { %17519 = vrot.lane.b32.xlu0 %v22592_v58, %s22712_s14 }
0x218d   :  { %v22594_v43 = vpop.eup %22593 }
0x218e   :  { %17521 = vrot.lane.b32.xlu1 %v22594_v43, %s22712_s14 }
0x21fc   :  { %v17520_v16 = vpop.permute.xlu0 %17519 }
0x21fd   :  { %v17525_v4 = vmul.f32 %v22588_v30, %v17520_v16 }
0x21ff   :  { %17529 = vrot.lane.b32.xlu0 %v17525_v4, %s22710_s12 }
0x2200   :  { %v17522_v44 = vpop.permute.xlu1 %17521 }
0x2201   :  { %v17526_v53 = vmul.f32 %v22590_v5, %v17522_v44 }
0x2203   :  { %17531 = vrot.lane.b32.xlu1 %v17526_v53, %s22710_s12 }
0x2271   :  { %v17530_v42 = vpop.permute.xlu0 %17529 }
0x2272   :  { %17536 = vst.msk [vmem:[#allocation5 + $0x18] sm:$0xf] %vm26_vm0, %v17530_v42  ;;  %17538 = vxpose.xlu0.b32.start.end [1/1] (short) (narrow) %v17530_v42, 32 }
0x2275   :  { %v17532_v13 = vpop.permute.xlu1 %17531 }
0x2276   :  { %17537 = vst.msk [vmem:[#allocation5 + $0x38] sm:$0xf] %vm26_vm0, %v17532_v13  ;;  %17570 = vxpose.xlu1.b32.start.end [1/1] (short) (narrow) %v17532_v13, 32 }
0x22f2   :  { %v17554_v22 = vpop.trf.xlu0 }
0x22f3   :  { %v17602_v38 = vcombine.high %v17554_v22, %v25439_v0  ;;  %v17609_v54 = vrot.slane %v17554_v22, %v22765_v14 }
0x22f5   :  { %v17616_v61 = vrot.slane %v17602_v38, %v22765_v14 }
0x22f6   :  { %v17586_v11 = vpop.trf.xlu1  ;;  %v17555_v55 = vpop.trf.xlu0 }
0x22f7   :  { %v17617_v26 = vcombine.high %v17586_v11, %v25439_v0  ;;  %v17624_v12 = vrot.slane %v17586_v11, %v22765_v14  ;;  %v17675_v63 = vrot.slane %v17555_v55, %v22765_v14  ;;  %v17668_v59 = vcombine.high %v17555_v55, %v25439_v0 }
0x22f9   :  { %v17631_v6 = vrot.slane %v17617_v26, %v22765_v14  ;;  %v17632_v36 = vcombine.low %v17609_v54, %v17624_v12  ;;  %v17633_v57 = vcombine.high %v17609_v54, %v17624_v12  ;;  %v17682_v9 = vrot.slane %v17668_v59, %v22765_v14 }
0x22fa   :  { %v17587_v40 = vpop.trf.xlu1  ;;  %v17556_v48 = vpop.trf.xlu0 }
0x22fb   :  { %v17649_v45 = vcombine.high %v17616_v61, %v17631_v6  ;;  %v17647_v37 = vrot.slane %v17633_v57, %v22772_v21  ;;  %v17640_v35 = vrot.slane %v17632_v36, %v22772_v21  ;;  %v17690_v33 = vrot.slane %v17587_v40, %v22765_v14 }
0x22fc   :  { %v17683_v19 = vcombine.high %v17587_v40, %v25439_v0  ;;  %v17648_v24 = vcombine.low %v17616_v61, %v17631_v6  ;;  %v17741_v43 = vrot.slane %v17556_v48, %v22765_v14  ;;  %v17734_v13 = vcombine.high %v17556_v48, %v25439_v0 }
0x22fd   :  { %17930 = vxpose.xlu1.b32.start.end [1/1] (short) (narrow) %v17647_v37, 8  ;;  %17866 = vxpose.xlu0.b32.start.end [1/1] (short) (narrow) %v17640_v35, 8  ;;  %v17698_v41 = vcombine.low %v17675_v63, %v17690_v33  ;;  %v17664_v30 = vcombine.high %v17640_v35, %v25439_v0  ;;  %v17663_v5 = vrot.slane %v17649_v45, %v22772_v21 }
0x22fe   :  { %v17697_v47 = vrot.slane %v17683_v19, %v22765_v14  ;;  %v17699_v46 = vcombine.high %v17675_v63, %v17690_v33  ;;  %v17665_v3 = vcombine.high %v17647_v37, %v25439_v0  ;;  %v17588_v28 = vpop.trf.xlu1  ;;  %v17656_v58 = vrot.slane %v17648_v24, %v22772_v21  ;;  %v17557_v40 = vpop.trf.xlu0 }
0x22ff   :  { %v17706_v31 = vrot.slane %v17698_v41, %v22772_v21  ;;  %v17756_v44 = vrot.slane %v17588_v28, %v22765_v14  ;;  %v17749_v42 = vcombine.high %v17588_v28, %v25439_v0  ;;  %v17667_v54 = vcombine.high %v17663_v5, %v25439_v0 }
0x2300   :  { %v17714_v50 = vcombine.low %v17682_v9, %v17697_v47  ;;  %v17713_v29 = vrot.slane %v17699_v46, %v22772_v21  ;;  %v17715_v16 = vcombine.high %v17682_v9, %v17697_v47  ;;  %v17666_v53 = vcombine.high %v17656_v58, %v25439_v0 }
0x2301   :  { %17898 = vxpose.xlu0.b32.start.end [1/1] (short) (narrow) %v17664_v30, 8  ;;  %18058 = vxpose.xlu1.b32.start.end [1/1] (short) (narrow) %v17663_v5, 8  ;;  %v17764_v22 = vcombine.low %v17741_v43, %v17756_v44  ;;  %v17763_v11 = vrot.slane %v17749_v42, %v22765_v14  ;;  %v17748_v26 = vrot.slane %v17734_v13, %v22765_v14 }
0x2302   :  { %v17722_v4 = vrot.slane %v17714_v50, %v22772_v21  ;;  %v17729_v38 = vrot.slane %v17715_v16, %v22772_v21  ;;  %v17765_v12 = vcombine.high %v17741_v43, %v17756_v44  ;;  %v17730_v61 = vcombine.high %v17706_v31, %v25439_v0  ;;  %v17589_v57 = vpop.trf.xlu1 }
0x2303   :  { %v17772_v55 = vrot.slane %v17764_v22, %v22772_v21  ;;  %v17780_v6 = vcombine.low %v17748_v26, %v17763_v11  ;;  %v17731_v63 = vcombine.high %v17713_v29, %v25439_v0  ;;  %v17781_v45 = vcombine.high %v17748_v26, %v17763_v11 }
0x2304   :  { %v17779_v36 = vrot.slane %v17765_v12, %v22772_v21  ;;  %v17822_v35 = vrot.slane %v17589_v57, %v22765_v14  ;;  %v17807_v33 = vrot.slane %v17557_v40, %v22765_v14  ;;  %v17732_v59 = vcombine.high %v17722_v4, %v25439_v0 }
0x2305   :  { %17962 = vxpose.xlu0.b32.start.end [1/1] (short) (narrow) %v17665_v3, 8  ;;  %18122 = vxpose.xlu1.b32.start.end [1/1] (short) (narrow) %v17706_v31, 8  ;;  %v17788_v37 = vrot.slane %v17780_v6, %v22772_v21  ;;  %v17815_v19 = vcombine.high %v17589_v57, %v25439_v0  ;;  %v17800_v41 = vcombine.high %v17557_v40, %v25439_v0  ;;  %v84_v57 = vsub.s32 7, %v25442_v62  ;;  %v22633_v40 = vld [vmem:[%s25245_s0] sm:$0xff] }
0x2306   :  { %v17830_v30 = vcombine.low %v17807_v33, %v17822_v35  ;;  %v17795_v5 = vrot.slane %v17781_v45, %v22772_v21  ;;  %v17733_v9 = vcombine.high %v17729_v38, %v25439_v0  ;;  %v17796_v46 = vcombine.high %v17772_v55, %v25439_v0  ;;  %v22634_v45 = vld [vmem:[%s25245_s0 + $0x8] sm:$0xff] }
0x2307   :  { %v17829_v47 = vrot.slane %v17815_v19, %v22765_v14  ;;  %v17814_v31 = vrot.slane %v17800_v41, %v22765_v14  ;;  %v17831_v24 = vcombine.high %v17807_v33, %v17822_v35  ;;  %v17797_v48 = vcombine.high %v17779_v36, %v25439_v0 }
0x2308   :  { %v17838_v3 = vrot.slane %v17830_v30, %v22772_v21  ;;  %v17798_v43 = vcombine.high %v17788_v37, %v25439_v0 }
0x2309   :  { %17994 = vxpose.xlu0.b32.start.end [1/1] (short) (narrow) %v17656_v58, 8  ;;  %18186 = vxpose.xlu1.b32.start.end [1/1] (short) (narrow) %v17713_v29, 8  ;;  %v17846_v50 = vcombine.low %v17814_v31, %v17829_v47  ;;  %v17845_v29 = vrot.slane %v17831_v24, %v22772_v21  ;;  %v17847_v28 = vcombine.high %v17814_v31, %v17829_v47 }
0x230a   :  { %v17862_v44 = vcombine.high %v17838_v3, %v25439_v0 }
0x230b   :  { %v17854_v58 = vrot.slane %v17846_v50, %v22772_v21  ;;  %v17861_v16 = vrot.slane %v17847_v28, %v22772_v21 }
0x230d   :  { %18026 = vxpose.xlu0.b32.start.end [1/1] (short) (narrow) %v17666_v53, 8  ;;  %18250 = vxpose.xlu1.b32.start.end [1/1] (short) (narrow) %v17722_v4, 8  ;;  %v17799_v4 = vcombine.high %v17795_v5, %v25439_v0  ;;  %v17863_v53 = vcombine.high %v17845_v29, %v25439_v0  ;;  %v17864_v42 = vcombine.high %v17854_v58, %v25439_v0 }
0x230e   :  { %v17865_v13 = vcombine.high %v17861_v16, %v25439_v0 }
0x2311   :  { %18090 = vxpose.xlu0.b32.start.end [1/1] (short) (narrow) %v17667_v54, 8  ;;  %18314 = vxpose.xlu1.b32.start.end [1/1] (short) (narrow) %v17729_v38, 8 }
0x2315   :  { %18154 = vxpose.xlu0.b32.start.end [1/1] (short) (narrow) %v17730_v61, 8  ;;  %18378 = vxpose.xlu1.b32.start.end [1/1] (short) (narrow) %v17772_v55, 8 }
0x2319   :  { %18218 = vxpose.xlu0.b32.start.end [1/1] (short) (narrow) %v17731_v63, 8  ;;  %18442 = vxpose.xlu1.b32.start.end [1/1] (short) (narrow) %v17779_v36, 8  ;;  %v85_v63 = vrot.slane %v22633_v40, %v84_v57 }
0x231d   :  { %18282 = vxpose.xlu0.b32.start.end [1/1] (short) (narrow) %v17732_v59, 8  ;;  %18506 = vxpose.xlu1.b32.start.end [1/1] (short) (narrow) %v17788_v37, 8  ;;  %v141_v37 = vrot.slane %v22634_v45, %v84_v57 }
0x2321   :  { %18346 = vxpose.xlu0.b32.start.end [1/1] (short) (narrow) %v17733_v9, 8  ;;  %18570 = vxpose.xlu1.b32.start.end [1/1] (short) (narrow) %v17795_v5, 8 }
0x2325   :  { %18410 = vxpose.xlu0.b32.start.end [1/1] (short) (narrow) %v17796_v46, 8  ;;  %18634 = vxpose.xlu1.b32.start.end [1/1] (short) (narrow) %v17838_v3, 8 }
0x2329   :  { %18474 = vxpose.xlu0.b32.start.end [1/1] (short) (narrow) %v17797_v48, 8  ;;  %18698 = vxpose.xlu1.b32.start.end [1/1] (short) (narrow) %v17845_v29, 8 }
0x232d   :  { %18538 = vxpose.xlu0.b32.start.end [1/1] (short) (narrow) %v17798_v43, 8  ;;  %18762 = vxpose.xlu1.b32.start.end [1/1] (short) (narrow) %v17854_v58, 8 }
0x2331   :  { %18602 = vxpose.xlu0.b32.start.end [1/1] (short) (narrow) %v17799_v4, 8  ;;  %18826 = vxpose.xlu1.b32.start.end [1/1] (short) (narrow) %v17861_v16, 8 }
0x2335   :  { %18666 = vxpose.xlu0.b32.start.end [1/1] (short) (narrow) %v17862_v44, 8 }
0x2339   :  { %18730 = vxpose.xlu0.b32.start.end [1/1] (short) (narrow) %v17863_v53, 8 }
0x233d   :  { %18794 = vxpose.xlu0.b32.start.end [1/1] (short) (narrow) %v17864_v42, 8 }
0x2341   :  { %18858 = vxpose.xlu0.b32.start.end [1/1] (short) (narrow) %v17865_v13, 8 }
0x234f   :  { %87 = vbcast.lane.b32.xlu1 %v85_v63, 256 }
0x236a   :  { %143 = vbcast.lane.b32.xlu0 %v141_v37, 256 }
0x237d   :  { %v17946_v22 = vpop.trf.xlu1  ;;  %v17882_v38 = vpop.trf.xlu0 }
0x237e   :  { %v18890_v31 = vcombine.low %v17882_v38, %v17946_v22 }
0x2380   :  { %v24989_v16 = vrot.slane %v18890_v31, %v22765_v14 }
0x2381   :  { %v17914_v54 = vpop.trf.xlu0  ;;  %v18074_v11 = vpop.trf.xlu1 }
0x2385   :  { %v17978_v26 = vpop.trf.xlu0  ;;  %v18138_v12 = vpop.trf.xlu1 }
0x2386   :  { %v18898_v5 = vcombine.low %v17914_v54, %v17978_v26 }
0x2388   :  { %v24980_v29 = vrot.slane %v18898_v5, %v22765_v14 }
0x2389   :  { %v18010_v61 = vpop.trf.xlu0  ;;  %v18202_v55 = vpop.trf.xlu1 }
0x238a   :  { %v18906_v9 = vcombine.low %v18010_v61, %v18074_v11  ;;  %v18958_v3 = vcombine.low %v18138_v12, %v18202_v55  ;;  %v18922_v42 = vcombine.low %v24989_v16, %v24980_v29 }
0x238c   :  { %v24983_v48 = vrot.slane %v18906_v9, %v22765_v14  ;;  %v18965_v44 = vrot.slane %v18958_v3, %v22765_v14  ;;  %v18930_v61 = vrot.slane %v18922_v42, %v22772_v21 }
0x238d   :  { %v18042_v6 = vpop.trf.xlu0  ;;  %v18266_v36 = vpop.trf.xlu1 }
0x2391   :  { %v18106_v35 = vpop.trf.xlu0  ;;  %v18330_v33 = vpop.trf.xlu1 }
0x2392   :  { %v18914_v62 = vcombine.low %v18042_v6, %v18106_v35  ;;  %v18974_v58 = vcombine.low %v18266_v36, %v18330_v33 }
0x2394   :  { %v24977_v24 = vrot.slane %v18914_v62, %v22765_v14  ;;  %v18981_v22 = vrot.slane %v18974_v58, %v22765_v14 }
0x2395   :  { %v18170_v59 = vpop.trf.xlu0  ;;  %v24972_v19 = vpop.trf.xlu1 }
0x2396   :  { %v18938_v4 = vcombine.low %v24983_v48, %v24977_v24 }
0x2398   :  { %v18946_v26 = vrot.slane %v18938_v4, %v22772_v21 }
0x2399   :  { %v18234_v41 = vpop.trf.xlu0  ;;  %v24974_v30 = vpop.trf.xlu1 }
0x239a   :  { %v18966_v47 = vcombine.low %v18170_v59, %v18234_v41  ;;  %v18954_v57 = vcombine.low %v18930_v61, %v18946_v26  ;;  %v18955_v63 = vcombine.high %v18930_v61, %v18946_v26 }
0x239c   :  { %v24986_v28 = vrot.slane %v18966_v47, %v22765_v14 }
0x239d   :  { %v18298_v46 = vpop.trf.xlu0  ;;  %v18522_v50 = vpop.trf.xlu1 }
0x239e   :  { %v18990_v13 = vcombine.low %v18965_v44, %v24986_v28 }
0x23a0   :  { %v18998_v55 = vrot.slane %v18990_v13, %v22772_v21 }
0x23a1   :  { %v18362_v43 = vpop.trf.xlu0  ;;  %v18586_v11 = vpop.trf.xlu1 }
0x23a2   :  { %v18982_v53 = vcombine.low %v18298_v46, %v18362_v43  ;;  %v19042_v3 = vcombine.low %v18522_v50, %v18586_v11 }
0x23a4   :  { %v18989_v38 = vrot.slane %v18982_v53, %v22765_v14  ;;  %v19026_v53 = vcombine.low %v24972_v19, %v24974_v30  ;;  %v18923_v19 = vcombine.high %v24989_v16, %v24980_v29  ;;  %v18939_v30 = vcombine.high %v24983_v48, %v24977_v24 }
0x23a5   :  { %v18426_v54 = vpop.trf.xlu0  ;;  %v18650_v37 = vpop.trf.xlu1 }
0x23a6   :  { %v19006_v12 = vcombine.low %v18981_v22, %v18989_v38  ;;  %v19033_v50 = vrot.slane %v19026_v53, %v22765_v14  ;;  %v18953_v24 = vrot.slane %v18939_v30, %v22772_v21  ;;  %v25687_v30 = vld [vmem:[#allocation38_spill] sm:$0xff] }
0x23a8   :  { %v19014_v6 = vrot.slane %v19006_v12, %v22772_v21  ;;  %v19049_v12 = vrot.slane %v19042_v3, %v22765_v14 }
0x23a9   :  { %v18490_v36 = vpop.trf.xlu0  ;;  %v18714_v62 = vpop.trf.xlu1 }
0x23aa   :  { %v19022_v40 = vcombine.low %v18998_v55, %v19014_v6  ;;  %v19023_v45 = vcombine.high %v18998_v55, %v19014_v6  ;;  %v19034_v31 = vcombine.low %v18426_v54, %v18490_v36  ;;  %v19094_v13 = vcombine.low %v18650_v37, %v18714_v62 }
0x23ab   :  { %v19007_v6 = vcombine.high %v18981_v22, %v18989_v38 }
0x23ac   :  { %v22441_v35 = vpack.c.bf16 %v19022_v40, %v18954_v57  ;;  %v22449_v33 = vpack.c.bf16 %v19023_v45, %v18955_v63  ;;  %v19041_v26 = vrot.slane %v19034_v31, %v22765_v14  ;;  %v19101_v11 = vrot.slane %v19094_v13, %v22765_v14 }
0x23ad   :  { %v18554_v59 = vpop.trf.xlu0  ;;  %v18778_v9 = vpop.trf.xlu1  ;;  %v18991_v40 = vcombine.high %v18965_v44, %v24986_v28  ;;  %v19021_v38 = vrot.slane %v19007_v6, %v22772_v21 }
0x23ae   :  { %22442 = vmatprep.subr.bf16.mxu0 %v22441_v35  ;;  %22450 = vmatprep.subr.bf16.mxu1 %v22449_v33  ;;  %v19058_v63 = vcombine.low %v19033_v50, %v19041_v26 }
0x23af   :  { %22444 = vmatpush3.bf16.msra.mxu0 %v22441_v35  ;;  %22452 = vmatpush3.bf16.msra.mxu1 %v22449_v33  ;;  %v19005_v29 = vrot.slane %v18991_v40, %v22772_v21  ;;  %v25688_v40 = vld [vmem:[#allocation29_spill] sm:$0xff] }
0x23b0   :  { %v19066_v48 = vrot.slane %v19058_v63, %v22772_v21  ;;  %v25689_v63 = vld [vmem:[#allocation40_spill] sm:$0xff] }
0x23b1   :  { %v18618_v41 = vpop.trf.xlu0  ;;  %v18842_v43 = vpop.trf.xlu1 }
0x23b2   :  { %v19050_v46 = vcombine.low %v18554_v59, %v18618_v41  ;;  %v19110_v55 = vcombine.low %v18778_v9, %v18842_v43  ;;  %v18937_v59 = vrot.slane %v18923_v19, %v22772_v21  ;;  %v19025_v9 = vcombine.high %v19005_v29, %v19021_v38 }
0x23b4   :  { %v19057_v42 = vrot.slane %v19050_v46, %v22765_v14  ;;  %v19117_v37 = vrot.slane %v19110_v55, %v22765_v14  ;;  %v18956_v13 = vcombine.low %v18937_v59, %v18953_v24  ;;  %v18957_v55 = vcombine.high %v18937_v59, %v18953_v24  ;;  %v25696_v59 = vld [vmem:[#allocation37_spill] sm:$0xff]  ;;  %v25699_v24 = vld [vmem:[#allocation50_spill] sm:$0xff] }
0x23b5   :  { %v18682_v5 = vpop.trf.xlu0 }
0x23b6   :  { %v19074_v54 = vcombine.low %v19049_v12, %v19057_v42  ;;  %v19075_v41 = vcombine.high %v19049_v12, %v19057_v42  ;;  %v22465_v12 = vpack.c.bf16 %v19025_v9, %v18957_v55  ;;  %v25706_v9 = vld [vmem:[#allocation47_spill] sm:$0xff]  ;;  %v22636_v55 = vld [vmem:[%s25247_s2] sm:$0xf] }
0x23b8   :  { %v19082_v35 = vrot.slane %v19074_v54, %v22772_v21  ;;  %v19089_v6 = vrot.slane %v19075_v41, %v22772_v21  ;;  %v25703_v41 = vld [vmem:[#allocation54_spill] sm:$0xff] }
0x23b9   :  { %v18746_v47 = vpop.trf.xlu0 }
0x23ba   :  { %v19102_v58 = vcombine.low %v18682_v5, %v18746_v47  ;;  %v19024_v5 = vcombine.low %v19005_v29, %v19021_v38  ;;  %v19090_v47 = vcombine.low %v19066_v48, %v19082_v35  ;;  %v19091_v31 = vcombine.high %v19066_v48, %v19082_v35  ;;  %v25693_v38 = vld [vmem:[#allocation44_spill] sm:$0xff]  ;;  %v25694_v35 = vld [vmem:[#allocation35_spill] sm:$0xff]  ;;  %v25700_v48 = vld [vmem:[#allocation41_spill] sm:$0xff] }
0x23bb   :  { %v25697_v29 = vld [vmem:[#allocation48_spill] sm:$0xff] }
0x23bc   :  { %v19109_v61 = vrot.slane %v19102_v58, %v22765_v14  ;;  %v19059_v58 = vcombine.high %v19033_v50, %v19041_v26  ;;  %v22457_v42 = vpack.c.bf16 %v19024_v5, %v18956_v13  ;;  %v25705_v5 = vld [vmem:[#allocation55_spill] sm:$0xff] }
0x23bd   :  { %v18810_v4 = vpop.trf.xlu0 }
0x23be   :  { %v19126_v45 = vcombine.low %v19101_v11, %v19109_v61  ;;  %v19127_v62 = vcombine.high %v19101_v11, %v19109_v61  ;;  %v19073_v61 = vrot.slane %v19059_v58, %v22772_v21  ;;  %v25711_v58 = vld [vmem:[#allocation58_spill] sm:$0xff] }
0x23c0   :  { %v19134_v28 = vrot.slane %v19126_v45, %v22772_v21  ;;  %v19092_v50 = vcombine.low %v19073_v61, %v19089_v6  ;;  %v19093_v11 = vcombine.high %v19073_v61, %v19089_v6  ;;  %v25690_v45 = vld [vmem:[#allocation31_spill] sm:$0xff] }
0x23c1   :  { %v18874_v57 = vpop.trf.xlu0 }
0x23c2   :  { %v19118_v36 = vcombine.low %v18810_v4, %v18874_v57  ;;  %v19141_v57 = vrot.slane %v19127_v62, %v22772_v21  ;;  %v25704_v62 = vld [vmem:[#allocation45_spill] sm:$0xff] }
0x23c4   :  { %v19125_v22 = vrot.slane %v19118_v36, %v22765_v14 }
0x23c6   :  { %v19142_v33 = vcombine.low %v19117_v37, %v19125_v22  ;;  %v19143_v16 = vcombine.high %v19117_v37, %v19125_v22  ;;  %v25691_v37 = vld [vmem:[#allocation42_spill] sm:$0xff]  ;;  %v25692_v22 = vld [vmem:[#allocation33_spill] sm:$0xff] }
0x23c8   :  { %v19150_v44 = vrot.slane %v19142_v33, %v22772_v21  ;;  %v19157_v43 = vrot.slane %v19143_v16, %v22772_v21  ;;  %v25695_v33 = vld [vmem:[#allocation46_spill] sm:$0xff]  ;;  %v25698_v16 = vld [vmem:[#allocation39_spill] sm:$0xff] }
0x23ca   :  { %v19158_v46 = vcombine.low %v19134_v28, %v19150_v44  ;;  %v19159_v3 = vcombine.high %v19134_v28, %v19150_v44  ;;  %v19160_v54 = vcombine.low %v19141_v57, %v19157_v43  ;;  %v19161_v26 = vcombine.high %v19141_v57, %v19157_v43  ;;  %v25701_v28 = vld [vmem:[#allocation52_spill] sm:$0xff]  ;;  %v25702_v44 = vld [vmem:[#allocation43_spill] sm:$0xff]  ;;  %v25712_v43 = vld [vmem:[#allocation53_spill] sm:$0xff] }
0x23cc   :  { %v22445_v4 = vpack.c.bf16 %v19158_v46, %v19090_v47  ;;  %v22453_v53 = vpack.c.bf16 %v19159_v3, %v19091_v31  ;;  %v22461_v36 = vpack.c.bf16 %v19160_v54, %v19092_v50  ;;  %v22469_v19 = vpack.c.bf16 %v19161_v26, %v19093_v11  ;;  %v25707_v47 = vld [vmem:[#allocation56_spill] sm:$0xff]  ;;  %v25708_v46 = vld [vmem:[#allocation49_spill] sm:$0xff]  ;;  %v25710_v3 = vld [vmem:[#allocation51_spill] sm:$0xff] }
0x23cd   :  { %v25709_v31 = vld [vmem:[#allocation57_spill] sm:$0xff] }
0x23ce   :  { %22446 = vmatprep.subr.bf16.mxu0 %v22445_v4  ;;  %22454 = vmatprep.subr.bf16.mxu1 %v22453_v53 }
0x23cf   :  { %22448 = vmatpush3.bf16.msra.mxu0 %v22445_v4  ;;  %22456 = vmatpush3.bf16.msra.mxu1 %v22453_v53  ;;  %v88_v4 = vpop.permute.xlu1 %87  ;;  %v22635_v53 = vld [vmem:[%s25246_s1] sm:$0xf]  ;;  %s22713_s1 = smov [#allocation7]  }
0x23d0   :  { %22458 = vmatprep.subr.bf16.mxu0 %v22457_v42  ;;  %22466 = vmatprep.subr.bf16.mxu1 %v22465_v12  ;;  %v153_v13 = vmul.f32 %v22635_v53, %v88_v4  ;;  %s19995_s2 = sshll.u32 %s22713_s1, 4  ;;  %s19996_s2 = int_to_ptr.vmem [resolvable:$true] %s19995_s2 }
0x23d1   :  { %p22642_p1 = scmp.lt.s32.totalorder %s19996_s2, %s19996_s2 }
0x23d2   :  { %22098 = vmatmul.mubr.msk.f32.vlgmr.msra.gmra.mrb[224].mxu0 %vm1871_vm1, %v22952_v34  ;;  %22130 = vmatmul.mubr.msk.f32.vlgmr.msra.gmra.mrb[224].mxu1 %vm1871_vm1, %v22914_v49  ;;  %v25669_v49 = vld [vmem:[#allocation20_spill] sm:$0xff]  ;;  %v25674_v34 = vld [vmem:[#allocation17_spill] sm:$0xff]  ;;  %v170_v6 = vadd.f32 %v22636_v55, %v153_v13 }
0x23d3   :  { %22100 = vmatprep.mubr.msk.f32.mxu0 %vm1871_vm1, %v22959_v51  ;;  %22132 = vmatprep.mubr.msk.f32.mxu1 %vm1871_vm1, %v22916_v52  ;;  %v25670_v52 = vld [vmem:[#allocation15_spill] sm:$0xff]  ;;  %v25676_v51 = vld [vmem:[#allocation18_spill] sm:$0xff] }
0x23d4   :  { %22460 = vmatpush3.bf16.msra.mxu0 %v22457_v42  ;;  %22468 = vmatpush3.bf16.msra.mxu1 %v22465_v12  ;;  %186 = vst [vmem:[#allocation2 + $0x1c] sm:$0xf] %v170_v6 }
0x23d5   :  { %22462 = vmatprep.subr.bf16.mxu0 %v22461_v36  ;;  %22470 = vmatprep.subr.bf16.mxu1 %v22469_v19 }
0x23d6   :  { %22101 = vmatmul.mubr.msk.f32.gmra.mrb[226].mxu0 %vm1871_vm1, %v22964_v1  ;;  %22133 = vmatmul.mubr.msk.f32.gmra.mrb[226].mxu1 %vm1871_vm1, %v22921_v60  ;;  %v25671_v60 = vld [vmem:[#allocation22_spill] sm:$0xff]  ;;  %v25678_v1 = vld [vmem:[#allocation19_spill] sm:$0xff] }
0x23d7   :  { %22103 = vmatprep.mubr.msk.f32.mxu0 %vm1871_vm1, %v22978_v7  ;;  %22135 = vmatprep.mubr.msk.f32.mxu1 %vm1871_vm1, %v22928_v8  ;;  %v25672_v8 = vld [vmem:[#allocation16_spill] sm:$0xff]  ;;  %v25680_v7 = vld [vmem:[#allocation21_spill] sm:$0xff] }
0x23d8   :  { %22464 = vmatpush3.bf16.msra.mxu0 %v22461_v36  ;;  %22472 = vmatpush3.bf16.msra.mxu1 %v22469_v19 }
0x23da   :  { %22104 = vmatmul.mubr.msk.f32.gmra.mrb[228].mxu0 %vm1871_vm1, %v23001_v17  ;;  %22136 = vmatmul.mubr.msk.f32.gmra.mrb[228].mxu1 %vm1871_vm1, %v22942_v20  ;;  %v25673_v20 = vld [vmem:[#allocation24_spill] sm:$0xff]  ;;  %v25682_v17 = vld [vmem:[#allocation23_spill] sm:$0xff] }
0x23db   :  { %22106 = vmatprep.mubr.msk.f32.mxu0 %vm1871_vm1, %v23011_v23  ;;  %22138 = vmatprep.mubr.msk.f32.mxu1 %vm1871_vm1, %v22955_v39  ;;  %v25675_v39 = vld [vmem:[#allocation26_spill] sm:$0xff] }
0x23dc   :  { %v25683_v23 = vld [vmem:[#allocation34_spill] sm:$0xff]  ;;  %v144_v57 = vpop.permute.xlu0 %143 }
0x23dd   :  { %v161_v42 = vmul.f32 %v22635_v53, %v144_v57 }
0x23de   :  { %22107 = vmatmul.mubr.msk.f32.gmra.mrb[230].mxu0 %vm1871_vm1, %v23021_v25  ;;  %22139 = vmatmul.mubr.msk.f32.gmra.mrb[230].mxu1 %vm1871_vm1, %v22962_v56  ;;  %v25677_v56 = vld [vmem:[#allocation28_spill] sm:$0xff]  ;;  %v25684_v25 = vld [vmem:[#allocation25_spill] sm:$0xff] }
0x23df   :  { %22109 = vmatprep.mubr.msk.f32.mxu0 %vm1871_vm1, %v23031_v27  ;;  %22141 = vmatprep.mubr.msk.f32.mxu1 %vm1871_vm1, %v22966_v2  ;;  %v25679_v2 = vld [vmem:[#allocation30_spill] sm:$0xff]  ;;  %v25685_v27 = vld [vmem:[#allocation36_spill] sm:$0xff]  ;;  %v178_v12 = vadd.f32 %v22636_v55, %v161_v42 }
0x23e1   :  { %194 = vst [vmem:[#allocation2 + $0x3c] sm:$0xf] %v178_v12 }
0x23e2   :  { %22110 = vmatmul.mubr.msk.f32.gmra.mrb[232].mxu0 %vm1871_vm1, %v23041_v15  ;;  %22142 = vmatmul.mubr.msk.f32.gmra.mrb[232].mxu1 %vm1871_vm1, %v22990_v10  ;;  %v25681_v10 = vld [vmem:[#allocation32_spill] sm:$0xff]  ;;  %v25686_v15 = vld [vmem:[#allocation27_spill] sm:$0xff] }
0x23e3   :  { %22112 = vmatprep.mubr.msk.f32.mxu0 %vm1871_vm1, %v25669_v49  ;;  %22144 = vmatprep.mubr.msk.f32.mxu1 %vm1871_vm1, %v25670_v52 }
0x23e6   :  { %22113 = vmatmul.mubr.msk.f32.gmra.mrb[234].mxu0 %vm1871_vm1, %v25671_v60  ;;  %22145 = vmatmul.mubr.msk.f32.gmra.mrb[234].mxu1 %vm1871_vm1, %v25672_v8 }
0x23e7   :  { %22115 = vmatprep.mubr.msk.f32.mxu0 %vm1871_vm1, %v25673_v20  ;;  %22147 = vmatprep.mubr.msk.f32.mxu1 %vm1871_vm1, %v25674_v34 }
0x23ea   :  { %22116 = vmatmul.mubr.msk.f32.gmra.mrb[236].mxu0 %vm1871_vm1, %v25675_v39  ;;  %22148 = vmatmul.mubr.msk.f32.gmra.mrb[236].mxu1 %vm1871_vm1, %v25676_v51 }
0x23eb   :  { %22118 = vmatprep.mubr.msk.f32.mxu0 %vm1871_vm1, %v25677_v56  ;;  %22150 = vmatprep.mubr.msk.f32.mxu1 %vm1871_vm1, %v25678_v1 }
0x23ee   :  { %22119 = vmatmul.mubr.msk.f32.gmra.mrb[238].mxu0 %vm1871_vm1, %v25679_v2  ;;  %22151 = vmatmul.mubr.msk.f32.gmra.mrb[238].mxu1 %vm1871_vm1, %v25680_v7 }
0x23ef   :  { %22161 = vmatprep.mubr.msk.f32.mxu0 %vm1871_vm1, %v25681_v10  ;;  %22193 = vmatprep.mubr.msk.f32.mxu1 %vm1871_vm1, %v25682_v17 }
0x23f2   :  { %22162 = vmatmul.mubr.msk.f32.vlgmr.msra.gmra.mrb[240].mxu0 %vm1871_vm1, %v25683_v23  ;;  %22194 = vmatmul.mubr.msk.f32.vlgmr.msra.gmra.mrb[240].mxu1 %vm1871_vm1, %v25684_v25 }
0x23f3   :  { %22164 = vmatprep.mubr.msk.f32.mxu0 %vm1871_vm1, %v25685_v27  ;;  %22196 = vmatprep.mubr.msk.f32.mxu1 %vm1871_vm1, %v25686_v15 }
0x23f6   :  { %22165 = vmatmul.mubr.msk.f32.gmra.mrb[242].mxu0 %vm1871_vm1, %v25687_v30  ;;  %22197 = vmatmul.mubr.msk.f32.gmra.mrb[242].mxu1 %vm1871_vm1, %v25688_v40 }
0x23f7   :  { %22167 = vmatprep.mubr.msk.f32.mxu0 %vm1871_vm1, %v25689_v63  ;;  %22199 = vmatprep.mubr.msk.f32.mxu1 %vm1871_vm1, %v25690_v45 }
0x23fa   :  { %22168 = vmatmul.mubr.msk.f32.gmra.mrb[244].mxu0 %vm1871_vm1, %v25691_v37  ;;  %22200 = vmatmul.mubr.msk.f32.gmra.mrb[244].mxu1 %vm1871_vm1, %v25692_v22 }
0x23fb   :  { %22170 = vmatprep.mubr.msk.f32.mxu0 %vm1871_vm1, %v25693_v38  ;;  %22202 = vmatprep.mubr.msk.f32.mxu1 %vm1871_vm1, %v25694_v35 }
0x23fe   :  { %22171 = vmatmul.mubr.msk.f32.gmra.mrb[246].mxu0 %vm1871_vm1, %v25695_v33  ;;  %22203 = vmatmul.mubr.msk.f32.gmra.mrb[246].mxu1 %vm1871_vm1, %v25696_v59 }
0x23ff   :  { %22173 = vmatprep.mubr.msk.f32.mxu0 %vm1871_vm1, %v25697_v29  ;;  %22205 = vmatprep.mubr.msk.f32.mxu1 %vm1871_vm1, %v25698_v16 }
0x2402   :  { %22174 = vmatmul.mubr.msk.f32.gmra.mrb[248].mxu0 %vm1871_vm1, %v25699_v24  ;;  %22206 = vmatmul.mubr.msk.f32.gmra.mrb[248].mxu1 %vm1871_vm1, %v25700_v48 }
0x2403   :  { %22176 = vmatprep.mubr.msk.f32.mxu0 %vm1871_vm1, %v25701_v28  ;;  %22208 = vmatprep.mubr.msk.f32.mxu1 %vm1871_vm1, %v25702_v44 }
0x2406   :  { %22177 = vmatmul.mubr.msk.f32.gmra.mrb[250].mxu0 %vm1871_vm1, %v25703_v41  ;;  %22209 = vmatmul.mubr.msk.f32.gmra.mrb[250].mxu1 %vm1871_vm1, %v25704_v62 }
0x2407   :  { %22179 = vmatprep.mubr.msk.f32.mxu0 %vm1871_vm1, %v25705_v5  ;;  %22211 = vmatprep.mubr.msk.f32.mxu1 %vm1871_vm1, %v25706_v9 }
0x240a   :  { %22180 = vmatmul.mubr.msk.f32.gmra.mrb[252].mxu0 %vm1871_vm1, %v25707_v47  ;;  %22212 = vmatmul.mubr.msk.f32.gmra.mrb[252].mxu1 %vm1871_vm1, %v25708_v46 }
0x240b   :  { %22182 = vmatprep.mubr.msk.f32.mxu0 %vm1871_vm1, %v25709_v31  ;;  %22214 = vmatprep.mubr.msk.f32.mxu1 %vm1871_vm1, %v25710_v3 }
0x240e   :  { %22183 = vmatmul.mubr.msk.f32.gmra.mrb[254].mxu0 %vm1871_vm1, %v25711_v58  ;;  %22215 = vmatmul.mubr.msk.f32.gmra.mrb[254].mxu1 %vm1871_vm1, %v25712_v43 }
0x24a5   :  { %v22099_v61 = vpop.f32.mrb[224].mxu0  ;;  %v22131_v54 = vpop.f32.mrb[224].mxu1 }
0x24a6   :  { %v19228_v26 = vpop.f32.mrb[225].mxu0  ;;  %v19373_v50 = vpop.f32.mrb[225].mxu1 }
0x24a7   :  { %19774 = vxpose.xlu0.b32.start [1/16] (narrow) %v19373_v50, 8  ;;  %19742 = vxpose.xlu1.b32.start [1/16] (narrow) %v19228_v26, 8 }
0x24a9   :  { %v22102_v11 = vpop.f32.mrb[226].mxu0  ;;  %v22134_v36 = vpop.f32.mrb[226].mxu1 }
0x24aa   :  { %v19238_v19 = vpop.f32.mrb[227].mxu0  ;;  %v19383_v49 = vpop.f32.mrb[227].mxu1 }
0x24ab   :  { %19775 = vxpose.xlu0.b32.cont [2/16] (narrow) %v22131_v54, 8  ;;  %19743 = vxpose.xlu1.b32.cont [2/16] (narrow) %v22099_v61, 8 }
0x24ad   :  { %v22105_v52 = vpop.f32.mrb[228].mxu0  ;;  %v22137_v60 = vpop.f32.mrb[228].mxu1 }
0x24ae   :  { %v19248_v8 = vpop.f32.mrb[229].mxu0  ;;  %v19393_v20 = vpop.f32.mrb[229].mxu1 }
0x24af   :  { %19776 = vxpose.xlu0.b32.cont [3/16] (narrow) %v19383_v49, 8  ;;  %19744 = vxpose.xlu1.b32.cont [3/16] (narrow) %v19238_v19, 8 }
0x24b1   :  { %v22108_v34 = vpop.f32.mrb[230].mxu0  ;;  %v22140_v39 = vpop.f32.mrb[230].mxu1 }
0x24b2   :  { %v19258_v51 = vpop.f32.mrb[231].mxu0  ;;  %v19403_v56 = vpop.f32.mrb[231].mxu1 }
0x24b3   :  { %19777 = vxpose.xlu0.b32.cont [4/16] (narrow) %v22134_v36, 8  ;;  %19745 = vxpose.xlu1.b32.cont [4/16] (narrow) %v22102_v11, 8 }
0x24b5   :  { %v22111_v1 = vpop.f32.mrb[232].mxu0  ;;  %v22143_v2 = vpop.f32.mrb[232].mxu1 }
0x24b6   :  { %v19268_v7 = vpop.f32.mrb[233].mxu0  ;;  %v19413_v10 = vpop.f32.mrb[233].mxu1 }
0x24b7   :  { %19778 = vxpose.xlu0.b32.cont [5/16] (narrow) %v19393_v20, 8  ;;  %19746 = vxpose.xlu1.b32.cont [5/16] (narrow) %v19248_v8, 8 }
0x24b9   :  { %v22114_v17 = vpop.f32.mrb[234].mxu0  ;;  %v22146_v23 = vpop.f32.mrb[234].mxu1 }
0x24ba   :  { %v19278_v25 = vpop.f32.mrb[235].mxu0  ;;  %v19423_v27 = vpop.f32.mrb[235].mxu1 }
0x24bb   :  { %19779 = vxpose.xlu0.b32.cont [6/16] (narrow) %v22137_v60, 8  ;;  %19747 = vxpose.xlu1.b32.cont [6/16] (narrow) %v22105_v52, 8 }
0x24bd   :  { %v22117_v15 = vpop.f32.mrb[236].mxu0  ;;  %v22149_v30 = vpop.f32.mrb[236].mxu1 }
0x24be   :  { %v19288_v40 = vpop.f32.mrb[237].mxu0  ;;  %v19433_v63 = vpop.f32.mrb[237].mxu1 }
0x24bf   :  { %19780 = vxpose.xlu0.b32.cont [7/16] (narrow) %v19403_v56, 8  ;;  %19748 = vxpose.xlu1.b32.cont [7/16] (narrow) %v19258_v51, 8  ;;  %v19896_v56 = vld [vmem:[#allocation2 + $0x1c] sm:$0xf] }
0x24c1   :  { %v22120_v45 = vpop.f32.mrb[238].mxu0  ;;  %v22152_v37 = vpop.f32.mrb[238].mxu1 }
0x24c2   :  { %v19298_v22 = vpop.f32.mrb[239].mxu0  ;;  %v19443_v38 = vpop.f32.mrb[239].mxu1 }
0x24c3   :  { %19781 = vxpose.xlu0.b32.cont [8/16] (narrow) %v22140_v39, 8  ;;  %19749 = vxpose.xlu1.b32.cont [8/16] (narrow) %v22108_v34, 8 }
0x24c5   :  { %v22163_v35 = vpop.f32.mrb[240].mxu0  ;;  %v22195_v33 = vpop.f32.mrb[240].mxu1 }
0x24c6   :  { %v19518_v59 = vpop.f32.mrb[241].mxu0  ;;  %v19663_v29 = vpop.f32.mrb[241].mxu1 }
0x24c7   :  { %19782 = vxpose.xlu0.b32.cont [9/16] (narrow) %v19413_v10, 8  ;;  %19750 = vxpose.xlu1.b32.cont [9/16] (narrow) %v19268_v7, 8  ;;  %v19897_v7 = vld [vmem:[#allocation2 + $0x3c] sm:$0xf] }
0x24c9   :  { %v22166_v16 = vpop.f32.mrb[242].mxu0  ;;  %v22198_v24 = vpop.f32.mrb[242].mxu1 }
0x24ca   :  { %v19528_v48 = vpop.f32.mrb[243].mxu0  ;;  %v19673_v28 = vpop.f32.mrb[243].mxu1 }
0x24cb   :  { %19783 = vxpose.xlu0.b32.cont [10/16] (narrow) %v22143_v2, 8  ;;  %19751 = vxpose.xlu1.b32.cont [10/16] (narrow) %v22111_v1, 8 }
0x24cd   :  { %v22169_v44 = vpop.f32.mrb[244].mxu0  ;;  %v22201_v41 = vpop.f32.mrb[244].mxu1 }
0x24ce   :  { %v19538_v62 = vpop.f32.mrb[245].mxu0  ;;  %v19683_v5 = vpop.f32.mrb[245].mxu1 }
0x24cf   :  { %19784 = vxpose.xlu0.b32.cont [11/16] (narrow) %v19423_v27, 8  ;;  %19752 = vxpose.xlu1.b32.cont [11/16] (narrow) %v19278_v25, 8 }
0x24d1   :  { %v22172_v9 = vpop.f32.mrb[246].mxu0  ;;  %v22204_v47 = vpop.f32.mrb[246].mxu1 }
0x24d2   :  { %v19548_v46 = vpop.f32.mrb[247].mxu0  ;;  %v19693_v31 = vpop.f32.mrb[247].mxu1 }
0x24d3   :  { %19785 = vxpose.xlu0.b32.cont [12/16] (narrow) %v22146_v23, 8  ;;  %19753 = vxpose.xlu1.b32.cont [12/16] (narrow) %v22114_v17, 8 }
0x24d5   :  { %v22175_v3 = vpop.f32.mrb[248].mxu0  ;;  %v22207_v58 = vpop.f32.mrb[248].mxu1 }
0x24d6   :  { %v19558_v43 = vpop.f32.mrb[249].mxu0  ;;  %v19703_v4 = vpop.f32.mrb[249].mxu1 }
0x24d7   :  { %19786 = vxpose.xlu0.b32.cont [13/16] (narrow) %v19433_v63, 8  ;;  %19754 = vxpose.xlu1.b32.cont [13/16] (narrow) %v19288_v40, 8 }
0x24d9   :  { %v22178_v53 = vpop.f32.mrb[250].mxu0  ;;  %v22210_v13 = vpop.f32.mrb[250].mxu1 }
0x24da   :  { %v19568_v55 = vpop.f32.mrb[251].mxu0  ;;  %v19713_v6 = vpop.f32.mrb[251].mxu1 }
0x24db   :  { %19787 = vxpose.xlu0.b32.cont [14/16] (narrow) %v22149_v30, 8  ;;  %19755 = vxpose.xlu1.b32.cont [14/16] (narrow) %v22117_v15, 8 }
0x24dd   :  { %v22181_v57 = vpop.f32.mrb[252].mxu0  ;;  %v22213_v42 = vpop.f32.mrb[252].mxu1 }
0x24de   :  { %v19578_v12 = vpop.f32.mrb[253].mxu0  ;;  %v19723_v61 = vpop.f32.mrb[253].mxu1 }
0x24df   :  { %19788 = vxpose.xlu0.b32.cont [15/16] (narrow) %v19443_v38, 8  ;;  %19756 = vxpose.xlu1.b32.cont [15/16] (narrow) %v19298_v22, 8 }
0x24e1   :  { %v22184_v54 = vpop.f32.mrb[254].mxu0  ;;  %v22216_v26 = vpop.f32.mrb[254].mxu1 }
0x24e2   :  { %v19588_v50 = vpop.f32.mrb[255].mxu0  ;;  %v19733_v11 = vpop.f32.mrb[255].mxu1 }
0x24e3   :  { %19789 = vxpose.xlu0.b32.end [16/16] (narrow) %v22152_v37, 8  ;;  %19757 = vxpose.xlu1.b32.end [16/16] (narrow) %v22120_v45, 8 }
0x24e7   :  { %19838 = vxpose.xlu0.b32.start [1/16] (narrow) %v19663_v29, 8  ;;  %19806 = vxpose.xlu1.b32.start [1/16] (narrow) %v19518_v59, 8 }
0x24eb   :  { %19839 = vxpose.xlu0.b32.cont [2/16] (narrow) %v22195_v33, 8  ;;  %19807 = vxpose.xlu1.b32.cont [2/16] (narrow) %v22163_v35, 8 }
0x24ef   :  { %19840 = vxpose.xlu0.b32.cont [3/16] (narrow) %v19673_v28, 8  ;;  %19808 = vxpose.xlu1.b32.cont [3/16] (narrow) %v19528_v48, 8 }
0x24f3   :  { %19841 = vxpose.xlu0.b32.cont [4/16] (narrow) %v22198_v24, 8  ;;  %19809 = vxpose.xlu1.b32.cont [4/16] (narrow) %v22166_v16, 8 }
0x24f7   :  { %19842 = vxpose.xlu0.b32.cont [5/16] (narrow) %v19683_v5, 8  ;;  %19810 = vxpose.xlu1.b32.cont [5/16] (narrow) %v19538_v62, 8 }
0x24fb   :  { %19843 = vxpose.xlu0.b32.cont [6/16] (narrow) %v22201_v41, 8  ;;  %19811 = vxpose.xlu1.b32.cont [6/16] (narrow) %v22169_v44, 8 }
0x24ff   :  { %19844 = vxpose.xlu0.b32.cont [7/16] (narrow) %v19693_v31, 8  ;;  %19812 = vxpose.xlu1.b32.cont [7/16] (narrow) %v19548_v46, 8 }
0x2503   :  { %19845 = vxpose.xlu0.b32.cont [8/16] (narrow) %v22204_v47, 8  ;;  %19813 = vxpose.xlu1.b32.cont [8/16] (narrow) %v22172_v9, 8 }
0x2507   :  { %19846 = vxpose.xlu0.b32.cont [9/16] (narrow) %v19703_v4, 8  ;;  %19814 = vxpose.xlu1.b32.cont [9/16] (narrow) %v19558_v43, 8 }
0x250b   :  { %19847 = vxpose.xlu0.b32.cont [10/16] (narrow) %v22207_v58, 8  ;;  %19815 = vxpose.xlu1.b32.cont [10/16] (narrow) %v22175_v3, 8 }
0x250f   :  { %19848 = vxpose.xlu0.b32.cont [11/16] (narrow) %v19713_v6, 8  ;;  %19816 = vxpose.xlu1.b32.cont [11/16] (narrow) %v19568_v55, 8 }
0x2513   :  { %19849 = vxpose.xlu0.b32.cont [12/16] (narrow) %v22210_v13, 8  ;;  %19817 = vxpose.xlu1.b32.cont [12/16] (narrow) %v22178_v53, 8 }
0x2517   :  { %19850 = vxpose.xlu0.b32.cont [13/16] (narrow) %v19723_v61, 8  ;;  %19818 = vxpose.xlu1.b32.cont [13/16] (narrow) %v19578_v12, 8 }
0x251b   :  { %19851 = vxpose.xlu0.b32.cont [14/16] (narrow) %v22213_v42, 8  ;;  %19819 = vxpose.xlu1.b32.cont [14/16] (narrow) %v22181_v57, 8 }
0x251f   :  { %19852 = vxpose.xlu0.b32.cont [15/16] (narrow) %v19733_v11, 8  ;;  %19820 = vxpose.xlu1.b32.cont [15/16] (narrow) %v19588_v50, 8 }
0x2523   :  { %19853 = vxpose.xlu0.b32.end [16/16] (narrow) %v22216_v26, 8  ;;  %19821 = vxpose.xlu1.b32.end [16/16] (narrow) %v22184_v54, 8 }
0x2527   :  { %v19758_v36 = vpop.trf.xlu1  ;;  %v19790_v19 = vpop.trf.xlu0 }
0x2567   :  { %v19822_v49 = vpop.trf.xlu1  ;;  %v19854_v52 = vpop.trf.xlu0 }
0x2568   :  { %v19870_v60 = vcombine.low %v19758_v36, %v19822_v49  ;;  %v19878_v8 = vcombine.low %v19790_v19, %v19854_v52 }
0x256a   :  { %v19877_v20 = vrot.slane %v19870_v60, %v22765_v14  ;;  %v19885_v34 = vrot.slane %v19878_v8, %v22765_v14 }
0x256c   :  { %v19886_v39 = vcombine.low %v19877_v20, %v19885_v34 }
0x256e   :  { %v19893_v51 = vrot.slane %v19886_v39, %v22772_v21 }
0x2570   :  { %v19894_v1 = vcombine.high %v19893_v51, %v25439_v0  ;;  %v19898_v2 = vadd.f32 %v19896_v56, %v19893_v51 }
0x2572   :  { %v19899_v10 = vadd.f32 %v19897_v7, %v19894_v1  ;;  %22595 = vtanh.f32 %v19898_v2  ;;  %v20551_v17 = vmul.f32 -1.442695, %v19898_v2 }
0x2574   :  { %22597 = vtanh.f32 %v19899_v10  ;;  %v20552_v23 = vmul.f32 -1.442695, %v19899_v10 }
0x2575   :  { %22599 = vpow2.f32 %v20551_v17 }
0x2576   :  { %22601 = vpow2.f32 %v20552_v23 }
0x257c   :  { %v22596_v25 = vpop.eup %22595 }
0x257d   :  { %19926 = vrot.lane.b32.xlu1 %v22596_v25, %s22710_s12 }
0x257e   :  { %v22598_v27 = vpop.eup %22597 }
0x257f   :  { %v22600_v14 = vpop.eup %22599  ;;  %19928 = vrot.lane.b32.xlu0 %v22598_v27, %s22710_s12 }
0x2580   :  { %v22602_v21 = vpop.eup %22601  ;;  %v19908_v15 = vadd.f32 1.0, %v22600_v14 }
0x2581   :  { %v19909_v30 = vadd.f32 1.0, %v22602_v21 }
0x2582   :  { %22603 = vrcp.f32 %v19908_v15 }
0x2583   :  { %22605 = vrcp.f32 %v19909_v30 }
0x258c   :  { %v22604_v0 = vpop.eup %22603 }
0x258d   :  { %19916 = vrot.lane.b32.xlu1 %v22604_v0, %s22711_s13  ;;  %v22606_v40 = vpop.eup %22605 }
0x2591   :  { %19918 = vrot.lane.b32.xlu1 %v22606_v40, %s22711_s13 }
0x25ef   :  { %v19927_v63 = vpop.permute.xlu1 %19926 }
0x25f0   :  { %v19932_v45 = vmul.f32 %v22604_v0, %v19927_v63 }
0x25f1   :  { %v19929_v37 = vpop.permute.xlu0 %19928 }
0x25f2   :  { %19936 = vrot.lane.b32.xlu1 %v19932_v45, %s22712_s14  ;;  %v19933_v22 = vmul.f32 %v22606_v40, %v19929_v37 }
0x25f6   :  { %19938 = vrot.lane.b32.xlu1 %v19933_v22, %s22712_s14 }
0x25ff   :  { %v19917_v38 = vpop.permute.xlu1 %19916 }
0x2600   :  { %v19922_v33 = vmul.f32 %v19917_v38, %v24896_v18 }
0x2603   :  { %v19919_v35 = vpop.permute.xlu1 %19918 }
0x2604   :  { %v19923_v16 = vmul.f32 %v19919_v35, %v24900_v32 }
0x2664   :  { %v19937_v59 = vpop.permute.xlu1 %19936 }
0x2665   :  { %v19942_v29 = vadd.f32 %v19937_v59, %v19922_v33 }
0x2667   :  { %22607 = vtanh.f32 %v19942_v29  ;;  %19969 = vst.msk [vmem:[#allocation4] sm:$0xf] %vm26_vm0, %v19942_v29  ;;  %19976 = vst.msk [vmem:[#allocation9] sm:$0xf] %vm26_vm0, %v19942_v29 }
0x2668   :  { %v19939_v24 = vpop.permute.xlu1 %19938 }
0x2669   :  { %v19943_v48 = vadd.f32 %v19939_v24, %v19923_v16 }
0x266b   :  { %22609 = vtanh.f32 %v19943_v48  ;;  %19970 = vst.msk [vmem:[#allocation4 + $0x4] sm:$0xf] %vm26_vm0, %v19943_v48  ;;  %19977 = vst.msk [vmem:[#allocation9 + $0x4] sm:$0xf] %vm26_vm0, %v19943_v48 }
0x2671   :  { %v22608_v28 = vpop.eup %22607 }
0x2672   :  { %19948 = vrot.lane.b32.xlu0 %v22608_v28, %s22712_s14 }
0x2675   :  { %v22610_v18 = vpop.eup %22609 }
0x2676   :  { %19950 = vrot.lane.b32.xlu1 %v22610_v18, %s22712_s14  ;;  %s22715_s14 = smov [#allocation9]  }
0x2677   :  { %s20007_s24 = sshll.u32 %s22715_s14, 4  ;;  %s25188_s24 = int_to_ptr.vmem [resolvable:$true] %s20007_s24 }
0x26e4   :  { %v19949_v44 = vpop.permute.xlu0 %19948 }
0x26e5   :  { %v19954_v32 = vmul.f32 %v22604_v0, %v19949_v44 }
0x26e7   :  { %19958 = vrot.lane.b32.xlu0 %v19954_v32, %s22710_s12 }
0x26e8   :  { %v19951_v41 = vpop.permute.xlu1 %19950 }
0x26e9   :  { %v19955_v62 = vmul.f32 %v22606_v40, %v19951_v41 }
0x26eb   :  { %19960 = vrot.lane.b32.xlu1 %v19955_v62, %s22710_s12  ;;  %s22637_s12 = scalar_lea.vmem %s19996_s2, 128 }
0x26ec   :  { %p22638_p0 = scmp.ne.s32.totalorder %s19996_s2, %s22637_s12  ;;  %p22643_p2 = scmp.lt.s32.totalorder %s22637_s12, %s22637_s12 }
0x26ee   :  { %p22644_p3 = por %p22643_p2, %p22642_p1 }
0x26f0   :  { %p22645_p4 = pnand %p22644_p3, %p22638_p0 }
0x2759   :  { %v19959_v5 = vpop.permute.xlu0 %19958 }
0x275a   :  { %19965 = vst.msk [vmem:[#allocation5 + $0x1c] sm:$0xf] %vm26_vm0, %v19959_v5  ;;  %19967 = vst.msk [vmem:[#allocation3] sm:$0xf] %vm26_vm0, %v19959_v5 }
0x275b   :  { %19974 = vst.msk [vmem:[#allocation7] sm:$0xf] %vm26_vm0, %v19959_v5 }
0x275d   :  { %v19961_v9 = vpop.permute.xlu1 %19960 }
0x275e   :  { %19966 = vst.msk [vmem:[#allocation5 + $0x3c] sm:$0xf] %vm26_vm0, %v19961_v9  ;;  %19968 = vst.msk [vmem:[#allocation3 + $0x4] sm:$0xf] %vm26_vm0, %v19961_v9 }
0x275f   :  { %19975 = vst.msk [vmem:[#allocation7 + $0x4] sm:$0xf] %vm26_vm0, %v19961_v9 }
0x2760   :  { %22648 = shalt.err (!%p22645_p4)
}
0x2761   :  { %s22649_s27 = scalar_lea.hbm %s25250_s5, 128 }
0x2762   :  { %p22650_p5 = scmp.ne.s32.totalorder %s25250_s5, %s22649_s27  ;;  %p22653_p6 = scmp.lt.u32.totalorder %s22649_s27, %s25250_s5 }
0x2764   :  { %p22655_p7 = pnand %p22653_p6, %p22650_p5 }
0x2766   :  { %22658 = shalt.err (!%p22655_p7)
}
0x2767   :  { %s22716_s7 = smov 4   ;;  %s22659_s10 = scalar_lea.vmem %s25183_s23, 1024 }
0x2768   :  { %20001 = dma.vmem_to_hbm [thread:$0]  %s19996_s2, 128, %s25250_s5, [#allocation8], %s22711_s13, %s22711_s13, %s22716_s7  }
0x2769   :  { %p22660_p8 = scmp.ne.s32.totalorder %s25183_s23, %s22659_s10  ;;  %p22664_p9 = scmp.lt.s32.totalorder %s25183_s23, %s25183_s23 }
0x276a   :  { %p22665_p10 = scmp.lt.s32.totalorder %s22659_s10, %s22659_s10 }
0x276c   :  { %p22666_p11 = por %p22665_p10, %p22664_p9 }
0x276e   :  { %p22667_p12 = pnand %p22666_p11, %p22660_p8 }
0x2770   :  { %22670 = shalt.err (!%p22667_p12)
}
0x2771   :  { %s22671_s16 = scalar_lea.hbm %s25249_s4, 1024 }
0x2772   :  { %p22672_p13 = scmp.ne.s32.totalorder %s25249_s4, %s22671_s16  ;;  %p22675_p0 = scmp.lt.u32.totalorder %s22671_s16, %s25249_s4 }
0x2774   :  { %p22677_p1 = pnand %p22675_p0, %p22672_p13 }
0x2776   :  { %22680 = shalt.err (!%p22677_p1)
}
0x2777   :  { %19989 = dma.vmem_to_hbm [thread:$0]  %s25183_s23, 1024, %s25249_s4, [#allocation6], %s22711_s13, %s22711_s13, %s22716_s7  }
0x2778   :  { %s22681_s21 = scalar_lea.vmem %s25188_s24, 128  ;;  %p22686_p3 = scmp.lt.s32.totalorder %s25188_s24, %s25188_s24 }
0x2779   :  { %p22682_p2 = scmp.ne.s32.totalorder %s25188_s24, %s22681_s21  ;;  %p22687_p4 = scmp.lt.s32.totalorder %s22681_s21, %s22681_s21 }
0x277b   :  { %p22688_p5 = por %p22687_p4, %p22686_p3 }
0x277d   :  { %p22689_p6 = pnand %p22688_p5, %p22682_p2 }
0x277f   :  { %22692 = shalt.err (!%p22689_p6)
}
0x2780   :  { %s22693_s22 = scalar_lea.hbm %s25251_s6, 128 }
0x2781   :  { %p22694_p7 = scmp.ne.s32.totalorder %s25251_s6, %s22693_s22  ;;  %p22697_p8 = scmp.lt.u32.totalorder %s22693_s22, %s25251_s6 }
0x2783   :  { %p22699_p9 = pnand %p22697_p8, %p22694_p7 }
0x2785   :  { %22702 = shalt.err (!%p22699_p9)
}
0x2786   :  { %20013 = dma.vmem_to_hbm [thread:$0]  %s25188_s24, 128, %s25251_s6, [#allocation8], %s22711_s13, %s22711_s13, %s22716_s7  }
0x2787   :  { %22703 = dma.done.wait [#allocation6], 1024  }
0x2788   :  { %22704 = vsyncadd [#allocation6], 4294966272 }
0x2789   :  { %22705 = dma.done.wait [#allocation8], 256  }
0x278a   :  { %22706 = vsyncadd [#allocation8], 4294967040 }
0x278b   :  { %20023 = vsyncpa [#allocation6], 1 }
0x278c   :  { %20024 = vsyncpa [#allocation8], 1 }

</bundles_post_ra>
